<compile_context>
chip_gen: v5e
topology: v5e:2x2
jax: 0.10.0
libtpu: 0.0.40
codegen_flags: <defaults>
</compile_context>

<pallas_src>
import functools

import jax
import jax.numpy as jnp
from jax.experimental import pallas as pl
from jax.experimental.pallas import tpu as pltpu


_PARALLEL = pltpu.CompilerParams(dimension_semantics=("parallel",))


def _const_spec(a):
    zeros = (0,) * a.ndim
    return pl.BlockSpec(a.shape, lambda b: zeros)


def _batch_spec(a):
    blk = (1,) + a.shape[1:]
    zeros = (0,) * (a.ndim - 1)
    return pl.BlockSpec(blk, lambda b: (b,) + zeros)


# --------------------------------------------------------------------------
# Kernel 1: adaptive-graph prelude (per batch element).
#   x1   = relu(block_diag(x_n1[b]) @ Wd_flat)          (the per-node 'bmm')
#   x1k  = LayerNorm_{[N,H]}(x1) * g + b                (eps = 1e-8)
#   adj  = relu((x1k @ Wxabs) @ x1^T)
# --------------------------------------------------------------------------
def _graph_prelude_kernel(xbd_ref, wd_ref, lng_ref, lnb_ref, wx_ref, o_ref):
    f32 = jnp.float32
    x1 = jnp.maximum(
        jnp.dot(xbd_ref[0], wd_ref[...], preferred_element_type=f32), 0.0)
    mu = jnp.mean(jnp.mean(x1, axis=1, keepdims=True), axis=0, keepdims=True)
    ctr = x1 - mu
    var = jnp.mean(jnp.mean(ctr * ctr, axis=1, keepdims=True),
                   axis=0, keepdims=True)
    x1k = ctr * jax.lax.rsqrt(var + 1e-8) * lng_ref[...] + lnb_ref[...]
    adpm = jnp.dot(x1k, wx_ref[...], preferred_element_type=f32)
    # adj = adpm @ x1^T  (contract last-with-last, no explicit transpose)
    adj = jax.lax.dot_general(adpm, x1, (((1,), (1,)), ((), ())),
                              preferred_element_type=f32)
    o_ref[0] = jnp.maximum(adj, 0.0).astype(o_ref.dtype)


def graph_prelude(xbd, wd_flat, ln_g, ln_b, wxabs):
    B, N, _ = xbd.shape
    return pl.pallas_call(
        _graph_prelude_kernel,
        out_shape=jax.ShapeDtypeStruct((B, N, N), xbd.dtype),
        grid=(B,),
        in_specs=[_batch_spec(xbd), _const_spec(wd_flat), _const_spec(ln_g),
                  _const_spec(ln_b), _const_spec(wxabs)],
        out_specs=pl.BlockSpec((1, N, N), lambda b: (b, 0, 0)),
        compiler_params=_PARALLEL,
    )(xbd, wd_flat, ln_g, ln_b, wxabs)


# --------------------------------------------------------------------------
# Kernel 2: the whole WaveNet stack + output head, fused (per batch element).
# Time-major row layout: row r = t*N + n, channels on lanes.
# --------------------------------------------------------------------------
def _wavenet_stack_kernel(inp_ref, start_w_ref, start_b_ref,
                          wf0_ref, wf1_ref, bf_ref,
                          wg0_ref, wg1_ref, bg_ref,
                          skw_ref, skb_ref,
                          gcw_ref, gcb_ref, bnsc_ref, bnsh_ref,
                          *rest, dilations, num_nodes):
    L = len(dilations)
    d1_refs = rest[0:L]
    d1sq_refs = rest[L:2 * L]
    d2_refs = rest[2 * L:3 * L]
    d2sq_refs = rest[3 * L:4 * L]
    e1w_ref, e1b_ref, e2w_ref, e2b_ref = rest[4 * L:4 * L + 4]
    out_ref = rest[4 * L + 4]
    x_sc = rest[4 * L + 5]       # VMEM scratch [R0, rc]   (current residual x)
    skip_sc = rest[4 * L + 6]    # VMEM scratch [R1, skip_c] (running skip)

    N = num_nodes
    dc = wf0_ref.shape[-1]
    f32 = jnp.float32

    def mm(a, b):
        return jnp.dot(a, b, preferred_element_type=f32)

    # start_conv (1x1) over time-major rows; K padded to 8 in the wrapper.
    x_sc[...] = (mm(inp_ref[0], start_w_ref[...]) + start_b_ref[...]).astype(
        x_sc.dtype)

    R = x_sc.shape[0]
    prev_skip_rows = 0
    for l, dil in enumerate(dilations):
        Rout = R - dil * N
        off = dil * N
        # dilated taps + residual are row slices of resident VMEM scratch
        xa = x_sc[0:Rout, :]
        xb = x_sc[off:off + Rout, :]          # == residual[:, -Tout:]

        filt = mm(xa, wf0_ref[l]) + mm(xb, wf1_ref[l]) + bf_ref[l]
        gate = mm(xa, wg0_ref[l]) + mm(xb, wg1_ref[l]) + bg_ref[l]
        gated = jnp.tanh(filt) * jax.nn.sigmoid(gate)        # [Rout, dc]

        # skip conv + running skip accumulation (no HBM, no zero init buffer)
        s = mm(gated, skw_ref[l]) + skb_ref[l]
        if l == 0:
            skip_val = s
        else:
            skip_val = s + skip_sc[prev_skip_rows - Rout:prev_skip_rows, :]
        skip_sc[0:Rout, :] = skip_val.astype(skip_sc.dtype)
        prev_skip_rows = Rout

        # order-2 graph diffusion with precomputed block-diagonal operators
        # kron(I_T, A^T) / kron(I_T, (A^T)^2): four independent MXU matmuls.
        y0 = mm(d1_refs[l][...], gated)       # A1  x
        y1 = mm(d1sq_refs[l][...], gated)     # A1^2 x
        y2 = mm(d2_refs[l][0], gated)         # A2  x
        y3 = mm(d2sq_refs[l][0], gated)       # A2^2 x

        # gcn MLP over [x | A1x | A1^2x | A2x | A2^2x] via split-weight partial
        # dots (sublane-aligned weight slices) + residual + folded BN affine.
        w = gcw_ref[l]
        h = (mm(gated, w[0:dc]) + mm(y0, w[dc:2 * dc]) + mm(y1, w[2 * dc:3 * dc])
             + mm(y2, w[3 * dc:4 * dc]) + mm(y3, w[4 * dc:5 * dc]) + gcb_ref[l])
        xnew = (h + xb) * bnsc_ref[l] + bnsh_ref[l]
        x_sc[0:Rout, :] = xnew.astype(x_sc.dtype)
        R = Rout

    # output head: relu(skip) -> end_conv_1 -> relu -> end_conv_2
    sk = jnp.maximum(skip_sc[0:R, :], 0.0)
    h1 = jnp.maximum(mm(sk, e1w_ref[...]) + e1b_ref[...], 0.0)
    out = mm(h1, e2w_ref[...]) + e2b_ref[...]
    out_ref[0] = out.astype(out_ref.dtype)


def wavenet_stack(inp_rows, start_w, start_b,
                  wf0, wf1, bf, wg0, wg1, bg, skw, skb, gcw, gcb, bnsc, bnsh,
                  d1_ops, d1sq_ops, d2_ops, d2sq_ops,
                  end1_w, end1_b, end2_w, end2_b, *, dilations, num_nodes):
    B, R0, _ = inp_rows.shape
    L = len(dilations)
    rc = start_w.shape[1]
    skip_c = skw.shape[-1]
    out_dim = end2_w.shape[1]
    N = num_nodes

    R_list = [R0]
    for d in dilations:
        R_list.append(R_list[-1] - d * N)
    R_last = R_list[-1]

    args = ([inp_rows, start_w, start_b,
             wf0, wf1, bf, wg0, wg1, bg, skw, skb, gcw, gcb, bnsc, bnsh]
            + list(d1_ops) + list(d1sq_ops) + list(d2_ops) + list(d2sq_ops)
            + [end1_w, end1_b, end2_w, end2_b])
    in_specs = ([_batch_spec(inp_rows)]
                + [_const_spec(a) for a in (start_w, start_b, wf0, wf1, bf,
                                            wg0, wg1, bg, skw, skb, gcw, gcb,
                                            bnsc, bnsh)]
                + [_const_spec(a) for a in d1_ops]
                + [_const_spec(a) for a in d1sq_ops]
                + [_batch_spec(a) for a in d2_ops]
                + [_batch_spec(a) for a in d2sq_ops]
                + [_const_spec(a) for a in (end1_w, end1_b, end2_w, end2_b)])

    return pl.pallas_call(
        functools.partial(_wavenet_stack_kernel,
                          dilations=tuple(dilations), num_nodes=N),
        out_shape=jax.ShapeDtypeStruct((B, R_last, out_dim), inp_rows.dtype),
        grid=(B,),
        in_specs=in_specs,
        out_specs=pl.BlockSpec((1, R_last, out_dim), lambda b: (b, 0, 0)),
        scratch_shapes=[pltpu.VMEM((R0, rc), jnp.float32),
                        pltpu.VMEM((R_list[1], skip_c), jnp.float32)],
        compiler_params=_PARALLEL,
    )(*args)


# --------------------------------------------------------------------------
# Block-diagonal diffusion operators kron(I_T, M) built in the wrapper (XLA).
# --------------------------------------------------------------------------
def _kron_eye(m, t):
    n = m.shape[0]
    eye = jnp.eye(t, dtype=m.dtype)
    return jnp.einsum("ts,vw->tvsw", eye, m).reshape(t * n, t * n)


def _kron_eye_batched(mb, t):
    bsz, n = mb.shape[0], mb.shape[1]
    eye = jnp.eye(t, dtype=mb.dtype)
    return jnp.einsum("ts,bvw->btvsw", eye, mb).reshape(bsz, t * n, t * n)


# --------------------------------------------------------------------------
# Parameter init (deterministic, synthetic).
# --------------------------------------------------------------------------
def init_params(key, cfg):
    N = cfg["num_nodes"]
    rc, dc = cfg["residual_channels"], cfg["dilation_channels"]
    skip_c, end_c = cfg["skip_channels"], cfg["end_channels"]
    out_dim, seq = cfg["out_dim"], cfg["seq_len"]
    emb, idm, hid = cfg["fft_emb"], cfg["identity_emb"], cfg["hidden_emb"]
    fft_len = seq // 2 + 1
    n_layers = cfg["blocks"] * cfg["layers"]
    keys = iter(jax.random.split(key, 16 * n_layers + 64))

    def nrm(shape, scale=0.1):
        return scale * jax.random.normal(next(keys), shape, dtype=jnp.float32)

    def xavier(shape):
        bound = (6.0 / (shape[0] + shape[1])) ** 0.5
        return jax.random.uniform(next(keys), shape, minval=-bound,
                                  maxval=bound, dtype=jnp.float32)

    p = {
        "start_w": nrm((cfg["in_dim"], rc)), "start_b": nrm((rc,), 0.01),
        "end1_w": nrm((skip_c, end_c)), "end1_b": nrm((end_c,), 0.01),
        "end2_w": nrm((end_c, out_dim)), "end2_b": nrm((out_dim,), 0.01),
        "Ex1": nrm((fft_len, emb), 1.0),
        "Wd": nrm((N, emb + idm + 2 * seq, hid), 1.0),
        "Wxabs": nrm((hid, hid), 1.0),
        "node_emb": nrm((N, idm), 1.0),
        "nodevec1": nrm((N, emb), 1.0),
        "nodevec2": nrm((emb, N), 1.0),
        "TiD": xavier((288, seq)),
        "DiW": xavier((7, seq)),
        "ln_g": jnp.ones((N, hid), jnp.float32),
        "ln_b": jnp.zeros((N, hid), jnp.float32),
    }
    layers = []
    for _ in range(n_layers):
        layers.append({
            "filt_w0": nrm((rc, dc)), "filt_w1": nrm((rc, dc)),
            "filt_b": nrm((dc,), 0.01),
            "gate_w0": nrm((rc, dc)), "gate_w1": nrm((rc, dc)),
            "gate_b": nrm((dc,), 0.01),
            "skip_w": nrm((dc, skip_c)), "skip_b": nrm((skip_c,), 0.01),
            "gconv_w": nrm((5 * dc, rc)), "gconv_b": nrm((rc,), 0.01),
            "bn_gamma": jnp.ones((rc,), jnp.float32),
            "bn_beta": jnp.zeros((rc,), jnp.float32),
            "bn_mean": jnp.zeros((rc,), jnp.float32),
            "bn_var": jnp.ones((rc,), jnp.float32),
        })
    p["layers"] = layers
    return p


# --------------------------------------------------------------------------
# Forward pass (mirrors DFDGCN.forward, eval mode).
# --------------------------------------------------------------------------
def dfdgcn_forward(params, history_data, mask_key, cfg):
    B, T, N, _ = history_data.shape
    seq_len = cfg["seq_len"]
    rf = cfg["receptive_field"]
    dilations = cfg["dilations"]
    L = len(dilations)

    # ---------- input prep: time-major rows [B, T0*N, Cin(padded to 8)] -------
    inp = history_data[..., 0:2]                            # [B, T, N, 2]
    if T < rf:
        inp = jnp.pad(inp, ((0, 0), (rf - T, 0), (0, 0), (0, 0)))
    T0 = inp.shape[1]
    in_c = inp.shape[-1]
    kpad = max(in_c, 8)
    inp_rows = jnp.pad(inp.reshape(B, T0 * N, in_c),
                       ((0, 0), (0, 0), (0, kpad - in_c)))
    start_w = jnp.pad(params["start_w"], ((0, kpad - in_c), (0, 0)))

    # ---------------- adaptive + dynamic frequency-domain graph ---------------
    gwadp = jax.nn.softmax(
        jnp.maximum(params["nodevec1"] @ params["nodevec2"], 0.0), axis=1)

    xn1 = jnp.transpose(history_data[:, -seq_len:, :, 0], (0, 2, 1))  # [B,N,S]
    # TODO(synk): FFT has no Pallas primitive; jnp.fft.rfft stays XLA glue.
    xn1 = jnp.abs(jnp.fft.rfft(xn1, axis=-1))
    xn1 = xn1 / jnp.maximum(jnp.linalg.norm(xn1, axis=1, keepdims=True), 1e-12)
    xn1 = xn1 / jnp.maximum(jnp.linalg.norm(xn1, axis=2, keepdims=True), 1e-12)
    xn1 = (xn1 * cfg["a"]) @ params["Ex1"]                  # [B, N, emb]

    # clamp gathers (tod == 1.0 would index 288 otherwise)
    t_idx = jnp.clip((history_data[:, -1, :, 1] * 288).astype(jnp.int32), 0, 287)
    d_idx = jnp.clip(history_data[:, -1, :, 2].astype(jnp.int32), 0, 6)
    T_D = params["TiD"][t_idx]                              # [B, N, seq]
    D_W = params["DiW"][d_idx]                              # [B, N, seq]
    node_emb_b = jnp.broadcast_to(params["node_emb"],
                                  (B,) + params["node_emb"].shape)
    x_n1 = jnp.concatenate([xn1, node_emb_b, T_D, D_W], axis=2)  # [B, N, F]
    F_dim = x_n1.shape[-1]

    # block-diagonal arrangement turns the per-node Wd bmm into one 2D matmul
    xbd = (x_n1[:, :, None, :]
           * jnp.eye(N, dtype=x_n1.dtype)[None, :, :, None]).reshape(
               B, N, N * F_dim)
    wd_flat = params["Wd"].reshape(N * F_dim, -1)
    adj_relu = graph_prelude(xbd, wd_flat, params["ln_g"], params["ln_b"],
                             params["Wxabs"])               # [B, N, N]

    # dy_mask_graph: keep top-K per row (noise only breaks ties, as reference)
    # TODO(synk): top_k/scatter has no clean Pallas equivalent; lax.top_k glue.
    noise = jax.random.uniform(mask_key, adj_relu.shape, dtype=adj_relu.dtype) * 0.01
    _, top_idx = jax.lax.top_k(adj_relu + noise, cfg["subgraph"])
    mask = jnp.sum(jax.nn.one_hot(top_idx, N, dtype=adj_relu.dtype), axis=2)
    adp = jax.nn.softmax(adj_relu * mask, axis=2)           # [B, N, N]

    # diffusion operators: squares precomputed -> independent in-kernel matmuls
    a1t = gwadp.T
    a1t2 = a1t @ a1t
    a2t = jnp.transpose(adp, (0, 2, 1))
    a2t2 = jnp.einsum("bij,bjk->bik", a2t, a2t)

    T_list = [T0]
    for d in dilations:
        T_list.append(T_list[-1] - d)

    d1_ops = [_kron_eye(a1t, T_list[l + 1]) for l in range(L)]
    d1sq_ops = [_kron_eye(a1t2, T_list[l + 1]) for l in range(L)]
    d2_ops = [_kron_eye_batched(a2t, T_list[l + 1]) for l in range(L)]
    d2sq_ops = [_kron_eye_batched(a2t2, T_list[l + 1]) for l in range(L)]

    # stacked per-layer weights; eval-mode BatchNorm folded into affine
    lay = params["layers"]

    def st(k):
        return jnp.stack([lay[i][k] for i in range(L)])

    wf0, wf1 = st("filt_w0"), st("filt_w1")
    wg0, wg1 = st("gate_w0"), st("gate_w1")
    bf, bg = st("filt_b")[:, None, :], st("gate_b")[:, None, :]
    skw, skb = st("skip_w"), st("skip_b")[:, None, :]
    gcw, gcb = st("gconv_w"), st("gconv_b")[:, None, :]
    bn_scale = st("bn_gamma") * jax.lax.rsqrt(st("bn_var") + 1e-5)
    bn_shift = st("bn_beta") - st("bn_mean") * bn_scale
    bnsc, bnsh = bn_scale[:, None, :], bn_shift[:, None, :]

    out_rows = wavenet_stack(
        inp_rows, start_w, params["start_b"][None, :],
        wf0, wf1, bf, wg0, wg1, bg, skw, skb, gcw, gcb, bnsc, bnsh,
        d1_ops, d1sq_ops, d2_ops, d2sq_ops,
        params["end1_w"], params["end1_b"][None, :],
        params["end2_w"], params["end2_b"][None, :],
        dilations=dilations, num_nodes=N)                   # [B, T_out*N, od]

    T_last = T_list[-1]
    out = out_rows.reshape(B, T_last, N, -1)
    return jnp.transpose(out, (0, 3, 2, 1))                 # [B, od, N, T_out]


# --------------------------------------------------------------------------
if __name__ == "__main__":
    cfg = dict(num_nodes=8, in_dim=2, out_dim=12,
               residual_channels=16, dilation_channels=16,
               skip_channels=32, end_channels=32,
               kernel_size=2, blocks=2, layers=2,
               seq_len=12, a=1.0,
               fft_emb=8, identity_emb=8, hidden_emb=16, subgraph=4)

    dilations, rf = [], 1
    for _ in range(cfg["blocks"]):
        add, d = cfg["kernel_size"] - 1, 1
        for _ in range(cfg["layers"]):
            dilations.append(d)
            d *= 2
            rf += add
            add *= 2
    cfg["dilations"] = dilations
    cfg["receptive_field"] = rf

    B, T, N, C = 2, cfg["seq_len"], cfg["num_nodes"], 3
    key = jax.random.PRNGKey(0)
    kv, kt, kd, kp, kmask = jax.random.split(key, 5)
    vals = jax.random.normal(kv, (B, T, N, 1), dtype=jnp.float32)
    tod = jax.random.randint(kt, (B, T, N, 1), 0, 288).astype(jnp.float32) / 288.0
    dow = jax.random.randint(kd, (B, T, N, 1), 0, 7).astype(jnp.float32)
    history_data = jnp.concatenate([vals, tod, dow], axis=-1)   # [B, T, N, 3]

    params = init_params(kp, cfg)

    fwd = jax.jit(functools.partial(dfdgcn_forward, cfg=cfg))
    out = fwd(params, history_data, kmask)
    out = jax.block_until_ready(out)

    t_out = T - sum(dilations)
    assert out.shape == (B, cfg["out_dim"], N, t_out), out.shape
    assert bool(jnp.all(jnp.isfinite(out)))
    print("KERNEL_OK")
</pallas_src>

<mosaic_0001>
module attributes {stable_mosaic.version = 11 : i64} {
  func.func @_graph_prelude_kernel(%arg0: i32, %arg1: memref<1x8x320xf32, #tpu.memory_space<vmem>>, %arg2: memref<320x16xf32, #tpu.memory_space<vmem>>, %arg3: memref<8x16xf32, #tpu.memory_space<vmem>>, %arg4: memref<8x16xf32, #tpu.memory_space<vmem>>, %arg5: memref<16x16xf32, #tpu.memory_space<vmem>>, %arg6: memref<1x8x8xf32, #tpu.memory_space<vmem>>) attributes {dimension_semantics = [#tpu.dimension_semantics<parallel>], iteration_bounds = array<i64: 2>, scalar_prefetch = 0 : i64, scratch_operands = 0 : i64, tpu.core_type = #tpu.core_type<tc>, window_params = [{transform_indices = @transform_0, window_bounds = array<i64: 1, 8, 320>}, {pipeline_mode = #tpu.pipeline_mode<synchronous>, transform_indices = @transform_1, window_bounds = array<i64: 320, 16>}, {pipeline_mode = #tpu.pipeline_mode<synchronous>, transform_indices = @transform_2, window_bounds = array<i64: 8, 16>}, {pipeline_mode = #tpu.pipeline_mode<synchronous>, transform_indices = @transform_3, window_bounds = array<i64: 8, 16>}, {pipeline_mode = #tpu.pipeline_mode<synchronous>, transform_indices = @transform_4, window_bounds = array<i64: 16, 16>}, {transform_indices = @transform_5, window_bounds = array<i64: 1, 8, 8>}]} {
    %c0 = arith.constant 0 : index
    %c0_0 = arith.constant 0 : index
    %c0_1 = arith.constant 0 : index
    %0 = vector.load %arg1[%c0, %c0_0, %c0_1] : memref<1x8x320xf32, #tpu.memory_space<vmem>>, vector<1x8x320xf32>
    %1 = vector.shape_cast %0 : vector<1x8x320xf32> to vector<8x320xf32>
    %c0_2 = arith.constant 0 : index
    %c0_3 = arith.constant 0 : index
    %2 = vector.load %arg2[%c0_2, %c0_3] : memref<320x16xf32, #tpu.memory_space<vmem>>, vector<320x16xf32>
    %cst = arith.constant dense<0.000000e+00> : vector<8x16xf32>
    %3 = tpu.matmul %1, %2, %cst {dimension_numbers = #tpu.dot_dimension_numbers<[1], [0], [0], [1], [0, 0, 1, 1], [], []>} : vector<8x320xf32>, vector<320x16xf32>, vector<8x16xf32> -> vector<8x16xf32>
    %cst_4 = arith.constant 0.000000e+00 : f32
    %4 = vector.broadcast %cst_4 : f32 to vector<8x16xf32>
    %5 = arith.maximumf %3, %4 : vector<8x16xf32>
    %cst_5 = arith.constant dense<0.000000e+00> : vector<8xf32>
    %6 = vector.multi_reduction <add>, %5, %cst_5 [1] : vector<8x16xf32> to vector<8xf32>
    %7 = vector.shape_cast %6 : vector<8xf32> to vector<8x1xf32>
    %cst_6 = arith.constant 1.600000e+01 : f32
    %8 = vector.broadcast %cst_6 : f32 to vector<8x1xf32>
    %9 = arith.divf %7, %8 : vector<8x1xf32>
    %cst_7 = arith.constant dense<0.000000e+00> : vector<1xf32>
    %10 = vector.multi_reduction <add>, %9, %cst_7 [0] : vector<8x1xf32> to vector<1xf32>
    %11 = vector.shape_cast %10 : vector<1xf32> to vector<1x1xf32>
    %cst_8 = arith.constant 8.000000e+00 : f32
    %12 = vector.broadcast %cst_8 : f32 to vector<1x1xf32>
    %13 = arith.divf %11, %12 : vector<1x1xf32>
    %14 = vector.broadcast %13 : vector<1x1xf32> to vector<8x16xf32>
    %15 = arith.subf %5, %14 : vector<8x16xf32>
    %16 = arith.mulf %15, %15 : vector<8x16xf32>
    %cst_9 = arith.constant dense<0.000000e+00> : vector<8xf32>
    %17 = vector.multi_reduction <add>, %16, %cst_9 [1] : vector<8x16xf32> to vector<8xf32>
    %18 = vector.shape_cast %17 : vector<8xf32> to vector<8x1xf32>
    %cst_10 = arith.constant 1.600000e+01 : f32
    %19 = vector.broadcast %cst_10 : f32 to vector<8x1xf32>
    %20 = arith.divf %18, %19 : vector<8x1xf32>
    %cst_11 = arith.constant dense<0.000000e+00> : vector<1xf32>
    %21 = vector.multi_reduction <add>, %20, %cst_11 [0] : vector<8x1xf32> to vector<1xf32>
    %22 = vector.shape_cast %21 : vector<1xf32> to vector<1x1xf32>
    %cst_12 = arith.constant 8.000000e+00 : f32
    %23 = vector.broadcast %cst_12 : f32 to vector<1x1xf32>
    %24 = arith.divf %22, %23 : vector<1x1xf32>
    %cst_13 = arith.constant 9.99999993E-9 : f32
    %25 = vector.broadcast %cst_13 : f32 to vector<1x1xf32>
    %26 = arith.addf %24, %25 : vector<1x1xf32>
    %27 = math.rsqrt %26 : vector<1x1xf32>
    %28 = vector.broadcast %27 : vector<1x1xf32> to vector<8x16xf32>
    %29 = arith.mulf %15, %28 : vector<8x16xf32>
    %c0_14 = arith.constant 0 : index
    %c0_15 = arith.constant 0 : index
    %30 = vector.load %arg3[%c0_14, %c0_15] : memref<8x16xf32, #tpu.memory_space<vmem>>, vector<8x16xf32>
    %31 = arith.mulf %29, %30 : vector<8x16xf32>
    %c0_16 = arith.constant 0 : index
    %c0_17 = arith.constant 0 : index
    %32 = vector.load %arg4[%c0_16, %c0_17] : memref<8x16xf32, #tpu.memory_space<vmem>>, vector<8x16xf32>
    %33 = arith.addf %31, %32 : vector<8x16xf32>
    %c0_18 = arith.constant 0 : index
    %c0_19 = arith.constant 0 : index
    %34 = vector.load %arg5[%c0_18, %c0_19] : memref<16x16xf32, #tpu.memory_space<vmem>>, vector<16x16xf32>
    %cst_20 = arith.constant dense<0.000000e+00> : vector<8x16xf32>
    %35 = tpu.matmul %33, %34, %cst_20 {dimension_numbers = #tpu.dot_dimension_numbers<[1], [0], [0], [1], [0, 0, 1, 1], [], []>} : vector<8x16xf32>, vector<16x16xf32>, vector<8x16xf32> -> vector<8x16xf32>
    %cst_21 = arith.constant dense<0.000000e+00> : vector<8x8xf32>
    %36 = tpu.matmul %35, %5, %cst_21 {dimension_numbers = #tpu.dot_dimension_numbers<[1], [1], [0], [0], [0, 0, 1, 0], [], []>} : vector<8x16xf32>, vector<8x16xf32>, vector<8x8xf32> -> vector<8x8xf32>
    %cst_22 = arith.constant 0.000000e+00 : f32
    %37 = vector.broadcast %cst_22 : f32 to vector<8x8xf32>
    %38 = arith.maximumf %36, %37 : vector<8x8xf32>
    %c0_23 = arith.constant 0 : index
    %c0_24 = arith.constant 0 : index
    %c0_25 = arith.constant 0 : index
    %39 = vector.load %arg6[%c0_23, %c0_24, %c0_25] : memref<1x8x8xf32, #tpu.memory_space<vmem>>, vector<1x8x8xf32>
    %40 = vector.shape_cast %39 : vector<1x8x8xf32> to vector<8x8xf32>
    %41 = vector.shape_cast %38 : vector<8x8xf32> to vector<1x8x8xf32>
    tpu.vector_store %arg6[%c0_23, %c0_24, %c0_25], %41 {strides = array<i32>} : memref<1x8x8xf32, #tpu.memory_space<vmem>>, vector<1x8x8xf32>,
    return
  }
  func.func @transform_0(%arg0: i32) -> (i32, i32, i32) {
    %c0_i32 = arith.constant 0 : i32
    %c0_i32_0 = arith.constant 0 : i32
    %c0_i32_1 = arith.constant 0 : i32
    return %arg0, %c0_i32, %c0_i32_0 : i32, i32, i32
  }
  func.func @transform_1(%arg0: i32) -> (i32, i32) {
    %c0_i32 = arith.constant 0 : i32
    %c0_i32_0 = arith.constant 0 : i32
    %c0_i32_1 = arith.constant 0 : i32
    return %c0_i32, %c0_i32_0 : i32, i32
  }
  func.func @transform_2(%arg0: i32) -> (i32, i32) {
    %c0_i32 = arith.constant 0 : i32
    %c0_i32_0 = arith.constant 0 : i32
    %c0_i32_1 = arith.constant 0 : i32
    return %c0_i32, %c0_i32_0 : i32, i32
  }
  func.func @transform_3(%arg0: i32) -> (i32, i32) {
    %c0_i32 = arith.constant 0 : i32
    %c0_i32_0 = arith.constant 0 : i32
    %c0_i32_1 = arith.constant 0 : i32
    return %c0_i32, %c0_i32_0 : i32, i32
  }
  func.func @transform_4(%arg0: i32) -> (i32, i32) {
    %c0_i32 = arith.constant 0 : i32
    %c0_i32_0 = arith.constant 0 : i32
    %c0_i32_1 = arith.constant 0 : i32
    return %c0_i32, %c0_i32_0 : i32, i32
  }
  func.func @transform_5(%arg0: i32) -> (i32, i32, i32) {
    %c0_i32 = arith.constant 0 : i32
    %c0_i32_0 = arith.constant 0 : i32
    %c0_i32_1 = arith.constant 0 : i32
    return %arg0, %c0_i32, %c0_i32_0 : i32, i32, i32
  }
}

module attributes {stable_mosaic.version = 11 : i64} {
  func.func @_wavenet_stack_kernel(%arg0: i32, %arg1: memref<1x96x8xf32, #tpu.memory_space<vmem>>, %arg2: memref<8x16xf32, #tpu.memory_space<vmem>>, %arg3: memref<1x16xf32, #tpu.memory_space<vmem>>, %arg4: memref<4x16x16xf32, #tpu.memory_space<vmem>>, %arg5: memref<4x16x16xf32, #tpu.memory_space<vmem>>, %arg6: memref<4x1x16xf32, #tpu.memory_space<vmem>>, %arg7: memref<4x16x16xf32, #tpu.memory_space<vmem>>, %arg8: memref<4x16x16xf32, #tpu.memory_space<vmem>>, %arg9: memref<4x1x16xf32, #tpu.memory_space<vmem>>, %arg10: memref<4x16x32xf32, #tpu.memory_space<vmem>>, %arg11: memref<4x1x32xf32, #tpu.memory_space<vmem>>, %arg12: memref<4x80x16xf32, #tpu.memory_space<vmem>>, %arg13: memref<4x1x16xf32, #tpu.memory_space<vmem>>, %arg14: memref<4x1x16xf32, #tpu.memory_space<vmem>>, %arg15: memref<4x1x16xf32, #tpu.memory_space<vmem>>, %arg16: memref<88x88xf32, #tpu.memory_space<vmem>>, %arg17: memref<72x72xf32, #tpu.memory_space<vmem>>, %arg18: memref<64x64xf32, #tpu.memory_space<vmem>>, %arg19: memref<48x48xf32, #tpu.memory_space<vmem>>, %arg20: memref<88x88xf32, #tpu.memory_space<vmem>>, %arg21: memref<72x72xf32, #tpu.memory_space<vmem>>, %arg22: memref<64x64xf32, #tpu.memory_space<vmem>>, %arg23: memref<48x48xf32, #tpu.memory_space<vmem>>, %arg24: memref<1x88x88xf32, #tpu.memory_space<vmem>>, %arg25: memref<1x72x72xf32, #tpu.memory_space<vmem>>, %arg26: memref<1x64x64xf32, #tpu.memory_space<vmem>>, %arg27: memref<1x48x48xf32, #tpu.memory_space<vmem>>, %arg28: memref<1x88x88xf32, #tpu.memory_space<vmem>>, %arg29: memref<1x72x72xf32, #tpu.memory_space<vmem>>, %arg30: memref<1x64x64xf32, #tpu.memory_space<vmem>>, %arg31: memref<1x48x48xf32, #tpu.memory_space<vmem>>, %arg32: memref<32x32xf32, #tpu.memory_space<vmem>>, %arg33: memref<1x32xf32, #tpu.memory_space<vmem>>, %arg34: memref<32x12xf32, #tpu.memory_space<vmem>>, %arg35: memref<1x12xf32, #tpu.memory_space<vmem>>, %arg36: memref<1x48x12xf32, #tpu.memory_space<vmem>>, %arg37: memref<96x16xf32, #tpu.memory_space<vmem>>, %arg38: memref<88x32xf32, #tpu.memory_space<vmem>>) attributes {dimension_semantics = [#tpu.dimension_semantics<parallel>], iteration_bounds = array<i64: 2>, scalar_prefetch = 0 : i64, scratch_operands = 2 : i64, tpu.core_type = #tpu.core_type<tc>, window_params = [{transform_indices = @transform_0, window_bounds = array<i64: 1, 96, 8>}, {pipeline_mode = #tpu.pipeline_mode<synchronous>, transform_indices = @transform_1, window_bounds = array<i64: 8, 16>}, {pipeline_mode = #tpu.pipeline_mode<synchronous>, transform_indices = @transform_2, window_bounds = array<i64: 1, 16>}, {pipeline_mode = #tpu.pipeline_mode<synchronous>, transform_indices = @transform_3, window_bounds = array<i64: 4, 16, 16>}, {pipeline_mode = #tpu.pipeline_mode<synchronous>, transform_indices = @transform_4, window_bounds = array<i64: 4, 16, 16>}, {pipeline_mode = #tpu.pipeline_mode<synchronous>, transform_indices = @transform_5, window_bounds = array<i64: 4, 1, 16>}, {pipeline_mode = #tpu.pipeline_mode<synchronous>, transform_indices = @transform_6, window_bounds = array<i64: 4, 16, 16>}, {pipeline_mode = #tpu.pipeline_mode<synchronous>, transform_indices = @transform_7, window_bounds = array<i64: 4, 16, 16>}, {pipeline_mode = #tpu.pipeline_mode<synchronous>, transform_indices = @transform_8, window_bounds = array<i64: 4, 1, 16>}, {pipeline_mode = #tpu.pipeline_mode<synchronous>, transform_indices = @transform_9, window_bounds = array<i64: 4, 16, 32>}, {pipeline_mode = #tpu.pipeline_mode<synchronous>, transform_indices = @transform_10, window_bounds = array<i64: 4, 1, 32>}, {pipeline_mode = #tpu.pipeline_mode<synchronous>, transform_indices = @transform_11, window_bounds = array<i64: 4, 80, 16>}, {pipeline_mode = #tpu.pipeline_mode<synchronous>, transform_indices = @transform_12, window_bounds = array<i64: 4, 1, 16>}, {pipeline_mode = #tpu.pipeline_mode<synchronous>, transform_indices = @transform_13, window_bounds = array<i64: 4, 1, 16>}, {pipeline_mode = #tpu.pipeline_mode<synchronous>, transform_indices = @transform_14, window_bounds = array<i64: 4, 1, 16>}, {pipeline_mode = #tpu.pipeline_mode<synchronous>, transform_indices = @transform_15, window_bounds = array<i64: 88, 88>}, {pipeline_mode = #tpu.pipeline_mode<synchronous>, transform_indices = @transform_16, window_bounds = array<i64: 72, 72>}, {pipeline_mode = #tpu.pipeline_mode<synchronous>, transform_indices = @transform_17, window_bounds = array<i64: 64, 64>}, {pipeline_mode = #tpu.pipeline_mode<synchronous>, transform_indices = @transform_18, window_bounds = array<i64: 48, 48>}, {pipeline_mode = #tpu.pipeline_mode<synchronous>, transform_indices = @transform_19, window_bounds = array<i64: 88, 88>}, {pipeline_mode = #tpu.pipeline_mode<synchronous>, transform_indices = @transform_20, window_bounds = array<i64: 72, 72>}, {pipeline_mode = #tpu.pipeline_mode<synchronous>, transform_indices = @transform_21, window_bounds = array<i64: 64, 64>}, {pipeline_mode = #tpu.pipeline_mode<synchronous>, transform_indices = @transform_22, window_bounds = array<i64: 48, 48>}, {transform_indices = @transform_23, window_bounds = array<i64: 1, 88, 88>}, {transform_indices = @transform_24, window_bounds = array<i64: 1, 72, 72>}, {transform_indices = @transform_25, window_bounds = array<i64: 1, 64, 64>}, {transform_indices = @transform_26, window_bounds = array<i64: 1, 48, 48>}, {transform_indices = @transform_27, window_bounds = array<i64: 1, 88, 88>}, {transform_indices = @transform_28, window_bounds = array<i64: 1, 72, 72>}, {transform_indices = @transform_29, window_bounds = array<i64: 1, 64, 64>}, {transform_indices = @transform_30, window_bounds = array<i64: 1, 48, 48>}, {pipeline_mode = #tpu.pipeline_mode<synchronous>, transform_indices = @transform_31, window_bounds = array<i64: 32, 32>}, {pipeline_mode = #tpu.pipeline_mode<synchronous>, transform_indices = @transform_32, window_bounds = array<i64: 1, 32>}, {pipeline_mode = #tpu.pipeline_mode<synchronous>, transform_indices = @transform_33, window_bounds = array<i64: 32, 12>}, {pipeline_mode = #tpu.pipeline_mode<synchronous>, transform_indices = @transform_34, window_bounds = array<i64: 1, 12>}, {transform_indices = @transform_35, window_bounds = array<i64: 1, 48, 12>}]} {
    %c0 = arith.constant 0 : index
    %c0_0 = arith.constant 0 : index
    %c0_1 = arith.constant 0 : index
    %0 = vector.load %arg1[%c0, %c0_0, %c0_1] : memref<1x96x8xf32, #tpu.memory_space<vmem>>, vector<1x96x8xf32>
    %1 = vector.shape_cast %0 : vector<1x96x8xf32> to vector<96x8xf32>
    %c0_2 = arith.constant 0 : index
    %c0_3 = arith.constant 0 : index
    %2 = vector.load %arg2[%c0_2, %c0_3] : memref<8x16xf32, #tpu.memory_space<vmem>>, vector<8x16xf32>
    %cst = arith.constant dense<0.000000e+00> : vector<96x16xf32>
    %3 = tpu.matmul %1, %2, %cst {dimension_numbers = #tpu.dot_dimension_numbers<[1], [0], [0], [1], [0, 0, 1, 1], [], []>} : vector<96x8xf32>, vector<8x16xf32>, vector<96x16xf32> -> vector<96x16xf32>
    %c0_4 = arith.constant 0 : index
    %c0_5 = arith.constant 0 : index
    %4 = vector.load %arg3[%c0_4, %c0_5] : memref<1x16xf32, #tpu.memory_space<vmem>>, vector<1x16xf32>
    %5 = vector.broadcast %4 : vector<1x16xf32> to vector<96x16xf32>
    %6 = arith.addf %3, %5 : vector<96x16xf32>
    %c0_6 = arith.constant 0 : index
    %c0_7 = arith.constant 0 : index
    %7 = vector.load %arg37[%c0_6, %c0_7] : memref<96x16xf32, #tpu.memory_space<vmem>>, vector<96x16xf32>
    tpu.vector_store %arg37[%c0_6, %c0_7], %6 {strides = array<i32>} : memref<96x16xf32, #tpu.memory_space<vmem>>, vector<96x16xf32>,
    %c0_8 = arith.constant 0 : index
    %c0_9 = arith.constant 0 : index
    %8 = vector.load %arg37[%c0_8, %c0_9] : memref<96x16xf32, #tpu.memory_space<vmem>>, vector<88x16xf32>
    %c8 = arith.constant 8 : index
    %c0_10 = arith.constant 0 : index
    %9 = vector.load %arg37[%c8, %c0_10] : memref<96x16xf32, #tpu.memory_space<vmem>>, vector<88x16xf32>
    %c0_11 = arith.constant 0 : index
    %c0_12 = arith.constant 0 : index
    %c0_13 = arith.constant 0 : index
    %10 = vector.load %arg4[%c0_11, %c0_12, %c0_13] : memref<4x16x16xf32, #tpu.memory_space<vmem>>, vector<1x16x16xf32>
    %11 = vector.shape_cast %10 : vector<1x16x16xf32> to vector<16x16xf32>
    %cst_14 = arith.constant dense<0.000000e+00> : vector<88x16xf32>
    %12 = tpu.matmul %8, %11, %cst_14 {dimension_numbers = #tpu.dot_dimension_numbers<[1], [0], [0], [1], [0, 0, 1, 1], [], []>} : vector<88x16xf32>, vector<16x16xf32>, vector<88x16xf32> -> vector<88x16xf32>
    %c0_15 = arith.constant 0 : index
    %c0_16 = arith.constant 0 : index
    %c0_17 = arith.constant 0 : index
    %13 = vector.load %arg5[%c0_15, %c0_16, %c0_17] : memref<4x16x16xf32, #tpu.memory_space<vmem>>, vector<1x16x16xf32>
    %14 = vector.shape_cast %13 : vector<1x16x16xf32> to vector<16x16xf32>
    %cst_18 = arith.constant dense<0.000000e+00> : vector<88x16xf32>
    %15 = tpu.matmul %9, %14, %cst_18 {dimension_numbers = #tpu.dot_dimension_numbers<[1], [0], [0], [1], [0, 0, 1, 1], [], []>} : vector<88x16xf32>, vector<16x16xf32>, vector<88x16xf32> -> vector<88x16xf32>
    %16 = arith.addf %12, %15 : vector<88x16xf32>
    %c0_19 = arith.constant 0 : index
    %c0_20 = arith.constant 0 : index
    %c0_21 = arith.constant 0 : index
    %17 = vector.load %arg6[%c0_19, %c0_20, %c0_21] : memref<4x1x16xf32, #tpu.memory_space<vmem>>, vector<1x1x16xf32>
    %18 = vector.shape_cast %17 : vector<1x1x16xf32> to vector<1x16xf32>
    %19 = vector.broadcast %18 : vector<1x16xf32> to vector<88x16xf32>
    %20 = arith.addf %16, %19 : vector<88x16xf32>
    %c0_22 = arith.constant 0 : index
    %c0_23 = arith.constant 0 : index
    %c0_24 = arith.constant 0 : index
    %21 = vector.load %arg7[%c0_22, %c0_23, %c0_24] : memref<4x16x16xf32, #tpu.memory_space<vmem>>, vector<1x16x16xf32>
    %22 = vector.shape_cast %21 : vector<1x16x16xf32> to vector<16x16xf32>
    %cst_25 = arith.constant dense<0.000000e+00> : vector<88x16xf32>
    %23 = tpu.matmul %8, %22, %cst_25 {dimension_numbers = #tpu.dot_dimension_numbers<[1], [0], [0], [1], [0, 0, 1, 1], [], []>} : vector<88x16xf32>, vector<16x16xf32>, vector<88x16xf32> -> vector<88x16xf32>
    %c0_26 = arith.constant 0 : index
    %c0_27 = arith.constant 0 : index
    %c0_28 = arith.constant 0 : index
    %24 = vector.load %arg8[%c0_26, %c0_27, %c0_28] : memref<4x16x16xf32, #tpu.memory_space<vmem>>, vector<1x16x16xf32>
    %25 = vector.shape_cast %24 : vector<1x16x16xf32> to vector<16x16xf32>
    %cst_29 = arith.constant dense<0.000000e+00> : vector<88x16xf32>
    %26 = tpu.matmul %9, %25, %cst_29 {dimension_numbers = #tpu.dot_dimension_numbers<[1], [0], [0], [1], [0, 0, 1, 1], [], []>} : vector<88x16xf32>, vector<16x16xf32>, vector<88x16xf32> -> vector<88x16xf32>
    %27 = arith.addf %23, %26 : vector<88x16xf32>
    %c0_30 = arith.constant 0 : index
    %c0_31 = arith.constant 0 : index
    %c0_32 = arith.constant 0 : index
    %28 = vector.load %arg9[%c0_30, %c0_31, %c0_32] : memref<4x1x16xf32, #tpu.memory_space<vmem>>, vector<1x1x16xf32>
    %29 = vector.shape_cast %28 : vector<1x1x16xf32> to vector<1x16xf32>
    %30 = vector.broadcast %29 : vector<1x16xf32> to vector<88x16xf32>
    %31 = arith.addf %27, %30 : vector<88x16xf32>
    %32 = math.tanh %20 : vector<88x16xf32>
    %33 = arith.negf %31 : vector<88x16xf32>
    %34 = math.exp %33 : vector<88x16xf32>
    %cst_33 = arith.constant 1.000000e+00 : f32
    %35 = vector.broadcast %cst_33 : f32 to vector<88x16xf32>
    %36 = arith.addf %35, %34 : vector<88x16xf32>
    %37 = arith.divf %35, %36 : vector<88x16xf32>
    %38 = arith.mulf %32, %37 : vector<88x16xf32>
    %c0_34 = arith.constant 0 : index
    %c0_35 = arith.constant 0 : index
    %c0_36 = arith.constant 0 : index
    %39 = vector.load %arg10[%c0_34, %c0_35, %c0_36] : memref<4x16x32xf32, #tpu.memory_space<vmem>>, vector<1x16x32xf32>
    %40 = vector.shape_cast %39 : vector<1x16x32xf32> to vector<16x32xf32>
    %cst_37 = arith.constant dense<0.000000e+00> : vector<88x32xf32>
    %41 = tpu.matmul %38, %40, %cst_37 {dimension_numbers = #tpu.dot_dimension_numbers<[1], [0], [0], [1], [0, 0, 1, 1], [], []>} : vector<88x16xf32>, vector<16x32xf32>, vector<88x32xf32> -> vector<88x32xf32>
    %c0_38 = arith.constant 0 : index
    %c0_39 = arith.constant 0 : index
    %c0_40 = arith.constant 0 : index
    %42 = vector.load %arg11[%c0_38, %c0_39, %c0_40] : memref<4x1x32xf32, #tpu.memory_space<vmem>>, vector<1x1x32xf32>
    %43 = vector.shape_cast %42 : vector<1x1x32xf32> to vector<1x32xf32>
    %44 = vector.broadcast %43 : vector<1x32xf32> to vector<88x32xf32>
    %45 = arith.addf %41, %44 : vector<88x32xf32>
    %c0_41 = arith.constant 0 : index
    %c0_42 = arith.constant 0 : index
    %46 = vector.load %arg38[%c0_41, %c0_42] : memref<88x32xf32, #tpu.memory_space<vmem>>, vector<88x32xf32>
    tpu.vector_store %arg38[%c0_41, %c0_42], %45 {strides = array<i32>} : memref<88x32xf32, #tpu.memory_space<vmem>>, vector<88x32xf32>,
    %c0_43 = arith.constant 0 : index
    %c0_44 = arith.constant 0 : index
    %47 = vector.load %arg16[%c0_43, %c0_44] : memref<88x88xf32, #tpu.memory_space<vmem>>, vector<88x88xf32>
    %cst_45 = arith.constant dense<0.000000e+00> : vector<88x16xf32>
    %48 = tpu.matmul %47, %38, %cst_45 {dimension_numbers = #tpu.dot_dimension_numbers<[1], [0], [0], [1], [0, 0, 1, 1], [], []>} : vector<88x88xf32>, vector<88x16xf32>, vector<88x16xf32> -> vector<88x16xf32>
    %c0_46 = arith.constant 0 : index
    %c0_47 = arith.constant 0 : index
    %49 = vector.load %arg20[%c0_46, %c0_47] : memref<88x88xf32, #tpu.memory_space<vmem>>, vector<88x88xf32>
    %cst_48 = arith.constant dense<0.000000e+00> : vector<88x16xf32>
    %50 = tpu.matmul %49, %38, %cst_48 {dimension_numbers = #tpu.dot_dimension_numbers<[1], [0], [0], [1], [0, 0, 1, 1], [], []>} : vector<88x88xf32>, vector<88x16xf32>, vector<88x16xf32> -> vector<88x16xf32>
    %c0_49 = arith.constant 0 : index
    %c0_50 = arith.constant 0 : index
    %c0_51 = arith.constant 0 : index
    %51 = vector.load %arg24[%c0_49, %c0_50, %c0_51] : memref<1x88x88xf32, #tpu.memory_space<vmem>>, vector<1x88x88xf32>
    %52 = vector.shape_cast %51 : vector<1x88x88xf32> to vector<88x88xf32>
    %cst_52 = arith.constant dense<0.000000e+00> : vector<88x16xf32>
    %53 = tpu.matmul %52, %38, %cst_52 {dimension_numbers = #tpu.dot_dimension_numbers<[1], [0], [0], [1], [0, 0, 1, 1], [], []>} : vector<88x88xf32>, vector<88x16xf32>, vector<88x16xf32> -> vector<88x16xf32>
    %c0_53 = arith.constant 0 : index
    %c0_54 = arith.constant 0 : index
    %c0_55 = arith.constant 0 : index
    %54 = vector.load %arg28[%c0_53, %c0_54, %c0_55] : memref<1x88x88xf32, #tpu.memory_space<vmem>>, vector<1x88x88xf32>
    %55 = vector.shape_cast %54 : vector<1x88x88xf32> to vector<88x88xf32>
    %cst_56 = arith.constant dense<0.000000e+00> : vector<88x16xf32>
    %56 = tpu.matmul %55, %38, %cst_56 {dimension_numbers = #tpu.dot_dimension_numbers<[1], [0], [0], [1], [0, 0, 1, 1], [], []>} : vector<88x88xf32>, vector<88x16xf32>, vector<88x16xf32> -> vector<88x16xf32>
    %c0_57 = arith.constant 0 : index
    %c0_58 = arith.constant 0 : index
    %c0_59 = arith.constant 0 : index
    %57 = vector.load %arg12[%c0_57, %c0_58, %c0_59] : memref<4x80x16xf32, #tpu.memory_space<vmem>>, vector<1x80x16xf32>
    %58 = vector.shape_cast %57 : vector<1x80x16xf32> to vector<80x16xf32>
    %59 = vector.extract_strided_slice %58 {offsets = [0, 0], sizes = [16, 16], strides = [1, 1]} : vector<80x16xf32> to vector<16x16xf32>
    %cst_60 = arith.constant dense<0.000000e+00> : vector<88x16xf32>
    %60 = tpu.matmul %38, %59, %cst_60 {dimension_numbers = #tpu.dot_dimension_numbers<[1], [0], [0], [1], [0, 0, 1, 1], [], []>} : vector<88x16xf32>, vector<16x16xf32>, vector<88x16xf32> -> vector<88x16xf32>
    %61 = vector.extract_strided_slice %58 {offsets = [16, 0], sizes = [16, 16], strides = [1, 1]} : vector<80x16xf32> to vector<16x16xf32>
    %cst_61 = arith.constant dense<0.000000e+00> : vector<88x16xf32>
    %62 = tpu.matmul %48, %61, %cst_61 {dimension_numbers = #tpu.dot_dimension_numbers<[1], [0], [0], [1], [0, 0, 1, 1], [], []>} : vector<88x16xf32>, vector<16x16xf32>, vector<88x16xf32> -> vector<88x16xf32>
    %63 = arith.addf %60, %62 : vector<88x16xf32>
    %64 = vector.extract_strided_slice %58 {offsets = [32, 0], sizes = [16, 16], strides = [1, 1]} : vector<80x16xf32> to vector<16x16xf32>
    %cst_62 = arith.constant dense<0.000000e+00> : vector<88x16xf32>
    %65 = tpu.matmul %50, %64, %cst_62 {dimension_numbers = #tpu.dot_dimension_numbers<[1], [0], [0], [1], [0, 0, 1, 1], [], []>} : vector<88x16xf32>, vector<16x16xf32>, vector<88x16xf32> -> vector<88x16xf32>
    %66 = arith.addf %63, %65 : vector<88x16xf32>
    %67 = vector.extract_strided_slice %58 {offsets = [48, 0], sizes = [16, 16], strides = [1, 1]} : vector<80x16xf32> to vector<16x16xf32>
    %cst_63 = arith.constant dense<0.000000e+00> : vector<88x16xf32>
    %68 = tpu.matmul %53, %67, %cst_63 {dimension_numbers = #tpu.dot_dimension_numbers<[1], [0], [0], [1], [0, 0, 1, 1], [], []>} : vector<88x16xf32>, vector<16x16xf32>, vector<88x16xf32> -> vector<88x16xf32>
    %69 = arith.addf %66, %68 : vector<88x16xf32>
    %70 = vector.extract_strided_slice %58 {offsets = [64, 0], sizes = [16, 16], strides = [1, 1]} : vector<80x16xf32> to vector<16x16xf32>
    %cst_64 = arith.constant dense<0.000000e+00> : vector<88x16xf32>
    %71 = tpu.matmul %56, %70, %cst_64 {dimension_numbers = #tpu.dot_dimension_numbers<[1], [0], [0], [1], [0, 0, 1, 1], [], []>} : vector<88x16xf32>, vector<16x16xf32>, vector<88x16xf32> -> vector<88x16xf32>
    %72 = arith.addf %69, %71 : vector<88x16xf32>
    %c0_65 = arith.constant 0 : index
    %c0_66 = arith.constant 0 : index
    %c0_67 = arith.constant 0 : index
    %73 = vector.load %arg13[%c0_65, %c0_66, %c0_67] : memref<4x1x16xf32, #tpu.memory_space<vmem>>, vector<1x1x16xf32>
    %74 = vector.shape_cast %73 : vector<1x1x16xf32> to vector<1x16xf32>
    %75 = vector.broadcast %74 : vector<1x16xf32> to vector<88x16xf32>
    %76 = arith.addf %72, %75 : vector<88x16xf32>
    %77 = arith.addf %76, %9 : vector<88x16xf32>
    %c0_68 = arith.constant 0 : index
    %c0_69 = arith.constant 0 : index
    %c0_70 = arith.constant 0 : index
    %78 = vector.load %arg14[%c0_68, %c0_69, %c0_70] : memref<4x1x16xf32, #tpu.memory_space<vmem>>, vector<1x1x16xf32>
    %79 = vector.shape_cast %78 : vector<1x1x16xf32> to vector<1x16xf32>
    %80 = vector.broadcast %79 : vector<1x16xf32> to vector<88x16xf32>
    %81 = arith.mulf %77, %80 : vector<88x16xf32>
    %c0_71 = arith.constant 0 : index
    %c0_72 = arith.constant 0 : index
    %c0_73 = arith.constant 0 : index
    %82 = vector.load %arg15[%c0_71, %c0_72, %c0_73] : memref<4x1x16xf32, #tpu.memory_space<vmem>>, vector<1x1x16xf32>
    %83 = vector.shape_cast %82 : vector<1x1x16xf32> to vector<1x16xf32>
    %84 = vector.broadcast %83 : vector<1x16xf32> to vector<88x16xf32>
    %85 = arith.addf %81, %84 : vector<88x16xf32>
    %c0_74 = arith.constant 0 : index
    %c0_75 = arith.constant 0 : index
    %86 = vector.load %arg37[%c0_74, %c0_75] : memref<96x16xf32, #tpu.memory_space<vmem>>, vector<88x16xf32>
    tpu.vector_store %arg37[%c0_74, %c0_75], %85 {strides = array<i32>} : memref<96x16xf32, #tpu.memory_space<vmem>>, vector<88x16xf32>,
    %c0_76 = arith.constant 0 : index
    %c0_77 = arith.constant 0 : index
    %87 = vector.load %arg37[%c0_76, %c0_77] : memref<96x16xf32, #tpu.memory_space<vmem>>, vector<72x16xf32>
    %c16 = arith.constant 16 : index
    %c0_78 = arith.constant 0 : index
    %88 = vector.load %arg37[%c16, %c0_78] : memref<96x16xf32, #tpu.memory_space<vmem>>, vector<72x16xf32>
    %c1 = arith.constant 1 : index
    %c0_79 = arith.constant 0 : index
    %c0_80 = arith.constant 0 : index
    %89 = vector.load %arg4[%c1, %c0_79, %c0_80] : memref<4x16x16xf32, #tpu.memory_space<vmem>>, vector<1x16x16xf32>
    %90 = vector.shape_cast %89 : vector<1x16x16xf32> to vector<16x16xf32>
    %cst_81 = arith.constant dense<0.000000e+00> : vector<72x16xf32>
    %91 = tpu.matmul %87, %90, %cst_81 {dimension_numbers = #tpu.dot_dimension_numbers<[1], [0], [0], [1], [0, 0, 1, 1], [], []>} : vector<72x16xf32>, vector<16x16xf32>, vector<72x16xf32> -> vector<72x16xf32>
    %c1_82 = arith.constant 1 : index
    %c0_83 = arith.constant 0 : index
    %c0_84 = arith.constant 0 : index
    %92 = vector.load %arg5[%c1_82, %c0_83, %c0_84] : memref<4x16x16xf32, #tpu.memory_space<vmem>>, vector<1x16x16xf32>
    %93 = vector.shape_cast %92 : vector<1x16x16xf32> to vector<16x16xf32>
    %cst_85 = arith.constant dense<0.000000e+00> : vector<72x16xf32>
    %94 = tpu.matmul %88, %93, %cst_85 {dimension_numbers = #tpu.dot_dimension_numbers<[1], [0], [0], [1], [0, 0, 1, 1], [], []>} : vector<72x16xf32>, vector<16x16xf32>, vector<72x16xf32> -> vector<72x16xf32>
    %95 = arith.addf %91, %94 : vector<72x16xf32>
    %c1_86 = arith.constant 1 : index
    %c0_87 = arith.constant 0 : index
    %c0_88 = arith.constant 0 : index
    %96 = vector.load %arg6[%c1_86, %c0_87, %c0_88] : memref<4x1x16xf32, #tpu.memory_space<vmem>>, vector<1x1x16xf32>
    %97 = vector.shape_cast %96 : vector<1x1x16xf32> to vector<1x16xf32>
    %98 = vector.broadcast %97 : vector<1x16xf32> to vector<72x16xf32>
    %99 = arith.addf %95, %98 : vector<72x16xf32>
    %c1_89 = arith.constant 1 : index
    %c0_90 = arith.constant 0 : index
    %c0_91 = arith.constant 0 : index
    %100 = vector.load %arg7[%c1_89, %c0_90, %c0_91] : memref<4x16x16xf32, #tpu.memory_space<vmem>>, vector<1x16x16xf32>
    %101 = vector.shape_cast %100 : vector<1x16x16xf32> to vector<16x16xf32>
    %cst_92 = arith.constant dense<0.000000e+00> : vector<72x16xf32>
    %102 = tpu.matmul %87, %101, %cst_92 {dimension_numbers = #tpu.dot_dimension_numbers<[1], [0], [0], [1], [0, 0, 1, 1], [], []>} : vector<72x16xf32>, vector<16x16xf32>, vector<72x16xf32> -> vector<72x16xf32>
    %c1_93 = arith.constant 1 : index
    %c0_94 = arith.constant 0 : index
    %c0_95 = arith.constant 0 : index
    %103 = vector.load %arg8[%c1_93, %c0_94, %c0_95] : memref<4x16x16xf32, #tpu.memory_space<vmem>>, vector<1x16x16xf32>
    %104 = vector.shape_cast %103 : vector<1x16x16xf32> to vector<16x16xf32>
    %cst_96 = arith.constant dense<0.000000e+00> : vector<72x16xf32>
    %105 = tpu.matmul %88, %104, %cst_96 {dimension_numbers = #tpu.dot_dimension_numbers<[1], [0], [0], [1], [0, 0, 1, 1], [], []>} : vector<72x16xf32>, vector<16x16xf32>, vector<72x16xf32> -> vector<72x16xf32>
    %106 = arith.addf %102, %105 : vector<72x16xf32>
    %c1_97 = arith.constant 1 : index
    %c0_98 = arith.constant 0 : index
    %c0_99 = arith.constant 0 : index
    %107 = vector.load %arg9[%c1_97, %c0_98, %c0_99] : memref<4x1x16xf32, #tpu.memory_space<vmem>>, vector<1x1x16xf32>
    %108 = vector.shape_cast %107 : vector<1x1x16xf32> to vector<1x16xf32>
    %109 = vector.broadcast %108 : vector<1x16xf32> to vector<72x16xf32>
    %110 = arith.addf %106, %109 : vector<72x16xf32>
    %111 = math.tanh %99 : vector<72x16xf32>
    %112 = arith.negf %110 : vector<72x16xf32>
    %113 = math.exp %112 : vector<72x16xf32>
    %cst_100 = arith.constant 1.000000e+00 : f32
    %114 = vector.broadcast %cst_100 : f32 to vector<72x16xf32>
    %115 = arith.addf %114, %113 : vector<72x16xf32>
    %116 = arith.divf %114, %115 : vector<72x16xf32>
    %117 = arith.mulf %111, %116 : vector<72x16xf32>
    %c1_101 = arith.constant 1 : index
    %c0_102 = arith.constant 0 : index
    %c0_103 = arith.constant 0 : index
    %118 = vector.load %arg10[%c1_101, %c0_102, %c0_103] : memref<4x16x32xf32, #tpu.memory_space<vmem>>, vector<1x16x32xf32>
    %119 = vector.shape_cast %118 : vector<1x16x32xf32> to vector<16x32xf32>
    %cst_104 = arith.constant dense<0.000000e+00> : vector<72x32xf32>
    %120 = tpu.matmul %117, %119, %cst_104 {dimension_numbers = #tpu.dot_dimension_numbers<[1], [0], [0], [1], [0, 0, 1, 1], [], []>} : vector<72x16xf32>, vector<16x32xf32>, vector<72x32xf32> -> vector<72x32xf32>
    %c1_105 = arith.constant 1 : index
    %c0_106 = arith.constant 0 : index
    %c0_107 = arith.constant 0 : index
    %121 = vector.load %arg11[%c1_105, %c0_106, %c0_107] : memref<4x1x32xf32, #tpu.memory_space<vmem>>, vector<1x1x32xf32>
    %122 = vector.shape_cast %121 : vector<1x1x32xf32> to vector<1x32xf32>
    %123 = vector.broadcast %122 : vector<1x32xf32> to vector<72x32xf32>
    %124 = arith.addf %120, %123 : vector<72x32xf32>
    %c16_108 = arith.constant 16 : index
    %c0_109 = arith.constant 0 : index
    %125 = vector.load %arg38[%c16_108, %c0_109] : memref<88x32xf32, #tpu.memory_space<vmem>>, vector<72x32xf32>
    %126 = arith.addf %124, %125 : vector<72x32xf32>
    %c0_110 = arith.constant 0 : index
    %c0_111 = arith.constant 0 : index
    %127 = vector.load %arg38[%c0_110, %c0_111] : memref<88x32xf32, #tpu.memory_space<vmem>>, vector<72x32xf32>
    tpu.vector_store %arg38[%c0_110, %c0_111], %126 {strides = array<i32>} : memref<88x32xf32, #tpu.memory_space<vmem>>, vector<72x32xf32>,
    %c0_112 = arith.constant 0 : index
    %c0_113 = arith.constant 0 : index
    %128 = vector.load %arg17[%c0_112, %c0_113] : memref<72x72xf32, #tpu.memory_space<vmem>>, vector<72x72xf32>
    %cst_114 = arith.constant dense<0.000000e+00> : vector<72x16xf32>
    %129 = tpu.matmul %128, %117, %cst_114 {dimension_numbers = #tpu.dot_dimension_numbers<[1], [0], [0], [1], [0, 0, 1, 1], [], []>} : vector<72x72xf32>, vector<72x16xf32>, vector<72x16xf32> -> vector<72x16xf32>
    %c0_115 = arith.constant 0 : index
    %c0_116 = arith.constant 0 : index
    %130 = vector.load %arg21[%c0_115, %c0_116] : memref<72x72xf32, #tpu.memory_space<vmem>>, vector<72x72xf32>
    %cst_117 = arith.constant dense<0.000000e+00> : vector<72x16xf32>
    %131 = tpu.matmul %130, %117, %cst_117 {dimension_numbers = #tpu.dot_dimension_numbers<[1], [0], [0], [1], [0, 0, 1, 1], [], []>} : vector<72x72xf32>, vector<72x16xf32>, vector<72x16xf32> -> vector<72x16xf32>
    %c0_118 = arith.constant 0 : index
    %c0_119 = arith.constant 0 : index
    %c0_120 = arith.constant 0 : index
    %132 = vector.load %arg25[%c0_118, %c0_119, %c0_120] : memref<1x72x72xf32, #tpu.memory_space<vmem>>, vector<1x72x72xf32>
    %133 = vector.shape_cast %132 : vector<1x72x72xf32> to vector<72x72xf32>
    %cst_121 = arith.constant dense<0.000000e+00> : vector<72x16xf32>
    %134 = tpu.matmul %133, %117, %cst_121 {dimension_numbers = #tpu.dot_dimension_numbers<[1], [0], [0], [1], [0, 0, 1, 1], [], []>} : vector<72x72xf32>, vector<72x16xf32>, vector<72x16xf32> -> vector<72x16xf32>
    %c0_122 = arith.constant 0 : index
    %c0_123 = arith.constant 0 : index
    %c0_124 = arith.constant 0 : index
    %135 = vector.load %arg29[%c0_122, %c0_123, %c0_124] : memref<1x72x72xf32, #tpu.memory_space<vmem>>, vector<1x72x72xf32>
    %136 = vector.shape_cast %135 : vector<1x72x72xf32> to vector<72x72xf32>
    %cst_125 = arith.constant dense<0.000000e+00> : vector<72x16xf32>
    %137 = tpu.matmul %136, %117, %cst_125 {dimension_numbers = #tpu.dot_dimension_numbers<[1], [0], [0], [1], [0, 0, 1, 1], [], []>} : vector<72x72xf32>, vector<72x16xf32>, vector<72x16xf32> -> vector<72x16xf32>
    %c1_126 = arith.constant 1 : index
    %c0_127 = arith.constant 0 : index
    %c0_128 = arith.constant 0 : index
    %138 = vector.load %arg12[%c1_126, %c0_127, %c0_128] : memref<4x80x16xf32, #tpu.memory_space<vmem>>, vector<1x80x16xf32>
    %139 = vector.shape_cast %138 : vector<1x80x16xf32> to vector<80x16xf32>
    %140 = vector.extract_strided_slice %139 {offsets = [0, 0], sizes = [16, 16], strides = [1, 1]} : vector<80x16xf32> to vector<16x16xf32>
    %cst_129 = arith.constant dense<0.000000e+00> : vector<72x16xf32>
    %141 = tpu.matmul %117, %140, %cst_129 {dimension_numbers = #tpu.dot_dimension_numbers<[1], [0], [0], [1], [0, 0, 1, 1], [], []>} : vector<72x16xf32>, vector<16x16xf32>, vector<72x16xf32> -> vector<72x16xf32>
    %142 = vector.extract_strided_slice %139 {offsets = [16, 0], sizes = [16, 16], strides = [1, 1]} : vector<80x16xf32> to vector<16x16xf32>
    %cst_130 = arith.constant dense<0.000000e+00> : vector<72x16xf32>
    %143 = tpu.matmul %129, %142, %cst_130 {dimension_numbers = #tpu.dot_dimension_numbers<[1], [0], [0], [1], [0, 0, 1, 1], [], []>} : vector<72x16xf32>, vector<16x16xf32>, vector<72x16xf32> -> vector<72x16xf32>
    %144 = arith.addf %141, %143 : vector<72x16xf32>
    %145 = vector.extract_strided_slice %139 {offsets = [32, 0], sizes = [16, 16], strides = [1, 1]} : vector<80x16xf32> to vector<16x16xf32>
    %cst_131 = arith.constant dense<0.000000e+00> : vector<72x16xf32>
    %146 = tpu.matmul %131, %145, %cst_131 {dimension_numbers = #tpu.dot_dimension_numbers<[1], [0], [0], [1], [0, 0, 1, 1], [], []>} : vector<72x16xf32>, vector<16x16xf32>, vector<72x16xf32> -> vector<72x16xf32>
    %147 = arith.addf %144, %146 : vector<72x16xf32>
    %148 = vector.extract_strided_slice %139 {offsets = [48, 0], sizes = [16, 16], strides = [1, 1]} : vector<80x16xf32> to vector<16x16xf32>
    %cst_132 = arith.constant dense<0.000000e+00> : vector<72x16xf32>
    %149 = tpu.matmul %134, %148, %cst_132 {dimension_numbers = #tpu.dot_dimension_numbers<[1], [0], [0], [1], [0, 0, 1, 1], [], []>} : vector<72x16xf32>, vector<16x16xf32>, vector<72x16xf32> -> vector<72x16xf32>
    %150 = arith.addf %147, %149 : vector<72x16xf32>
    %151 = vector.extract_strided_slice %139 {offsets = [64, 0], sizes = [16, 16], strides = [1, 1]} : vector<80x16xf32> to vector<16x16xf32>
    %cst_133 = arith.constant dense<0.000000e+00> : vector<72x16xf32>
    %152 = tpu.matmul %137, %151, %cst_133 {dimension_numbers = #tpu.dot_dimension_numbers<[1], [0], [0], [1], [0, 0, 1, 1], [], []>} : vector<72x16xf32>, vector<16x16xf32>, vector<72x16xf32> -> vector<72x16xf32>
    %153 = arith.addf %150, %152 : vector<72x16xf32>
    %c1_134 = arith.constant 1 : index
    %c0_135 = arith.constant 0 : index
    %c0_136 = arith.constant 0 : index
    %154 = vector.load %arg13[%c1_134, %c0_135, %c0_136] : memref<4x1x16xf32, #tpu.memory_space<vmem>>, vector<1x1x16xf32>
    %155 = vector.shape_cast %154 : vector<1x1x16xf32> to vector<1x16xf32>
    %156 = vector.broadcast %155 : vector<1x16xf32> to vector<72x16xf32>
    %157 = arith.addf %153, %156 : vector<72x16xf32>
    %158 = arith.addf %157, %88 : vector<72x16xf32>
    %c1_137 = arith.constant 1 : index
    %c0_138 = arith.constant 0 : index
    %c0_139 = arith.constant 0 : index
    %159 = vector.load %arg14[%c1_137, %c0_138, %c0_139] : memref<4x1x16xf32, #tpu.memory_space<vmem>>, vector<1x1x16xf32>
    %160 = vector.shape_cast %159 : vector<1x1x16xf32> to vector<1x16xf32>
    %161 = vector.broadcast %160 : vector<1x16xf32> to vector<72x16xf32>
    %162 = arith.mulf %158, %161 : vector<72x16xf32>
    %c1_140 = arith.constant 1 : index
    %c0_141 = arith.constant 0 : index
    %c0_142 = arith.constant 0 : index
    %163 = vector.load %arg15[%c1_140, %c0_141, %c0_142] : memref<4x1x16xf32, #tpu.memory_space<vmem>>, vector<1x1x16xf32>
    %164 = vector.shape_cast %163 : vector<1x1x16xf32> to vector<1x16xf32>
    %165 = vector.broadcast %164 : vector<1x16xf32> to vector<72x16xf32>
    %166 = arith.addf %162, %165 : vector<72x16xf32>
    %c0_143 = arith.constant 0 : index
    %c0_144 = arith.constant 0 : index
    %167 = vector.load %arg37[%c0_143, %c0_144] : memref<96x16xf32, #tpu.memory_space<vmem>>, vector<72x16xf32>
    tpu.vector_store %arg37[%c0_143, %c0_144], %166 {strides = array<i32>} : memref<96x16xf32, #tpu.memory_space<vmem>>, vector<72x16xf32>,
    %c0_145 = arith.constant 0 : index
    %c0_146 = arith.constant 0 : index
    %168 = vector.load %arg37[%c0_145, %c0_146] : memref<96x16xf32, #tpu.memory_space<vmem>>, vector<64x16xf32>
    %c8_147 = arith.constant 8 : index
    %c0_148 = arith.constant 0 : index
    %169 = vector.load %arg37[%c8_147, %c0_148] : memref<96x16xf32, #tpu.memory_space<vmem>>, vector<64x16xf32>
    %c2 = arith.constant 2 : index
    %c0_149 = arith.constant 0 : index
    %c0_150 = arith.constant 0 : index
    %170 = vector.load %arg4[%c2, %c0_149, %c0_150] : memref<4x16x16xf32, #tpu.memory_space<vmem>>, vector<1x16x16xf32>
    %171 = vector.shape_cast %170 : vector<1x16x16xf32> to vector<16x16xf32>
    %cst_151 = arith.constant dense<0.000000e+00> : vector<64x16xf32>
    %172 = tpu.matmul %168, %171, %cst_151 {dimension_numbers = #tpu.dot_dimension_numbers<[1], [0], [0], [1], [0, 0, 1, 1], [], []>} : vector<64x16xf32>, vector<16x16xf32>, vector<64x16xf32> -> vector<64x16xf32>
    %c2_152 = arith.constant 2 : index
    %c0_153 = arith.constant 0 : index
    %c0_154 = arith.constant 0 : index
    %173 = vector.load %arg5[%c2_152, %c0_153, %c0_154] : memref<4x16x16xf32, #tpu.memory_space<vmem>>, vector<1x16x16xf32>
    %174 = vector.shape_cast %173 : vector<1x16x16xf32> to vector<16x16xf32>
    %cst_155 = arith.constant dense<0.000000e+00> : vector<64x16xf32>
    %175 = tpu.matmul %169, %174, %cst_155 {dimension_numbers = #tpu.dot_dimension_numbers<[1], [0], [0], [1], [0, 0, 1, 1], [], []>} : vector<64x16xf32>, vector<16x16xf32>, vector<64x16xf32> -> vector<64x16xf32>
    %176 = arith.addf %172, %175 : vector<64x16xf32>
    %c2_156 = arith.constant 2 : index
    %c0_157 = arith.constant 0 : index
    %c0_158 = arith.constant 0 : index
    %177 = vector.load %arg6[%c2_156, %c0_157, %c0_158] : memref<4x1x16xf32, #tpu.memory_space<vmem>>, vector<1x1x16xf32>
    %178 = vector.shape_cast %177 : vector<1x1x16xf32> to vector<1x16xf32>
    %179 = vector.broadcast %178 : vector<1x16xf32> to vector<64x16xf32>
    %180 = arith.addf %176, %179 : vector<64x16xf32>
    %c2_159 = arith.constant 2 : index
    %c0_160 = arith.constant 0 : index
    %c0_161 = arith.constant 0 : index
    %181 = vector.load %arg7[%c2_159, %c0_160, %c0_161] : memref<4x16x16xf32, #tpu.memory_space<vmem>>, vector<1x16x16xf32>
    %182 = vector.shape_cast %181 : vector<1x16x16xf32> to vector<16x16xf32>
    %cst_162 = arith.constant dense<0.000000e+00> : vector<64x16xf32>
    %183 = tpu.matmul %168, %182, %cst_162 {dimension_numbers = #tpu.dot_dimension_numbers<[1], [0], [0], [1], [0, 0, 1, 1], [], []>} : vector<64x16xf32>, vector<16x16xf32>, vector<64x16xf32> -> vector<64x16xf32>
    %c2_163 = arith.constant 2 : index
    %c0_164 = arith.constant 0 : index
    %c0_165 = arith.constant 0 : index
    %184 = vector.load %arg8[%c2_163, %c0_164, %c0_165] : memref<4x16x16xf32, #tpu.memory_space<vmem>>, vector<1x16x16xf32>
    %185 = vector.shape_cast %184 : vector<1x16x16xf32> to vector<16x16xf32>
    %cst_166 = arith.constant dense<0.000000e+00> : vector<64x16xf32>
    %186 = tpu.matmul %169, %185, %cst_166 {dimension_numbers = #tpu.dot_dimension_numbers<[1], [0], [0], [1], [0, 0, 1, 1], [], []>} : vector<64x16xf32>, vector<16x16xf32>, vector<64x16xf32> -> vector<64x16xf32>
    %187 = arith.addf %183, %186 : vector<64x16xf32>
    %c2_167 = arith.constant 2 : index
    %c0_168 = arith.constant 0 : index
    %c0_169 = arith.constant 0 : index
    %188 = vector.load %arg9[%c2_167, %c0_168, %c0_169] : memref<4x1x16xf32, #tpu.memory_space<vmem>>, vector<1x1x16xf32>
    %189 = vector.shape_cast %188 : vector<1x1x16xf32> to vector<1x16xf32>
    %190 = vector.broadcast %189 : vector<1x16xf32> to vector<64x16xf32>
    %191 = arith.addf %187, %190 : vector<64x16xf32>
    %192 = math.tanh %180 : vector<64x16xf32>
    %193 = arith.negf %191 : vector<64x16xf32>
    %194 = math.exp %193 : vector<64x16xf32>
    %cst_170 = arith.constant 1.000000e+00 : f32
    %195 = vector.broadcast %cst_170 : f32 to vector<64x16xf32>
    %196 = arith.addf %195, %194 : vector<64x16xf32>
    %197 = arith.divf %195, %196 : vector<64x16xf32>
    %198 = arith.mulf %192, %197 : vector<64x16xf32>
    %c2_171 = arith.constant 2 : index
    %c0_172 = arith.constant 0 : index
    %c0_173 = arith.constant 0 : index
    %199 = vector.load %arg10[%c2_171, %c0_172, %c0_173] : memref<4x16x32xf32, #tpu.memory_space<vmem>>, vector<1x16x32xf32>
    %200 = vector.shape_cast %199 : vector<1x16x32xf32> to vector<16x32xf32>
    %cst_174 = arith.constant dense<0.000000e+00> : vector<64x32xf32>
    %201 = tpu.matmul %198, %200, %cst_174 {dimension_numbers = #tpu.dot_dimension_numbers<[1], [0], [0], [1], [0, 0, 1, 1], [], []>} : vector<64x16xf32>, vector<16x32xf32>, vector<64x32xf32> -> vector<64x32xf32>
    %c2_175 = arith.constant 2 : index
    %c0_176 = arith.constant 0 : index
    %c0_177 = arith.constant 0 : index
    %202 = vector.load %arg11[%c2_175, %c0_176, %c0_177] : memref<4x1x32xf32, #tpu.memory_space<vmem>>, vector<1x1x32xf32>
    %203 = vector.shape_cast %202 : vector<1x1x32xf32> to vector<1x32xf32>
    %204 = vector.broadcast %203 : vector<1x32xf32> to vector<64x32xf32>
    %205 = arith.addf %201, %204 : vector<64x32xf32>
    %c8_178 = arith.constant 8 : index
    %c0_179 = arith.constant 0 : index
    %206 = vector.load %arg38[%c8_178, %c0_179] : memref<88x32xf32, #tpu.memory_space<vmem>>, vector<64x32xf32>
    %207 = arith.addf %205, %206 : vector<64x32xf32>
    %c0_180 = arith.constant 0 : index
    %c0_181 = arith.constant 0 : index
    %208 = vector.load %arg38[%c0_180, %c0_181] : memref<88x32xf32, #tpu.memory_space<vmem>>, vector<64x32xf32>
    tpu.vector_store %arg38[%c0_180, %c0_181], %207 {strides = array<i32>} : memref<88x32xf32, #tpu.memory_space<vmem>>, vector<64x32xf32>,
    %c0_182 = arith.constant 0 : index
    %c0_183 = arith.constant 0 : index
    %209 = vector.load %arg18[%c0_182, %c0_183] : memref<64x64xf32, #tpu.memory_space<vmem>>, vector<64x64xf32>
    %cst_184 = arith.constant dense<0.000000e+00> : vector<64x16xf32>
    %210 = tpu.matmul %209, %198, %cst_184 {dimension_numbers = #tpu.dot_dimension_numbers<[1], [0], [0], [1], [0, 0, 1, 1], [], []>} : vector<64x64xf32>, vector<64x16xf32>, vector<64x16xf32> -> vector<64x16xf32>
    %c0_185 = arith.constant 0 : index
    %c0_186 = arith.constant 0 : index
    %211 = vector.load %arg22[%c0_185, %c0_186] : memref<64x64xf32, #tpu.memory_space<vmem>>, vector<64x64xf32>
    %cst_187 = arith.constant dense<0.000000e+00> : vector<64x16xf32>
    %212 = tpu.matmul %211, %198, %cst_187 {dimension_numbers = #tpu.dot_dimension_numbers<[1], [0], [0], [1], [0, 0, 1, 1], [], []>} : vector<64x64xf32>, vector<64x16xf32>, vector<64x16xf32> -> vector<64x16xf32>
    %c0_188 = arith.constant 0 : index
    %c0_189 = arith.constant 0 : index
    %c0_190 = arith.constant 0 : index
    %213 = vector.load %arg26[%c0_188, %c0_189, %c0_190] : memref<1x64x64xf32, #tpu.memory_space<vmem>>, vector<1x64x64xf32>
    %214 = vector.shape_cast %213 : vector<1x64x64xf32> to vector<64x64xf32>
    %cst_191 = arith.constant dense<0.000000e+00> : vector<64x16xf32>
    %215 = tpu.matmul %214, %198, %cst_191 {dimension_numbers = #tpu.dot_dimension_numbers<[1], [0], [0], [1], [0, 0, 1, 1], [], []>} : vector<64x64xf32>, vector<64x16xf32>, vector<64x16xf32> -> vector<64x16xf32>
    %c0_192 = arith.constant 0 : index
    %c0_193 = arith.constant 0 : index
    %c0_194 = arith.constant 0 : index
    %216 = vector.load %arg30[%c0_192, %c0_193, %c0_194] : memref<1x64x64xf32, #tpu.memory_space<vmem>>, vector<1x64x64xf32>
    %217 = vector.shape_cast %216 : vector<1x64x64xf32> to vector<64x64xf32>
    %cst_195 = arith.constant dense<0.000000e+00> : vector<64x16xf32>
    %218 = tpu.matmul %217, %198, %cst_195 {dimension_numbers = #tpu.dot_dimension_numbers<[1], [0], [0], [1], [0, 0, 1, 1], [], []>} : vector<64x64xf32>, vector<64x16xf32>, vector<64x16xf32> -> vector<64x16xf32>
    %c2_196 = arith.constant 2 : index
    %c0_197 = arith.constant 0 : index
    %c0_198 = arith.constant 0 : index
    %219 = vector.load %arg12[%c2_196, %c0_197, %c0_198] : memref<4x80x16xf32, #tpu.memory_space<vmem>>, vector<1x80x16xf32>
    %220 = vector.shape_cast %219 : vector<1x80x16xf32> to vector<80x16xf32>
    %221 = vector.extract_strided_slice %220 {offsets = [0, 0], sizes = [16, 16], strides = [1, 1]} : vector<80x16xf32> to vector<16x16xf32>
    %cst_199 = arith.constant dense<0.000000e+00> : vector<64x16xf32>
    %222 = tpu.matmul %198, %221, %cst_199 {dimension_numbers = #tpu.dot_dimension_numbers<[1], [0], [0], [1], [0, 0, 1, 1], [], []>} : vector<64x16xf32>, vector<16x16xf32>, vector<64x16xf32> -> vector<64x16xf32>
    %223 = vector.extract_strided_slice %220 {offsets = [16, 0], sizes = [16, 16], strides = [1, 1]} : vector<80x16xf32> to vector<16x16xf32>
    %cst_200 = arith.constant dense<0.000000e+00> : vector<64x16xf32>
    %224 = tpu.matmul %210, %223, %cst_200 {dimension_numbers = #tpu.dot_dimension_numbers<[1], [0], [0], [1], [0, 0, 1, 1], [], []>} : vector<64x16xf32>, vector<16x16xf32>, vector<64x16xf32> -> vector<64x16xf32>
    %225 = arith.addf %222, %224 : vector<64x16xf32>
    %226 = vector.extract_strided_slice %220 {offsets = [32, 0], sizes = [16, 16], strides = [1, 1]} : vector<80x16xf32> to vector<16x16xf32>
    %cst_201 = arith.constant dense<0.000000e+00> : vector<64x16xf32>
    %227 = tpu.matmul %212, %226, %cst_201 {dimension_numbers = #tpu.dot_dimension_numbers<[1], [0], [0], [1], [0, 0, 1, 1], [], []>} : vector<64x16xf32>, vector<16x16xf32>, vector<64x16xf32> -> vector<64x16xf32>
    %228 = arith.addf %225, %227 : vector<64x16xf32>
    %229 = vector.extract_strided_slice %220 {offsets = [48, 0], sizes = [16, 16], strides = [1, 1]} : vector<80x16xf32> to vector<16x16xf32>
    %cst_202 = arith.constant dense<0.000000e+00> : vector<64x16xf32>
    %230 = tpu.matmul %215, %229, %cst_202 {dimension_numbers = #tpu.dot_dimension_numbers<[1], [0], [0], [1], [0, 0, 1, 1], [], []>} : vector<64x16xf32>, vector<16x16xf32>, vector<64x16xf32> -> vector<64x16xf32>
    %231 = arith.addf %228, %230 : vector<64x16xf32>
    %232 = vector.extract_strided_slice %220 {offsets = [64, 0], sizes = [16, 16], strides = [1, 1]} : vector<80x16xf32> to vector<16x16xf32>
    %cst_203 = arith.constant dense<0.000000e+00> : vector<64x16xf32>
    %233 = tpu.matmul %218, %232, %cst_203 {dimension_numbers = #tpu.dot_dimension_numbers<[1], [0], [0], [1], [0, 0, 1, 1], [], []>} : vector<64x16xf32>, vector<16x16xf32>, vector<64x16xf32> -> vector<64x16xf32>
    %234 = arith.addf %231, %233 : vector<64x16xf32>
    %c2_204 = arith.constant 2 : index
    %c0_205 = arith.constant 0 : index
    %c0_206 = arith.constant 0 : index
    %235 = vector.load %arg13[%c2_204, %c0_205, %c0_206] : memref<4x1x16xf32, #tpu.memory_space<vmem>>, vector<1x1x16xf32>
    %236 = vector.shape_cast %235 : vector<1x1x16xf32> to vector<1x16xf32>
    %237 = vector.broadcast %236 : vector<1x16xf32> to vector<64x16xf32>
    %238 = arith.addf %234, %237 : vector<64x16xf32>
    %239 = arith.addf %238, %169 : vector<64x16xf32>
    %c2_207 = arith.constant 2 : index
    %c0_208 = arith.constant 0 : index
    %c0_209 = arith.constant 0 : index
    %240 = vector.load %arg14[%c2_207, %c0_208, %c0_209] : memref<4x1x16xf32, #tpu.memory_space<vmem>>, vector<1x1x16xf32>
    %241 = vector.shape_cast %240 : vector<1x1x16xf32> to vector<1x16xf32>
    %242 = vector.broadcast %241 : vector<1x16xf32> to vector<64x16xf32>
    %243 = arith.mulf %239, %242 : vector<64x16xf32>
    %c2_210 = arith.constant 2 : index
    %c0_211 = arith.constant 0 : index
    %c0_212 = arith.constant 0 : index
    %244 = vector.load %arg15[%c2_210, %c0_211, %c0_212] : memref<4x1x16xf32, #tpu.memory_space<vmem>>, vector<1x1x16xf32>
    %245 = vector.shape_cast %244 : vector<1x1x16xf32> to vector<1x16xf32>
    %246 = vector.broadcast %245 : vector<1x16xf32> to vector<64x16xf32>
    %247 = arith.addf %243, %246 : vector<64x16xf32>
    %c0_213 = arith.constant 0 : index
    %c0_214 = arith.constant 0 : index
    %248 = vector.load %arg37[%c0_213, %c0_214] : memref<96x16xf32, #tpu.memory_space<vmem>>, vector<64x16xf32>
    tpu.vector_store %arg37[%c0_213, %c0_214], %247 {strides = array<i32>} : memref<96x16xf32, #tpu.memory_space<vmem>>, vector<64x16xf32>,
    %c0_215 = arith.constant 0 : index
    %c0_216 = arith.constant 0 : index
    %249 = vector.load %arg37[%c0_215, %c0_216] : memref<96x16xf32, #tpu.memory_space<vmem>>, vector<48x16xf32>
    %c16_217 = arith.constant 16 : index
    %c0_218 = arith.constant 0 : index
    %250 = vector.load %arg37[%c16_217, %c0_218] : memref<96x16xf32, #tpu.memory_space<vmem>>, vector<48x16xf32>
    %c3 = arith.constant 3 : index
    %c0_219 = arith.constant 0 : index
    %c0_220 = arith.constant 0 : index
    %251 = vector.load %arg4[%c3, %c0_219, %c0_220] : memref<4x16x16xf32, #tpu.memory_space<vmem>>, vector<1x16x16xf32>
    %252 = vector.shape_cast %251 : vector<1x16x16xf32> to vector<16x16xf32>
    %cst_221 = arith.constant dense<0.000000e+00> : vector<48x16xf32>
    %253 = tpu.matmul %249, %252, %cst_221 {dimension_numbers = #tpu.dot_dimension_numbers<[1], [0], [0], [1], [0, 0, 1, 1], [], []>} : vector<48x16xf32>, vector<16x16xf32>, vector<48x16xf32> -> vector<48x16xf32>
    %c3_222 = arith.constant 3 : index
    %c0_223 = arith.constant 0 : index
    %c0_224 = arith.constant 0 : index
    %254 = vector.load %arg5[%c3_222, %c0_223, %c0_224] : memref<4x16x16xf32, #tpu.memory_space<vmem>>, vector<1x16x16xf32>
    %255 = vector.shape_cast %254 : vector<1x16x16xf32> to vector<16x16xf32>
    %cst_225 = arith.constant dense<0.000000e+00> : vector<48x16xf32>
    %256 = tpu.matmul %250, %255, %cst_225 {dimension_numbers = #tpu.dot_dimension_numbers<[1], [0], [0], [1], [0, 0, 1, 1], [], []>} : vector<48x16xf32>, vector<16x16xf32>, vector<48x16xf32> -> vector<48x16xf32>
    %257 = arith.addf %253, %256 : vector<48x16xf32>
    %c3_226 = arith.constant 3 : index
    %c0_227 = arith.constant 0 : index
    %c0_228 = arith.constant 0 : index
    %258 = vector.load %arg6[%c3_226, %c0_227, %c0_228] : memref<4x1x16xf32, #tpu.memory_space<vmem>>, vector<1x1x16xf32>
    %259 = vector.shape_cast %258 : vector<1x1x16xf32> to vector<1x16xf32>
    %260 = vector.broadcast %259 : vector<1x16xf32> to vector<48x16xf32>
    %261 = arith.addf %257, %260 : vector<48x16xf32>
    %c3_229 = arith.constant 3 : index
    %c0_230 = arith.constant 0 : index
    %c0_231 = arith.constant 0 : index
    %262 = vector.load %arg7[%c3_229, %c0_230, %c0_231] : memref<4x16x16xf32, #tpu.memory_space<vmem>>, vector<1x16x16xf32>
    %263 = vector.shape_cast %262 : vector<1x16x16xf32> to vector<16x16xf32>
    %cst_232 = arith.constant dense<0.000000e+00> : vector<48x16xf32>
    %264 = tpu.matmul %249, %263, %cst_232 {dimension_numbers = #tpu.dot_dimension_numbers<[1], [0], [0], [1], [0, 0, 1, 1], [], []>} : vector<48x16xf32>, vector<16x16xf32>, vector<48x16xf32> -> vector<48x16xf32>
    %c3_233 = arith.constant 3 : index
    %c0_234 = arith.constant 0 : index
    %c0_235 = arith.constant 0 : index
    %265 = vector.load %arg8[%c3_233, %c0_234, %c0_235] : memref<4x16x16xf32, #tpu.memory_space<vmem>>, vector<1x16x16xf32>
    %266 = vector.shape_cast %265 : vector<1x16x16xf32> to vector<16x16xf32>
    %cst_236 = arith.constant dense<0.000000e+00> : vector<48x16xf32>
    %267 = tpu.matmul %250, %266, %cst_236 {dimension_numbers = #tpu.dot_dimension_numbers<[1], [0], [0], [1], [0, 0, 1, 1], [], []>} : vector<48x16xf32>, vector<16x16xf32>, vector<48x16xf32> -> vector<48x16xf32>
    %268 = arith.addf %264, %267 : vector<48x16xf32>
    %c3_237 = arith.constant 3 : index
    %c0_238 = arith.constant 0 : index
    %c0_239 = arith.constant 0 : index
    %269 = vector.load %arg9[%c3_237, %c0_238, %c0_239] : memref<4x1x16xf32, #tpu.memory_space<vmem>>, vector<1x1x16xf32>
    %270 = vector.shape_cast %269 : vector<1x1x16xf32> to vector<1x16xf32>
    %271 = vector.broadcast %270 : vector<1x16xf32> to vector<48x16xf32>
    %272 = arith.addf %268, %271 : vector<48x16xf32>
    %273 = math.tanh %261 : vector<48x16xf32>
    %274 = arith.negf %272 : vector<48x16xf32>
    %275 = math.exp %274 : vector<48x16xf32>
    %cst_240 = arith.constant 1.000000e+00 : f32
    %276 = vector.broadcast %cst_240 : f32 to vector<48x16xf32>
    %277 = arith.addf %276, %275 : vector<48x16xf32>
    %278 = arith.divf %276, %277 : vector<48x16xf32>
    %279 = arith.mulf %273, %278 : vector<48x16xf32>
    %c3_241 = arith.constant 3 : index
    %c0_242 = arith.constant 0 : index
    %c0_243 = arith.constant 0 : index
    %280 = vector.load %arg10[%c3_241, %c0_242, %c0_243] : memref<4x16x32xf32, #tpu.memory_space<vmem>>, vector<1x16x32xf32>
    %281 = vector.shape_cast %280 : vector<1x16x32xf32> to vector<16x32xf32>
    %cst_244 = arith.constant dense<0.000000e+00> : vector<48x32xf32>
    %282 = tpu.matmul %279, %281, %cst_244 {dimension_numbers = #tpu.dot_dimension_numbers<[1], [0], [0], [1], [0, 0, 1, 1], [], []>} : vector<48x16xf32>, vector<16x32xf32>, vector<48x32xf32> -> vector<48x32xf32>
    %c3_245 = arith.constant 3 : index
    %c0_246 = arith.constant 0 : index
    %c0_247 = arith.constant 0 : index
    %283 = vector.load %arg11[%c3_245, %c0_246, %c0_247] : memref<4x1x32xf32, #tpu.memory_space<vmem>>, vector<1x1x32xf32>
    %284 = vector.shape_cast %283 : vector<1x1x32xf32> to vector<1x32xf32>
    %285 = vector.broadcast %284 : vector<1x32xf32> to vector<48x32xf32>
    %286 = arith.addf %282, %285 : vector<48x32xf32>
    %c16_248 = arith.constant 16 : index
    %c0_249 = arith.constant 0 : index
    %287 = vector.load %arg38[%c16_248, %c0_249] : memref<88x32xf32, #tpu.memory_space<vmem>>, vector<48x32xf32>
    %288 = arith.addf %286, %287 : vector<48x32xf32>
    %c0_250 = arith.constant 0 : index
    %c0_251 = arith.constant 0 : index
    %289 = vector.load %arg38[%c0_250, %c0_251] : memref<88x32xf32, #tpu.memory_space<vmem>>, vector<48x32xf32>
    tpu.vector_store %arg38[%c0_250, %c0_251], %288 {strides = array<i32>} : memref<88x32xf32, #tpu.memory_space<vmem>>, vector<48x32xf32>,
    %c0_252 = arith.constant 0 : index
    %c0_253 = arith.constant 0 : index
    %290 = vector.load %arg19[%c0_252, %c0_253] : memref<48x48xf32, #tpu.memory_space<vmem>>, vector<48x48xf32>
    %cst_254 = arith.constant dense<0.000000e+00> : vector<48x16xf32>
    %291 = tpu.matmul %290, %279, %cst_254 {dimension_numbers = #tpu.dot_dimension_numbers<[1], [0], [0], [1], [0, 0, 1, 1], [], []>} : vector<48x48xf32>, vector<48x16xf32>, vector<48x16xf32> -> vector<48x16xf32>
    %c0_255 = arith.constant 0 : index
    %c0_256 = arith.constant 0 : index
    %292 = vector.load %arg23[%c0_255, %c0_256] : memref<48x48xf32, #tpu.memory_space<vmem>>, vector<48x48xf32>
    %cst_257 = arith.constant dense<0.000000e+00> : vector<48x16xf32>
    %293 = tpu.matmul %292, %279, %cst_257 {dimension_numbers = #tpu.dot_dimension_numbers<[1], [0], [0], [1], [0, 0, 1, 1], [], []>} : vector<48x48xf32>, vector<48x16xf32>, vector<48x16xf32> -> vector<48x16xf32>
    %c0_258 = arith.constant 0 : index
    %c0_259 = arith.constant 0 : index
    %c0_260 = arith.constant 0 : index
    %294 = vector.load %arg27[%c0_258, %c0_259, %c0_260] : memref<1x48x48xf32, #tpu.memory_space<vmem>>, vector<1x48x48xf32>
    %295 = vector.shape_cast %294 : vector<1x48x48xf32> to vector<48x48xf32>
    %cst_261 = arith.constant dense<0.000000e+00> : vector<48x16xf32>
    %296 = tpu.matmul %295, %279, %cst_261 {dimension_numbers = #tpu.dot_dimension_numbers<[1], [0], [0], [1], [0, 0, 1, 1], [], []>} : vector<48x48xf32>, vector<48x16xf32>, vector<48x16xf32> -> vector<48x16xf32>
    %c0_262 = arith.constant 0 : index
    %c0_263 = arith.constant 0 : index
    %c0_264 = arith.constant 0 : index
    %297 = vector.load %arg31[%c0_262, %c0_263, %c0_264] : memref<1x48x48xf32, #tpu.memory_space<vmem>>, vector<1x48x48xf32>
    %298 = vector.shape_cast %297 : vector<1x48x48xf32> to vector<48x48xf32>
    %cst_265 = arith.constant dense<0.000000e+00> : vector<48x16xf32>
    %299 = tpu.matmul %298, %279, %cst_265 {dimension_numbers = #tpu.dot_dimension_numbers<[1], [0], [0], [1], [0, 0, 1, 1], [], []>} : vector<48x48xf32>, vector<48x16xf32>, vector<48x16xf32> -> vector<48x16xf32>
    %c3_266 = arith.constant 3 : index
    %c0_267 = arith.constant 0 : index
    %c0_268 = arith.constant 0 : index
    %300 = vector.load %arg12[%c3_266, %c0_267, %c0_268] : memref<4x80x16xf32, #tpu.memory_space<vmem>>, vector<1x80x16xf32>
    %301 = vector.shape_cast %300 : vector<1x80x16xf32> to vector<80x16xf32>
    %302 = vector.extract_strided_slice %301 {offsets = [0, 0], sizes = [16, 16], strides = [1, 1]} : vector<80x16xf32> to vector<16x16xf32>
    %cst_269 = arith.constant dense<0.000000e+00> : vector<48x16xf32>
    %303 = tpu.matmul %279, %302, %cst_269 {dimension_numbers = #tpu.dot_dimension_numbers<[1], [0], [0], [1], [0, 0, 1, 1], [], []>} : vector<48x16xf32>, vector<16x16xf32>, vector<48x16xf32> -> vector<48x16xf32>
    %304 = vector.extract_strided_slice %301 {offsets = [16, 0], sizes = [16, 16], strides = [1, 1]} : vector<80x16xf32> to vector<16x16xf32>
    %cst_270 = arith.constant dense<0.000000e+00> : vector<48x16xf32>
    %305 = tpu.matmul %291, %304, %cst_270 {dimension_numbers = #tpu.dot_dimension_numbers<[1], [0], [0], [1], [0, 0, 1, 1], [], []>} : vector<48x16xf32>, vector<16x16xf32>, vector<48x16xf32> -> vector<48x16xf32>
    %306 = arith.addf %303, %305 : vector<48x16xf32>
    %307 = vector.extract_strided_slice %301 {offsets = [32, 0], sizes = [16, 16], strides = [1, 1]} : vector<80x16xf32> to vector<16x16xf32>
    %cst_271 = arith.constant dense<0.000000e+00> : vector<48x16xf32>
    %308 = tpu.matmul %293, %307, %cst_271 {dimension_numbers = #tpu.dot_dimension_numbers<[1], [0], [0], [1], [0, 0, 1, 1], [], []>} : vector<48x16xf32>, vector<16x16xf32>, vector<48x16xf32> -> vector<48x16xf32>
    %309 = arith.addf %306, %308 : vector<48x16xf32>
    %310 = vector.extract_strided_slice %301 {offsets = [48, 0], sizes = [16, 16], strides = [1, 1]} : vector<80x16xf32> to vector<16x16xf32>
    %cst_272 = arith.constant dense<0.000000e+00> : vector<48x16xf32>
    %311 = tpu.matmul %296, %310, %cst_272 {dimension_numbers = #tpu.dot_dimension_numbers<[1], [0], [0], [1], [0, 0, 1, 1], [], []>} : vector<48x16xf32>, vector<16x16xf32>, vector<48x16xf32> -> vector<48x16xf32>
    %312 = arith.addf %309, %311 : vector<48x16xf32>
    %313 = vector.extract_strided_slice %301 {offsets = [64, 0], sizes = [16, 16], strides = [1, 1]} : vector<80x16xf32> to vector<16x16xf32>
    %cst_273 = arith.constant dense<0.000000e+00> : vector<48x16xf32>
    %314 = tpu.matmul %299, %313, %cst_273 {dimension_numbers = #tpu.dot_dimension_numbers<[1], [0], [0], [1], [0, 0, 1, 1], [], []>} : vector<48x16xf32>, vector<16x16xf32>, vector<48x16xf32> -> vector<48x16xf32>
    %315 = arith.addf %312, %314 : vector<48x16xf32>
    %c3_274 = arith.constant 3 : index
    %c0_275 = arith.constant 0 : index
    %c0_276 = arith.constant 0 : index
    %316 = vector.load %arg13[%c3_274, %c0_275, %c0_276] : memref<4x1x16xf32, #tpu.memory_space<vmem>>, vector<1x1x16xf32>
    %317 = vector.shape_cast %316 : vector<1x1x16xf32> to vector<1x16xf32>
    %318 = vector.broadcast %317 : vector<1x16xf32> to vector<48x16xf32>
    %319 = arith.addf %315, %318 : vector<48x16xf32>
    %320 = arith.addf %319, %250 : vector<48x16xf32>
    %c3_277 = arith.constant 3 : index
    %c0_278 = arith.constant 0 : index
    %c0_279 = arith.constant 0 : index
    %321 = vector.load %arg14[%c3_277, %c0_278, %c0_279] : memref<4x1x16xf32, #tpu.memory_space<vmem>>, vector<1x1x16xf32>
    %322 = vector.shape_cast %321 : vector<1x1x16xf32> to vector<1x16xf32>
    %323 = vector.broadcast %322 : vector<1x16xf32> to vector<48x16xf32>
    %324 = arith.mulf %320, %323 : vector<48x16xf32>
    %c3_280 = arith.constant 3 : index
    %c0_281 = arith.constant 0 : index
    %c0_282 = arith.constant 0 : index
    %325 = vector.load %arg15[%c3_280, %c0_281, %c0_282] : memref<4x1x16xf32, #tpu.memory_space<vmem>>, vector<1x1x16xf32>
    %326 = vector.shape_cast %325 : vector<1x1x16xf32> to vector<1x16xf32>
    %327 = vector.broadcast %326 : vector<1x16xf32> to vector<48x16xf32>
    %328 = arith.addf %324, %327 : vector<48x16xf32>
    %c0_283 = arith.constant 0 : index
    %c0_284 = arith.constant 0 : index
    %329 = vector.load %arg37[%c0_283, %c0_284] : memref<96x16xf32, #tpu.memory_space<vmem>>, vector<48x16xf32>
    tpu.vector_store %arg37[%c0_283, %c0_284], %328 {strides = array<i32>} : memref<96x16xf32, #tpu.memory_space<vmem>>, vector<48x16xf32>,
    %c0_285 = arith.constant 0 : index
    %c0_286 = arith.constant 0 : index
    %330 = vector.load %arg38[%c0_285, %c0_286] : memref<88x32xf32, #tpu.memory_space<vmem>>, vector<48x32xf32>
    %cst_287 = arith.constant 0.000000e+00 : f32
    %331 = vector.broadcast %cst_287 : f32 to vector<48x32xf32>
    %332 = arith.maximumf %330, %331 : vector<48x32xf32>
    %c0_288 = arith.constant 0 : index
    %c0_289 = arith.constant 0 : index
    %333 = vector.load %arg32[%c0_288, %c0_289] : memref<32x32xf32, #tpu.memory_space<vmem>>, vector<32x32xf32>
    %cst_290 = arith.constant dense<0.000000e+00> : vector<48x32xf32>
    %334 = tpu.matmul %332, %333, %cst_290 {dimension_numbers = #tpu.dot_dimension_numbers<[1], [0], [0], [1], [0, 0, 1, 1], [], []>} : vector<48x32xf32>, vector<32x32xf32>, vector<48x32xf32> -> vector<48x32xf32>
    %c0_291 = arith.constant 0 : index
    %c0_292 = arith.constant 0 : index
    %335 = vector.load %arg33[%c0_291, %c0_292] : memref<1x32xf32, #tpu.memory_space<vmem>>, vector<1x32xf32>
    %336 = vector.broadcast %335 : vector<1x32xf32> to vector<48x32xf32>
    %337 = arith.addf %334, %336 : vector<48x32xf32>
    %cst_293 = arith.constant 0.000000e+00 : f32
    %338 = vector.broadcast %cst_293 : f32 to vector<48x32xf32>
    %339 = arith.maximumf %337, %338 : vector<48x32xf32>
    %c0_294 = arith.constant 0 : index
    %c0_295 = arith.constant 0 : index
    %340 = vector.load %arg34[%c0_294, %c0_295] : memref<32x12xf32, #tpu.memory_space<vmem>>, vector<32x12xf32>
    %cst_296 = arith.constant dense<0.000000e+00> : vector<48x12xf32>
    %341 = tpu.matmul %339, %340, %cst_296 {dimension_numbers = #tpu.dot_dimension_numbers<[1], [0], [0], [1], [0, 0, 1, 1], [], []>} : vector<48x32xf32>, vector<32x12xf32>, vector<48x12xf32> -> vector<48x12xf32>
    %c0_297 = arith.constant 0 : index
    %c0_298 = arith.constant 0 : index
    %342 = vector.load %arg35[%c0_297, %c0_298] : memref<1x12xf32, #tpu.memory_space<vmem>>, vector<1x12xf32>
    %343 = vector.broadcast %342 : vector<1x12xf32> to vector<48x12xf32>
    %344 = arith.addf %341, %343 : vector<48x12xf32>
    %c0_299 = arith.constant 0 : index
    %c0_300 = arith.constant 0 : index
    %c0_301 = arith.constant 0 : index
    %345 = vector.load %arg36[%c0_299, %c0_300, %c0_301] : memref<1x48x12xf32, #tpu.memory_space<vmem>>, vector<1x48x12xf32>
    %346 = vector.shape_cast %345 : vector<1x48x12xf32> to vector<48x12xf32>
    %347 = vector.shape_cast %344 : vector<48x12xf32> to vector<1x48x12xf32>
    tpu.vector_store %arg36[%c0_299, %c0_300, %c0_301], %347 {strides = array<i32>} : memref<1x48x12xf32, #tpu.memory_space<vmem>>, vector<1x48x12xf32>,
    return
  }
  func.func @transform_0(%arg0: i32) -> (i32, i32, i32) {
    %c0_i32 = arith.constant 0 : i32
    %c0_i32_0 = arith.constant 0 : i32
    %c0_i32_1 = arith.constant 0 : i32
    return %arg0, %c0_i32, %c0_i32_0 : i32, i32, i32
  }
  func.func @transform_1(%arg0: i32) -> (i32, i32) {
    %c0_i32 = arith.constant 0 : i32
    %c0_i32_0 = arith.constant 0 : i32
    %c0_i32_1 = arith.constant 0 : i32
    return %c0_i32, %c0_i32_0 : i32, i32
  }
  func.func @transform_2(%arg0: i32) -> (i32, i32) {
    %c0_i32 = arith.constant 0 : i32
    %c0_i32_0 = arith.constant 0 : i32
    %c0_i32_1 = arith.constant 0 : i32
    return %c0_i32, %c0_i32_0 : i32, i32
  }
  func.func @transform_3(%arg0: i32) -> (i32, i32, i32) {
    %c0_i32 = arith.constant 0 : i32
    %c0_i32_0 = arith.constant 0 : i32
    %c0_i32_1 = arith.constant 0 : i32
    %c0_i32_2 = arith.constant 0 : i32
    return %c0_i32, %c0_i32_0, %c0_i32_1 : i32, i32, i32
  }
  func.func @transform_4(%arg0: i32) -> (i32, i32, i32) {
    %c0_i32 = arith.constant 0 : i32
    %c0_i32_0 = arith.constant 0 : i32
    %c0_i32_1 = arith.constant 0 : i32
    %c0_i32_2 = arith.constant 0 : i32
    return %c0_i32, %c0_i32_0, %c0_i32_1 : i32, i32, i32
  }
  func.func @transform_5(%arg0: i32) -> (i32, i32, i32) {
    %c0_i32 = arith.constant 0 : i32
    %c0_i32_0 = arith.constant 0 : i32
    %c0_i32_1 = arith.constant 0 : i32
    %c0_i32_2 = arith.constant 0 : i32
    return %c0_i32, %c0_i32_0, %c0_i32_1 : i32, i32, i32
  }
  func.func @transform_6(%arg0: i32) -> (i32, i32, i32) {
    %c0_i32 = arith.constant 0 : i32
    %c0_i32_0 = arith.constant 0 : i32
    %c0_i32_1 = arith.constant 0 : i32
    %c0_i32_2 = arith.constant 0 : i32
    return %c0_i32, %c0_i32_0, %c0_i32_1 : i32, i32, i32
  }
  func.func @transform_7(%arg0: i32) -> (i32, i32, i32) {
    %c0_i32 = arith.constant 0 : i32
    %c0_i32_0 = arith.constant 0 : i32
    %c0_i32_1 = arith.constant 0 : i32
    %c0_i32_2 = arith.constant 0 : i32
    return %c0_i32, %c0_i32_0, %c0_i32_1 : i32, i32, i32
  }
  func.func @transform_8(%arg0: i32) -> (i32, i32, i32) {
    %c0_i32 = arith.constant 0 : i32
    %c0_i32_0 = arith.constant 0 : i32
    %c0_i32_1 = arith.constant 0 : i32
    %c0_i32_2 = arith.constant 0 : i32
    return %c0_i32, %c0_i32_0, %c0_i32_1 : i32, i32, i32
  }
  func.func @transform_9(%arg0: i32) -> (i32, i32, i32) {
    %c0_i32 = arith.constant 0 : i32
    %c0_i32_0 = arith.constant 0 : i32
    %c0_i32_1 = arith.constant 0 : i32
    %c0_i32_2 = arith.constant 0 : i32
    return %c0_i32, %c0_i32_0, %c0_i32_1 : i32, i32, i32
  }
  func.func @transform_10(%arg0: i32) -> (i32, i32, i32) {
    %c0_i32 = arith.constant 0 : i32
    %c0_i32_0 = arith.constant 0 : i32
    %c0_i32_1 = arith.constant 0 : i32
    %c0_i32_2 = arith.constant 0 : i32
    return %c0_i32, %c0_i32_0, %c0_i32_1 : i32, i32, i32
  }
  func.func @transform_11(%arg0: i32) -> (i32, i32, i32) {
    %c0_i32 = arith.constant 0 : i32
    %c0_i32_0 = arith.constant 0 : i32
    %c0_i32_1 = arith.constant 0 : i32
    %c0_i32_2 = arith.constant 0 : i32
    return %c0_i32, %c0_i32_0, %c0_i32_1 : i32, i32, i32
  }
  func.func @transform_12(%arg0: i32) -> (i32, i32, i32) {
    %c0_i32 = arith.constant 0 : i32
    %c0_i32_0 = arith.constant 0 : i32
    %c0_i32_1 = arith.constant 0 : i32
    %c0_i32_2 = arith.constant 0 : i32
    return %c0_i32, %c0_i32_0, %c0_i32_1 : i32, i32, i32
  }
  func.func @transform_13(%arg0: i32) -> (i32, i32, i32) {
    %c0_i32 = arith.constant 0 : i32
    %c0_i32_0 = arith.constant 0 : i32
    %c0_i32_1 = arith.constant 0 : i32
    %c0_i32_2 = arith.constant 0 : i32
    return %c0_i32, %c0_i32_0, %c0_i32_1 : i32, i32, i32
  }
  func.func @transform_14(%arg0: i32) -> (i32, i32, i32) {
    %c0_i32 = arith.constant 0 : i32
    %c0_i32_0 = arith.constant 0 : i32
    %c0_i32_1 = arith.constant 0 : i32
    %c0_i32_2 = arith.constant 0 : i32
    return %c0_i32, %c0_i32_0, %c0_i32_1 : i32, i32, i32
  }
  func.func @transform_15(%arg0: i32) -> (i32, i32) {
    %c0_i32 = arith.constant 0 : i32
    %c0_i32_0 = arith.constant 0 : i32
    %c0_i32_1 = arith.constant 0 : i32
    return %c0_i32, %c0_i32_0 : i32, i32
  }
  func.func @transform_16(%arg0: i32) -> (i32, i32) {
    %c0_i32 = arith.constant 0 : i32
    %c0_i32_0 = arith.constant 0 : i32
    %c0_i32_1 = arith.constant 0 : i32
    return %c0_i32, %c0_i32_0 : i32, i32
  }
  func.func @transform_17(%arg0: i32) -> (i32, i32) {
    %c0_i32 = arith.constant 0 : i32
    %c0_i32_0 = arith.constant 0 : i32
    %c0_i32_1 = arith.constant 0 : i32
    return %c0_i32, %c0_i32_0 : i32, i32
  }
  func.func @transform_18(%arg0: i32) -> (i32, i32) {
    %c0_i32 = arith.constant 0 : i32
    %c0_i32_0 = arith.constant 0 : i32
    %c0_i32_1 = arith.constant 0 : i32
    return %c0_i32, %c0_i32_0 : i32, i32
  }
  func.func @transform_19(%arg0: i32) -> (i32, i32) {
    %c0_i32 = arith.constant 0 : i32
    %c0_i32_0 = arith.constant 0 : i32
    %c0_i32_1 = arith.constant 0 : i32
    return %c0_i32, %c0_i32_0 : i32, i32
  }
  func.func @transform_20(%arg0: i32) -> (i32, i32) {
    %c0_i32 = arith.constant 0 : i32
    %c0_i32_0 = arith.constant 0 : i32
    %c0_i32_1 = arith.constant 0 : i32
    return %c0_i32, %c0_i32_0 : i32, i32
  }
  func.func @transform_21(%arg0: i32) -> (i32, i32) {
    %c0_i32 = arith.constant 0 : i32
    %c0_i32_0 = arith.constant 0 : i32
    %c0_i32_1 = arith.constant 0 : i32
    return %c0_i32, %c0_i32_0 : i32, i32
  }
  func.func @transform_22(%arg0: i32) -> (i32, i32) {
    %c0_i32 = arith.constant 0 : i32
    %c0_i32_0 = arith.constant 0 : i32
    %c0_i32_1 = arith.constant 0 : i32
    return %c0_i32, %c0_i32_0 : i32, i32
  }
  func.func @transform_23(%arg0: i32) -> (i32, i32, i32) {
    %c0_i32 = arith.constant 0 : i32
    %c0_i32_0 = arith.constant 0 : i32
    %c0_i32_1 = arith.constant 0 : i32
    return %arg0, %c0_i32, %c0_i32_0 : i32, i32, i32
  }
  func.func @transform_24(%arg0: i32) -> (i32, i32, i32) {
    %c0_i32 = arith.constant 0 : i32
    %c0_i32_0 = arith.constant 0 : i32
    %c0_i32_1 = arith.constant 0 : i32
    return %arg0, %c0_i32, %c0_i32_0 : i32, i32, i32
  }
  func.func @transform_25(%arg0: i32) -> (i32, i32, i32) {
    %c0_i32 = arith.constant 0 : i32
    %c0_i32_0 = arith.constant 0 : i32
    %c0_i32_1 = arith.constant 0 : i32
    return %arg0, %c0_i32, %c0_i32_0 : i32, i32, i32
  }
  func.func @transform_26(%arg0: i32) -> (i32, i32, i32) {
    %c0_i32 = arith.constant 0 : i32
    %c0_i32_0 = arith.constant 0 : i32
    %c0_i32_1 = arith.constant 0 : i32
    return %arg0, %c0_i32, %c0_i32_0 : i32, i32, i32
  }
  func.func @transform_27(%arg0: i32) -> (i32, i32, i32) {
    %c0_i32 = arith.constant 0 : i32
    %c0_i32_0 = arith.constant 0 : i32
    %c0_i32_1 = arith.constant 0 : i32
    return %arg0, %c0_i32, %c0_i32_0 : i32, i32, i32
  }
  func.func @transform_28(%arg0: i32) -> (i32, i32, i32) {
    %c0_i32 = arith.constant 0 : i32
    %c0_i32_0 = arith.constant 0 : i32
    %c0_i32_1 = arith.constant 0 : i32
    return %arg0, %c0_i32, %c0_i32_0 : i32, i32, i32
  }
  func.func @transform_29(%arg0: i32) -> (i32, i32, i32) {
    %c0_i32 = arith.constant 0 : i32
    %c0_i32_0 = arith.constant 0 : i32
    %c0_i32_1 = arith.constant 0 : i32
    return %arg0, %c0_i32, %c0_i32_0 : i32, i32, i32
  }
  func.func @transform_30(%arg0: i32) -> (i32, i32, i32) {
    %c0_i32 = arith.constant 0 : i32
    %c0_i32_0 = arith.constant 0 : i32
    %c0_i32_1 = arith.constant 0 : i32
    return %arg0, %c0_i32, %c0_i32_0 : i32, i32, i32
  }
  func.func @transform_31(%arg0: i32) -> (i32, i32) {
    %c0_i32 = arith.constant 0 : i32
    %c0_i32_0 = arith.constant 0 : i32
    %c0_i32_1 = arith.constant 0 : i32
    return %c0_i32, %c0_i32_0 : i32, i32
  }
  func.func @transform_32(%arg0: i32) -> (i32, i32) {
    %c0_i32 = arith.constant 0 : i32
    %c0_i32_0 = arith.constant 0 : i32
    %c0_i32_1 = arith.constant 0 : i32
    return %c0_i32, %c0_i32_0 : i32, i32
  }
  func.func @transform_33(%arg0: i32) -> (i32, i32) {
    %c0_i32 = arith.constant 0 : i32
    %c0_i32_0 = arith.constant 0 : i32
    %c0_i32_1 = arith.constant 0 : i32
    return %c0_i32, %c0_i32_0 : i32, i32
  }
  func.func @transform_34(%arg0: i32) -> (i32, i32) {
    %c0_i32 = arith.constant 0 : i32
    %c0_i32_0 = arith.constant 0 : i32
    %c0_i32_1 = arith.constant 0 : i32
    return %c0_i32, %c0_i32_0 : i32, i32
  }
  func.func @transform_35(%arg0: i32) -> (i32, i32, i32) {
    %c0_i32 = arith.constant 0 : i32
    %c0_i32_0 = arith.constant 0 : i32
    %c0_i32_1 = arith.constant 0 : i32
    return %arg0, %c0_i32, %c0_i32_0 : i32, i32, i32
  }
}

</mosaic_0001>

<bundles_post_ra>
// kernel: dfdgcn_forward.2
= control target key start
LH: loop header
LB: loop body
LE: loop exit
PB: predicated region body
PF: predicated region fallthrough
CT: control target
= control target key end

     0   :  { %10 = vsyncpa [#allocation3], 0  ;;  %s965_s0 = inlined_call_operand.vmem [shape: f32[2,8,320], index: 0, kind: input, shape index: {}]   ;;  %s966_s1 = inlined_call_operand.vmem [shape: f32[320,16], index: 1, kind: input, shape index: {}]   ;;  %s967_s2 = inlined_call_operand.hbm [shape: f32[8,16], index: 2, kind: input, shape index: {}]   ;;  %s968_s3 = inlined_call_operand.hbm [shape: f32[8,16], index: 3, kind: input, shape index: {}]   ;;  %s969_s4 = inlined_call_operand.hbm [shape: f32[16,16], index: 4, kind: input, shape index: {}]   ;;  %s970_s5 = inlined_call_operand.vmem [shape: f32[2,8,8], index: 5, kind: output, shape index: {}]  }
   0x1   :  { %11 = vsyncpa [#allocation5], 0  ;;  %s782_s18 = smov 0  }
   0x2 LB: > { %s185_s21 = sshll.u32 %s968_s3, 4  ;;  %s791_s22 = sadd.s32 4294967295, %s743_s18   ;;  %s743_s18 = sphi %s782_s18, %s17_s18   ;;  %s186_s21 = int_to_ptr.hbm [resolvable:$true] %s185_s21 }
   0x3   : > { %p572_p0 = scmp.ge.s32.totalorder %s743_s18, 1  ;;  %p158_p1 = scmp.lt.s32.totalorder %s743_s18, 3 }
   0x4   : > { %p612_p2 = scmp.eq.s32.totalorder %s791_s22, 0  ;;  %s745_s24 = smov [#allocation4]  }
   0x5   : > { %p796_p3 = pnand %p572_p0, %p158_p1  ;;  %s187_s25 = sshll.u32 %s745_s24, 4  ;;  %s188_s25 = int_to_ptr.vmem [resolvable:$true] %s187_s25 }
   0x6   : > { %s173_s28 = sshll.u32 %s967_s2, 4  ;;  %s196_s6 = sshll.u32 %s969_s4, 4  ;;  %s174_s28 = int_to_ptr.hbm [resolvable:$true] %s173_s28  ;;  %s197_s6 = int_to_ptr.hbm [resolvable:$true] %s196_s6 }
   0x7   : > { %p602_p4 = pneg %p796_p3  ;;  %s746_s7 = smov [#allocation2]  }
   0x8   : > { %s175_s8 = sshll.u32 %s746_s7, 4  ;;  %s747_s9 = smov [#allocation6]   ;;  %s176_s8 = int_to_ptr.vmem [resolvable:$true] %s175_s8 }
   0x9   : > { %p603_p5 = pnand %p612_p2, %p602_p4  ;;  %s198_s10 = sshll.u32 %s747_s9, 4  ;;  %s199_s10 = int_to_ptr.vmem [resolvable:$true] %s198_s10 }
   0xa   : > { %s748_s11 = smov 128   ;;  %s749_s12 = smov 8  }
   0xb   : > { %608 = dma.hbm_to_vmem [thread:$0]  (!%p603_p5), %s186_s21, 128, %s188_s25, [#allocation5]  }
   0xc   : > { %605 = dma.hbm_to_vmem [thread:$0]  (!%p603_p5), %s174_s28, 128, %s176_s8, [#allocation3]  }
   0xd   : > { %611 = dma.hbm_to_vmem [thread:$0]  (!%p603_p5), %s197_s6, 256, %s199_s10, [#allocation5], %s748_s11, %s748_s11, %s749_s12  }
   0xe   : > { %222 = sbr.rel (%p796_p3) target bundleno = 750 (0x2ee), region = 40 }
  0x13   : > { %734 = dma.done.wait (%p612_p2), [#allocation3], 128  }
  0x14   : > { %736 = vsyncadd (%p612_p2), [#allocation3], 4294967168 }
  0x15   : > { %738 = dma.done.wait (%p612_p2), [#allocation5], 384  }
  0x16   : > { %740 = vsyncadd (%p612_p2), [#allocation5], 4294966912  ;;  %v287_v0 = vld [vmem:[%s966_s1 + $0x78] sm:$0xff]  ;;  %v286_v2 = vld [vmem:[%s966_s1 + $0x70] sm:$0xff]  ;;  %p260_p6 = scmp.lt.s32.totalorder %s791_s22, 1  ;;  %vm312_vm0 = vcmask 523264  }
  0x17   : > { %v303_v1 = vld [vmem:[%s966_s1 + $0xf8] sm:$0xff]  ;;  %316 = vmatpush.msra.mxu0 %v287_v0  ;;  %v302_v3 = vld [vmem:[%s966_s1 + $0xf0] sm:$0xff]  ;;  %v285_v4 = vld [vmem:[%s966_s1 + $0x68] sm:$0xff]  ;;  %vm377_vm1 = vcmask 130048   ;;  %v750_v52 = vmov 16.0   ;;  %v751_v56 = vmov 8.0  }
  0x18   : > { %336 = vmatpush.msra.mxu1 %v303_v1  ;;  %v301_v5 = vld [vmem:[%s966_s1 + $0xe8] sm:$0xff]  ;;  %v284_v6 = vld [vmem:[%s966_s1 + $0x60] sm:$0xff]  ;;  %v311_v8 = vld [vmem:[%s966_s1 + $0x138] sm:$0xff]  ;;  %s973_s22 = smov (!%p260_p6, %s791_s22), 1  ;;  %633 = vrcp.f32 %v750_v52  ;;  %vm484_vm7 = vcmask 64512  }
  0x19   : > { %317 = vmatpush.msra.mxu0 %v286_v2  ;;  %v300_v7 = vld [vmem:[%s966_s1 + $0xe0] sm:$0xff]  ;;  %v310_v9 = vld [vmem:[%s966_s1 + $0x130] sm:$0xff]  ;;  %v283_v10 = vld [vmem:[%s966_s1 + $0x58] sm:$0xff]  ;;  %364 = vmatpush.msra.mxu2 %v311_v8  ;;  %s589_s9 = smul.u32 24, %s973_s22  ;;  %635 = vrcp.f32 %v751_v56 }
  0x1a   : > { %337 = vmatpush.msra.mxu1 %v302_v3  ;;  %v299_v11 = vld [vmem:[%s966_s1 + $0xd8] sm:$0xff]  ;;  %v309_v12 = vld [vmem:[%s966_s1 + $0x128] sm:$0xff]  ;;  %v282_v13 = vld [vmem:[%s966_s1 + $0x50] sm:$0xff] }
  0x1b   : > { %318 = vmatpush.msra.mxu0 %v285_v4  ;;  %v298_v14 = vld [vmem:[%s966_s1 + $0xd0] sm:$0xff]  ;;  %365 = vmatpush.msra.mxu2 %v310_v9  ;;  %v308_v15 = vld [vmem:[%s966_s1 + $0x120] sm:$0xff]  ;;  %v281_v16 = vld [vmem:[%s966_s1 + $0x48] sm:$0xff]  ;;  %s909_s26 = scalar_lea.vmem %s965_s0, %s589_s9 }
  0x1c   : > { %338 = vmatpush.msra.mxu1 %v301_v5  ;;  %v297_v17 = vld [vmem:[%s966_s1 + $0xc8] sm:$0xff]  ;;  %v307_v18 = vld [vmem:[%s966_s1 + $0x118] sm:$0xff]  ;;  %v280_v19 = vld [vmem:[%s966_s1 + $0x40] sm:$0xff] }
  0x1d   : > { %319 = vmatpush.msra.mxu0 %v284_v6  ;;  %366 = vmatpush.msra.mxu2 %v309_v12  ;;  %v296_v20 = vld [vmem:[%s966_s1 + $0xc0] sm:$0xff]  ;;  %v306_v21 = vld [vmem:[%s966_s1 + $0x110] sm:$0xff]  ;;  %v279_v22 = vld [vmem:[%s966_s1 + $0x38] sm:$0xff] }
  0x1e   : > { %339 = vmatpush.msra.mxu1 %v300_v7  ;;  %v295_v23 = vld [vmem:[%s966_s1 + $0xb8] sm:$0xff]  ;;  %v305_v24 = vld [vmem:[%s966_s1 + $0x108] sm:$0xff]  ;;  %v278_v25 = vld [vmem:[%s966_s1 + $0x30] sm:$0xff]  ;;  %v634_v53 = vpop.eup %633 }
  0x1f   : > { %320 = vmatpush.msra.mxu0 %v283_v10  ;;  %367 = vmatpush.msra.mxu2 %v308_v15  ;;  %v294_v26 = vld [vmem:[%s966_s1 + $0xb0] sm:$0xff]  ;;  %v304_v27 = vld [vmem:[%s966_s1 + $0x100] sm:$0xff]  ;;  %v277_v28 = vld [vmem:[%s966_s1 + $0x28] sm:$0xff]  ;;  %v382_v54 = vmul.f32 16.0, %v634_v53  ;;  %v636_v58 = vpop.eup %635  ;;  %vm386_vm2 = vweird.f32 %v634_v53 }
  0x20   : > { %340 = vmatpush.msra.mxu1 %v299_v11  ;;  %v293_v29 = vld [vmem:[%s966_s1 + $0xa8] sm:$0xff]  ;;  %v271_v30 = vld [vmem:[%s909_s26 + $0x10] sm:$0xff]  ;;  %v276_v31 = vld [vmem:[%s966_s1 + $0x20] sm:$0xff]  ;;  %v396_v60 = vmul.f32 8.0, %v636_v58  ;;  %vm400_vm3 = vweird.f32 %v636_v58 }
  0x21   : > { %321 = vmatpush.msra.mxu0 %v282_v13  ;;  %368 = vmatpush.msra.mxu2 %v307_v18  ;;  %v292_v32 = vld [vmem:[%s966_s1 + $0xa0] sm:$0xff]  ;;  %v275_v33 = vld [vmem:[%s966_s1 + $0x18] sm:$0xff]  ;;  %v274_v35 = vld [vmem:[%s966_s1 + $0x10] sm:$0xff]  ;;  %v383_v55 = vsub.f32 1.0, %v382_v54 }
  0x22   : > { %341 = vmatpush.msra.mxu1 %v298_v14  ;;  %v291_v34 = vld [vmem:[%s966_s1 + $0x98] sm:$0xff]  ;;  %v290_v36 = vld [vmem:[%s966_s1 + $0x90] sm:$0xff]  ;;  %v273_v37 = vld [vmem:[%s966_s1 + $0x8] sm:$0xff]  ;;  %v397_v63 = vsub.f32 1.0, %v396_v60 }
  0x23   : > { %322 = vmatpush.msra.mxu0 %v281_v16  ;;  %369 = vmatpush.msra.mxu2 %v306_v21  ;;  %v289_v38 = vld [vmem:[%s966_s1 + $0x88] sm:$0xff]  ;;  %v272_v39 = vld [vmem:[%s966_s1] sm:$0xff]  ;;  %v433_v43 = vld [vmem:[#allocation6 + $0x8] sm:$0xff]  ;;  %v384_v57 = vmul.f32 %v634_v53, %v383_v55 }
  0x24   : > { %342 = vmatpush.msra.mxu1 %v297_v17  ;;  %v288_v40 = vld [vmem:[%s966_s1 + $0x80] sm:$0xff]  ;;  %v270_v42 = vld [vmem:[%s909_s26 + $0x8] sm:$0xff]  ;;  %451 = vmatpush.msra.mxu3 %v433_v43  ;;  %v432_v44 = vld [vmem:[#allocation6] sm:$0xff]  ;;  %v398_v2 = vmul.f32 %v636_v58, %v397_v63 }
  0x25   : > { %323 = vmatpush.msra.mxu0 %v280_v19  ;;  %370 = vmatpush.msra.mxu2 %v305_v24  ;;  %v269_v41 = vld [vmem:[%s909_s26] sm:$0xff]  ;;  %v385_v59 = vadd.f32 %v634_v53, %v384_v57  ;;  %s582_s26 = sshll.u32 %s973_s22, 3 }
  0x26   : > { %343 = vmatpush.msra.mxu1 %v296_v20  ;;  %452 = vmatpush.msra.mxu3 %v432_v44  ;;  %v399_v5 = vadd.f32 %v636_v58, %v398_v2  ;;  %s268_s8 = scalar_lea.vmem %s970_s5, %s582_s26 }
  0x27   : > { %324 = vmatpush.msra.mxu0 %v279_v22  ;;  %371 = vmatpush.msra.mxu2 %v304_v27  ;;  %v387_v61 = vsel %vm386_vm2, %v634_v53, %v385_v59 }
  0x28   : > { %344 = vmatpush.msra.mxu1 %v295_v23  ;;  %583 = vmatmul.msk.f32.vlgmr.msra.gmra.mxu2 %vm312_vm0, %v271_v30  ;;  %v401_v8 = vsel %vm400_vm3, %v636_v58, %v399_v5 }
  0x29   : > { %325 = vmatpush.msra.mxu0 %v278_v25 }
  0x2a   : > { %345 = vmatpush.msra.mxu1 %v294_v26 }
  0x2b   : > { %326 = vmatpush.msra.mxu0 %v277_v28 }
  0x2c   : > { %346 = vmatpush.msra.mxu1 %v293_v29 }
  0x2d   : > { %327 = vmatpush.msra.mxu0 %v276_v31  ;;  %v428_v31 = vld [vmem:[#allocation2] sm:$0xff] }
  0x2e   : > { %347 = vmatpush.msra.mxu1 %v292_v32 }
  0x2f   : > { %328 = vmatpush.msra.mxu0 %v275_v33  ;;  %v430_v33 = vld [vmem:[#allocation4] sm:$0xff] }
  0x30   : > { %348 = vmatpush.msra.mxu1 %v291_v34 }
  0x31   : > { %329 = vmatpush.msra.mxu0 %v274_v35 }
  0x32   : > { %349 = vmatpush.msra.mxu1 %v290_v36 }
  0x33   : > { %330 = vmatpush.msra.mxu0 %v273_v37 }
  0x34   : > { %350 = vmatpush.msra.mxu1 %v289_v38 }
  0x35   : > { %331 = vmatpush.msra.mxu0 %v272_v39 }
  0x36   : > { %351 = vmatpush.msra.mxu1 %v288_v40  ;;  %332 = vmatmul.f32.vlgmr.msra.gmra.mxu0 %v269_v41 }
  0x37   : > { %352 = vmatmul.f32.vlgmr.msra.gmra.mxu1 %v270_v42 }
  0xab   : > { %v373_v45 = vpop.f32.mrf.mxu2 }
  0xb3   : > { %v333_v46 = vpop.f32.mrf.mxu0 }
  0xb4   : > { %v353_v47 = vpop.f32.mrf.mxu1 }
  0xb5   : > { %v354_v48 = vadd.f32 %v353_v47, %v333_v46 }
  0xb7   : > { %v374_v49 = vadd.f32 %v373_v45, %v354_v48 }
  0xb9   : > { %v376_v50 = vmax.f32 %v374_v49, 0.0 }
  0xbb   : > { %585 = vmatpush.xpose.msk.msrb.mxu3 %vm377_vm1, %v376_v50  ;;  %v378_v51 = vsel %vm377_vm1, %v376_v50, 0.0 }
  0xbc   : > { %379 = vadd.xlane.f32.xlu0 %v378_v51 }
 0x12f   : > { %v380_v62 = vpop.xlane.xlu0 %379 }
 0x130   : > { %v388_v0 = vmul.f32 %v387_v61, %v380_v62 }
 0x132   : > { %v389_v1 = vrot.slane %v388_v0, 4 }
 0x134   : > { %v390_v3 = vadd.f32 %v389_v1, %v388_v0 }
 0x136   : > { %v391_v4 = vrot.slane %v390_v3, 2 }
 0x138   : > { %v392_v6 = vadd.f32 %v391_v4, %v390_v3 }
 0x13a   : > { %v393_v7 = vrot.slane %v392_v6, 1 }
 0x13c   : > { %v394_v9 = vadd.f32 %v393_v7, %v392_v6 }
 0x13e   : > { %v402_v10 = vmul.f32 %v401_v8, %v394_v9 }
 0x140   : > { %v403_v11 = vsub.f32 %v376_v50, %v402_v10 }
 0x142   : > { %v404_v12 = vmul.f32 %v403_v11, %v403_v11 }
 0x144   : > { %v405_v13 = vsel %vm377_vm1, %v404_v12, 0.0 }
 0x145   : > { %406 = vadd.xlane.f32.xlu0 %v405_v13 }
 0x1b8   : > { %v407_v14 = vpop.xlane.xlu0 %406 }
 0x1b9   : > { %v408_v15 = vmul.f32 %v407_v14, %v387_v61 }
 0x1bb   : > { %v409_v16 = vrot.slane %v408_v15, 4 }
 0x1bd   : > { %v410_v17 = vadd.f32 %v409_v16, %v408_v15 }
 0x1bf   : > { %v411_v18 = vrot.slane %v410_v17, 2 }
 0x1c1   : > { %v412_v19 = vadd.f32 %v411_v18, %v410_v17 }
 0x1c3   : > { %v413_v20 = vrot.slane %v412_v19, 1 }
 0x1c5   : > { %v414_v21 = vadd.f32 %v413_v20, %v412_v19 }
 0x1c7   : > { %v415_v22 = vmul.f32 %v414_v21, %v401_v8 }
 0x1c9   : > { %v416_v23 = vadd.f32 1e-08, %v415_v22 }
 0x1cb   : > { %637 = vrsqrt.f32 %v416_v23  ;;  %vm423_vm5 = vweird.f32 %v416_v23 }
 0x1d1   : > { %v638_v24 = vpop.eup %637 }
 0x1d2   : > { %v418_v25 = vmul.f32 %v638_v24, %v416_v23  ;;  %vm424_vm4 = vweird.f32 %v638_v24 }
 0x1d3   : > { %vm425_vm6 = vmor %vm423_vm5, %vm424_vm4 }
 0x1d4   : > { %v419_v26 = vmul.f32 %v638_v24, %v418_v25 }
 0x1d6   : > { %v420_v27 = vmul.f32 0.5, %v419_v26 }
 0x1d8   : > { %v421_v28 = vsub.f32 1.5, %v420_v27 }
 0x1da   : > { %v422_v29 = vmul.f32 %v638_v24, %v421_v28 }
 0x1dc   : > { %v426_v30 = vsel %vm425_vm6, %v638_v24, %v422_v29 }
 0x1dd   : > { %v427_v32 = vmul.f32 %v426_v30, %v403_v11 }
 0x1df   : > { %v429_v34 = vmul.f32 %v428_v31, %v427_v32 }
 0x1e1   : > { %v431_v35 = vadd.f32 %v430_v33, %v429_v34 }
 0x1e3   : > { %584 = vmatmul.msk.f32.vlgmr.msra.gmra.mxu3 %vm377_vm1, %v431_v35 }
 0x266   : > { %v454_v36 = vpop.f32.mrf.mxu3 }
 0x267   : > { %586 = vmatmul.msk.f32.vlgmr.msrb.gmra.mxu3 %vm377_vm1, %v454_v36 }
 0x2ea   : > { %v480_v37 = vpop.f32.mrf.mxu3 }
 0x2eb   : > { %v483_v38 = vmax.f32 %v480_v37, 0.0 }
 0x2ed   : > { %485 = vst.msk [vmem:[%s268_s8] sm:$0xff] %vm484_vm7, %v483_v38 }
 0x2ee PF: > { %s17_s18 = sadd.s32 1, %s743_s18  }
 0x2ef   : > { %p14_p7 = scmp.ge.s32.totalorder %s17_s18, 4  }
 0x2f1   :  { %16 = sbr.rel (!%p14_p7) target bundleno = 2 (0x2), region = 83 }
 0x2f6   :  { %505 = vsyncpa [#allocation3], 1 }
 0x2f7   :  { %507 = vsyncpa [#allocation3 + $0x1], 1 }
 0x2f8   :  { %508 = vsyncpa [#allocation5], 1 }

// kernel: dfdgcn_forward.3
= control target key start
LH: loop header
LB: loop body
LE: loop exit
PB: predicated region body
PF: predicated region fallthrough
CT: control target
= control target key end

     0   :  { %s7981_s6 = smov 1   ;;  %s7982_s10 = smov 2   ;;  %s10201_s0 = inlined_call_operand.smem [shape: u32[36], index: -1, kind: input, shape index: {}] }
   0x1   :  { %s8032_s5 = sld [smem:[%s10201_s0]]   ;;  %s7983_s14 = smov 3  }
   0x2   :  { %s8037_s9 = sld [smem:[%s10201_s0 + %s7981_s6]]   ;;  %s7984_s18 = smov 4  }
   0x3   :  { %s8042_s13 = sld [smem:[%s10201_s0 + %s7982_s10]]   ;;  %s7985_s22 = smov 5  }
   0x4   :  { %s8047_s17 = sld [smem:[%s10201_s0 + %s7983_s14]]   ;;  %s7986_s26 = smov 6  }
   0x5   :  { %s8052_s21 = sld [smem:[%s10201_s0 + %s7984_s18]]   ;;  %s7987_s30 = smov 7  }
   0x6   :  { %s8057_s25 = sld [smem:[%s10201_s0 + %s7985_s22]]   ;;  %s7988_s4 = smov 8  }
   0x7   :  { %10235 = sst [smem:[#allocation17_spill]] %s8032_s5  ;;  %s7989_s10 = smov 9  }
   0x8   :  { %10236 = sst [smem:[#allocation18_spill]] %s8037_s9  ;;  %s7990_s15 = smov 10  }
   0x9   :  { %s8062_s29 = sld [smem:[%s10201_s0 + %s7986_s26]]   ;;  %s7991_s20 = smov 11  }
   0xa   :  { %s8067_s3 = sld [smem:[%s10201_s0 + %s7987_s30]]   ;;  %s7992_s26 = smov 12  }
   0xb   :  { %s8072_s8 = sld [smem:[%s10201_s0 + %s7988_s4]]   ;;  %s7993_s1 = smov 13  }
   0xc   :  { %s8077_s14 = sld [smem:[%s10201_s0 + %s7989_s10]]   ;;  %s7994_s7 = smov 14  }
   0xd   :  { %s8082_s19 = sld [smem:[%s10201_s0 + %s7990_s15]]   ;;  %s7995_s15 = smov 15  }
   0xe   :  { %s8087_s24 = sld [smem:[%s10201_s0 + %s7991_s20]]   ;;  %s7996_s22 = smov 16  }
   0xf   :  { %s8092_s30 = sld [smem:[%s10201_s0 + %s7992_s26]]   ;;  %s7997_s28 = smov 17  }
  0x10   :  { %10237 = sst [smem:[#allocation19_spill]] %s8067_s3 }
  0x11   :  { %10238 = sst [smem:[#allocation20_spill]] %s8072_s8 }
  0x12   :  { %s8097_s6 = sld [smem:[%s10201_s0 + %s7993_s1]]  }
  0x13   :  { %10239 = sst [smem:[#allocation21_spill]] %s8082_s19 }
  0x14   :  { %10240 = sst [smem:[#allocation22_spill]] %s8087_s24 }
  0x15   :  { %10241 = sst [smem:[#allocation23_spill]] %s8092_s30 }
  0x16   :  { %s8102_s12 = sld [smem:[%s10201_s0 + %s7994_s7]]   ;;  %s7998_s7 = smov 18  }
  0x17   :  { %s8107_s20 = sld [smem:[%s10201_s0 + %s7995_s15]]   ;;  %s7999_s15 = smov 19  }
  0x18   :  { %10242 = sst [smem:[#allocation24_spill]] %s8097_s6 }
  0x19   :  { %s8112_s27 = sld [smem:[%s10201_s0 + %s7996_s22]]   ;;  %s8000_s22 = smov 20  }
  0x1a   :  { %s8117_s4 = sld [smem:[%s10201_s0 + %s7997_s28]]   ;;  %s8001_s28 = smov 21  }
  0x1b   :  { %s8127_s6 = sld [smem:[%s10201_s0 + %s7999_s15]]   ;;  %s8003_s15 = smov 23  }
  0x1c   :  { %10243 = sst [smem:[#allocation25_spill]] %s8102_s12 }
  0x1d   :  { %s8122_s12 = sld [smem:[%s10201_s0 + %s7998_s7]]   ;;  %s8002_s7 = smov 22  }
  0x1e   :  { %s8147_s30 = sld [smem:[%s10201_s0 + %s8003_s15]]   ;;  %s8007_s15 = smov 27  }
  0x1f   :  { %10244 = sst [smem:[#allocation26_spill]] %s8112_s27 }
  0x20   :  { %10245 = sst [smem:[#allocation27_spill]] %s8117_s4 }
  0x21   :  { %10247 = sst [smem:[#allocation29_spill]] %s8127_s6 }
  0x22   :  { %s8132_s27 = sld [smem:[%s10201_s0 + %s8000_s22]]   ;;  %s8004_s22 = smov 24  }
  0x23   :  { %10246 = sst [smem:[#allocation28_spill]] %s8122_s12 }
  0x24   :  { %s8137_s4 = sld [smem:[%s10201_s0 + %s8001_s28]]   ;;  %s8005_s28 = smov 25  }
  0x25   :  { %s8142_s12 = sld [smem:[%s10201_s0 + %s8002_s7]]   ;;  %s8006_s7 = smov 26  }
  0x26   :  { %s8167_s24 = sld [smem:[%s10201_s0 + %s8007_s15]]   ;;  %s8011_s15 = smov 31  }
  0x27   :  { %s8187_s19 = sld [smem:[%s10201_s0 + %s8011_s15]]   ;;  %s8015_s15 = smov 35  }
  0x28   :  { %10248 = sst [smem:[#allocation30_spill]] %s8132_s27 }
  0x29   :  { %s8152_s27 = sld [smem:[%s10201_s0 + %s8004_s22]]   ;;  %s8008_s22 = smov 28  }
  0x2a   :  { %10249 = sst [smem:[#allocation31_spill]] %s8137_s4 }
  0x2b   :  { %10250 = sst [smem:[#allocation32_spill]] %s8142_s12 }
  0x2c   :  { %s8157_s4 = sld [smem:[%s10201_s0 + %s8005_s28]]   ;;  %s8009_s28 = smov 29  }
  0x2d   :  { %s8162_s12 = sld [smem:[%s10201_s0 + %s8006_s7]]   ;;  %s8010_s7 = smov 30  }
  0x2e   :  { %10254 = sst [smem:[#allocation36_spill]] %s8167_s24 }
  0x2f   :  { %10251 = sst [smem:[#allocation33_spill]] %s8152_s27 }
  0x30   :  { %s8172_s27 = sld [smem:[%s10201_s0 + %s8008_s22]]   ;;  %s8012_s22 = smov 32  }
  0x31   :  { %s8207_s24 = sld [smem:[%s10201_s0 + %s8015_s15]]  }
  0x32   :  { %10252 = sst [smem:[#allocation34_spill]] %s8157_s4 }
  0x33   :  { %10253 = sst [smem:[#allocation35_spill]] %s8162_s12 }
  0x34   :  { %s8177_s4 = sld [smem:[%s10201_s0 + %s8009_s28]]   ;;  %s8013_s28 = smov 33  }
  0x35   :  { %s8182_s12 = sld [smem:[%s10201_s0 + %s8010_s7]]   ;;  %s8014_s7 = smov 34  }
  0x36   :  { %10255 = sst [smem:[#allocation37_spill]] %s8172_s27 }
  0x37   :  { %s8192_s27 = sld [smem:[%s10201_s0 + %s8012_s22]]  }
  0x38   :  { %10259 = sst [smem:[#allocation41_spill]] %s8207_s24 }
  0x3a   :  { %10256 = sst [smem:[#allocation38_spill]] %s8177_s4 }
  0x3b   :  { %10257 = sst [smem:[#allocation39_spill]] %s8182_s12 }
  0x3c   :  { %s8197_s4 = sld [smem:[%s10201_s0 + %s8013_s28]]  }
  0x3d   :  { %s8202_s12 = sld [smem:[%s10201_s0 + %s8014_s7]]  }
  0x42   :  { %10258 = sst [smem:[#allocation40_spill]] %s8197_s4 }
  0x43   :  { %76 = vsyncpa [#allocation5], 0 }
  0x44   :  { %77 = vsyncpa [#allocation8], 0 }
  0x45   :  { %78 = vsyncpa [#allocation11], 0 }
  0x46   :  { %79 = vsyncpa [#allocation6], 0 }
  0x47   :  { %81 = vsyncpa [#allocation6 + $0x1], 0  ;;  %s8209_s22 = smov 0   ;;  %s8211_s23 = smov 0  }
  0x48   :  { %s8213_s26 = smov 0   ;;  %s8215_s28 = smov 0  }
  0x49 LB: > { %s10260_s4 = sld [smem:[#allocation40_spill]]  ;;  %s8230_s0 = sadd.s32 4294967295, %s7979_s28   ;;  %s7979_s28 = sphi %s8215_s28, %s10314_s28   ;;  %s7975_s26 = sphi %s8213_s26, %s10317_s26   ;;  %s7971_s23 = sphi %s8211_s23, %s10316_s23   ;;  %s7967_s22 = sphi %s8209_s22, %s10315_s22  }
  0x4a   : > { %s10261_s8 = sld [smem:[#allocation20_spill]]  ;;  %s6752_s1 = sadd.s32 4294967294, %s7979_s28  }
  0x4b   : > { %s10262_s6 = sld [smem:[#allocation29_spill]]  ;;  %s8234_s2 = sadd.s32 1, %s7979_s28  }
  0x4c   : > { %s10263_s3 = sld [smem:[#allocation19_spill]]  ;;  %s874_s7 = sadd.s32 1, %s7975_s26 }
  0x4d   : > { %10264 = sst [smem:[#allocation42_spill]] %s7967_s22  ;;  %s871_s10 = ssub.s32 %s7979_s28, %s8234_s2 }
  0x4e   : > { %10265 = sst [smem:[#allocation43_spill]] %s7971_s23  ;;  %p884_p0 = scmp.ne.s32.totalorder %s7975_s26, %s7971_s23 }
  0x4f   : > { %10266 = sst [smem:[#allocation44_spill]] %s7975_s26  ;;  %p872_p1 = scmp.eq.s32.totalorder %s871_s10, 0 }
  0x50   : > { %10267 = sst [smem:[#allocation45_spill]] %s7979_s28  ;;  %p885_p2 = scmp.eq.s32.totalorder %s8230_s0, 1 }
  0x51   : > { %10268 = sst [smem:[#allocation46_spill]] %s8234_s2  ;;  %p890_p3 = scmp.ne.s32.totalorder %s7971_s23, %s7967_s22 }
  0x52   : > { %p891_p4 = scmp.eq.s32.totalorder %s6752_s1, 1  ;;  %p8247_p5 = por %p885_p2, %p884_p0 }
  0x53   : > { %s8245_s11 = scalar_select %p872_p1, %s7975_s26, %s874_s7  }
  0x54   : > { %s10270_s15 = scalar_select %p8247_p5, 1, 0 }
  0x55   : > { %10269 = sst [smem:[#allocation47_spill]] %s8245_s11  ;;  %p8251_p6 = por %p891_p4, %p890_p3 }
  0x56   : > { %10271 = sst [smem:[#allocation48_spill]] %s10270_s15  ;;  %p6753_p7 = scmp.ge.s32.totalorder %s7979_s28, 1 }
  0x57   : > { %s10272_s16 = scalar_select %p8251_p6, 1, 0 }
  0x58   : > { %p898_p8 = scmp.lt.s32.totalorder %s7979_s28, 3  ;;  %p7436_p9 = scmp.eq.s32.totalorder %s8230_s0, 0 }
  0x59   : > { %10273 = sst [smem:[#allocation49_spill]] %s10272_s16  ;;  %s984_s10 = sshll.u32 %s8187_s19, 4  ;;  %s985_s10 = int_to_ptr.hbm [resolvable:$true] %s984_s10 }
  0x5a   : > { %p8258_p10 = pnand %p6753_p7, %p898_p8  ;;  %s8016_s1 = smov [#allocation7]  }
  0x5b   : > { %s986_s7 = sshll.u32 %s8016_s1, 4  ;;  %s913_s26 = sshll.u32 %s8042_s13, 4  ;;  %s987_s7 = int_to_ptr.vmem [resolvable:$true] %s986_s7  ;;  %s8272_s26 = int_to_ptr.hbm [resolvable:$true] %s913_s26 }
  0x5c   : > { %p7419_p11 = pneg %p8258_p10  ;;  %s7785_s2 = sshra.s32 %s985_s10, 4  ;;  %s7786_s2 = int_to_ptr.hbm [resolvable:$true] %s7785_s2 }
  0x5d   : > { %s7787_s16 = scalar_lea.hbm %s7786_s2, 32  ;;  %s7792_s1 = scalar_lea.hbm %s8187_s19, 32 }
  0x5e   : > { %p8267_p12 = pnand %p7436_p9, %p7419_p11  ;;  %p7788_p13 = scmp.ne.s32.totalorder %s7786_s2, %s7787_s16 }
  0x5f   : > { %p7793_p3 = scmp.lt.s32.totalorder %s7786_s2, %s8187_s19  ;;  %p7794_p4 = scmp.lt.s32.totalorder %s7792_s1, %s7787_s16 }
  0x60   : > { %p7789_p0 = pneg %p8267_p12 }
  0x61   : > { %p7795_p7 = por %p7794_p4, %p7793_p3 }
  0x62   : > { %p7790_p1 = pnand %p7789_p0, %p7788_p13 }
  0x64   : > { %p7791_p2 = pneg %p7790_p1 }
  0x66   : > { %p7796_p8 = pnand %p7795_p7, %p7791_p2 }
  0x68   : > { %7799 = shalt.err (!%p7796_p8)
}
  0x69   : > { %s8017_s22 = smov 128   ;;  %s8018_s28 = smov 8  }
  0x6a   : > { %7425 = dma.hbm_to_vmem [thread:$0]  (!%p8267_p12), %s985_s10, 512, %s987_s7, [#allocation8], %s8017_s22, %s8017_s22, %s8018_s28  }
  0x6b   : > { %s8019_s15 = smov [#allocation4]   ;;  %s999_s23 = sshll.u32 %s8192_s27, 4  ;;  %s8284_s23 = int_to_ptr.hbm [resolvable:$true] %s999_s23 }
  0x6c   : > { %s915_s24 = sshll.u32 %s8019_s15, 4  ;;  %s7815_s2 = sshra.s32 %s8272_s26, 4  ;;  %s916_s24 = int_to_ptr.vmem [resolvable:$true] %s915_s24  ;;  %s7816_s2 = int_to_ptr.hbm [resolvable:$true] %s7815_s2 }
  0x6d   : > { %s7817_s16 = scalar_lea.hbm %s7816_s2, 1  ;;  %s7822_s1 = scalar_lea.hbm %s8042_s13, 1 }
  0x6e   : > { %p7818_p11 = scmp.ne.s32.totalorder %s7816_s2, %s7817_s16  ;;  %p7823_p2 = scmp.lt.s32.totalorder %s7816_s2, %s8042_s13 }
  0x6f   : > { %p7824_p3 = scmp.lt.s32.totalorder %s7822_s1, %s7817_s16 }
  0x70   : > { %p7820_p13 = pnand %p7818_p11, %p7789_p0 }
  0x71   : > { %p7825_p4 = por %p7824_p3, %p7823_p2 }
  0x72   : > { %p7821_p1 = pneg %p7820_p13 }
  0x74   : > { %p7826_p7 = pnand %p7825_p4, %p7821_p1 }
  0x76   : > { %7829 = shalt.err (!%p7826_p7)
}
  0x77   : > { %7422 = dma.hbm_to_vmem [thread:$0]  (!%p8267_p12), %s8272_s26, 16, %s916_s24, [#allocation5]  }
  0x78   : > { %s1014_s22 = sshll.u32 %s8202_s12, 4  ;;  %s8020_s28 = smov [#allocation9]   ;;  %s8296_s22 = int_to_ptr.hbm [resolvable:$true] %s1014_s22 }
  0x79   : > { %s1001_s15 = sshll.u32 %s8020_s28, 4  ;;  %s7845_s10 = sshra.s32 %s8284_s23, 4  ;;  %s1002_s15 = int_to_ptr.vmem [resolvable:$true] %s1001_s15  ;;  %s7846_s10 = int_to_ptr.hbm [resolvable:$true] %s7845_s10 }
  0x7a   : > { %s7847_s7 = scalar_lea.hbm %s7846_s10, 1  ;;  %s7852_s2 = scalar_lea.hbm %s8192_s27, 1 }
  0x7b   : > { %p7848_p8 = scmp.ne.s32.totalorder %s7846_s10, %s7847_s7  ;;  %p7853_p1 = scmp.lt.s32.totalorder %s7846_s10, %s8192_s27 }
  0x7c   : > { %p7854_p2 = scmp.lt.s32.totalorder %s7852_s2, %s7847_s7 }
  0x7d   : > { %p7850_p11 = pnand %p7848_p8, %p7789_p0 }
  0x7e   : > { %p7855_p3 = por %p7854_p2, %p7853_p1 }
  0x7f   : > { %p7851_p13 = pneg %p7850_p11 }
  0x81   : > { %p7856_p4 = pnand %p7855_p3, %p7851_p13 }
  0x83   : > { %7859 = shalt.err (!%p7856_p4)
}
  0x84   : > { %7428 = dma.hbm_to_vmem [thread:$0]  (!%p8267_p12), %s8284_s23, 16, %s1002_s15, [#allocation8]  }
  0x85   : > { %s8021_s24 = smov [#allocation10]   ;;  %s7875_s16 = sshra.s32 %s8296_s22, 4  ;;  %s7876_s16 = int_to_ptr.hbm [resolvable:$true] %s7875_s16 }
  0x86   : > { %s1016_s26 = sshll.u32 %s8021_s24, 4  ;;  %s7877_s1 = scalar_lea.hbm %s7876_s16, 1  ;;  %s1017_s26 = int_to_ptr.vmem [resolvable:$true] %s1016_s26 }
  0x87   : > { %p7878_p7 = scmp.ne.s32.totalorder %s7876_s16, %s7877_s1  ;;  %s7882_s28 = scalar_lea.hbm %s8202_s12, 1 }
  0x88   : > { %p7883_p13 = scmp.lt.s32.totalorder %s7876_s16, %s8202_s12  ;;  %p7884_p1 = scmp.lt.s32.totalorder %s7882_s28, %s7877_s1 }
  0x89   : > { %p7880_p8 = pnand %p7878_p7, %p7789_p0 }
  0x8a   : > { %p7885_p2 = por %p7884_p1, %p7883_p13 }
  0x8b   : > { %p7881_p11 = pneg %p7880_p8 }
  0x8d   : > { %p7886_p3 = pnand %p7885_p2, %p7881_p11 }
  0x8f   : > { %7889 = shalt.err (!%p7886_p3)
}
  0x90   : > { %7431 = dma.hbm_to_vmem [thread:$0]  (!%p8267_p12), %s8296_s22, 16, %s1017_s26, [#allocation11]  }
  0x91   : > { %1101 = sbr.rel (%p8258_p10) target bundleno = 2917 (0xb65), region = 160 }
  0x96   : > { %7950 = dma.done.wait (%p7436_p9), [#allocation5], 16  }
  0x97   : > { %7952 = vsyncadd (%p7436_p9), [#allocation5], 4294967280 }
  0x98   : > { %7954 = dma.done.wait (%p7436_p9), [#allocation8], 528  }
  0x99   : > { %7956 = vsyncadd (%p7436_p9), [#allocation8], 4294966768 }
  0x9a   : > { %7958 = dma.done.wait (%p7436_p9), [#allocation11], 16  }
  0x9b   : > { %7960 = vsyncadd (%p7436_p9), [#allocation11], 4294967280  ;;  %s10276_s5 = sld [smem:[#allocation17_spill]]  ;;  %p1245_p10 = scmp.lt.s32.totalorder %s8230_s0, 1  ;;  %vm1307_vm0 = vcmask 64512   ;;  %v1425_v13 = vld [vmem:[%s8052_s21 + $0x8] sm:$0xff] }
  0x9c   : > { %s10277_s9 = sld [smem:[#allocation18_spill]]  ;;  %v1580_v14 = vld [vmem:[%s10263_s3 + $0x8] sm:$0xff]  ;;  %1473 = vmatpush.msra.mxu1 %v1425_v13  ;;  %v1424_v15 = vld [vmem:[%s8052_s21] sm:$0xff]  ;;  %v8353_v17 = vld [vmem:[#allocation4] ss:$0 sm:$0xff]  ;;  %vm1397_vm1 = vcmask 130048  }
  0x9d   : > { %s8332_s23 = scalar_select %p1245_p10, %s8230_s0, 1  ;;  %1595 = vmatpush.msra.mxu3 %v1580_v14  ;;  %v1579_v16 = vld [vmem:[%s10263_s3] sm:$0xff]  ;;  %v1578_v37 = vld [vmem:[%s8062_s29 + $0x8] sm:$0xff] }
  0x9e   : > { %1474 = vmatpush.msra.mxu1 %v1424_v15  ;;  %v1577_v38 = vld [vmem:[%s8062_s29] sm:$0xff]  ;;  %v1423_v47 = vld [vmem:[%s8047_s17 + $0x8] sm:$0xff]  ;;  %s10278_s10 = sld [smem:[#allocation36_spill]] }
  0x9f   : > { %s7396_s11 = smul.u32 96, %s8332_s23  ;;  %1596 = vmatpush.msra.mxu3 %v1579_v16  ;;  %v1422_v48 = vld [vmem:[%s8047_s17] sm:$0xff]  ;;  %s10279_s7 = sld [smem:[#allocation21_spill]] }
  0xa0   : > { %1645 = vmatpush.msrb.mxu1 %v1578_v37  ;;  %s7397_s22 = smul.u32 88, %s8332_s23  ;;  %s10280_s24 = sld [smem:[#allocation22_spill]] }
  0xa1   : > { %s1249_s18 = scalar_lea.vmem %s10276_s5, %s7396_s11  ;;  %s10281_s26 = sld [smem:[#allocation23_spill]] }
  0xa2   : > { %v1302_v0 = vld [vmem:[%s10277_s9] sm:$0xff]  ;;  %v1291_v2 = vld [vmem:[%s1249_s18 + $0x8] sm:$0xff]  ;;  %v1292_v3 = vld [vmem:[%s1249_s18 + $0x10] sm:$0xff]  ;;  %1646 = vmatpush.msrb.mxu1 %v1577_v38  ;;  %s8630_s15 = scalar_lea.vmem %s8147_s30, %s7397_s22  ;;  %s10283_s1 = sld [smem:[#allocation24_spill]] }
  0xa3   : > { %v1290_v1 = vld [vmem:[%s1249_s18] sm:$0xff]  ;;  %1359 = vmatpush.msra.mxu0 %v1302_v0  ;;  %7392 = vmatpush.msra.mxu2 %v1302_v0  ;;  %v1293_v4 = vld [vmem:[%s1249_s18 + $0x18] sm:$0xff]  ;;  %v1295_v6 = vld [vmem:[%s1249_s18 + $0x28] sm:$0xff]  ;;  %s10284_s28 = sld [smem:[#allocation25_spill]] }
  0xa4   : > { %6775 = vmatmul.msk.f32.vlgmr.msra.gmra.mxu0 %vm1307_vm0, %v1290_v1  ;;  %v1294_v5 = vld [vmem:[%s1249_s18 + $0x20] sm:$0xff]  ;;  %v1296_v7 = vld [vmem:[%s1249_s18 + $0x30] sm:$0xff]  ;;  %v1301_v8 = vld [vmem:[%s1249_s18 + $0x58] sm:$0xff]  ;;  %s8659_s2 = scalar_lea.vmem %s10278_s10, %s7397_s22  ;;  %s10289_s22 = sld [smem:[#allocation26_spill]] }
  0xa5   : > { %6786 = vmatmul.msk.f32.vlgmr.msra.gmra.mxu2 %vm1307_vm0, %v1301_v8  ;;  %v1297_v9 = vld [vmem:[%s1249_s18 + $0x38] sm:$0xff]  ;;  %v1298_v10 = vld [vmem:[%s1249_s18 + $0x40] sm:$0xff]  ;;  %v1299_v11 = vld [vmem:[%s1249_s18 + $0x48] sm:$0xff]  ;;  %s7398_s10 = smul.u32 72, %s8332_s23 }
  0xa6   : > { %v1300_v12 = vld [vmem:[%s1249_s18 + $0x50] sm:$0xff]  ;;  %7393 = vmatpush.msrb.mxu2 %v1425_v13  ;;  %s10288_s18 = sld [smem:[#allocation33_spill]] }
  0xa7   : > { %s10282_s16 = smov %s10281_s26 }
  0xa8   : > { %7394 = vmatpush.msrb.mxu2 %v1424_v15 }
  0xa9   : > { %s10285_s11 = smov %s10284_s28 }
  0xaa   : > { %1526 = vmatpush.msra.mxu2 %v1423_v47 }
  0xac   : > { %6776 = vmatmul.msk.f32.gmra.mxu0 %vm1307_vm0, %v1291_v2  ;;  %1527 = vmatpush.msra.mxu2 %v1422_v48 }
  0xb4   : > { %6777 = vmatmul.msk.f32.gmra.mxu0 %vm1307_vm0, %v1292_v3 }
  0xbc   : > { %6778 = vmatmul.msk.f32.gmra.mxu0 %vm1307_vm0, %v1293_v4 }
  0xc4   : > { %6779 = vmatmul.msk.f32.gmra.mxu0 %vm1307_vm0, %v1294_v5  ;;  %v8462_v5 = vld [vmem:[%s10261_s8] ss:$0 sm:$0xff] }
  0xcc   : > { %6780 = vmatmul.msk.f32.gmra.mxu0 %vm1307_vm0, %v1295_v6 }
  0xd4   : > { %6781 = vmatmul.msk.f32.gmra.mxu0 %vm1307_vm0, %v1296_v7 }
  0xdc   : > { %6782 = vmatmul.msk.f32.gmra.mxu0 %vm1307_vm0, %v1297_v9  ;;  %v1928_v9 = vld [vmem:[%s8077_s14 + $0x8] sm:$0xff] }
  0xe4   : > { %6783 = vmatmul.msk.f32.gmra.mxu0 %vm1307_vm0, %v1298_v10 }
  0xec   : > { %6784 = vmatmul.msk.f32.gmra.mxu0 %vm1307_vm0, %v1299_v11  ;;  %v1927_v11 = vld [vmem:[%s8077_s14] sm:$0xff] }
  0xf4   : > { %6785 = vmatmul.msk.f32.gmra.mxu0 %vm1307_vm0, %v1300_v12 }
 0x121   : > { %v1361_v18 = vpop.f32.mrf.mxu0 }
 0x122   : > { %v1362_v19 = vadd.f32 %v8353_v17, %v1361_v18 }
 0x124   : > { %1398 = vst.msk [vmem:[#allocation2] sm:$0xff] %vm1397_vm1, %v1362_v19 }
 0x128   : > { %v1394_v39 = vpop.f32.mrf.mxu2 }
 0x129   : > { %v1364_v20 = vpop.f32.mrf.mxu0  ;;  %v1395_v41 = vadd.f32 %v8353_v17, %v1394_v39 }
 0x12a   : > { %v1365_v21 = vadd.f32 %v8353_v17, %v1364_v20 }
 0x12b   : > { %1409 = vst.msk [vmem:[#allocation2 + $0x58] sm:$0xff] %vm1397_vm1, %v1395_v41  ;;  %v1410_v56 = vld [vmem:[#allocation2] sm:$0xff] }
 0x12c   : > { %1399 = vst.msk [vmem:[#allocation2 + $0x8] sm:$0xff] %vm1397_vm1, %v1365_v21 }
 0x131   : > { %v1367_v22 = vpop.f32.mrf.mxu0 }
 0x132   : > { %v1368_v23 = vadd.f32 %v8353_v17, %v1367_v22  ;;  %v1421_v57 = vld [vmem:[#allocation2 + $0x58] sm:$0xff] }
 0x133   : > { %v8360_v24 = vld [vmem:[#allocation2 + $0x8] sm:$0xff] }
 0x134   : > { %1400 = vst.msk [vmem:[#allocation2 + $0x10] sm:$0xff] %vm1397_vm1, %v1368_v23  ;;  %6787 = vmatmul.msk.f32.vlgmr.msra.gmra.mxu1 %vm1397_vm1, %v8360_v24  ;;  %6809 = vmatmul.msk.f32.vlgmr.msra.gmra.mxu3 %vm1397_vm1, %v8360_v24 }
 0x139   : > { %v1370_v25 = vpop.f32.mrf.mxu0 }
 0x13a   : > { %v1371_v26 = vadd.f32 %v8353_v17, %v1370_v25 }
 0x13b   : > { %v8368_v27 = vld [vmem:[#allocation2 + $0x10] sm:$0xff] }
 0x13c   : > { %1401 = vst.msk [vmem:[#allocation2 + $0x18] sm:$0xff] %vm1397_vm1, %v1371_v26  ;;  %6788 = vmatmul.msk.f32.gmra.mxu1 %vm1397_vm1, %v8368_v27  ;;  %6810 = vmatmul.msk.f32.gmra.mxu3 %vm1397_vm1, %v8368_v27  ;;  %v8474_v26 = vld [vmem:[%s8057_s25] ss:$0 sm:$0xff] }
 0x141   : > { %v1373_v28 = vpop.f32.mrf.mxu0 }
 0x142   : > { %v1374_v29 = vadd.f32 %v8353_v17, %v1373_v28 }
 0x143   : > { %v8376_v30 = vld [vmem:[#allocation2 + $0x18] sm:$0xff] }
 0x144   : > { %1402 = vst.msk [vmem:[#allocation2 + $0x20] sm:$0xff] %vm1397_vm1, %v1374_v29  ;;  %6789 = vmatmul.msk.f32.gmra.mxu1 %vm1397_vm1, %v8376_v30  ;;  %6811 = vmatmul.msk.f32.gmra.mxu3 %vm1397_vm1, %v8376_v30 }
 0x149   : > { %v1376_v31 = vpop.f32.mrf.mxu0 }
 0x14a   : > { %v1377_v32 = vadd.f32 %v8353_v17, %v1376_v31 }
 0x14b   : > { %v1414_v33 = vld [vmem:[#allocation2 + $0x20] sm:$0xff] }
 0x14c   : > { %1403 = vst.msk [vmem:[#allocation2 + $0x28] sm:$0xff] %vm1397_vm1, %v1377_v32  ;;  %6790 = vmatmul.msk.f32.gmra.mxu1 %vm1397_vm1, %v1414_v33  ;;  %6812 = vmatmul.msk.f32.gmra.mxu3 %vm1397_vm1, %v1414_v33 }
 0x151   : > { %v1379_v34 = vpop.f32.mrf.mxu0 }
 0x152   : > { %v1380_v35 = vadd.f32 %v8353_v17, %v1379_v34 }
 0x153   : > { %v1415_v36 = vld [vmem:[#allocation2 + $0x28] sm:$0xff] }
 0x154   : > { %1404 = vst.msk [vmem:[#allocation2 + $0x30] sm:$0xff] %vm1397_vm1, %v1380_v35  ;;  %6791 = vmatmul.msk.f32.gmra.mxu1 %vm1397_vm1, %v1415_v36  ;;  %6813 = vmatmul.msk.f32.gmra.mxu3 %vm1397_vm1, %v1415_v36 }
 0x159   : > { %v1382_v40 = vpop.f32.mrf.mxu0 }
 0x15a   : > { %v1383_v42 = vadd.f32 %v8353_v17, %v1382_v40 }
 0x15b   : > { %v1416_v43 = vld [vmem:[#allocation2 + $0x30] sm:$0xff] }
 0x15c   : > { %1405 = vst.msk [vmem:[#allocation2 + $0x38] sm:$0xff] %vm1397_vm1, %v1383_v42  ;;  %6792 = vmatmul.msk.f32.gmra.mxu1 %vm1397_vm1, %v1416_v43  ;;  %6814 = vmatmul.msk.f32.gmra.mxu3 %vm1397_vm1, %v1416_v43 }
 0x161   : > { %v1385_v44 = vpop.f32.mrf.mxu0 }
 0x162   : > { %v1386_v45 = vadd.f32 %v8353_v17, %v1385_v44 }
 0x163   : > { %v1417_v46 = vld [vmem:[#allocation2 + $0x38] sm:$0xff] }
 0x164   : > { %1406 = vst.msk [vmem:[#allocation2 + $0x40] sm:$0xff] %vm1397_vm1, %v1386_v45  ;;  %6793 = vmatmul.msk.f32.gmra.mxu1 %vm1397_vm1, %v1417_v46  ;;  %6815 = vmatmul.msk.f32.gmra.mxu3 %vm1397_vm1, %v1417_v46 }
 0x169   : > { %v1388_v49 = vpop.f32.mrf.mxu0 }
 0x16a   : > { %v1389_v50 = vadd.f32 %v8353_v17, %v1388_v49 }
 0x16b   : > { %v1418_v51 = vld [vmem:[#allocation2 + $0x40] sm:$0xff] }
 0x16c   : > { %1407 = vst.msk [vmem:[#allocation2 + $0x48] sm:$0xff] %vm1397_vm1, %v1389_v50  ;;  %6794 = vmatmul.msk.f32.gmra.mxu1 %vm1397_vm1, %v1418_v51  ;;  %6816 = vmatmul.msk.f32.gmra.mxu3 %vm1397_vm1, %v1418_v51 }
 0x171   : > { %v1391_v52 = vpop.f32.mrf.mxu0 }
 0x172   : > { %v1392_v53 = vadd.f32 %v8353_v17, %v1391_v52 }
 0x173   : > { %v1419_v54 = vld [vmem:[#allocation2 + $0x48] sm:$0xff] }
 0x174   : > { %1408 = vst.msk [vmem:[#allocation2 + $0x50] sm:$0xff] %vm1397_vm1, %v1392_v53  ;;  %6795 = vmatmul.msk.f32.gmra.mxu1 %vm1397_vm1, %v1419_v54  ;;  %6817 = vmatmul.msk.f32.gmra.mxu3 %vm1397_vm1, %v1419_v54 }
 0x17b   : > { %v1420_v55 = vld [vmem:[#allocation2 + $0x50] sm:$0xff] }
 0x17c   : > { %6796 = vmatmul.msk.f32.vlgmr.msrb.gmra.mxu2 %vm1397_vm1, %v1420_v55  ;;  %6818 = vmatmul.msk.f32.gmra.mxu3 %vm1397_vm1, %v1420_v55 }
 0x17d   : > { %6820 = vmatmul.msk.f32.vlgmr.msrb.gmra.mxu1 %vm1397_vm1, %v1410_v56  ;;  %1980 = vmatpush.msrb.mxu2 %v1928_v9 }
 0x17f   : > { %1981 = vmatpush.msrb.mxu2 %v1927_v11 }
 0x184   : > { %6797 = vmatmul.msk.f32.gmra.mxu2 %vm1397_vm1, %v1421_v57  ;;  %6819 = vmatmul.msk.f32.gmra.mxu3 %vm1397_vm1, %v1421_v57 }
 0x185   : > { %6821 = vmatmul.msk.f32.gmra.mxu1 %vm1397_vm1, %v8360_v24 }
 0x18c   : > { %6798 = vmatmul.msk.f32.vlgmr.msra.gmra.mxu2 %vm1397_vm1, %v1410_v56 }
 0x18d   : > { %6822 = vmatmul.msk.f32.gmra.mxu1 %vm1397_vm1, %v8368_v27 }
 0x194   : > { %6799 = vmatmul.msk.f32.gmra.mxu2 %vm1397_vm1, %v8360_v24 }
 0x195   : > { %6823 = vmatmul.msk.f32.gmra.mxu1 %vm1397_vm1, %v8376_v30 }
 0x19c   : > { %6800 = vmatmul.msk.f32.gmra.mxu2 %vm1397_vm1, %v8368_v27 }
 0x19d   : > { %6824 = vmatmul.msk.f32.gmra.mxu1 %vm1397_vm1, %v1414_v33 }
 0x1a4   : > { %6801 = vmatmul.msk.f32.gmra.mxu2 %vm1397_vm1, %v8376_v30 }
 0x1a5   : > { %6825 = vmatmul.msk.f32.gmra.mxu1 %vm1397_vm1, %v1415_v36 }
 0x1ac   : > { %6802 = vmatmul.msk.f32.gmra.mxu2 %vm1397_vm1, %v1414_v33 }
 0x1ad   : > { %6826 = vmatmul.msk.f32.gmra.mxu1 %vm1397_vm1, %v1416_v43 }
 0x1b1   : > { %v1476_v58 = vpop.f32.mrf.mxu1 }
 0x1b4   : > { %6803 = vmatmul.msk.f32.gmra.mxu2 %vm1397_vm1, %v1415_v36 }
 0x1b5   : > { %6827 = vmatmul.msk.f32.gmra.mxu1 %vm1397_vm1, %v1417_v46 }
 0x1b7   : > { %v1598_v1 = vpop.f32.mrf.mxu3 }
 0x1b9   : > { %v8437_v59 = vpop.f32.mrf.mxu1 }
 0x1bc   : > { %6804 = vmatmul.msk.f32.gmra.mxu2 %vm1397_vm1, %v1416_v43 }
 0x1bd   : > { %6828 = vmatmul.msk.f32.gmra.mxu1 %vm1397_vm1, %v1418_v51 }
 0x1bf   : > { %v1601_v3 = vpop.f32.mrf.mxu3 }
 0x1c1   : > { %v8441_v60 = vpop.f32.mrf.mxu1 }
 0x1c4   : > { %6805 = vmatmul.msk.f32.gmra.mxu2 %vm1397_vm1, %v1417_v46 }
 0x1c5   : > { %6829 = vmatmul.msk.f32.gmra.mxu1 %vm1397_vm1, %v1419_v54 }
 0x1c7   : > { %v1604_v6 = vpop.f32.mrf.mxu3 }
 0x1c9   : > { %v8445_v61 = vpop.f32.mrf.mxu1 }
 0x1cc   : > { %6806 = vmatmul.msk.f32.gmra.mxu2 %vm1397_vm1, %v1418_v51 }
 0x1cd   : > { %6830 = vmatmul.msk.f32.gmra.mxu1 %vm1397_vm1, %v1420_v55 }
 0x1cf   : > { %v1607_v16 = vpop.f32.mrf.mxu3 }
 0x1d1   : > { %v8449_v62 = vpop.f32.mrf.mxu1 }
 0x1d4   : > { %6807 = vmatmul.msk.f32.gmra.mxu2 %vm1397_vm1, %v1419_v54 }
 0x1d7   : > { %v1610_v25 = vpop.f32.mrf.mxu3 }
 0x1d9   : > { %v8452_v63 = vpop.f32.mrf.mxu1 }
 0x1dc   : > { %6808 = vmatmul.msk.f32.gmra.mxu2 %vm1397_vm1, %v1420_v55 }
 0x1df   : > { %v1613_v47 = vpop.f32.mrf.mxu3 }
 0x1e1   : > { %v8455_v0 = vpop.f32.mrf.mxu1 }
 0x1e9   : > { %v8457_v2 = vpop.f32.mrf.mxu1 }
 0x1f1   : > { %v8459_v4 = vpop.f32.mrf.mxu1 }
 0x1fa   : > { %v1648_v7 = vpop.f32.mrf.mxu1 }
 0x1fb   : > { %v1649_v8 = vadd.f32 %v1648_v7, %v1598_v1 }
 0x1fd   : > { %v1685_v10 = vadd.f32 %v8462_v5, %v1649_v8 }
 0x1ff   : > { %v6831_v12 = vmul.f32 -1.442695, %v1685_v10  ;;  %v8467_v13 = vpop.f32.mrf.mxu2 }
 0x201   : > { %7547 = vpow2.f32 %v6831_v12 }
 0x202   : > { %v1651_v14 = vpop.f32.mrf.mxu1 }
 0x203   : > { %v1652_v15 = vadd.f32 %v1651_v14, %v1601_v3 }
 0x205   : > { %v1686_v17 = vadd.f32 %v8462_v5, %v1652_v15 }
 0x207   : > { %v7548_v18 = vpop.eup %7547  ;;  %v6832_v19 = vmul.f32 -1.442695, %v1686_v17  ;;  %v8470_v20 = vpop.f32.mrf.mxu2 }
 0x208   : > { %v1740_v21 = vadd.f32 1.0, %v7548_v18 }
 0x209   : > { %7549 = vpow2.f32 %v6832_v19 }
 0x20a   : > { %7551 = vrcp.f32 %v1740_v21  ;;  %v1654_v22 = vpop.f32.mrf.mxu1  ;;  %v1762_v38 = vand.u32 2147483648, %v1740_v21  ;;  %v1760_v40 = vand.u32 2147483647, %v1740_v21  ;;  %vm1756_vm3 = vweird.f32 %v1740_v21 }
 0x20b   : > { %v1655_v23 = vadd.f32 %v1654_v22, %v1604_v6 }
 0x20c   : > { %v1763_v49 = vor.u32 1.1754944e-38, %v1762_v38  ;;  %vm1761_vm5 = vcmp.eq.f32.partialorder %v1760_v40, 8.507059e+37 }
 0x20d   : > { %v1687_v24 = vadd.f32 %v8462_v5, %v1655_v23 }
 0x20f   : > { %v7550_v27 = vpop.eup %7549  ;;  %v6833_v28 = vmul.f32 -1.442695, %v1687_v24  ;;  %v1529_v29 = vpop.f32.mrf.mxu2 }
 0x210   : > { %v7552_v30 = vpop.eup %7551  ;;  %v1741_v31 = vadd.f32 1.0, %v7550_v27  ;;  %v1530_v32 = vadd.f32 %v1529_v29, %v1476_v58 }
 0x211   : > { %v1752_v33 = vmul.f32 %v7552_v30, %v1740_v21  ;;  %7553 = vpow2.f32 %v6833_v28  ;;  %vm1757_vm2 = vweird.f32 %v7552_v30  ;;  %v1616_v21 = vpop.f32.mrf.mxu3 }
 0x212   : > { %7555 = vrcp.f32 %v1741_v31  ;;  %v1566_v34 = vadd.f32 %v8474_v26, %v1530_v32  ;;  %v1657_v35 = vpop.f32.mrf.mxu1  ;;  %vm1758_vm4 = vmor %vm1756_vm3, %vm1757_vm2  ;;  %v1777_v3 = vand.u32 2147483648, %v1741_v31  ;;  %vm1771_vm7 = vweird.f32 %v1741_v31 }
 0x213   : > { %v1753_v36 = vsub.f32 1.0, %v1752_v33  ;;  %v1658_v37 = vadd.f32 %v1657_v35, %v1607_v16 }
 0x214   : > { %7557 = vtanh.f32 %v1566_v34  ;;  %v1778_v15 = vor.u32 1.1754944e-38, %v1777_v3 }
 0x215   : > { %v1754_v39 = vmul.f32 %v7552_v30, %v1753_v36  ;;  %v1688_v41 = vadd.f32 %v8462_v5, %v1658_v37 }
 0x217   : > { %v7554_v42 = vpop.eup %7553  ;;  %v1755_v43 = vadd.f32 %v7552_v30, %v1754_v39  ;;  %v6834_v44 = vmul.f32 -1.442695, %v1688_v41  ;;  %v1532_v45 = vpop.f32.mrf.mxu2 }
 0x218   : > { %v7556_v46 = vpop.eup %7555  ;;  %v8478_v48 = vadd.f32 1.0, %v7554_v42  ;;  %v1533_v50 = vadd.f32 %v1532_v45, %v8437_v59  ;;  %v1775_v59 = vand.u32 2147483647, %v1741_v31 }
 0x219   : > { %v1767_v51 = vmul.f32 %v7556_v46, %v1741_v31  ;;  %v1759_v52 = vsel %vm1758_vm4, %v7552_v30, %v1755_v43  ;;  %7559 = vpow2.f32 %v6834_v44  ;;  %vm1772_vm6 = vweird.f32 %v7556_v46 }
 0x21a   : > { %v7558_v53 = vpop.eup %7557  ;;  %7561 = vrcp.f32 %v8478_v48  ;;  %v1764_v54 = vsel %vm1761_vm5, %v1763_v49, %v1759_v52  ;;  %v1567_v55 = vadd.f32 %v8474_v26, %v1533_v50  ;;  %v1660_v56 = vpop.f32.mrf.mxu1  ;;  %vm1773_vm8 = vmor %vm1771_vm7, %vm1772_vm6  ;;  %vm1776_vm9 = vcmp.eq.f32.partialorder %v1775_v59, 8.507059e+37 }
 0x21b   : > { %v1768_v57 = vsub.f32 1.0, %v1767_v51  ;;  %v8483_v58 = vmul.f32 %v7558_v53, %v1764_v54  ;;  %v1661_v1 = vadd.f32 %v1660_v56, %v1610_v25  ;;  %v1790_v30 = vand.u32 2147483647, %v8478_v48  ;;  %v1619_v49 = vpop.f32.mrf.mxu3 }
 0x21c   : > { %7563 = vtanh.f32 %v1567_v55  ;;  %vm1786_vm11 = vweird.f32 %v8478_v48 }
 0x21d   : > { %v1769_v6 = vmul.f32 %v7556_v46, %v1768_v57  ;;  %v1689_v7 = vadd.f32 %v8462_v5, %v1661_v1  ;;  %6842 = vmatmul.msk.f32.vlgmr.msrb.gmra.mxu2 %vm1397_vm1, %v8483_v58  ;;  %vm1791_vm13 = vcmp.eq.f32.partialorder %v1790_v30, 8.507059e+37 }
 0x21f   : > { %v7560_v8 = vpop.eup %7559  ;;  %v1770_v9 = vadd.f32 %v7556_v46, %v1769_v6  ;;  %v6835_v10 = vmul.f32 -1.442695, %v1689_v7  ;;  %v1535_v11 = vpop.f32.mrf.mxu2 }
 0x220   : > { %v7562_v12 = vpop.eup %7561  ;;  %v8488_v14 = vadd.f32 1.0, %v7560_v8  ;;  %v1536_v16 = vadd.f32 %v1535_v11, %v8441_v60  ;;  %v1792_v60 = vand.u32 2147483648, %v8478_v48 }
 0x221   : > { %v1782_v17 = vmul.f32 %v7562_v12, %v8478_v48  ;;  %v1774_v18 = vsel %vm1773_vm8, %v7556_v46, %v1770_v9  ;;  %7565 = vpow2.f32 %v6835_v10  ;;  %vm1787_vm10 = vweird.f32 %v7562_v12 }
 0x222   : > { %v7564_v19 = vpop.eup %7563  ;;  %7567 = vrcp.f32 %v8488_v14  ;;  %v1779_v22 = vsel %vm1776_vm9, %v1778_v15, %v1774_v18  ;;  %v1568_v23 = vadd.f32 %v8474_v26, %v1536_v16  ;;  %v1663_v24 = vpop.f32.mrf.mxu1  ;;  %vm1788_vm12 = vmor %vm1786_vm11, %vm1787_vm10  ;;  %v1793_v38 = vor.u32 1.1754944e-38, %v1792_v60 }
 0x223   : > { %v1783_v25 = vsub.f32 1.0, %v1782_v17  ;;  %v8494_v27 = vmul.f32 %v7564_v19, %v1779_v22  ;;  %v1664_v28 = vadd.f32 %v1663_v24, %v1613_v47  ;;  %v1805_v51 = vand.u32 2147483647, %v8488_v14  ;;  %v1622_v19 = vpop.f32.mrf.mxu3 }
 0x224   : > { %7569 = vtanh.f32 %v1568_v23  ;;  %vm1801_vm15 = vweird.f32 %v8488_v14 }
 0x225   : > { %v1784_v29 = vmul.f32 %v7562_v12, %v1783_v25  ;;  %v1690_v31 = vadd.f32 %v8462_v5, %v1664_v28  ;;  %6843 = vmatmul.msk.f32.gmra.mxu2 %vm1397_vm1, %v8494_v27  ;;  %vm1806_vm2 = vcmp.eq.f32.partialorder %v1805_v51, 8.507059e+37 }
 0x227   : > { %v7566_v32 = vpop.eup %7565  ;;  %v1785_v33 = vadd.f32 %v7562_v12, %v1784_v29  ;;  %v6836_v34 = vmul.f32 -1.442695, %v1690_v31  ;;  %v1538_v35 = vpop.f32.mrf.mxu2 }
 0x228   : > { %v7568_v36 = vpop.eup %7567  ;;  %v8502_v37 = vadd.f32 1.0, %v7566_v32  ;;  %v1539_v39 = vadd.f32 %v1538_v35, %v8445_v61  ;;  %v1807_v61 = vand.u32 2147483648, %v8488_v14 }
 0x229   : > { %v1797_v40 = vmul.f32 %v7568_v36, %v8488_v14  ;;  %v1789_v41 = vsel %vm1788_vm12, %v7562_v12, %v1785_v33  ;;  %7571 = vpow2.f32 %v6836_v34  ;;  %vm1802_vm14 = vweird.f32 %v7568_v36 }
 0x22a   : > { %v7570_v42 = vpop.eup %7569  ;;  %7573 = vrcp.f32 %v8502_v37  ;;  %v1794_v43 = vsel %vm1791_vm13, %v1793_v38, %v1789_v41  ;;  %v1569_v44 = vadd.f32 %v8474_v26, %v1539_v39  ;;  %v1666_v45 = vpop.f32.mrf.mxu1  ;;  %vm1803_vm0 = vmor %vm1801_vm15, %vm1802_vm14  ;;  %v1808_v3 = vor.u32 1.1754944e-38, %v1807_v61 }
 0x22b   : > { %v1798_v46 = vsub.f32 1.0, %v1797_v40  ;;  %v8508_v47 = vmul.f32 %v7570_v42, %v1794_v43  ;;  %v1667_v48 = vadd.f32 %v1666_v45, %v1616_v21  ;;  %v1822_v16 = vand.u32 2147483648, %v8502_v37 }
 0x22c   : > { %7575 = vtanh.f32 %v1569_v44  ;;  %v1820_v17 = vand.u32 2147483647, %v8502_v37  ;;  %vm1816_vm4 = vweird.f32 %v8502_v37 }
 0x22d   : > { %v1799_v50 = vmul.f32 %v7568_v36, %v1798_v46  ;;  %v1691_v52 = vadd.f32 %v8462_v5, %v1667_v48  ;;  %6844 = vmatmul.msk.f32.gmra.mxu2 %vm1397_vm1, %v8508_v47  ;;  %v1823_v60 = vor.u32 1.1754944e-38, %v1822_v16  ;;  %v1625_v48 = vpop.f32.mrf.mxu3 }
 0x22e   : > { %vm1821_vm6 = vcmp.eq.f32.partialorder %v1820_v17, 8.507059e+37 }
 0x22f   : > { %v7572_v53 = vpop.eup %7571  ;;  %v1800_v54 = vadd.f32 %v7568_v36, %v1799_v50  ;;  %v6837_v55 = vmul.f32 -1.442695, %v1691_v52  ;;  %v1541_v56 = vpop.f32.mrf.mxu2 }
 0x230   : > { %v7574_v57 = vpop.eup %7573  ;;  %v8516_v1 = vadd.f32 1.0, %v7572_v53  ;;  %v1542_v6 = vadd.f32 %v1541_v56, %v8449_v62 }
 0x231   : > { %v1812_v59 = vmul.f32 %v7574_v57, %v8502_v37  ;;  %v1804_v7 = vsel %vm1803_vm0, %v7568_v36, %v1800_v54  ;;  %7577 = vpow2.f32 %v6837_v55  ;;  %vm1817_vm3 = vweird.f32 %v7574_v57 }
 0x232   : > { %v7576_v8 = vpop.eup %7575  ;;  %7579 = vrcp.f32 %v8516_v1  ;;  %v1809_v9 = vsel %vm1806_vm2, %v1808_v3, %v1804_v7  ;;  %v1570_v10 = vadd.f32 %v8474_v26, %v1542_v6  ;;  %v1669_v11 = vpop.f32.mrf.mxu1  ;;  %vm1818_vm5 = vmor %vm1816_vm4, %vm1817_vm3  ;;  %v1837_v39 = vand.u32 2147483648, %v8516_v1 }
 0x233   : > { %v1813_v12 = vsub.f32 1.0, %v1812_v59  ;;  %v8522_v14 = vmul.f32 %v7576_v8, %v1809_v9  ;;  %v1670_v15 = vadd.f32 %v1669_v11, %v1619_v49  ;;  %v1835_v40 = vand.u32 2147483647, %v8516_v1 }
 0x234   : > { %7581 = vtanh.f32 %v1570_v10  ;;  %vm1831_vm8 = vweird.f32 %v8516_v1  ;;  %v1838_v61 = vor.u32 1.1754944e-38, %v1837_v39 }
 0x235   : > { %v1814_v62 = vmul.f32 %v7574_v57, %v1813_v12  ;;  %v1692_v18 = vadd.f32 %v8462_v5, %v1670_v15  ;;  %6845 = vmatmul.msk.f32.gmra.mxu2 %vm1397_vm1, %v8522_v14  ;;  %vm1836_vm10 = vcmp.eq.f32.partialorder %v1835_v40, 8.507059e+37 }
 0x237   : > { %v7578_v21 = vpop.eup %7577  ;;  %v1815_v22 = vadd.f32 %v7574_v57, %v1814_v62  ;;  %v6838_v23 = vmul.f32 -1.442695, %v1692_v18  ;;  %v1544_v24 = vpop.f32.mrf.mxu2 }
 0x238   : > { %v7580_v25 = vpop.eup %7579  ;;  %v8530_v28 = vadd.f32 1.0, %v7578_v21  ;;  %v1545_v29 = vadd.f32 %v1544_v24, %v8452_v63  ;;  %v1628_v21 = vpop.f32.mrf.mxu3 }
 0x239   : > { %v1827_v30 = vmul.f32 %v7580_v25, %v8516_v1  ;;  %v1819_v31 = vsel %vm1818_vm5, %v7574_v57, %v1815_v22  ;;  %7583 = vpow2.f32 %v6838_v23  ;;  %vm1832_vm7 = vweird.f32 %v7580_v25 }
 0x23a   : > { %v7582_v32 = vpop.eup %7581  ;;  %7585 = vrcp.f32 %v8530_v28  ;;  %v1824_v33 = vsel %vm1821_vm6, %v1823_v60, %v1819_v31  ;;  %v1571_v34 = vadd.f32 %v8474_v26, %v1545_v29  ;;  %v1672_v35 = vpop.f32.mrf.mxu1  ;;  %vm1833_vm9 = vmor %vm1831_vm8, %vm1832_vm7  ;;  %v1852_v6 = vand.u32 2147483648, %v8530_v28 }
 0x23b   : > { %v1828_v36 = vsub.f32 1.0, %v1827_v30  ;;  %v8536_v37 = vmul.f32 %v7582_v32, %v1824_v33  ;;  %v1673_v38 = vadd.f32 %v1672_v35, %v1622_v19  ;;  %v1850_v59 = vand.u32 2147483647, %v8530_v28 }
 0x23c   : > { %7587 = vtanh.f32 %v1571_v34  ;;  %vm1846_vm12 = vweird.f32 %v8530_v28  ;;  %v1853_v16 = vor.u32 1.1754944e-38, %v1852_v6 }
 0x23d   : > { %v1829_v63 = vmul.f32 %v7580_v25, %v1828_v36  ;;  %v1693_v41 = vadd.f32 %v8462_v5, %v1673_v38  ;;  %6846 = vmatmul.msk.f32.gmra.mxu2 %vm1397_vm1, %v8536_v37  ;;  %vm1851_vm14 = vcmp.eq.f32.partialorder %v1850_v59, 8.507059e+37 }
 0x23f   : > { %v7584_v42 = vpop.eup %7583  ;;  %v1830_v43 = vadd.f32 %v7580_v25, %v1829_v63  ;;  %v6839_v44 = vmul.f32 -1.442695, %v1693_v41  ;;  %v1547_v45 = vpop.f32.mrf.mxu2 }
 0x240   : > { %v7586_v46 = vpop.eup %7585  ;;  %v8544_v49 = vadd.f32 1.0, %v7584_v42  ;;  %v1548_v50 = vadd.f32 %v1547_v45, %v8455_v0 }
 0x241   : > { %v1842_v51 = vmul.f32 %v7586_v46, %v8530_v28  ;;  %v1834_v52 = vsel %vm1833_vm9, %v7580_v25, %v1830_v43  ;;  %7589 = vpow2.f32 %v6839_v44  ;;  %vm1847_vm11 = vweird.f32 %v7586_v46 }
 0x242   : > { %v7588_v53 = vpop.eup %7587  ;;  %7591 = vrcp.f32 %v8544_v49  ;;  %v1839_v54 = vsel %vm1836_vm10, %v1838_v61, %v1834_v52  ;;  %v1572_v55 = vadd.f32 %v8474_v26, %v1548_v50  ;;  %v1675_v56 = vpop.f32.mrf.mxu1  ;;  %vm1848_vm13 = vmor %vm1846_vm12, %vm1847_vm11  ;;  %v1867_v29 = vand.u32 2147483648, %v8544_v49 }
 0x243   : > { %v1843_v57 = vsub.f32 1.0, %v1842_v51  ;;  %v8550_v1 = vmul.f32 %v7588_v53, %v1839_v54  ;;  %v1676_v3 = vadd.f32 %v1675_v56, %v1625_v48  ;;  %v1865_v30 = vand.u32 2147483647, %v8544_v49 }
 0x244   : > { %7593 = vtanh.f32 %v1572_v55  ;;  %vm1861_vm0 = vweird.f32 %v8544_v49  ;;  %v1868_v39 = vor.u32 1.1754944e-38, %v1867_v29 }
 0x245   : > { %v1844_v0 = vmul.f32 %v7586_v46, %v1843_v57  ;;  %v1694_v7 = vadd.f32 %v8462_v5, %v1676_v3  ;;  %6847 = vmatmul.msk.f32.gmra.mxu2 %vm1397_vm1, %v8550_v1  ;;  %vm1866_vm3 = vcmp.eq.f32.partialorder %v1865_v30, 8.507059e+37 }
 0x247   : > { %v7590_v8 = vpop.eup %7589  ;;  %v1845_v9 = vadd.f32 %v7586_v46, %v1844_v0  ;;  %v6840_v10 = vmul.f32 -1.442695, %v1694_v7  ;;  %v1550_v11 = vpop.f32.mrf.mxu2 }
 0x248   : > { %v7592_v12 = vpop.eup %7591  ;;  %v1748_v15 = vadd.f32 1.0, %v7590_v8  ;;  %v1551_v62 = vadd.f32 %v1550_v11, %v8457_v2 }
 0x249   : > { %v1857_v17 = vmul.f32 %v7592_v12, %v8544_v49  ;;  %v1849_v18 = vsel %vm1848_vm13, %v7586_v46, %v1845_v9  ;;  %7595 = vpow2.f32 %v6840_v10  ;;  %vm1862_vm15 = vweird.f32 %v7592_v12 }
 0x24a   : > { %v7594_v19 = vpop.eup %7593  ;;  %7597 = vrcp.f32 %v1748_v15  ;;  %v1854_v22 = vsel %vm1851_vm14, %v1853_v16, %v1849_v18  ;;  %v1573_v23 = vadd.f32 %v8474_v26, %v1551_v62  ;;  %v1678_v24 = vpop.f32.mrf.mxu1  ;;  %vm1863_vm2 = vmor %vm1861_vm0, %vm1862_vm15  ;;  %v1882_v46 = vand.u32 2147483648, %v1748_v15 }
 0x24b   : > { %v1858_v25 = vsub.f32 1.0, %v1857_v17  ;;  %v8561_v28 = vmul.f32 %v7594_v19, %v1854_v22  ;;  %v1679_v60 = vadd.f32 %v1678_v24, %v1628_v21  ;;  %v1880_v49 = vand.u32 2147483647, %v1748_v15 }
 0x24c   : > { %7599 = vtanh.f32 %v1573_v23  ;;  %vm1876_vm5 = vweird.f32 %v1748_v15  ;;  %v1883_v53 = vor.u32 1.1754944e-38, %v1882_v46  ;;  %vm2039_vm0 = vcmask 719872  }
 0x24d   : > { %v1859_v2 = vmul.f32 %v7592_v12, %v1858_v25  ;;  %v1695_v31 = vadd.f32 %v8462_v5, %v1679_v60  ;;  %6848 = vmatmul.msk.f32.gmra.mxu2 %vm1397_vm1, %v8561_v28  ;;  %vm1881_vm7 = vcmp.eq.f32.partialorder %v1880_v49, 8.507059e+37 }
 0x24f   : > { %v7596_v32 = vpop.eup %7595  ;;  %v1860_v33 = vadd.f32 %v7592_v12, %v1859_v2  ;;  %v6841_v34 = vmul.f32 -1.442695, %v1695_v31  ;;  %v1553_v35 = vpop.f32.mrf.mxu2  ;;  %v2028_v31 = vld [vmem:[%s8107_s20] sm:$0xff] }
 0x250   : > { %v7598_v36 = vpop.eup %7597  ;;  %v1749_v38 = vadd.f32 1.0, %v7596_v32  ;;  %v1554_v63 = vadd.f32 %v1553_v35, %v8459_v4  ;;  %v2123_v32 = vld [vmem:[%s10262_s6] sm:$0xff]  ;;  %v2124_v35 = vld [vmem:[%s10262_s6 + $0x8] sm:$0xff] }
 0x251   : > { %v1872_v40 = vmul.f32 %v7598_v36, %v1748_v15  ;;  %v1864_v41 = vsel %vm1863_vm2, %v7592_v12, %v1860_v33  ;;  %7601 = vpow2.f32 %v6841_v34  ;;  %vm1877_vm4 = vweird.f32 %v7598_v36  ;;  %v2217_v33 = vld [vmem:[%s8630_s15] sm:$0xff]  ;;  %v2029_v34 = vld [vmem:[%s8107_s20 + $0x8] sm:$0xff] }
 0x252   : > { %v7600_v5 = vpop.eup %7599  ;;  %7603 = vrcp.f32 %v1749_v38  ;;  %v1869_v42 = vsel %vm1866_vm3, %v1868_v39, %v1864_v41  ;;  %v1574_v43 = vadd.f32 %v8474_v26, %v1554_v63  ;;  %vm1878_vm6 = vmor %vm1876_vm5, %vm1877_vm4  ;;  %v1897_v7 = vand.u32 2147483648, %v1749_v38  ;;  %v2125_v39 = vld [vmem:[%s10262_s6 + $0x10] sm:$0xff]  ;;  %v2031_v41 = vld [vmem:[%s8107_s20 + $0x18] sm:$0xff] }
 0x253   : > { %v1873_v44 = vsub.f32 1.0, %v1872_v40  ;;  %v8571_v45 = vmul.f32 %v7600_v5, %v1869_v42  ;;  %v1895_v9 = vand.u32 2147483647, %v1749_v38  ;;  %vm1891_vm9 = vweird.f32 %v1749_v38  ;;  %v2219_v63 = vld [vmem:[%s8630_s15 + $0x10] sm:$0xff]  ;;  %v2311_v40 = vld [vmem:[%s8659_s2] sm:$0xff]  ;;  %v2126_v5 = vld [vmem:[%s10262_s6 + $0x18] sm:$0xff] }
 0x254   : > { %7605 = vtanh.f32 %v1574_v43  ;;  %v1898_v12 = vor.u32 1.1754944e-38, %v1897_v7  ;;  %v2220_v42 = vld [vmem:[%s8630_s15 + $0x18] sm:$0xff]  ;;  %v2312_v43 = vld [vmem:[%s8659_s2 + $0x8] sm:$0xff]  ;;  %vm2016_vm2 = vcmask 261120   ;;  %v2223_v7 = vld [vmem:[%s8630_s15 + $0x30] sm:$0xff] }
 0x255   : > { %v1874_v48 = vmul.f32 %v7598_v36, %v1873_v44  ;;  %6849 = vmatmul.msk.f32.gmra.mxu2 %vm1397_vm1, %v8571_v45  ;;  %vm1896_vm11 = vcmp.eq.f32.partialorder %v1895_v9, 8.507059e+37  ;;  %v8674_v44 = vld [vmem:[%s10279_s7] ss:$0 sm:$0xff]  ;;  %v2406_v9 = vld [vmem:[%s10280_s24 + $0x8] sm:$0xff] }
 0x257   : > { %v7602_v4 = vpop.eup %7601  ;;  %v1875_v61 = vadd.f32 %v7598_v36, %v1874_v48  ;;  %v1556_v50 = vpop.f32.mrf.mxu2  ;;  %v2032_v48 = vld [vmem:[%s8107_s20 + $0x20] sm:$0xff] }
 0x258   : > { %v7604_v51 = vpop.eup %7603  ;;  %v1750_v52 = vadd.f32 1.0, %v7602_v4  ;;  %v1557_v54 = vadd.f32 %v1556_v50, %v8467_v13  ;;  %v2127_v4 = vld [vmem:[%s10262_s6 + $0x20] sm:$0xff]  ;;  %v2313_v50 = vld [vmem:[%s8659_s2 + $0x10] sm:$0xff] }
 0x259   : > { %v1887_v55 = vmul.f32 %v7604_v51, %v1749_v38  ;;  %v1879_v56 = vsel %vm1878_vm6, %v7598_v36, %v1875_v61  ;;  %vm1892_vm8 = vweird.f32 %v7604_v51  ;;  %v2218_v36 = vld [vmem:[%s8630_s15 + $0x8] sm:$0xff]  ;;  %v2030_v38 = vld [vmem:[%s8107_s20 + $0x10] sm:$0xff]  ;;  %v2221_v61 = vld [vmem:[%s8630_s15 + $0x20] sm:$0xff] }
 0x25a   : > { %v7606_v57 = vpop.eup %7605  ;;  %7607 = vrcp.f32 %v1750_v52  ;;  %v1884_v3 = vsel %vm1881_vm7, %v1883_v53, %v1879_v56  ;;  %v1575_v6 = vadd.f32 %v8474_v26, %v1557_v54  ;;  %vm1893_vm10 = vmor %vm1891_vm9, %vm1892_vm8  ;;  %v1912_v23 = vand.u32 2147483648, %v1750_v52  ;;  %v2128_v54 = vld [vmem:[%s10262_s6 + $0x28] sm:$0xff]  ;;  %v2314_v56 = vld [vmem:[%s8659_s2 + $0x18] sm:$0xff] }
 0x25b   : > { %v1888_v0 = vsub.f32 1.0, %v1887_v55  ;;  %v8577_v59 = vmul.f32 %v7606_v57, %v1884_v3  ;;  %v1910_v25 = vand.u32 2147483647, %v1750_v52  ;;  %vm1906_vm13 = vweird.f32 %v1750_v52  ;;  %v2222_v55 = vld [vmem:[%s8630_s15 + $0x28] sm:$0xff]  ;;  %v2034_v3 = vld [vmem:[%s8107_s20 + $0x30] sm:$0xff] }
 0x25c   : > { %7609 = vtanh.f32 %v1575_v6 }
 0x25d   : > { %v1889_v8 = vmul.f32 %v7604_v51, %v1888_v0  ;;  %6850 = vmatmul.msk.f32.gmra.mxu2 %vm1397_vm1, %v8577_v59  ;;  %vm1911_vm15 = vcmp.eq.f32.partialorder %v1910_v25, 8.507059e+37  ;;  %v2129_v0 = vld [vmem:[%s10262_s6 + $0x30] sm:$0xff] }
 0x25f   : > { %v1890_v13 = vadd.f32 %v7604_v51, %v1889_v8  ;;  %v1559_v10 = vpop.f32.mrf.mxu2  ;;  %v2315_v8 = vld [vmem:[%s8659_s2 + $0x20] sm:$0xff] }
 0x260   : > { %v7608_v11 = vpop.eup %7607  ;;  %v1560_v15 = vadd.f32 %v1559_v10, %v8470_v20  ;;  %v1913_v20 = vor.u32 1.1754944e-38, %v1912_v23  ;;  %v2035_v10 = vld [vmem:[%s8107_s20 + $0x38] sm:$0xff]  ;;  %v2225_v23 = vld [vmem:[%s8630_s15 + $0x40] sm:$0xff] }
 0x261   : > { %v1902_v16 = vmul.f32 %v7608_v11, %v1750_v52  ;;  %v1894_v62 = vsel %vm1893_vm10, %v7604_v51, %v1890_v13  ;;  %vm1907_vm12 = vweird.f32 %v7608_v11  ;;  %v2033_v52 = vld [vmem:[%s8107_s20 + $0x28] sm:$0xff] }
 0x262   : > { %v7610_v17 = vpop.eup %7609  ;;  %v1899_v18 = vsel %vm1896_vm11, %v1898_v12, %v1894_v62  ;;  %v1576_v19 = vadd.f32 %v8474_v26, %v1560_v15  ;;  %vm1908_vm14 = vmor %vm1906_vm13, %vm1907_vm12  ;;  %v2130_v12 = vld [vmem:[%s10262_s6 + $0x38] sm:$0xff]  ;;  %v2316_v62 = vld [vmem:[%s8659_s2 + $0x28] sm:$0xff] }
 0x263   : > { %v1903_v21 = vsub.f32 1.0, %v1902_v16  ;;  %v8583_v22 = vmul.f32 %v7610_v17, %v1899_v18  ;;  %v2224_v15 = vld [vmem:[%s8630_s15 + $0x38] sm:$0xff]  ;;  %v2405_v16 = vld [vmem:[%s10280_s24] sm:$0xff] }
 0x264   : > { %7611 = vtanh.f32 %v1576_v19  ;;  %v2036_v18 = vld [vmem:[%s8107_s20 + $0x40] sm:$0xff] }
 0x265   : > { %v1904_v24 = vmul.f32 %v7608_v11, %v1903_v21  ;;  %6851 = vmatmul.msk.f32.gmra.mxu2 %vm1397_vm1, %v8583_v22  ;;  %v2131_v21 = vld [vmem:[%s10262_s6 + $0x40] sm:$0xff] }
 0x267   : > { %v1905_v60 = vadd.f32 %v7608_v11, %v1904_v24  ;;  %v2317_v24 = vld [vmem:[%s8659_s2 + $0x30] sm:$0xff] }
 0x269   : > { %v1909_v29 = vsel %vm1908_vm14, %v7608_v11, %v1905_v60  ;;  %v2037_v60 = vld [vmem:[%s8107_s20 + $0x48] sm:$0xff] }
 0x26a   : > { %v7612_v2 = vpop.eup %7611  ;;  %v1914_v30 = vsel %vm1911_vm15, %v1913_v20, %v1909_v29  ;;  %v2132_v29 = vld [vmem:[%s10262_s6 + $0x48] sm:$0xff] }
 0x26b   : > { %v8587_v26 = vmul.f32 %v7612_v2, %v1914_v30  ;;  %v2226_v2 = vld [vmem:[%s8630_s15 + $0x48] sm:$0xff]  ;;  %v2318_v30 = vld [vmem:[%s8659_s2 + $0x38] sm:$0xff] }
 0x26d   : > { %6852 = vmatmul.msk.f32.gmra.mxu2 %vm1397_vm1, %v8587_v26  ;;  %2078 = vmatpush.msrb.mxu3 %v8587_v26 }
 0x26e   : > { %2172 = vmatpush.msrb.mxu0 %v8587_v26  ;;  %2266 = vmatpush.msra.mxu1 %v8587_v26 }
 0x26f   : > { %2360 = vmatpush.msra.mxu2 %v8587_v26  ;;  %2079 = vmatpush.msrb.mxu3 %v8583_v22 }
 0x270   : > { %2173 = vmatpush.msrb.mxu0 %v8583_v22  ;;  %2267 = vmatpush.msra.mxu1 %v8583_v22 }
 0x271   : > { %2361 = vmatpush.msra.mxu2 %v8583_v22  ;;  %2080 = vmatpush.msrb.mxu3 %v8577_v59 }
 0x272   : > { %2174 = vmatpush.msrb.mxu0 %v8577_v59  ;;  %2268 = vmatpush.msra.mxu1 %v8577_v59 }
 0x273   : > { %2362 = vmatpush.msra.mxu2 %v8577_v59  ;;  %2081 = vmatpush.msrb.mxu3 %v8571_v45 }
 0x274   : > { %2175 = vmatpush.msrb.mxu0 %v8571_v45  ;;  %2269 = vmatpush.msra.mxu1 %v8571_v45 }
 0x275   : > { %2363 = vmatpush.msra.mxu2 %v8571_v45  ;;  %2082 = vmatpush.msrb.mxu3 %v8561_v28 }
 0x276   : > { %2176 = vmatpush.msrb.mxu0 %v8561_v28  ;;  %2270 = vmatpush.msra.mxu1 %v8561_v28 }
 0x277   : > { %2364 = vmatpush.msra.mxu2 %v8561_v28  ;;  %2083 = vmatpush.msrb.mxu3 %v8550_v1 }
 0x278   : > { %2177 = vmatpush.msrb.mxu0 %v8550_v1  ;;  %2271 = vmatpush.msra.mxu1 %v8550_v1 }
 0x279   : > { %2365 = vmatpush.msra.mxu2 %v8550_v1  ;;  %2084 = vmatpush.msrb.mxu3 %v8536_v37 }
 0x27a   : > { %2178 = vmatpush.msrb.mxu0 %v8536_v37  ;;  %2272 = vmatpush.msra.mxu1 %v8536_v37 }
 0x27b   : > { %2366 = vmatpush.msra.mxu2 %v8536_v37  ;;  %2085 = vmatpush.msrb.mxu3 %v8522_v14 }
 0x27c   : > { %2179 = vmatpush.msrb.mxu0 %v8522_v14  ;;  %2273 = vmatpush.msra.mxu1 %v8522_v14 }
 0x27d   : > { %2367 = vmatpush.msra.mxu2 %v8522_v14  ;;  %2086 = vmatpush.msrb.mxu3 %v8508_v47 }
 0x27e   : > { %2180 = vmatpush.msrb.mxu0 %v8508_v47  ;;  %2274 = vmatpush.msra.mxu1 %v8508_v47 }
 0x27f   : > { %2368 = vmatpush.msra.mxu2 %v8508_v47  ;;  %2087 = vmatpush.msrb.mxu3 %v8494_v27 }
 0x280   : > { %2181 = vmatpush.msrb.mxu0 %v8494_v27  ;;  %2275 = vmatpush.msra.mxu1 %v8494_v27 }
 0x281   : > { %2369 = vmatpush.msra.mxu2 %v8494_v27  ;;  %2088 = vmatpush.msrb.mxu3 %v8483_v58 }
 0x282   : > { %2182 = vmatpush.msrb.mxu0 %v8483_v58  ;;  %2276 = vmatpush.msra.mxu1 %v8483_v58 }
 0x283   : > { %2370 = vmatpush.msra.mxu2 %v8483_v58  ;;  %6853 = vmatmul.msk.f32.vlgmr.msrb.gmra.mxu3 %vm2039_vm0, %v2028_v31 }
 0x284   : > { %6864 = vmatmul.msk.f32.vlgmr.msrb.gmra.mxu0 %vm2039_vm0, %v2123_v32  ;;  %6875 = vmatmul.msk.f32.vlgmr.msra.gmra.mxu1 %vm2039_vm0, %v2217_v33  ;;  %v2038_v32 = vld [vmem:[%s8107_s20 + $0x50] sm:$0xff] }
 0x285   : > { %6886 = vmatmul.msk.f32.vlgmr.msra.gmra.mxu2 %vm2039_vm0, %v2311_v40  ;;  %2512 = vmatpush.msra.mxu0 %v2406_v9  ;;  %v2320_v40 = vld [vmem:[%s8659_s2 + $0x48] sm:$0xff] }
 0x287   : > { %2513 = vmatpush.msra.mxu0 %v2405_v16 }
 0x28b   : > { %6854 = vmatmul.msk.f32.gmra.mxu3 %vm2039_vm0, %v2029_v34  ;;  %v2133_v34 = vld [vmem:[%s10262_s6 + $0x50] sm:$0xff] }
 0x28c   : > { %6865 = vmatmul.msk.f32.gmra.mxu0 %vm2039_vm0, %v2124_v35  ;;  %6876 = vmatmul.msk.f32.gmra.mxu1 %vm2039_vm0, %v2218_v36  ;;  %v2227_v35 = vld [vmem:[%s8630_s15 + $0x50] sm:$0xff]  ;;  %v2408_v36 = vld [vmem:[%s10280_s24 + $0x18] sm:$0xff]  ;;  %s10290_s15 = smov %s10289_s22 }
 0x28d   : > { %6887 = vmatmul.msk.f32.gmra.mxu2 %vm2039_vm0, %v2312_v43  ;;  %2462 = vmatpush.msra.mxu3 %v2408_v36  ;;  %v2407_v43 = vld [vmem:[%s10280_s24 + $0x10] sm:$0xff] }
 0x28f   : > { %2463 = vmatpush.msra.mxu3 %v2407_v43 }
 0x293   : > { %6855 = vmatmul.msk.f32.gmra.mxu3 %vm2039_vm0, %v2030_v38  ;;  %v2319_v38 = vld [vmem:[%s8659_s2 + $0x40] sm:$0xff] }
 0x294   : > { %6866 = vmatmul.msk.f32.gmra.mxu0 %vm2039_vm0, %v2125_v39  ;;  %6877 = vmatmul.msk.f32.gmra.mxu1 %vm2039_vm0, %v2219_v63 }
 0x295   : > { %6888 = vmatmul.msk.f32.gmra.mxu2 %vm2039_vm0, %v2313_v50 }
 0x29b   : > { %6856 = vmatmul.msk.f32.gmra.mxu3 %vm2039_vm0, %v2031_v41 }
 0x29c   : > { %6867 = vmatmul.msk.f32.gmra.mxu0 %vm2039_vm0, %v2126_v5  ;;  %6878 = vmatmul.msk.f32.gmra.mxu1 %vm2039_vm0, %v2220_v42  ;;  %v2321_v42 = vld [vmem:[%s8659_s2 + $0x50] sm:$0xff]  ;;  %s10291_s2 = sld [smem:[#allocation30_spill]] }
 0x29d   : > { %6889 = vmatmul.msk.f32.gmra.mxu2 %vm2039_vm0, %v2314_v56 }
 0x2a0   : > { %v1983_v46 = vpop.f32.mrf.mxu2 }
 0x2a1   : > { %v1984_v49 = vadd.f32 %v8674_v44, %v1983_v46 }
 0x2a3   : > { %2017 = vst.msk [vmem:[#allocation3] sm:$0xff] %vm2016_vm2, %v1984_v49  ;;  %6857 = vmatmul.msk.f32.gmra.mxu3 %vm2039_vm0, %v2032_v48  ;;  %v2412_v48 = vld [vmem:[%s10280_s24 + $0x38] sm:$0xff]  ;;  %v2411_v49 = vld [vmem:[%s10280_s24 + $0x30] sm:$0xff] }
 0x2a4   : > { %6868 = vmatmul.msk.f32.gmra.mxu0 %vm2039_vm0, %v2127_v4  ;;  %6879 = vmatmul.msk.f32.gmra.mxu1 %vm2039_vm0, %v2221_v61  ;;  %v2410_v4 = vld [vmem:[%s10280_s24 + $0x28] sm:$0xff]  ;;  %v2409_v61 = vld [vmem:[%s10280_s24 + $0x20] sm:$0xff] }
 0x2a5   : > { %6890 = vmatmul.msk.f32.gmra.mxu2 %vm2039_vm0, %v2315_v8  ;;  %2595 = vmatpush.msrb.mxu1 %v2410_v4 }
 0x2a6   : > { %2689 = vmatpush.msrb.mxu2 %v2412_v48 }
 0x2a7   : > { %2596 = vmatpush.msrb.mxu1 %v2409_v61  ;;  %v6976_v61 = vld [vmem:[%s8062_s29 + $0x18] sm:$0xff] }
 0x2a8   : > { %v1986_v51 = vpop.f32.mrf.mxu2  ;;  %2690 = vmatpush.msrb.mxu2 %v2411_v49 }
 0x2a9   : > { %v1987_v53 = vadd.f32 %v8674_v44, %v1986_v51 }
 0x2aa   : > { %3113 = vmatpush.msra.mxu2 %v6976_v61 }
 0x2ab   : > { %2018 = vst.msk [vmem:[#allocation3 + $0x8] sm:$0xff] %vm2016_vm2, %v1987_v53  ;;  %6858 = vmatmul.msk.f32.gmra.mxu3 %vm2039_vm0, %v2033_v52 }
 0x2ac   : > { %6869 = vmatmul.msk.f32.gmra.mxu0 %vm2039_vm0, %v2128_v54  ;;  %6880 = vmatmul.msk.f32.gmra.mxu1 %vm2039_vm0, %v2222_v55 }
 0x2ad   : > { %6891 = vmatmul.msk.f32.gmra.mxu2 %vm2039_vm0, %v2316_v62 }
 0x2b0   : > { %v1989_v57 = vpop.f32.mrf.mxu2 }
 0x2b1   : > { %v1990_v6 = vadd.f32 %v8674_v44, %v1989_v57 }
 0x2b3   : > { %2019 = vst.msk [vmem:[#allocation3 + $0x10] sm:$0xff] %vm2016_vm2, %v1990_v6  ;;  %6859 = vmatmul.msk.f32.gmra.mxu3 %vm2039_vm0, %v2034_v3 }
 0x2b4   : > { %6870 = vmatmul.msk.f32.gmra.mxu0 %vm2039_vm0, %v2129_v0  ;;  %6881 = vmatmul.msk.f32.gmra.mxu1 %vm2039_vm0, %v2223_v7  ;;  %v2414_v7 = vld [vmem:[%s10280_s24 + $0x48] sm:$0xff] }
 0x2b5   : > { %6892 = vmatmul.msk.f32.gmra.mxu2 %vm2039_vm0, %v2317_v24  ;;  %2783 = vmatpush.msrb.mxu3 %v2414_v7  ;;  %v8860_v7 = vld [vmem:[%s10283_s1] ss:$0 sm:$0xff] }
 0x2b8   : > { %v1992_v13 = vpop.f32.mrf.mxu2 }
 0x2b9   : > { %v1993_v11 = vadd.f32 %v8674_v44, %v1992_v13 }
 0x2bb   : > { %2020 = vst.msk [vmem:[#allocation3 + $0x18] sm:$0xff] %vm2016_vm2, %v1993_v11  ;;  %6860 = vmatmul.msk.f32.gmra.mxu3 %vm2039_vm0, %v2035_v10  ;;  %v2413_v11 = vld [vmem:[%s10280_s24 + $0x40] sm:$0xff] }
 0x2bc   : > { %6871 = vmatmul.msk.f32.gmra.mxu0 %vm2039_vm0, %v2130_v12  ;;  %6882 = vmatmul.msk.f32.gmra.mxu1 %vm2039_vm0, %v2224_v15 }
 0x2bd   : > { %6893 = vmatmul.msk.f32.gmra.mxu2 %vm2039_vm0, %v2318_v30  ;;  %2784 = vmatpush.msrb.mxu3 %v2413_v11 }
 0x2c0   : > { %v1995_v17 = vpop.f32.mrf.mxu2 }
 0x2c1   : > { %v1996_v19 = vadd.f32 %v8674_v44, %v1995_v17 }
 0x2c3   : > { %2021 = vst.msk [vmem:[#allocation3 + $0x20] sm:$0xff] %vm2016_vm2, %v1996_v19  ;;  %6861 = vmatmul.msk.f32.gmra.mxu3 %vm2039_vm0, %v2036_v18 }
 0x2c4   : > { %6872 = vmatmul.msk.f32.gmra.mxu0 %vm2039_vm0, %v2131_v21  ;;  %6883 = vmatmul.msk.f32.gmra.mxu1 %vm2039_vm0, %v2225_v23 }
 0x2c5   : > { %6894 = vmatmul.msk.f32.gmra.mxu2 %vm2039_vm0, %v2319_v38 }
 0x2c8   : > { %v1998_v25 = vpop.f32.mrf.mxu2 }
 0x2c9   : > { %v1999_v20 = vadd.f32 %v8674_v44, %v1998_v25 }
 0x2cb   : > { %2022 = vst.msk [vmem:[#allocation3 + $0x28] sm:$0xff] %vm2016_vm2, %v1999_v20  ;;  %6862 = vmatmul.msk.f32.gmra.mxu3 %vm2039_vm0, %v2037_v60 }
 0x2cc   : > { %6873 = vmatmul.msk.f32.gmra.mxu0 %vm2039_vm0, %v2132_v29  ;;  %6884 = vmatmul.msk.f32.gmra.mxu1 %vm2039_vm0, %v2226_v2 }
 0x2cd   : > { %6895 = vmatmul.msk.f32.gmra.mxu2 %vm2039_vm0, %v2320_v40 }
 0x2d0   : > { %v2001_v31 = vpop.f32.mrf.mxu2 }
 0x2d1   : > { %v2002_v33 = vadd.f32 %v8674_v44, %v2001_v31 }
 0x2d3   : > { %2023 = vst.msk [vmem:[#allocation3 + $0x30] sm:$0xff] %vm2016_vm2, %v2002_v33  ;;  %6863 = vmatmul.msk.f32.gmra.mxu3 %vm2039_vm0, %v2038_v32 }
 0x2d4   : > { %6874 = vmatmul.msk.f32.gmra.mxu0 %vm2039_vm0, %v2133_v34  ;;  %6885 = vmatmul.msk.f32.gmra.mxu1 %vm2039_vm0, %v2227_v35 }
 0x2d5   : > { %6896 = vmatmul.msk.f32.gmra.mxu2 %vm2039_vm0, %v2321_v42 }
 0x2d8   : > { %v2004_v39 = vpop.f32.mrf.mxu2 }
 0x2d9   : > { %v2005_v63 = vadd.f32 %v8674_v44, %v2004_v39 }
 0x2db   : > { %2024 = vst.msk [vmem:[#allocation3 + $0x38] sm:$0xff] %vm2016_vm2, %v2005_v63 }
 0x2dc   : > { %6908 = vmatmul.msk.f32.vlgmr.msra.gmra.mxu0 %vm1397_vm1, %v8483_v58 }
 0x2e0   : > { %v2007_v41 = vpop.f32.mrf.mxu2 }
 0x2e1   : > { %v2008_v5 = vadd.f32 %v8674_v44, %v2007_v41 }
 0x2e3   : > { %2025 = vst.msk [vmem:[#allocation3 + $0x40] sm:$0xff] %vm2016_vm2, %v2008_v5 }
 0x2e4   : > { %6909 = vmatmul.msk.f32.gmra.mxu0 %vm1397_vm1, %v8494_v27 }
 0x2e8   : > { %v2010_v46 = vpop.f32.mrf.mxu2 }
 0x2e9   : > { %v2011_v58 = vadd.f32 %v8674_v44, %v2010_v46 }
 0x2eb   : > { %2026 = vst.msk [vmem:[#allocation3 + $0x48] sm:$0xff] %vm2016_vm2, %v2011_v58 }
 0x2ec   : > { %6910 = vmatmul.msk.f32.gmra.mxu0 %vm1397_vm1, %v8508_v47 }
 0x2f0   : > { %v2013_v27 = vpop.f32.mrf.mxu2 }
 0x2f1   : > { %v2014_v50 = vadd.f32 %v8674_v44, %v2013_v27 }
 0x2f3   : > { %2027 = vst.msk [vmem:[#allocation3 + $0x50] sm:$0xff] %vm2016_vm2, %v2014_v50  ;;  %v6955_v50 = vld [vmem:[%s8052_s21 + $0x18] sm:$0xff] }
 0x2f4   : > { %6911 = vmatmul.msk.f32.gmra.mxu0 %vm1397_vm1, %v8522_v14 }
 0x2f5   : > { %2955 = vmatpush.msrb.mxu0 %v6955_v50 }
 0x2fc   : > { %6912 = vmatmul.msk.f32.gmra.mxu0 %vm1397_vm1, %v8536_v37 }
 0x301   : > { %v2184_v51 = vpop.f32.mrf.mxu0  ;;  %v2278_v52 = vpop.f32.mrf.mxu1 }
 0x302   : > { %6930 = vmatmul.msk.f32.vlgmr.msrb.gmra.mxu2 %vm1397_vm1, %v2278_v52  ;;  %6919 = vmatmul.msk.f32.vlgmr.msrb.gmra.mxu1 %vm1397_vm1, %v2184_v51  ;;  %v6975_v51 = vld [vmem:[%s8062_s29 + $0x10] sm:$0xff] }
 0x303   : > { %3114 = vmatpush.msra.mxu2 %v6975_v51 }
 0x304   : > { %6913 = vmatmul.msk.f32.gmra.mxu0 %vm1397_vm1, %v8550_v1 }
 0x306   : > { %v2090_v47 = vpop.f32.mrf.mxu3 }
 0x307   : > { %6897 = vmatmul.msk.f32.vlgmr.msra.gmra.mxu3 %vm1397_vm1, %v2090_v47 }
 0x308   : > { %v2372_v18 = vpop.f32.mrf.mxu2 }
 0x309   : > { %v2187_v44 = vpop.f32.mrf.mxu0  ;;  %v2281_v53 = vpop.f32.mrf.mxu1 }
 0x30a   : > { %6931 = vmatmul.msk.f32.gmra.mxu2 %vm1397_vm1, %v2281_v53  ;;  %6920 = vmatmul.msk.f32.gmra.mxu1 %vm1397_vm1, %v2187_v44 }
 0x30c   : > { %6914 = vmatmul.msk.f32.gmra.mxu0 %vm1397_vm1, %v8561_v28 }
 0x30e   : > { %v2093_v14 = vpop.f32.mrf.mxu3 }
 0x30f   : > { %6898 = vmatmul.msk.f32.gmra.mxu3 %vm1397_vm1, %v2093_v14 }
 0x310   : > { %v2375_v24 = vpop.f32.mrf.mxu2 }
 0x311   : > { %v2190_v37 = vpop.f32.mrf.mxu0  ;;  %v2284_v54 = vpop.f32.mrf.mxu1 }
 0x312   : > { %6932 = vmatmul.msk.f32.gmra.mxu2 %vm1397_vm1, %v2284_v54  ;;  %6921 = vmatmul.msk.f32.gmra.mxu1 %vm1397_vm1, %v2190_v37 }
 0x314   : > { %6915 = vmatmul.msk.f32.gmra.mxu0 %vm1397_vm1, %v8571_v45 }
 0x316   : > { %v2096_v1 = vpop.f32.mrf.mxu3 }
 0x317   : > { %6899 = vmatmul.msk.f32.gmra.mxu3 %vm1397_vm1, %v2096_v1 }
 0x318   : > { %v2378_v60 = vpop.f32.mrf.mxu2 }
 0x319   : > { %v2193_v55 = vpop.f32.mrf.mxu0  ;;  %v2287_v56 = vpop.f32.mrf.mxu1 }
 0x31a   : > { %6933 = vmatmul.msk.f32.gmra.mxu2 %vm1397_vm1, %v2287_v56  ;;  %6922 = vmatmul.msk.f32.gmra.mxu1 %vm1397_vm1, %v2193_v55  ;;  %v8855_v55 = vld [vmem:[%s10281_s26] ss:$0 sm:$0xff]  ;;  %s9219_s26 = scalar_lea.vmem %s10288_s18, %s7398_s10 }
 0x31c   : > { %6916 = vmatmul.msk.f32.gmra.mxu0 %vm1397_vm1, %v8577_v59 }
 0x31e   : > { %v2099_v28 = vpop.f32.mrf.mxu3 }
 0x31f   : > { %6900 = vmatmul.msk.f32.gmra.mxu3 %vm1397_vm1, %v2099_v28 }
 0x320   : > { %v2381_v20 = vpop.f32.mrf.mxu2 }
 0x321   : > { %v2196_v57 = vpop.f32.mrf.mxu0  ;;  %v2290_v3 = vpop.f32.mrf.mxu1 }
 0x322   : > { %6934 = vmatmul.msk.f32.gmra.mxu2 %vm1397_vm1, %v2290_v3  ;;  %6923 = vmatmul.msk.f32.gmra.mxu1 %vm1397_vm1, %v2196_v57  ;;  %v6978_v3 = vld [vmem:[%s10263_s3 + $0x18] sm:$0xff] }
 0x323   : > { %3069 = vmatpush.msra.mxu1 %v6978_v3 }
 0x324   : > { %6917 = vmatmul.msk.f32.gmra.mxu0 %vm1397_vm1, %v8583_v22 }
 0x326   : > { %v2102_v45 = vpop.f32.mrf.mxu3 }
 0x327   : > { %6901 = vmatmul.msk.f32.gmra.mxu3 %vm1397_vm1, %v2102_v45 }
 0x328   : > { %v2384_v29 = vpop.f32.mrf.mxu2 }
 0x329   : > { %v2199_v6 = vpop.f32.mrf.mxu0  ;;  %v2293_v0 = vpop.f32.mrf.mxu1 }
 0x32a   : > { %6935 = vmatmul.msk.f32.gmra.mxu2 %vm1397_vm1, %v2293_v0  ;;  %6924 = vmatmul.msk.f32.gmra.mxu1 %vm1397_vm1, %v2199_v6 }
 0x32c   : > { %6918 = vmatmul.msk.f32.gmra.mxu0 %vm1397_vm1, %v8587_v26 }
 0x32e   : > { %v2105_v59 = vpop.f32.mrf.mxu3 }
 0x32f   : > { %6902 = vmatmul.msk.f32.gmra.mxu3 %vm1397_vm1, %v2105_v59  ;;  %v6954_v59 = vld [vmem:[%s8052_s21 + $0x10] sm:$0xff] }
 0x330   : > { %v2387_v2 = vpop.f32.mrf.mxu2  ;;  %2956 = vmatpush.msrb.mxu0 %v6954_v59 }
 0x331   : > { %v2202_v8 = vpop.f32.mrf.mxu0  ;;  %v2296_v22 = vpop.f32.mrf.mxu1 }
 0x332   : > { %6936 = vmatmul.msk.f32.gmra.mxu2 %vm1397_vm1, %v2296_v22  ;;  %6925 = vmatmul.msk.f32.gmra.mxu1 %vm1397_vm1, %v2202_v8  ;;  %v6977_v8 = vld [vmem:[%s10263_s3 + $0x10] sm:$0xff]  ;;  %v7751_v22 = vld [vmem:[#allocation2 + $0x8] sm:$0xff] }
 0x333   : > { %3070 = vmatpush.msra.mxu1 %v6977_v8 }
 0x336   : > { %v2108_v9 = vpop.f32.mrf.mxu3 }
 0x337   : > { %6903 = vmatmul.msk.f32.gmra.mxu3 %vm1397_vm1, %v2108_v9 }
 0x338   : > { %v2390_v30 = vpop.f32.mrf.mxu2 }
 0x339   : > { %v2205_v13 = vpop.f32.mrf.mxu0  ;;  %v2299_v10 = vpop.f32.mrf.mxu1 }
 0x33a   : > { %6937 = vmatmul.msk.f32.gmra.mxu2 %vm1397_vm1, %v2299_v10  ;;  %6926 = vmatmul.msk.f32.gmra.mxu1 %vm1397_vm1, %v2205_v13  ;;  %v8865_v13 = vld [vmem:[%s10284_s28] ss:$0 sm:$0xff]  ;;  %s10292_s28 = sld [smem:[#allocation37_spill]] }
 0x33e   : > { %v2111_v26 = vpop.f32.mrf.mxu3 }
 0x33f   : > { %6904 = vmatmul.msk.f32.gmra.mxu3 %vm1397_vm1, %v2111_v26 }
 0x340   : > { %v2393_v32 = vpop.f32.mrf.mxu2  ;;  %s9257_s18 = scalar_lea.vmem %s10292_s28, %s7398_s10  ;;  %s10296_s10 = sld [smem:[#allocation27_spill]] }
 0x341   : > { %v2208_v12 = vpop.f32.mrf.mxu0  ;;  %v2302_v15 = vpop.f32.mrf.mxu1  ;;  %s10297_s28 = sld [smem:[#allocation31_spill]] }
 0x342   : > { %6938 = vmatmul.msk.f32.gmra.mxu2 %vm1397_vm1, %v2302_v15  ;;  %6927 = vmatmul.msk.f32.gmra.mxu1 %vm1397_vm1, %v2208_v12 }
 0x346   : > { %v2114_v16 = vpop.f32.mrf.mxu3 }
 0x347   : > { %6905 = vmatmul.msk.f32.gmra.mxu3 %vm1397_vm1, %v2114_v16 }
 0x348   : > { %v2396_v34 = vpop.f32.mrf.mxu2 }
 0x349   : > { %v2211_v62 = vpop.f32.mrf.mxu0  ;;  %v2305_v17 = vpop.f32.mrf.mxu1 }
 0x34a   : > { %6939 = vmatmul.msk.f32.gmra.mxu2 %vm1397_vm1, %v2305_v17  ;;  %6928 = vmatmul.msk.f32.gmra.mxu1 %vm1397_vm1, %v2211_v62 }
 0x34e   : > { %v2117_v19 = vpop.f32.mrf.mxu3 }
 0x34f   : > { %6906 = vmatmul.msk.f32.gmra.mxu3 %vm1397_vm1, %v2117_v19 }
 0x350   : > { %v2399_v38 = vpop.f32.mrf.mxu2 }
 0x351   : > { %v2214_v21 = vpop.f32.mrf.mxu0  ;;  %v2308_v23 = vpop.f32.mrf.mxu1 }
 0x352   : > { %6940 = vmatmul.msk.f32.gmra.mxu2 %vm1397_vm1, %v2308_v23  ;;  %6929 = vmatmul.msk.f32.gmra.mxu1 %vm1397_vm1, %v2214_v21  ;;  %v7752_v23 = vld [vmem:[#allocation2 + $0x10] sm:$0xff] }
 0x356   : > { %v2120_v25 = vpop.f32.mrf.mxu3 }
 0x357   : > { %6907 = vmatmul.msk.f32.gmra.mxu3 %vm1397_vm1, %v2120_v25 }
 0x358   : > { %v2402_v63 = vpop.f32.mrf.mxu2 }
 0x359   : > { %v2515_v42 = vpop.f32.mrf.mxu0 }
 0x35f   : > { %6941 = vmatmul.msk.f32.vlgmr.msrb.gmra.mxu3 %vm1397_vm1, %v2372_v18 }
 0x361   : > { %v2518_v48 = vpop.f32.mrf.mxu0 }
 0x367   : > { %6942 = vmatmul.msk.f32.gmra.mxu3 %vm1397_vm1, %v2375_v24 }
 0x369   : > { %v2521_v52 = vpop.f32.mrf.mxu0 }
 0x36f   : > { %6943 = vmatmul.msk.f32.gmra.mxu3 %vm1397_vm1, %v2378_v60 }
 0x371   : > { %v2524_v56 = vpop.f32.mrf.mxu0 }
 0x377   : > { %6944 = vmatmul.msk.f32.gmra.mxu3 %vm1397_vm1, %v2381_v20 }
 0x379   : > { %v2527_v17 = vpop.f32.mrf.mxu0 }
 0x37f   : > { %6945 = vmatmul.msk.f32.gmra.mxu3 %vm1397_vm1, %v2384_v29  ;;  %v2598_v43 = vpop.f32.mrf.mxu1 }
 0x385   : > { %v2692_v46 = vpop.f32.mrf.mxu2 }
 0x387   : > { %6946 = vmatmul.msk.f32.gmra.mxu3 %vm1397_vm1, %v2387_v2  ;;  %v2601_v49 = vpop.f32.mrf.mxu1 }
 0x38a   : > { %v2465_v31 = vpop.f32.mrf.mxu3 }
 0x38b   : > { %v2516_v47 = vadd.f32 %v2515_v42, %v2465_v31 }
 0x38d   : > { %v2695_v27 = vpop.f32.mrf.mxu2  ;;  %v2631_v14 = vadd.f32 %v2598_v43, %v2516_v47  ;;  %v7754_v47 = vld [vmem:[#allocation2 + $0x20] sm:$0xff] }
 0x38f   : > { %6947 = vmatmul.msk.f32.gmra.mxu3 %vm1397_vm1, %v2390_v30  ;;  %v2604_v44 = vpop.f32.mrf.mxu1  ;;  %v2725_v54 = vadd.f32 %v2692_v46, %v2631_v14 }
 0x392   : > { %v2468_v33 = vpop.f32.mrf.mxu3 }
 0x393   : > { %v2519_v1 = vadd.f32 %v2518_v48, %v2468_v33 }
 0x395   : > { %v2698_v37 = vpop.f32.mrf.mxu2  ;;  %v2632_v6 = vadd.f32 %v2601_v49, %v2519_v1 }
 0x397   : > { %6948 = vmatmul.msk.f32.gmra.mxu3 %vm1397_vm1, %v2393_v32  ;;  %v2607_v45 = vpop.f32.mrf.mxu1  ;;  %v2726_v11 = vadd.f32 %v2695_v27, %v2632_v6 }
 0x39a   : > { %v2471_v35 = vpop.f32.mrf.mxu3 }
 0x39b   : > { %v2522_v26 = vadd.f32 %v2521_v52, %v2471_v35  ;;  %v2530_v35 = vpop.f32.mrf.mxu0 }
 0x39d   : > { %v2701_v10 = vpop.f32.mrf.mxu2  ;;  %v2633_v18 = vadd.f32 %v2604_v44, %v2522_v26 }
 0x39f   : > { %6949 = vmatmul.msk.f32.gmra.mxu3 %vm1397_vm1, %v2396_v34  ;;  %v2610_v21 = vpop.f32.mrf.mxu1  ;;  %v2727_v25 = vadd.f32 %v2698_v37, %v2633_v18 }
 0x3a2   : > { %v8833_v36 = vpop.f32.mrf.mxu3 }
 0x3a3   : > { %v2525_v60 = vadd.f32 %v2524_v56, %v8833_v36 }
 0x3a5   : > { %v2704_v29 = vpop.f32.mrf.mxu2  ;;  %v2634_v33 = vadd.f32 %v2607_v45, %v2525_v60 }
 0x3a7   : > { %6950 = vmatmul.msk.f32.gmra.mxu3 %vm1397_vm1, %v2399_v38  ;;  %v7753_v38 = vld [vmem:[#allocation2 + $0x18] sm:$0xff]  ;;  %v2728_v42 = vadd.f32 %v2701_v10, %v2634_v33 }
 0x3a8   : > { %v7757_v33 = vld [vmem:[#allocation2 + $0x38] sm:$0xff] }
 0x3aa   : > { %v8836_v39 = vpop.f32.mrf.mxu3 }
 0x3ab   : > { %v2528_v43 = vadd.f32 %v2527_v17, %v8836_v39  ;;  %v2533_v39 = vpop.f32.mrf.mxu0 }
 0x3ad   : > { %v2707_v27 = vpop.f32.mrf.mxu2  ;;  %v2635_v51 = vadd.f32 %v2610_v21, %v2528_v43 }
 0x3af   : > { %6951 = vmatmul.msk.f32.gmra.mxu3 %vm1397_vm1, %v2402_v63  ;;  %v2613_v63 = vpop.f32.mrf.mxu1  ;;  %v2729_v14 = vadd.f32 %v2704_v29, %v2635_v51 }
 0x3b2   : > { %v8839_v40 = vpop.f32.mrf.mxu3 }
 0x3b3   : > { %v2531_v37 = vadd.f32 %v2530_v35, %v8839_v40  ;;  %v2536_v10 = vpop.f32.mrf.mxu0 }
 0x3b5   : > { %v2636_v45 = vadd.f32 %v2613_v63, %v2531_v37  ;;  %v2710_v40 = vpop.f32.mrf.mxu2 }
 0x3b7   : > { %v2616_v1 = vpop.f32.mrf.mxu1  ;;  %v2730_v8 = vadd.f32 %v2707_v27, %v2636_v45  ;;  %v7758_v27 = vld [vmem:[#allocation2 + $0x40] sm:$0xff]  ;;  %v6953_v45 = vld [vmem:[%s8047_s17 + $0x18] sm:$0xff] }
 0x3b8   : > { %3005 = vmatpush.msra.mxu0 %v6953_v45 }
 0x3ba   : > { %v8841_v41 = vpop.f32.mrf.mxu3 }
 0x3bb   : > { %v2539_v29 = vpop.f32.mrf.mxu0 }
 0x3c2   : > { %v8843_v5 = vpop.f32.mrf.mxu3 }
 0x3ca   : > { %v8845_v58 = vpop.f32.mrf.mxu3 }
 0x3d2   : > { %v8847_v4 = vpop.f32.mrf.mxu3 }
 0x3da   : > { %v8852_v53 = vpop.f32.mrf.mxu3 }
 0x3e2   : > { %v2786_v28 = vpop.f32.mrf.mxu3 }
 0x3e3   : > { %v2819_v57 = vadd.f32 %v2786_v28, %v2725_v54 }
 0x3e5   : > { %v2834_v0 = vadd.f32 %v8855_v55, %v2819_v57 }
 0x3e7   : > { %v2845_v9 = vadd.f32 %v7751_v22, %v2834_v0  ;;  %v7755_v0 = vld [vmem:[#allocation2 + $0x28] sm:$0xff]  ;;  %v2534_v22 = vadd.f32 %v2533_v39, %v8841_v41  ;;  %v7756_v41 = vld [vmem:[#allocation2 + $0x30] sm:$0xff] }
 0x3e9   : > { %v2860_v12 = vmul.f32 %v8860_v7, %v2845_v9 }
 0x3ea   : > { %v2789_v15 = vpop.f32.mrf.mxu3 }
 0x3eb   : > { %v2875_v16 = vadd.f32 %v8865_v13, %v2860_v12  ;;  %v2820_v62 = vadd.f32 %v2789_v15, %v2726_v11  ;;  %v2619_v15 = vpop.f32.mrf.mxu1 }
 0x3ed   : > { %2886 = vst.msk [vmem:[#allocation2] sm:$0xff] %vm1397_vm1, %v2875_v16  ;;  %v2835_v19 = vadd.f32 %v8855_v55, %v2820_v62  ;;  %v2637_v62 = vadd.f32 %v2616_v1, %v2534_v22 }
 0x3ef   : > { %v2846_v24 = vadd.f32 %v7752_v23, %v2835_v19  ;;  %v2713_v19 = vpop.f32.mrf.mxu2  ;;  %v2731_v21 = vadd.f32 %v2710_v40, %v2637_v62  ;;  %v2537_v23 = vadd.f32 %v2536_v10, %v8843_v5 }
 0x3f1   : > { %v2861_v20 = vmul.f32 %v8860_v7, %v2846_v24 }
 0x3f2   : > { %v2792_v2 = vpop.f32.mrf.mxu3 }
 0x3f3   : > { %v2876_v30 = vadd.f32 %v8865_v13, %v2861_v20  ;;  %v2821_v31 = vadd.f32 %v2792_v2, %v2727_v25  ;;  %v2622_v5 = vpop.f32.mrf.mxu1 }
 0x3f4   : > { %v8874_v32 = vld [vmem:[#allocation2] sm:$0xff] }
 0x3f5   : > { %2887 = vst.msk [vmem:[#allocation2 + $0x8] sm:$0xff] %vm1397_vm1, %v2876_v30  ;;  %v2836_v34 = vadd.f32 %v8855_v55, %v2821_v31  ;;  %6988 = vmatmul.msk.f32.vlgmr.msra.gmra.mxu2 %vm1397_vm1, %v8874_v32  ;;  %v2638_v30 = vadd.f32 %v2619_v15, %v2537_v23 }
 0x3f7   : > { %v2847_v36 = vadd.f32 %v7753_v38, %v2836_v34  ;;  %v2732_v35 = vadd.f32 %v2713_v19, %v2638_v30  ;;  %v2540_v38 = vadd.f32 %v2539_v29, %v8845_v58  ;;  %v2716_v63 = vpop.f32.mrf.mxu2  ;;  %v2542_v58 = vpop.f32.mrf.mxu0 }
 0x3f9   : > { %v2862_v46 = vmul.f32 %v8860_v7, %v2847_v36 }
 0x3fa   : > { %v2795_v48 = vpop.f32.mrf.mxu3 }
 0x3fb   : > { %v2877_v49 = vadd.f32 %v8865_v13, %v2862_v46  ;;  %v2822_v61 = vadd.f32 %v2795_v48, %v2728_v42 }
 0x3fc   : > { %v8883_v50 = vld [vmem:[#allocation2 + $0x8] sm:$0xff] }
 0x3fd   : > { %2888 = vst.msk [vmem:[#allocation2 + $0x10] sm:$0xff] %vm1397_vm1, %v2877_v49  ;;  %v2837_v52 = vadd.f32 %v8855_v55, %v2822_v61  ;;  %6989 = vmatmul.msk.f32.gmra.mxu2 %vm1397_vm1, %v8883_v50  ;;  %v2639_v49 = vadd.f32 %v2622_v5, %v2540_v38 }
 0x3ff   : > { %v2848_v44 = vadd.f32 %v7754_v47, %v2837_v52  ;;  %v2625_v52 = vpop.f32.mrf.mxu1  ;;  %v2733_v47 = vadd.f32 %v2716_v63, %v2639_v49  ;;  %v2719_v1 = vpop.f32.mrf.mxu2 }
 0x401   : > { %v2863_v54 = vmul.f32 %v8860_v7, %v2848_v44  ;;  %v2543_v44 = vadd.f32 %v2542_v58, %v8847_v4  ;;  %v7759_v4 = vld [vmem:[#allocation2 + $0x48] sm:$0xff] }
 0x402   : > { %v2798_v56 = vpop.f32.mrf.mxu3 }
 0x403   : > { %v2878_v28 = vadd.f32 %v8865_v13, %v2863_v54  ;;  %v2823_v57 = vadd.f32 %v2798_v56, %v2729_v14 }
 0x404   : > { %v8892_v3 = vld [vmem:[#allocation2 + $0x10] sm:$0xff] }
 0x405   : > { %2889 = vst.msk [vmem:[#allocation2 + $0x18] sm:$0xff] %vm1397_vm1, %v2878_v28  ;;  %v2838_v6 = vadd.f32 %v8855_v55, %v2823_v57  ;;  %6956 = vmatmul.msk.f32.vlgmr.msrb.gmra.mxu0 %vm1397_vm1, %v8892_v3  ;;  %6979 = vmatmul.msk.f32.vlgmr.msra.gmra.mxu1 %vm1397_vm1, %v8892_v3  ;;  %v2640_v28 = vadd.f32 %v2625_v52, %v2543_v44 }
 0x406   : > { %6990 = vmatmul.msk.f32.gmra.mxu2 %vm1397_vm1, %v8892_v3 }
 0x407   : > { %v2849_v59 = vadd.f32 %v7755_v0, %v2838_v6  ;;  %v6952_v6 = vld [vmem:[%s8047_s17 + $0x10] sm:$0xff]  ;;  %v2545_v0 = vpop.f32.mrf.mxu0 }
 0x408   : > { %3006 = vmatpush.msra.mxu0 %v6952_v6 }
 0x409   : > { %v2864_v9 = vmul.f32 %v8860_v7, %v2849_v59  ;;  %v2734_v59 = vadd.f32 %v2719_v1, %v2640_v28  ;;  %v7007_v28 = vld [vmem:[%s8077_s14 + $0x10] sm:$0xff] }
 0x40a   : > { %v2801_v11 = vpop.f32.mrf.mxu3 }
 0x40b   : > { %v2879_v26 = vadd.f32 %v8865_v13, %v2864_v9  ;;  %v2824_v12 = vadd.f32 %v2801_v11, %v2730_v8  ;;  %v2546_v8 = vadd.f32 %v2545_v0, %v8852_v53  ;;  %v2628_v9 = vpop.f32.mrf.mxu1  ;;  %v7760_v53 = vld [vmem:[#allocation2 + $0x50] sm:$0xff] }
 0x40c   : > { %v8905_v16 = vld [vmem:[#allocation2 + $0x18] sm:$0xff] }
 0x40d   : > { %2890 = vst.msk [vmem:[#allocation2 + $0x20] sm:$0xff] %vm1397_vm1, %v2879_v26  ;;  %v2839_v17 = vadd.f32 %v8855_v55, %v2824_v12  ;;  %6957 = vmatmul.msk.f32.gmra.mxu0 %vm1397_vm1, %v8905_v16  ;;  %6980 = vmatmul.msk.f32.gmra.mxu1 %vm1397_vm1, %v8905_v16  ;;  %v2641_v15 = vadd.f32 %v2628_v9, %v2546_v8 }
 0x40e   : > { %6991 = vmatmul.msk.f32.gmra.mxu2 %vm1397_vm1, %v8905_v16 }
 0x40f   : > { %v2850_v18 = vadd.f32 %v7756_v41, %v2839_v17  ;;  %v2722_v17 = vpop.f32.mrf.mxu2 }
 0x411   : > { %v2865_v24 = vmul.f32 %v8860_v7, %v2850_v18  ;;  %v2735_v18 = vadd.f32 %v2722_v17, %v2641_v15 }
 0x412   : > { %v2804_v25 = vpop.f32.mrf.mxu3 }
 0x413   : > { %v2880_v60 = vadd.f32 %v8865_v13, %v2865_v24  ;;  %v2825_v20 = vadd.f32 %v2804_v25, %v2731_v21 }
 0x414   : > { %v8918_v2 = vld [vmem:[#allocation2 + $0x20] sm:$0xff] }
 0x415   : > { %2891 = vst.msk [vmem:[#allocation2 + $0x28] sm:$0xff] %vm1397_vm1, %v2880_v60  ;;  %v2840_v31 = vadd.f32 %v8855_v55, %v2825_v20  ;;  %6958 = vmatmul.msk.f32.gmra.mxu0 %vm1397_vm1, %v8918_v2  ;;  %6981 = vmatmul.msk.f32.gmra.mxu1 %vm1397_vm1, %v8918_v2  ;;  %v7761_v20 = vld [vmem:[#allocation2 + $0x58] sm:$0xff] }
 0x416   : > { %6992 = vmatmul.msk.f32.gmra.mxu2 %vm1397_vm1, %v8918_v2 }
 0x417   : > { %v2851_v34 = vadd.f32 %v7757_v33, %v2840_v31 }
 0x419   : > { %v2866_v36 = vmul.f32 %v8860_v7, %v2851_v34 }
 0x41a   : > { %v2807_v42 = vpop.f32.mrf.mxu3 }
 0x41b   : > { %v2881_v43 = vadd.f32 %v8865_v13, %v2866_v36  ;;  %v2826_v46 = vadd.f32 %v2807_v42, %v2732_v35  ;;  %v8997_v35 = vld [vmem:[%s10261_s8 + $0x1] ss:$0 sm:$0xff] }
 0x41c   : > { %v8931_v48 = vld [vmem:[#allocation2 + $0x28] sm:$0xff] }
 0x41d   : > { %2892 = vst.msk [vmem:[#allocation2 + $0x30] sm:$0xff] %vm1397_vm1, %v2881_v43  ;;  %v2841_v61 = vadd.f32 %v8855_v55, %v2826_v46  ;;  %6959 = vmatmul.msk.f32.gmra.mxu0 %vm1397_vm1, %v8931_v48  ;;  %6982 = vmatmul.msk.f32.gmra.mxu1 %vm1397_vm1, %v8931_v48 }
 0x41e   : > { %6993 = vmatmul.msk.f32.gmra.mxu2 %vm1397_vm1, %v8931_v48 }
 0x41f   : > { %v2852_v51 = vadd.f32 %v7758_v27, %v2841_v61 }
 0x421   : > { %v2867_v39 = vmul.f32 %v8860_v7, %v2852_v51 }
 0x422   : > { %v2810_v14 = vpop.f32.mrf.mxu3 }
 0x423   : > { %v2882_v37 = vadd.f32 %v8865_v13, %v2867_v39  ;;  %v2827_v54 = vadd.f32 %v2810_v14, %v2733_v47 }
 0x424   : > { %v2903_v56 = vld [vmem:[#allocation2 + $0x30] sm:$0xff] }
 0x425   : > { %2893 = vst.msk [vmem:[#allocation2 + $0x38] sm:$0xff] %vm1397_vm1, %v2882_v37  ;;  %v2842_v57 = vadd.f32 %v8855_v55, %v2827_v54  ;;  %6960 = vmatmul.msk.f32.gmra.mxu0 %vm1397_vm1, %v2903_v56  ;;  %6983 = vmatmul.msk.f32.gmra.mxu1 %vm1397_vm1, %v2903_v56  ;;  %v7008_v37 = vld [vmem:[%s8077_s14 + $0x18] sm:$0xff] }
 0x426   : > { %6994 = vmatmul.msk.f32.gmra.mxu2 %vm1397_vm1, %v2903_v56  ;;  %3395 = vmatpush.msra.mxu3 %v7008_v37 }
 0x427   : > { %v2853_v40 = vadd.f32 %v7759_v4, %v2842_v57 }
 0x428   : > { %3396 = vmatpush.msra.mxu3 %v7007_v28 }
 0x429   : > { %v2868_v22 = vmul.f32 %v8860_v7, %v2853_v40 }
 0x42a   : > { %v2813_v10 = vpop.f32.mrf.mxu3 }
 0x42b   : > { %v2883_v11 = vadd.f32 %v8865_v13, %v2868_v22  ;;  %v2828_v26 = vadd.f32 %v2813_v10, %v2734_v59 }
 0x42c   : > { %v2904_v12 = vld [vmem:[#allocation2 + $0x38] sm:$0xff] }
 0x42d   : > { %2894 = vst.msk [vmem:[#allocation2 + $0x40] sm:$0xff] %vm1397_vm1, %v2883_v11  ;;  %v2843_v62 = vadd.f32 %v8855_v55, %v2828_v26  ;;  %6961 = vmatmul.msk.f32.gmra.mxu0 %vm1397_vm1, %v2904_v12  ;;  %6984 = vmatmul.msk.f32.gmra.mxu1 %vm1397_vm1, %v2904_v12 }
 0x42e   : > { %6995 = vmatmul.msk.f32.gmra.mxu2 %vm1397_vm1, %v2904_v12 }
 0x42f   : > { %v2854_v41 = vadd.f32 %v7760_v53, %v2843_v62 }
 0x431   : > { %v2869_v19 = vmul.f32 %v8860_v7, %v2854_v41 }
 0x432   : > { %v2816_v21 = vpop.f32.mrf.mxu3 }
 0x433   : > { %v2884_v23 = vadd.f32 %v8865_v13, %v2869_v19  ;;  %v2829_v24 = vadd.f32 %v2816_v21, %v2735_v18  ;;  %v9029_v18 = vld [vmem:[%s8057_s25 + $0x1] ss:$0 sm:$0xff] }
 0x434   : > { %v2905_v25 = vld [vmem:[#allocation2 + $0x40] sm:$0xff] }
 0x435   : > { %2895 = vst.msk [vmem:[#allocation2 + $0x48] sm:$0xff] %vm1397_vm1, %v2884_v23  ;;  %v2844_v60 = vadd.f32 %v8855_v55, %v2829_v24  ;;  %6962 = vmatmul.msk.f32.gmra.mxu0 %vm1397_vm1, %v2905_v25  ;;  %6985 = vmatmul.msk.f32.gmra.mxu1 %vm1397_vm1, %v2905_v25 }
 0x436   : > { %6996 = vmatmul.msk.f32.gmra.mxu2 %vm1397_vm1, %v2905_v25 }
 0x437   : > { %v2855_v29 = vadd.f32 %v7761_v20, %v2844_v60 }
 0x439   : > { %v2870_v30 = vmul.f32 %v8860_v7, %v2855_v29 }
 0x43b   : > { %v2885_v31 = vadd.f32 %v8865_v13, %v2870_v30 }
 0x43c   : > { %v2906_v5 = vld [vmem:[#allocation2 + $0x48] sm:$0xff] }
 0x43d   : > { %2896 = vst.msk [vmem:[#allocation2 + $0x50] sm:$0xff] %vm1397_vm1, %v2885_v31  ;;  %6963 = vmatmul.msk.f32.gmra.mxu0 %vm1397_vm1, %v2906_v5  ;;  %6986 = vmatmul.msk.f32.gmra.mxu1 %vm1397_vm1, %v2906_v5 }
 0x444   : > { %v2907_v55 = vld [vmem:[#allocation2 + $0x50] sm:$0xff] }
 0x445   : > { %6964 = vmatmul.msk.f32.gmra.mxu0 %vm1397_vm1, %v2907_v55  ;;  %6987 = vmatmul.msk.f32.gmra.mxu1 %vm1397_vm1, %v2907_v55 }
 0x44d   : > { %6965 = vmatmul.msk.f32.vlgmr.msra.gmra.mxu0 %vm1397_vm1, %v8874_v32 }
 0x455   : > { %6966 = vmatmul.msk.f32.gmra.mxu0 %vm1397_vm1, %v8883_v50 }
 0x45d   : > { %6967 = vmatmul.msk.f32.gmra.mxu0 %vm1397_vm1, %v8892_v3 }
 0x465   : > { %6968 = vmatmul.msk.f32.gmra.mxu0 %vm1397_vm1, %v8905_v16 }
 0x46d   : > { %6969 = vmatmul.msk.f32.gmra.mxu0 %vm1397_vm1, %v8918_v2 }
 0x475   : > { %6970 = vmatmul.msk.f32.gmra.mxu0 %vm1397_vm1, %v8931_v48 }
 0x478   : > { %v3116_v50 = vpop.f32.mrf.mxu2 }
 0x47d   : > { %6971 = vmatmul.msk.f32.gmra.mxu0 %vm1397_vm1, %v2903_v56 }
 0x480   : > { %v3119_v33 = vpop.f32.mrf.mxu2 }
 0x482   : > { %v8986_v7 = vpop.f32.mrf.mxu0  ;;  %v3072_v32 = vpop.f32.mrf.mxu1 }
 0x483   : > { %v3117_v34 = vadd.f32 %v3116_v50, %v3072_v32 }
 0x485   : > { %6972 = vmatmul.msk.f32.gmra.mxu0 %vm1397_vm1, %v2904_v12  ;;  %v3148_v42 = vadd.f32 %v8997_v35, %v3117_v34 }
 0x487   : > { %v6998_v43 = vmul.f32 -1.442695, %v3148_v42 }
 0x489   : > { %v3122_v63 = vpop.f32.mrf.mxu2  ;;  %7613 = vpow2.f32 %v6998_v43 }
 0x48a   : > { %v8989_v13 = vpop.f32.mrf.mxu0  ;;  %v3075_v16 = vpop.f32.mrf.mxu1 }
 0x48b   : > { %v3120_v46 = vadd.f32 %v3119_v33, %v3075_v16 }
 0x48d   : > { %6973 = vmatmul.msk.f32.gmra.mxu0 %vm1397_vm1, %v2905_v25  ;;  %v3149_v61 = vadd.f32 %v8997_v35, %v3120_v46 }
 0x48f   : > { %v6999_v27 = vmul.f32 -1.442695, %v3149_v61  ;;  %v7614_v52 = vpop.eup %7613 }
 0x490   : > { %v9008_v39 = vadd.f32 1.0, %v7614_v52 }
 0x491   : > { %v3125_v58 = vpop.f32.mrf.mxu2  ;;  %7615 = vpow2.f32 %v6999_v27 }
 0x492   : > { %v8992_v3 = vpop.f32.mrf.mxu0  ;;  %v3078_v38 = vpop.f32.mrf.mxu1  ;;  %7617 = vrcp.f32 %v9008_v39  ;;  %v3213_v32 = vand.u32 2147483648, %v9008_v39  ;;  %vm3207_vm4 = vweird.f32 %v9008_v39 }
 0x493   : > { %v3123_v51 = vadd.f32 %v3122_v63, %v3078_v38 }
 0x495   : > { %v3150_v44 = vadd.f32 %v8997_v35, %v3123_v51 }
 0x497   : > { %v7000_v1 = vmul.f32 -1.442695, %v3150_v44  ;;  %v7616_v57 = vpop.eup %7615 }
 0x498   : > { %v9016_v4 = vadd.f32 1.0, %v7616_v57  ;;  %v7618_v40 = vpop.eup %7617 }
 0x499   : > { %v3128_v54 = vpop.f32.mrf.mxu2  ;;  %7619 = vpow2.f32 %v7000_v1  ;;  %v3203_v10 = vmul.f32 %v7618_v40, %v9008_v39  ;;  %vm3208_vm3 = vweird.f32 %v7618_v40 }
 0x49a   : > { %v8994_v2 = vpop.f32.mrf.mxu0  ;;  %v3081_v49 = vpop.f32.mrf.mxu1  ;;  %7621 = vrcp.f32 %v9016_v4  ;;  %vm9044_vm5 = vmor %vm3207_vm4, %vm3208_vm3  ;;  %vm3222_vm8 = vweird.f32 %v9016_v4  ;;  %v3226_v57 = vand.u32 2147483647, %v9016_v4 }
 0x49b   : > { %v3126_v56 = vadd.f32 %v3125_v58, %v3081_v49  ;;  %v3204_v15 = vsub.f32 1.0, %v3203_v10  ;;  %v3214_v49 = vor.u32 1.1754944e-38, %v3213_v32 }
 0x49c   : > { %vm3227_vm10 = vcmp.eq.f32.partialorder %v3226_v57, 8.507059e+37 }
 0x49d   : > { %v3151_v6 = vadd.f32 %v8997_v35, %v3126_v56  ;;  %v3205_v24 = vmul.f32 %v7618_v40, %v3204_v15 }
 0x49f   : > { %v7001_v59 = vmul.f32 -1.442695, %v3151_v6  ;;  %v7620_v9 = vpop.eup %7619  ;;  %v3206_v5 = vadd.f32 %v7618_v40, %v3205_v24 }
 0x4a0   : > { %v9023_v12 = vadd.f32 1.0, %v7620_v9  ;;  %v9025_v62 = vpop.eup %7621 }
 0x4a1   : > { %v3131_v22 = vpop.f32.mrf.mxu2  ;;  %7623 = vpow2.f32 %v7001_v59  ;;  %v3218_v21 = vmul.f32 %v9025_v62, %v9016_v4  ;;  %v3210_v63 = vsel %vm9044_vm5, %v7618_v40, %v3206_v5  ;;  %vm3223_vm7 = vweird.f32 %v9025_v62 }
 0x4a2   : > { %v8999_v36 = vpop.f32.mrf.mxu0  ;;  %v3084_v14 = vpop.f32.mrf.mxu1  ;;  %7625 = vrcp.f32 %v9023_v12  ;;  %vm3224_vm9 = vmor %vm3222_vm8, %vm3223_vm7  ;;  %vm3237_vm12 = vweird.f32 %v9023_v12 }
 0x4a3   : > { %v3129_v8 = vadd.f32 %v3128_v54, %v3084_v14  ;;  %v3219_v31 = vsub.f32 1.0, %v3218_v21 }
 0x4a5   : > { %v3152_v26 = vadd.f32 %v8997_v35, %v3129_v8  ;;  %v3220_v43 = vmul.f32 %v9025_v62, %v3219_v31 }
 0x4a7   : > { %v7002_v17 = vmul.f32 -1.442695, %v3152_v26  ;;  %v7624_v19 = vpop.eup %7623  ;;  %v3221_v54 = vadd.f32 %v9025_v62, %v3220_v43 }
 0x4a8   : > { %v9035_v29 = vadd.f32 1.0, %v7624_v19  ;;  %v9038_v55 = vpop.eup %7625 }
 0x4a9   : > { %v3134_v25 = vpop.f32.mrf.mxu2  ;;  %7627 = vpow2.f32 %v7002_v17  ;;  %v3233_v38 = vmul.f32 %v9038_v55, %v9023_v12  ;;  %vm3238_vm11 = vweird.f32 %v9038_v55 }
 0x4aa   : > { %v9002_v48 = vpop.f32.mrf.mxu0  ;;  %v3087_v0 = vpop.f32.mrf.mxu1  ;;  %vm3239_vm13 = vmor %vm3237_vm12, %vm3238_vm11  ;;  %vm3252_vm0 = vweird.f32 %v9035_v29 }
 0x4ab   : > { %v3132_v53 = vadd.f32 %v3131_v22, %v3087_v0  ;;  %v3234_v14 = vsub.f32 1.0, %v3233_v38  ;;  %v3225_v0 = vsel %vm3224_vm9, %v9025_v62, %v3221_v54 }
 0x4ad   : > { %v3153_v20 = vadd.f32 %v8997_v35, %v3132_v53  ;;  %v3235_v8 = vmul.f32 %v9038_v55, %v3234_v14 }
 0x4af   : > { %v7003_v50 = vmul.f32 -1.442695, %v3153_v20  ;;  %v7628_v34 = vpop.eup %7627  ;;  %v3236_v62 = vadd.f32 %v9038_v55, %v3235_v8 }
 0x4b0   : > { %v9055_v51 = vadd.f32 1.0, %v7628_v34 }
 0x4b1   : > { %v3137_v52 = vpop.f32.mrf.mxu2  ;;  %v3240_v31 = vsel %vm3239_vm13, %v9038_v55, %v3236_v62 }
 0x4b2   : > { %v9005_v47 = vpop.f32.mrf.mxu0  ;;  %v3090_v41 = vpop.f32.mrf.mxu1 }
 0x4b3   : > { %v3135_v16 = vadd.f32 %v3134_v25, %v3090_v41 }
 0x4b5   : > { %v3154_v58 = vadd.f32 %v8997_v35, %v3135_v16 }
 0x4b7   : > { %v7004_v56 = vmul.f32 -1.442695, %v3154_v58 }
 0x4ba   : > { %v9013_v45 = vpop.f32.mrf.mxu0  ;;  %v3093_v46 = vpop.f32.mrf.mxu1 }
 0x4bb   : > { %v3138_v28 = vadd.f32 %v3137_v52, %v3093_v46  ;;  %v3256_v46 = vand.u32 2147483647, %v9035_v29 }
 0x4bd   : > { %vm3257_vm4 = vcmp.eq.f32.partialorder %v3256_v46, 8.507059e+37 }
 0x4c2   : > { %v9020_v11 = vpop.f32.mrf.mxu0  ;;  %v3096_v15 = vpop.f32.mrf.mxu1 }
 0x4ca   : > { %v3008_v23 = vpop.f32.mrf.mxu0 }
 0x4cb   : > { %v3009_v60 = vadd.f32 %v3008_v23, %v8986_v7  ;;  %v3211_v7 = vand.u32 2147483647, %v9008_v39  ;;  %v3243_v23 = vand.u32 2147483648, %v9023_v12 }
 0x4cd   : > { %v3040_v30 = vadd.f32 %v9029_v18, %v3009_v60  ;;  %vm3212_vm6 = vcmp.eq.f32.partialorder %v3211_v7, 8.507059e+37  ;;  %v3241_v60 = vand.u32 2147483647, %v9023_v12 }
 0x4ce   : > { %v3215_v44 = vsel %vm3212_vm6, %v3214_v49, %v3210_v63  ;;  %vm3267_vm6 = vweird.f32 %v9055_v51 }
 0x4cf   : > { %7629 = vtanh.f32 %v3040_v30  ;;  %vm3242_vm14 = vcmp.eq.f32.partialorder %v3241_v60, 8.507059e+37 }
 0x4d0   : > { %7631 = vrcp.f32 %v9035_v29 }
 0x4d1   : > { %7633 = vpow2.f32 %v7003_v50  ;;  %v3244_v50 = vor.u32 1.1754944e-38, %v3243_v23 }
 0x4d2   : > { %v3011_v42 = vpop.f32.mrf.mxu0 }
 0x4d3   : > { %v3012_v61 = vadd.f32 %v3011_v42, %v8989_v13  ;;  %v3228_v13 = vand.u32 2147483648, %v9016_v4  ;;  %v3155_v4 = vadd.f32 %v8997_v35, %v3138_v28  ;;  %v3245_v34 = vsel %vm3242_vm14, %v3244_v50, %v3240_v31 }
 0x4d5   : > { %v7630_v27 = vpop.eup %7629  ;;  %v3041_v39 = vadd.f32 %v9029_v18, %v3012_v61  ;;  %v3229_v22 = vor.u32 1.1754944e-38, %v3228_v13  ;;  %v7005_v24 = vmul.f32 -1.442695, %v3155_v4 }
 0x4d6   : > { %v9058_v37 = vmul.f32 %v7630_v27, %v3215_v44  ;;  %v9062_v1 = vpop.eup %7631 }
 0x4d7   : > { %7635 = vtanh.f32 %v3041_v39  ;;  %v7634_v6 = vpop.eup %7633  ;;  %v3248_v40 = vmul.f32 %v9062_v1, %v9035_v29  ;;  %v3230_v17 = vsel %vm3227_vm10, %v3229_v22, %v3225_v0  ;;  %vm3253_vm15 = vweird.f32 %v9062_v1 }
 0x4d8   : > { %7010 = vmatmul.msk.f32.vlgmr.msra.gmra.mxu3 %vm1397_vm1, %v9058_v37  ;;  %7637 = vrcp.f32 %v9055_v51  ;;  %v9076_v26 = vadd.f32 1.0, %v7634_v6  ;;  %vm3254_vm3 = vmor %vm3252_vm0, %vm3253_vm15  ;;  %v3271_v6 = vand.u32 2147483647, %v9055_v51 }
 0x4d9   : > { %7639 = vpow2.f32 %v7004_v56  ;;  %v3249_v41 = vsub.f32 1.0, %v3248_v40 }
 0x4da   : > { %v3014_v59 = vpop.f32.mrf.mxu0  ;;  %vm3272_vm8 = vcmp.eq.f32.partialorder %v3271_v6, 8.507059e+37  ;;  %vm3282_vm10 = vweird.f32 %v9076_v26 }
 0x4db   : > { %v3015_v9 = vadd.f32 %v3014_v59, %v8992_v3  ;;  %v3140_v3 = vpop.f32.mrf.mxu2  ;;  %v3250_v32 = vmul.f32 %v9062_v1, %v3249_v41 }
 0x4dc   : > { %v3141_v25 = vadd.f32 %v3140_v3, %v3096_v15  ;;  %v3288_v3 = vand.u32 2147483648, %v9076_v26 }
 0x4dd   : > { %v7636_v10 = vpop.eup %7635  ;;  %v3042_v53 = vadd.f32 %v9029_v18, %v3015_v9  ;;  %v3251_v55 = vadd.f32 %v9062_v1, %v3250_v32 }
 0x4de   : > { %v9079_v19 = vmul.f32 %v7636_v10, %v3230_v17  ;;  %v9083_v21 = vpop.eup %7637  ;;  %v3156_v12 = vadd.f32 %v8997_v35, %v3141_v25 }
 0x4df   : > { %7641 = vtanh.f32 %v3042_v53  ;;  %v7640_v20 = vpop.eup %7639  ;;  %v3263_v30 = vmul.f32 %v9083_v21, %v9055_v51  ;;  %v3255_v58 = vsel %vm3254_vm3, %v9062_v1, %v3251_v55  ;;  %vm3268_vm5 = vweird.f32 %v9083_v21 }
 0x4e0   : > { %7011 = vmatmul.msk.f32.gmra.mxu3 %vm1397_vm1, %v9079_v19  ;;  %7643 = vrcp.f32 %v9076_v26  ;;  %v9097_v33 = vadd.f32 1.0, %v7640_v20  ;;  %v7006_v35 = vmul.f32 -1.442695, %v3156_v12  ;;  %vm3269_vm7 = vmor %vm3267_vm6, %vm3268_vm5  ;;  %v3289_v20 = vor.u32 1.1754944e-38, %v3288_v3  ;;  %v3616_v3 = vld [vmem:[%s9219_s26 + $0x18] sm:$0xff] }
 0x4e1   : > { %7645 = vpow2.f32 %v7005_v24  ;;  %v3264_v63 = vsub.f32 1.0, %v3263_v30 }
 0x4e2   : > { %v3017_v5 = vpop.f32.mrf.mxu0  ;;  %vm3297_vm14 = vweird.f32 %v9097_v33 }
 0x4e3   : > { %v3018_v16 = vadd.f32 %v3017_v5, %v8994_v2  ;;  %v3258_v2 = vand.u32 2147483648, %v9035_v29  ;;  %v3265_v52 = vmul.f32 %v9083_v21, %v3264_v63 }
 0x4e5   : > { %v7642_v7 = vpop.eup %7641  ;;  %v3043_v38 = vadd.f32 %v9029_v18, %v3018_v16  ;;  %v3259_v44 = vor.u32 1.1754944e-38, %v3258_v2  ;;  %v3266_v57 = vadd.f32 %v9083_v21, %v3265_v52 }
 0x4e6   : > { %v9100_v42 = vmul.f32 %v7642_v7, %v3245_v34  ;;  %v9104_v43 = vpop.eup %7643  ;;  %v3303_v7 = vand.u32 2147483648, %v9097_v33 }
 0x4e7   : > { %7647 = vtanh.f32 %v3043_v38  ;;  %v7646_v49 = vpop.eup %7645  ;;  %v3278_v61 = vmul.f32 %v9104_v43, %v9076_v26  ;;  %v3260_v54 = vsel %vm3257_vm4, %v3259_v44, %v3255_v58  ;;  %v3270_v59 = vsel %vm3269_vm7, %v9083_v21, %v3266_v57 }
 0x4e8   : > { %7012 = vmatmul.msk.f32.gmra.mxu3 %vm1397_vm1, %v9100_v42  ;;  %7649 = vrcp.f32 %v9097_v33  ;;  %v9117_v14 = vadd.f32 1.0, %v7646_v49  ;;  %vm3283_vm9 = vweird.f32 %v9104_v43 }
 0x4e9   : > { %7651 = vpow2.f32 %v7006_v35  ;;  %v3279_v56 = vsub.f32 1.0, %v3278_v61  ;;  %vm3284_vm11 = vmor %vm3282_vm10, %vm3283_vm9 }
 0x4ea   : > { %v3020_v27 = vpop.f32.mrf.mxu0  ;;  %vm3312_vm4 = vweird.f32 %v9117_v14  ;;  %v3316_v52 = vand.u32 2147483647, %v9117_v14 }
 0x4eb   : > { %v3021_v39 = vadd.f32 %v3020_v27, %v8999_v36  ;;  %v3273_v36 = vand.u32 2147483648, %v9055_v51  ;;  %v3280_v22 = vmul.f32 %v9104_v43, %v3279_v56  ;;  %v3318_v27 = vand.u32 2147483648, %v9117_v14 }
 0x4ec   : > { %vm3317_vm6 = vcmp.eq.f32.partialorder %v3316_v52, 8.507059e+37  ;;  %v3697_v52 = vld [vmem:[%s9257_s18 + $0x20] sm:$0xff] }
 0x4ed   : > { %v7648_v29 = vpop.eup %7647  ;;  %v3044_v13 = vadd.f32 %v9029_v18, %v3021_v39  ;;  %v3274_v9 = vor.u32 1.1754944e-38, %v3273_v36  ;;  %v3281_v62 = vadd.f32 %v9104_v43, %v3280_v22  ;;  %v3533_v22 = vld [vmem:[%s10291_s2] sm:$0xff] }
 0x4ee   : > { %v9120_v28 = vmul.f32 %v7648_v29, %v3260_v54  ;;  %v9124_v1 = vpop.eup %7649  ;;  %v3319_v29 = vor.u32 1.1754944e-38, %v3318_v27 }
 0x4ef   : > { %7653 = vtanh.f32 %v3044_v13  ;;  %v7652_v40 = vpop.eup %7651  ;;  %v3293_v0 = vmul.f32 %v9124_v1, %v9097_v33  ;;  %v3275_v15 = vsel %vm3272_vm8, %v3274_v9, %v3270_v59  ;;  %v3285_v24 = vsel %vm3284_vm11, %v9104_v43, %v3281_v62  ;;  %v3613_v9 = vld [vmem:[%s9219_s26] sm:$0xff]  ;;  %v3455_v62 = vld [vmem:[%s10290_s15 + $0x18] sm:$0xff] }
 0x4f0   : > { %7013 = vmatmul.msk.f32.gmra.mxu3 %vm1397_vm1, %v9120_v28  ;;  %7655 = vrcp.f32 %v9117_v14  ;;  %v9137_v10 = vadd.f32 1.0, %v7652_v40  ;;  %vm3298_vm13 = vweird.f32 %v9124_v1  ;;  %v3304_v43 = vor.u32 1.1754944e-38, %v3303_v7  ;;  %v3619_v7 = vld [vmem:[%s9219_s26 + $0x30] sm:$0xff] }
 0x4f1   : > { %v3294_v53 = vsub.f32 1.0, %v3293_v0  ;;  %vm3299_vm15 = vmor %vm3297_vm14, %vm3298_vm13  ;;  %vm3461_vm11 = vcmask 588800  }
 0x4f2   : > { %v3023_v8 = vpop.f32.mrf.mxu0  ;;  %vm3327_vm8 = vweird.f32 %v9137_v10  ;;  %v3331_v6 = vand.u32 2147483647, %v9137_v10 }
 0x4f3   : > { %v3024_v4 = vadd.f32 %v3023_v8, %v9002_v48  ;;  %v3286_v48 = vand.u32 2147483647, %v9076_v26  ;;  %v3295_v60 = vmul.f32 %v9124_v1, %v3294_v53  ;;  %v3452_v8 = vld [vmem:[%s10289_s22] sm:$0xff]  ;;  %v3615_v53 = vld [vmem:[%s9219_s26 + $0x10] sm:$0xff]  ;;  %s10295_s22 = sld [smem:[#allocation34_spill]] }
 0x4f4   : > { %vm3332_vm10 = vcmp.eq.f32.partialorder %v3331_v6, 8.507059e+37  ;;  %v3428_v6 = vld [vmem:[#allocation3 + $0x28] sm:$0xff] }
 0x4f5   : > { %v7654_v51 = vpop.eup %7653  ;;  %v3045_v17 = vadd.f32 %v9029_v18, %v3024_v4  ;;  %vm3287_vm12 = vcmp.eq.f32.partialorder %v3286_v48, 8.507059e+37  ;;  %v3296_v16 = vadd.f32 %v9124_v1, %v3295_v60  ;;  %v3453_v4 = vld [vmem:[%s10290_s15 + $0x8] sm:$0xff]  ;;  %v3693_v48 = vld [vmem:[%s9257_s18] sm:$0xff] }
 0x4f6   : > { %v9140_v41 = vmul.f32 %v7654_v51, %v3275_v15  ;;  %v7656_v21 = vpop.eup %7655  ;;  %v3290_v5 = vsel %vm3287_vm12, %v3289_v20, %v3285_v24  ;;  %v3534_v51 = vld [vmem:[%s10291_s2 + $0x8] sm:$0xff]  ;;  %v3454_v15 = vld [vmem:[%s10290_s15 + $0x10] sm:$0xff]  ;;  %v3537_v24 = vld [vmem:[%s10291_s2 + $0x20] sm:$0xff] }
 0x4f7   : > { %7657 = vtanh.f32 %v3045_v17  ;;  %v3308_v23 = vmul.f32 %v7656_v21, %v9117_v14  ;;  %v3300_v38 = vsel %vm3299_vm15, %v9124_v1, %v3296_v16  ;;  %vm3313_vm3 = vweird.f32 %v7656_v21  ;;  %v3535_v17 = vld [vmem:[%s10291_s2 + $0x10] sm:$0xff]  ;;  %v3694_v60 = vld [vmem:[%s9257_s18 + $0x8] sm:$0xff] }
 0x4f8   : > { %7014 = vmatmul.msk.f32.gmra.mxu3 %vm1397_vm1, %v9140_v41  ;;  %7659 = vrcp.f32 %v9137_v10  ;;  %vm3314_vm5 = vmor %vm3312_vm4, %vm3313_vm3  ;;  %v3333_v14 = vand.u32 2147483648, %v9137_v10  ;;  %v3457_v20 = vld [vmem:[%s10290_s15 + $0x28] sm:$0xff]  ;;  %v3458_v16 = vld [vmem:[%s10290_s15 + $0x30] sm:$0xff] }
 0x4f9   : > { %v3309_v32 = vsub.f32 1.0, %v3308_v23  ;;  %v3456_v23 = vld [vmem:[%s10290_s15 + $0x20] sm:$0xff] }
 0x4fa   : > { %v3026_v25 = vpop.f32.mrf.mxu0  ;;  %v3334_v40 = vor.u32 1.1754944e-38, %v3333_v14 }
 0x4fb   : > { %v3027_v30 = vadd.f32 %v3026_v25, %v9005_v47  ;;  %v3301_v47 = vand.u32 2147483647, %v9097_v33  ;;  %v3310_v55 = vmul.f32 %v7656_v21, %v3309_v32  ;;  %v3617_v25 = vld [vmem:[%s9219_s26 + $0x20] sm:$0xff]  ;;  %v3695_v32 = vld [vmem:[%s9257_s18 + $0x10] sm:$0xff] }
 0x4fd   : > { %v7658_v31 = vpop.eup %7657  ;;  %v3046_v26 = vadd.f32 %v9029_v18, %v3027_v30  ;;  %vm3302_vm0 = vcmp.eq.f32.partialorder %v3301_v47, 8.507059e+37  ;;  %v3311_v58 = vadd.f32 %v7656_v21, %v3310_v55  ;;  %v7056_v30 = vld [vmem:[%s10280_s24 + $0x58] sm:$0xff]  ;;  %v9283_v47 = vld [vmem:[%s10279_s7 + $0x1] ss:$0 sm:$0xff] }
 0x4fe   : > { %v9155_v50 = vmul.f32 %v7658_v31, %v3290_v5  ;;  %v7660_v12 = vpop.eup %7659  ;;  %v3305_v46 = vsel %vm3302_vm0, %v3304_v43, %v3300_v38  ;;  %v3538_v31 = vld [vmem:[%s10291_s2 + $0x28] sm:$0xff]  ;;  %v3696_v43 = vld [vmem:[%s9257_s18 + $0x18] sm:$0xff] }
 0x4ff   : > { %7661 = vtanh.f32 %v3046_v26  ;;  %v3323_v34 = vmul.f32 %v7660_v12, %v9137_v10  ;;  %vm3328_vm7 = vweird.f32 %v7660_v12  ;;  %v3614_v10 = vld [vmem:[%s9219_s26 + $0x8] sm:$0xff]  ;;  %v7055_v26 = vld [vmem:[%s10280_s24 + $0x50] sm:$0xff] }
 0x500   : > { %7015 = vmatmul.msk.f32.gmra.mxu3 %vm1397_vm1, %v9155_v50  ;;  %vm3329_vm9 = vmor %vm3327_vm8, %vm3328_vm7  ;;  %v3618_v5 = vld [vmem:[%s9219_s26 + $0x28] sm:$0xff] }
 0x501   : > { %v3324_v61 = vsub.f32 1.0, %v3323_v34 }
 0x502   : > { %v3029_v63 = vpop.f32.mrf.mxu0 }
 0x503   : > { %v3030_v2 = vadd.f32 %v3029_v63, %v9013_v45  ;;  %v3315_v45 = vsel %vm3314_vm5, %v7656_v21, %v3311_v58  ;;  %v3325_v39 = vmul.f32 %v7660_v12, %v3324_v61  ;;  %v3536_v21 = vld [vmem:[%s10291_s2 + $0x18] sm:$0xff]  ;;  %v3425_v63 = vld [vmem:[#allocation3 + $0x10] sm:$0xff] }
 0x504   : > { %v3320_v56 = vsel %vm3317_vm6, %v3319_v29, %v3315_v45  ;;  %v3426_v58 = vld [vmem:[#allocation3 + $0x18] sm:$0xff]  ;;  %v3460_v45 = vld [vmem:[%s10290_s15 + $0x40] sm:$0xff] }
 0x505   : > { %v7662_v35 = vpop.eup %7661  ;;  %v3047_v49 = vadd.f32 %v9029_v18, %v3030_v2  ;;  %v3326_v36 = vadd.f32 %v7660_v12, %v3325_v39  ;;  %v3459_v2 = vld [vmem:[%s10290_s15 + $0x38] sm:$0xff]  ;;  %v3621_v39 = vld [vmem:[%s9219_s26 + $0x40] sm:$0xff] }
 0x506   : > { %v9168_v33 = vmul.f32 %v7662_v35, %v3305_v46  ;;  %v3540_v35 = vld [vmem:[%s10291_s2 + $0x38] sm:$0xff] }
 0x507   : > { %7663 = vtanh.f32 %v3047_v49  ;;  %v3620_v46 = vld [vmem:[%s9219_s26 + $0x38] sm:$0xff]  ;;  %s7390_s26 = sshll.u32 %s8332_s23, 6 }
 0x508   : > { %7016 = vmatmul.msk.f32.gmra.mxu3 %vm1397_vm1, %v9168_v33 }
 0x50a   : > { %v3032_v44 = vpop.f32.mrf.mxu0 }
 0x50b   : > { %v3033_v54 = vadd.f32 %v3032_v44, %v9020_v11  ;;  %v3330_v11 = vsel %vm3329_vm9, %v7660_v12, %v3326_v36  ;;  %v3539_v12 = vld [vmem:[%s10291_s2 + $0x30] sm:$0xff]  ;;  %v3541_v44 = vld [vmem:[%s10291_s2 + $0x40] sm:$0xff]  ;;  %s9605_s2 = scalar_lea.vmem %s10295_s22, %s7390_s26  ;;  %s10299_s22 = sld [smem:[#allocation38_spill]] }
 0x50d   : > { %v7664_v13 = vpop.eup %7663  ;;  %v3048_v57 = vadd.f32 %v9029_v18, %v3033_v54  ;;  %v3335_v18 = vsel %vm3332_vm10, %v3334_v40, %v3330_v11  ;;  %v3699_v40 = vld [vmem:[%s9257_s18 + $0x30] sm:$0xff] }
 0x50e   : > { %v9177_v1 = vmul.f32 %v7664_v13, %v3320_v56  ;;  %v3427_v13 = vld [vmem:[#allocation3 + $0x20] sm:$0xff] }
 0x50f   : > { %7665 = vtanh.f32 %v3048_v57  ;;  %v3698_v57 = vld [vmem:[%s9257_s18 + $0x28] sm:$0xff] }
 0x510   : > { %7017 = vmatmul.msk.f32.gmra.mxu3 %vm1397_vm1, %v9177_v1 }
 0x515   : > { %v7666_v0 = vpop.eup %7665 }
 0x516   : > { %v9184_v59 = vmul.f32 %v7666_v0, %v3335_v18 }
 0x518   : > { %7018 = vmatmul.msk.f32.gmra.mxu3 %vm1397_vm1, %v9184_v59  ;;  %3496 = vmatpush.msrb.mxu0 %v9184_v59 }
 0x519   : > { %3576 = vmatpush.msrb.mxu1 %v9184_v59  ;;  %3656 = vmatpush.msrb.mxu2 %v9184_v59 }
 0x51a   : > { %3736 = vmatpush.msrb.mxu3 %v9184_v59  ;;  %3497 = vmatpush.msrb.mxu0 %v9177_v1 }
 0x51b   : > { %3577 = vmatpush.msrb.mxu1 %v9177_v1  ;;  %3657 = vmatpush.msrb.mxu2 %v9177_v1 }
 0x51c   : > { %3737 = vmatpush.msrb.mxu3 %v9177_v1  ;;  %3498 = vmatpush.msrb.mxu0 %v9168_v33 }
 0x51d   : > { %3578 = vmatpush.msrb.mxu1 %v9168_v33  ;;  %3658 = vmatpush.msrb.mxu2 %v9168_v33 }
 0x51e   : > { %3738 = vmatpush.msrb.mxu3 %v9168_v33  ;;  %3499 = vmatpush.msrb.mxu0 %v9155_v50 }
 0x51f   : > { %3579 = vmatpush.msrb.mxu1 %v9155_v50  ;;  %3659 = vmatpush.msrb.mxu2 %v9155_v50 }
 0x520   : > { %3739 = vmatpush.msrb.mxu3 %v9155_v50  ;;  %3500 = vmatpush.msrb.mxu0 %v9140_v41 }
 0x521   : > { %3580 = vmatpush.msrb.mxu1 %v9140_v41  ;;  %3660 = vmatpush.msrb.mxu2 %v9140_v41 }
 0x522   : > { %3740 = vmatpush.msrb.mxu3 %v9140_v41  ;;  %3501 = vmatpush.msrb.mxu0 %v9120_v28 }
 0x523   : > { %3581 = vmatpush.msrb.mxu1 %v9120_v28  ;;  %3661 = vmatpush.msrb.mxu2 %v9120_v28 }
 0x524   : > { %3741 = vmatpush.msrb.mxu3 %v9120_v28  ;;  %3502 = vmatpush.msrb.mxu0 %v9100_v42 }
 0x525   : > { %3582 = vmatpush.msrb.mxu1 %v9100_v42  ;;  %3662 = vmatpush.msrb.mxu2 %v9100_v42 }
 0x526   : > { %3742 = vmatpush.msrb.mxu3 %v9100_v42  ;;  %3503 = vmatpush.msrb.mxu0 %v9079_v19 }
 0x527   : > { %3583 = vmatpush.msrb.mxu1 %v9079_v19  ;;  %3663 = vmatpush.msrb.mxu2 %v9079_v19 }
 0x528   : > { %3743 = vmatpush.msrb.mxu3 %v9079_v19  ;;  %3504 = vmatpush.msrb.mxu0 %v9058_v37 }
 0x529   : > { %3584 = vmatpush.msrb.mxu1 %v9058_v37  ;;  %3664 = vmatpush.msrb.mxu2 %v9058_v37 }
 0x52a   : > { %3744 = vmatpush.msrb.mxu3 %v9058_v37  ;;  %7019 = vmatmul.msk.f32.vlgmr.msrb.gmra.mxu0 %vm3461_vm11, %v3452_v8 }
 0x52b   : > { %7028 = vmatmul.msk.f32.vlgmr.msrb.gmra.mxu1 %vm3461_vm11, %v3533_v22  ;;  %7037 = vmatmul.msk.f32.vlgmr.msrb.gmra.mxu2 %vm3461_vm11, %v3613_v9  ;;  %v3700_v22 = vld [vmem:[%s9257_s18 + $0x38] sm:$0xff] }
 0x52c   : > { %7046 = vmatmul.msk.f32.vlgmr.msrb.gmra.mxu3 %vm3461_vm11, %v3693_v48  ;;  %3869 = vmatpush.msra.mxu1 %v7056_v30  ;;  %v3431_v48 = vld [vmem:[#allocation3 + $0x40] sm:$0xff] }
 0x52e   : > { %3870 = vmatpush.msra.mxu1 %v7055_v26 }
 0x532   : > { %7020 = vmatmul.msk.f32.gmra.mxu0 %vm3461_vm11, %v3453_v4  ;;  %v7058_v4 = vld [vmem:[%s10280_s24 + $0x68] sm:$0xff] }
 0x533   : > { %7029 = vmatmul.msk.f32.gmra.mxu1 %vm3461_vm11, %v3534_v51  ;;  %7038 = vmatmul.msk.f32.gmra.mxu2 %vm3461_vm11, %v3614_v10  ;;  %v7060_v51 = vld [vmem:[%s10280_s24 + $0x78] sm:$0xff]  ;;  %v3701_v10 = vld [vmem:[%s9257_s18 + $0x40] sm:$0xff]  ;;  %s10298_s18 = smov %s10297_s28 }
 0x534   : > { %7047 = vmatmul.msk.f32.gmra.mxu3 %vm3461_vm11, %v3694_v60  ;;  %3825 = vmatpush.msra.mxu0 %v7058_v4 }
 0x535   : > { %3940 = vmatpush.msra.mxu2 %v7060_v51 }
 0x53a   : > { %7021 = vmatmul.msk.f32.gmra.mxu0 %vm3461_vm11, %v3454_v15  ;;  %v3430_v15 = vld [vmem:[#allocation3 + $0x38] sm:$0xff] }
 0x53b   : > { %7030 = vmatmul.msk.f32.gmra.mxu1 %vm3461_vm11, %v3535_v17  ;;  %7039 = vmatmul.msk.f32.gmra.mxu2 %vm3461_vm11, %v3615_v53  ;;  %v7057_v53 = vld [vmem:[%s10280_s24 + $0x60] sm:$0xff] }
 0x53c   : > { %7048 = vmatmul.msk.f32.gmra.mxu3 %vm3461_vm11, %v3695_v32  ;;  %3826 = vmatpush.msra.mxu0 %v7057_v53 }
 0x542   : > { %7022 = vmatmul.msk.f32.gmra.mxu0 %vm3461_vm11, %v3455_v62  ;;  %v7059_v62 = vld [vmem:[%s10280_s24 + $0x70] sm:$0xff] }
 0x543   : > { %7031 = vmatmul.msk.f32.gmra.mxu1 %vm3461_vm11, %v3536_v21  ;;  %7040 = vmatmul.msk.f32.gmra.mxu2 %vm3461_vm11, %v3616_v3  ;;  %v7062_v21 = vld [vmem:[%s10280_s24 + $0x88] sm:$0xff] }
 0x544   : > { %7049 = vmatmul.msk.f32.gmra.mxu3 %vm3461_vm11, %v3696_v43  ;;  %3941 = vmatpush.msra.mxu2 %v7059_v62  ;;  %v7064_v43 = vld [vmem:[%s10280_s24 + $0x98] sm:$0xff]  ;;  %v7114_v62 = vld [vmem:[%s8047_s17 + $0x28] sm:$0xff] }
 0x545   : > { %4020 = vmatpush.msra.mxu3 %v7062_v21  ;;  %4100 = vmatpush.msrb.mxu0 %v7064_v43  ;;  %v7113_v21 = vld [vmem:[%s8047_s17 + $0x20] sm:$0xff] }
 0x546   : > { %4296 = vmatpush.msrb.mxu2 %v7114_v62 }
 0x548   : > { %4297 = vmatpush.msrb.mxu2 %v7113_v21 }
 0x54a   : > { %7023 = vmatmul.msk.f32.gmra.mxu0 %vm3461_vm11, %v3456_v23  ;;  %v7061_v23 = vld [vmem:[%s10280_s24 + $0x80] sm:$0xff] }
 0x54b   : > { %7032 = vmatmul.msk.f32.gmra.mxu1 %vm3461_vm11, %v3537_v24  ;;  %7041 = vmatmul.msk.f32.gmra.mxu2 %vm3461_vm11, %v3617_v25 }
 0x54c   : > { %7050 = vmatmul.msk.f32.gmra.mxu3 %vm3461_vm11, %v3697_v52 }
 0x54d   : > { %4021 = vmatpush.msra.mxu3 %v7061_v23 }
 0x552   : > { %7024 = vmatmul.msk.f32.gmra.mxu0 %vm3461_vm11, %v3457_v20  ;;  %v3432_v20 = vld [vmem:[#allocation3 + $0x48] sm:$0xff] }
 0x553   : > { %7033 = vmatmul.msk.f32.gmra.mxu1 %vm3461_vm11, %v3538_v31  ;;  %7042 = vmatmul.msk.f32.gmra.mxu2 %vm3461_vm11, %v3618_v5  ;;  %v3433_v5 = vld [vmem:[#allocation3 + $0x50] sm:$0xff] }
 0x554   : > { %7051 = vmatmul.msk.f32.gmra.mxu3 %vm3461_vm11, %v3698_v57 }
 0x55a   : > { %7025 = vmatmul.msk.f32.gmra.mxu0 %vm3461_vm11, %v3458_v16 }
 0x55b   : > { %7034 = vmatmul.msk.f32.gmra.mxu1 %vm3461_vm11, %v3539_v12  ;;  %7043 = vmatmul.msk.f32.gmra.mxu2 %vm3461_vm11, %v3619_v7  ;;  %v3398_v34 = vpop.f32.mrf.mxu3 }
 0x55c   : > { %v3399_v38 = vadd.f32 %v9283_v47, %v3398_v34  ;;  %7052 = vmatmul.msk.f32.gmra.mxu3 %vm3461_vm11, %v3699_v40 }
 0x55e   : > { %v3434_v55 = vadd.f32 %v3425_v63, %v3399_v38 }
 0x560   : > { %3443 = vst.msk [vmem:[#allocation3] sm:$0xff] %vm2016_vm2, %v3434_v55 }
 0x562   : > { %7026 = vmatmul.msk.f32.gmra.mxu0 %vm3461_vm11, %v3459_v2 }
 0x563   : > { %7035 = vmatmul.msk.f32.gmra.mxu1 %vm3461_vm11, %v3540_v35  ;;  %7044 = vmatmul.msk.f32.gmra.mxu2 %vm3461_vm11, %v3620_v46  ;;  %v3401_v49 = vpop.f32.mrf.mxu3  ;;  %v7063_v46 = vld [vmem:[%s10280_s24 + $0x90] sm:$0xff] }
 0x564   : > { %v3402_v61 = vadd.f32 %v9283_v47, %v3401_v49  ;;  %7053 = vmatmul.msk.f32.gmra.mxu3 %vm3461_vm11, %v3700_v22  ;;  %4101 = vmatpush.msrb.mxu0 %v7063_v46 }
 0x566   : > { %v3435_v27 = vadd.f32 %v3426_v58, %v3402_v61 }
 0x568   : > { %3444 = vst.msk [vmem:[#allocation3 + $0x8] sm:$0xff] %vm2016_vm2, %v3435_v27 }
 0x56a   : > { %7027 = vmatmul.msk.f32.gmra.mxu0 %vm3461_vm11, %v3460_v45 }
 0x56b   : > { %7036 = vmatmul.msk.f32.gmra.mxu1 %vm3461_vm11, %v3541_v44  ;;  %7045 = vmatmul.msk.f32.gmra.mxu2 %vm3461_vm11, %v3621_v39  ;;  %v3404_v29 = vpop.f32.mrf.mxu3 }
 0x56c   : > { %v3405_v54 = vadd.f32 %v9283_v47, %v3404_v29  ;;  %7054 = vmatmul.msk.f32.gmra.mxu3 %vm3461_vm11, %v3701_v10 }
 0x56e   : > { %v3436_v56 = vadd.f32 %v3427_v13, %v3405_v54 }
 0x570   : > { %3445 = vst.msk [vmem:[#allocation3 + $0x10] sm:$0xff] %vm2016_vm2, %v3436_v56 }
 0x573   : > { %7074 = vmatmul.msk.f32.vlgmr.msra.gmra.mxu1 %vm1397_vm1, %v9058_v37  ;;  %v3407_v36 = vpop.f32.mrf.mxu3  ;;  %v3429_v37 = vld [vmem:[#allocation3 + $0x30] sm:$0xff] }
 0x574   : > { %v3408_v14 = vadd.f32 %v9283_v47, %v3407_v36 }
 0x576   : > { %v3437_v11 = vadd.f32 %v3428_v6, %v3408_v14 }
 0x578   : > { %3446 = vst.msk [vmem:[#allocation3 + $0x18] sm:$0xff] %vm2016_vm2, %v3437_v11 }
 0x57b   : > { %7075 = vmatmul.msk.f32.gmra.mxu1 %vm1397_vm1, %v9079_v19  ;;  %v3410_v0 = vpop.f32.mrf.mxu3 }
 0x57c   : > { %v3411_v18 = vadd.f32 %v9283_v47, %v3410_v0 }
 0x57e   : > { %v3438_v8 = vadd.f32 %v3429_v37, %v3411_v18 }
 0x580   : > { %3447 = vst.msk [vmem:[#allocation3 + $0x20] sm:$0xff] %vm2016_vm2, %v3438_v8 }
 0x583   : > { %7076 = vmatmul.msk.f32.gmra.mxu1 %vm1397_vm1, %v9100_v42  ;;  %v3413_v9 = vpop.f32.mrf.mxu3 }
 0x584   : > { %v3414_v19 = vadd.f32 %v9283_v47, %v3413_v9 }
 0x586   : > { %v3439_v17 = vadd.f32 %v3430_v15, %v3414_v19 }
 0x588   : > { %3448 = vst.msk [vmem:[#allocation3 + $0x28] sm:$0xff] %vm2016_vm2, %v3439_v17 }
 0x58b   : > { %7077 = vmatmul.msk.f32.gmra.mxu1 %vm1397_vm1, %v9120_v28  ;;  %v3416_v42 = vpop.f32.mrf.mxu3 }
 0x58c   : > { %v3417_v3 = vadd.f32 %v9283_v47, %v3416_v42  ;;  %v7135_v42 = vld [vmem:[%s8062_s29 + $0x28] sm:$0xff] }
 0x58e   : > { %v3440_v24 = vadd.f32 %v3431_v48, %v3417_v3  ;;  %v7134_v3 = vld [vmem:[%s8062_s29 + $0x20] sm:$0xff] }
 0x590   : > { %3449 = vst.msk [vmem:[#allocation3 + $0x30] sm:$0xff] %vm2016_vm2, %v3440_v24 }
 0x593   : > { %7078 = vmatmul.msk.f32.gmra.mxu1 %vm1397_vm1, %v9140_v41  ;;  %v3419_v25 = vpop.f32.mrf.mxu3 }
 0x594   : > { %v3420_v60 = vadd.f32 %v9283_v47, %v3419_v25 }
 0x596   : > { %v3441_v30 = vadd.f32 %v3432_v20, %v3420_v60  ;;  %v7137_v60 = vld [vmem:[%s10263_s3 + $0x28] sm:$0xff] }
 0x597   : > { %v7116_v20 = vld [vmem:[%s8052_s21 + $0x28] sm:$0xff]  ;;  %4356 = vmatpush.msrb.mxu3 %v7137_v60 }
 0x598   : > { %3450 = vst.msk [vmem:[#allocation3 + $0x38] sm:$0xff] %vm2016_vm2, %v3441_v30  ;;  %4252 = vmatpush.msrb.mxu1 %v7116_v20  ;;  %v7115_v30 = vld [vmem:[%s8052_s21 + $0x20] sm:$0xff] }
 0x59a   : > { %4253 = vmatpush.msrb.mxu1 %v7115_v30 }
 0x59b   : > { %7079 = vmatmul.msk.f32.gmra.mxu1 %vm1397_vm1, %v9155_v50  ;;  %v3422_v28 = vpop.f32.mrf.mxu3 }
 0x59c   : > { %v3423_v31 = vadd.f32 %v9283_v47, %v3422_v28  ;;  %v7136_v28 = vld [vmem:[%s10263_s3 + $0x20] sm:$0xff] }
 0x59d   : > { %4357 = vmatpush.msrb.mxu3 %v7136_v28 }
 0x59e   : > { %v3442_v26 = vadd.f32 %v3433_v5, %v3423_v31 }
 0x5a0   : > { %3451 = vst.msk [vmem:[#allocation3 + $0x40] sm:$0xff] %vm2016_vm2, %v3442_v26 }
 0x5a3   : > { %7080 = vmatmul.msk.f32.gmra.mxu1 %vm1397_vm1, %v9168_v33 }
 0x5a7   : > { %v3506_v41 = vpop.f32.mrf.mxu0 }
 0x5a8   : > { %v3586_v32 = vpop.f32.mrf.mxu1  ;;  %7065 = vmatmul.msk.f32.vlgmr.msra.gmra.mxu0 %vm1397_vm1, %v3506_v41 }
 0x5a9   : > { %7083 = vmatmul.msk.f32.vlgmr.msra.gmra.mxu2 %vm1397_vm1, %v3586_v32  ;;  %4397 = vmatpush.msra.mxu0 %v7135_v42 }
 0x5ab   : > { %7081 = vmatmul.msk.f32.gmra.mxu1 %vm1397_vm1, %v9177_v1  ;;  %4398 = vmatpush.msra.mxu0 %v7134_v3 }
 0x5ae   : > { %v3666_v50 = vpop.f32.mrf.mxu2 }
 0x5af   : > { %7092 = vmatmul.msk.f32.vlgmr.msra.gmra.mxu3 %vm1397_vm1, %v3666_v50  ;;  %v3509_v16 = vpop.f32.mrf.mxu0  ;;  %v3746_v44 = vpop.f32.mrf.mxu3  ;;  %v9413_v50 = vld [vmem:[%s10282_s16 + $0x1] ss:$0 sm:$0xff] }
 0x5b0   : > { %v3589_v12 = vpop.f32.mrf.mxu1  ;;  %7066 = vmatmul.msk.f32.gmra.mxu0 %vm1397_vm1, %v3509_v16 }
 0x5b1   : > { %7084 = vmatmul.msk.f32.gmra.mxu2 %vm1397_vm1, %v3589_v12 }
 0x5b3   : > { %7082 = vmatmul.msk.f32.gmra.mxu1 %vm1397_vm1, %v9184_v59 }
 0x5b6   : > { %v3669_v33 = vpop.f32.mrf.mxu2 }
 0x5b7   : > { %7093 = vmatmul.msk.f32.gmra.mxu3 %vm1397_vm1, %v3669_v33  ;;  %v3512_v7 = vpop.f32.mrf.mxu0  ;;  %v3749_v56 = vpop.f32.mrf.mxu3 }
 0x5b8   : > { %v3592_v47 = vpop.f32.mrf.mxu1  ;;  %7067 = vmatmul.msk.f32.gmra.mxu0 %vm1397_vm1, %v3512_v7 }
 0x5b9   : > { %7085 = vmatmul.msk.f32.gmra.mxu2 %vm1397_vm1, %v3592_v47 }
 0x5be   : > { %v3672_v1 = vpop.f32.mrf.mxu2 }
 0x5bf   : > { %7094 = vmatmul.msk.f32.gmra.mxu3 %vm1397_vm1, %v3672_v1  ;;  %v3515_v34 = vpop.f32.mrf.mxu0  ;;  %v3752_v36 = vpop.f32.mrf.mxu3  ;;  %v9417_v1 = vld [vmem:[%s10283_s1 + $0x1] ss:$0 sm:$0xff] }
 0x5c0   : > { %v3595_v38 = vpop.f32.mrf.mxu1  ;;  %7068 = vmatmul.msk.f32.gmra.mxu0 %vm1397_vm1, %v3515_v34 }
 0x5c1   : > { %7086 = vmatmul.msk.f32.gmra.mxu2 %vm1397_vm1, %v3595_v38  ;;  %v7762_v38 = vld [vmem:[#allocation2 + $0x10] sm:$0xff] }
 0x5c6   : > { %v3675_v59 = vpop.f32.mrf.mxu2 }
 0x5c7   : > { %7095 = vmatmul.msk.f32.gmra.mxu3 %vm1397_vm1, %v3675_v59  ;;  %v3518_v63 = vpop.f32.mrf.mxu0  ;;  %v3755_v14 = vpop.f32.mrf.mxu3 }
 0x5c8   : > { %v3598_v55 = vpop.f32.mrf.mxu1  ;;  %7069 = vmatmul.msk.f32.gmra.mxu0 %vm1397_vm1, %v3518_v63  ;;  %v9420_v63 = vld [vmem:[%s10285_s11 + $0x1] ss:$0 sm:$0xff] }
 0x5c9   : > { %7087 = vmatmul.msk.f32.gmra.mxu2 %vm1397_vm1, %v3598_v55 }
 0x5ce   : > { %v3678_v2 = vpop.f32.mrf.mxu2 }
 0x5cf   : > { %7096 = vmatmul.msk.f32.gmra.mxu3 %vm1397_vm1, %v3678_v2  ;;  %v3521_v35 = vpop.f32.mrf.mxu0  ;;  %v3758_v6 = vpop.f32.mrf.mxu3 }
 0x5d0   : > { %v3601_v49 = vpop.f32.mrf.mxu1  ;;  %7070 = vmatmul.msk.f32.gmra.mxu0 %vm1397_vm1, %v3521_v35 }
 0x5d1   : > { %7088 = vmatmul.msk.f32.gmra.mxu2 %vm1397_vm1, %v3601_v49 }
 0x5d6   : > { %v3681_v61 = vpop.f32.mrf.mxu2 }
 0x5d7   : > { %7097 = vmatmul.msk.f32.gmra.mxu3 %vm1397_vm1, %v3681_v61  ;;  %v3524_v58 = vpop.f32.mrf.mxu0  ;;  %v3761_v11 = vpop.f32.mrf.mxu3 }
 0x5d8   : > { %v3604_v27 = vpop.f32.mrf.mxu1  ;;  %7071 = vmatmul.msk.f32.gmra.mxu0 %vm1397_vm1, %v3524_v58 }
 0x5d9   : > { %7089 = vmatmul.msk.f32.gmra.mxu2 %vm1397_vm1, %v3604_v27 }
 0x5de   : > { %v3684_v52 = vpop.f32.mrf.mxu2 }
 0x5df   : > { %7098 = vmatmul.msk.f32.gmra.mxu3 %vm1397_vm1, %v3684_v52  ;;  %v3527_v45 = vpop.f32.mrf.mxu0  ;;  %v3764_v40 = vpop.f32.mrf.mxu3 }
 0x5e0   : > { %v3607_v39 = vpop.f32.mrf.mxu1  ;;  %7072 = vmatmul.msk.f32.gmra.mxu0 %vm1397_vm1, %v3527_v45 }
 0x5e1   : > { %7090 = vmatmul.msk.f32.gmra.mxu2 %vm1397_vm1, %v3607_v39 }
 0x5e6   : > { %v3687_v29 = vpop.f32.mrf.mxu2 }
 0x5e7   : > { %7099 = vmatmul.msk.f32.gmra.mxu3 %vm1397_vm1, %v3687_v29  ;;  %v3530_v54 = vpop.f32.mrf.mxu0  ;;  %v3767_v0 = vpop.f32.mrf.mxu3 }
 0x5e8   : > { %v3610_v13 = vpop.f32.mrf.mxu1  ;;  %7073 = vmatmul.msk.f32.gmra.mxu0 %vm1397_vm1, %v3530_v54 }
 0x5e9   : > { %7091 = vmatmul.msk.f32.gmra.mxu2 %vm1397_vm1, %v3610_v13 }
 0x5ee   : > { %v3690_v57 = vpop.f32.mrf.mxu2 }
 0x5ef   : > { %7100 = vmatmul.msk.f32.gmra.mxu3 %vm1397_vm1, %v3690_v57  ;;  %v3770_v8 = vpop.f32.mrf.mxu3 }
 0x5f0   : > { %7101 = vmatmul.msk.f32.vlgmr.msrb.gmra.mxu0 %vm1397_vm1, %v3746_v44  ;;  %v3872_v10 = vpop.f32.mrf.mxu1  ;;  %v7763_v44 = vld [vmem:[#allocation2 + $0x18] sm:$0xff] }
 0x5f8   : > { %7102 = vmatmul.msk.f32.gmra.mxu0 %vm1397_vm1, %v3749_v56  ;;  %v3875_v48 = vpop.f32.mrf.mxu1 }
 0x600   : > { %7103 = vmatmul.msk.f32.gmra.mxu0 %vm1397_vm1, %v3752_v36  ;;  %v3878_v5 = vpop.f32.mrf.mxu1 }
 0x608   : > { %7104 = vmatmul.msk.f32.gmra.mxu0 %vm1397_vm1, %v3755_v14  ;;  %v3881_v55 = vpop.f32.mrf.mxu1 }
 0x610   : > { %7105 = vmatmul.msk.f32.gmra.mxu0 %vm1397_vm1, %v3758_v6  ;;  %v3884_v56 = vpop.f32.mrf.mxu1 }
 0x618   : > { %7106 = vmatmul.msk.f32.gmra.mxu0 %vm1397_vm1, %v3761_v11  ;;  %v3887_v42 = vpop.f32.mrf.mxu1 }
 0x620   : > { %7107 = vmatmul.msk.f32.gmra.mxu0 %vm1397_vm1, %v3764_v40 }
 0x625   : > { %v3828_v18 = vpop.f32.mrf.mxu0 }
 0x626   : > { %v3873_v31 = vadd.f32 %v3872_v10, %v3828_v18 }
 0x628   : > { %7108 = vmatmul.msk.f32.gmra.mxu0 %vm1397_vm1, %v3767_v0 }
 0x62c   : > { %v3943_v15 = vpop.f32.mrf.mxu2 }
 0x62d   : > { %v3831_v37 = vpop.f32.mrf.mxu0  ;;  %v3970_v26 = vadd.f32 %v3943_v15, %v3873_v31 }
 0x62e   : > { %v3876_v7 = vadd.f32 %v3875_v48, %v3831_v37  ;;  %v7764_v37 = vld [vmem:[#allocation2 + $0x20] sm:$0xff] }
 0x630   : > { %7109 = vmatmul.msk.f32.gmra.mxu0 %vm1397_vm1, %v3770_v8 }
 0x632   : > { %v4023_v17 = vpop.f32.mrf.mxu3 }
 0x633   : > { %v4050_v32 = vadd.f32 %v4023_v17, %v3970_v26 }
 0x634   : > { %v3946_v23 = vpop.f32.mrf.mxu2 }
 0x635   : > { %v3834_v22 = vpop.f32.mrf.mxu0  ;;  %v3971_v34 = vadd.f32 %v3946_v23, %v3876_v7 }
 0x636   : > { %v3879_v27 = vadd.f32 %v3878_v5, %v3834_v22 }
 0x63a   : > { %v4026_v24 = vpop.f32.mrf.mxu3 }
 0x63b   : > { %v4051_v43 = vadd.f32 %v4026_v24, %v3971_v34  ;;  %v7765_v24 = vld [vmem:[#allocation2 + $0x28] sm:$0xff] }
 0x63c   : > { %v3949_v41 = vpop.f32.mrf.mxu2 }
 0x63d   : > { %v9392_v9 = vpop.f32.mrf.mxu0  ;;  %v3972_v45 = vadd.f32 %v3949_v41, %v3879_v27 }
 0x63e   : > { %v3882_v11 = vadd.f32 %v3881_v55, %v9392_v9 }
 0x642   : > { %v4029_v16 = vpop.f32.mrf.mxu3 }
 0x643   : > { %v4052_v29 = vadd.f32 %v4029_v16, %v3972_v45  ;;  %v3890_v16 = vpop.f32.mrf.mxu1 }
 0x644   : > { %v3952_v35 = vpop.f32.mrf.mxu2 }
 0x645   : > { %v9394_v4 = vpop.f32.mrf.mxu0  ;;  %v3973_v18 = vadd.f32 %v3952_v35, %v3882_v11 }
 0x646   : > { %v3885_v21 = vadd.f32 %v3884_v56, %v9394_v4 }
 0x64a   : > { %v4032_v58 = vpop.f32.mrf.mxu3 }
 0x64b   : > { %v4053_v22 = vadd.f32 %v4032_v58, %v3973_v18  ;;  %v3893_v27 = vpop.f32.mrf.mxu1 }
 0x64c   : > { %v3955_v14 = vpop.f32.mrf.mxu2 }
 0x64d   : > { %v9396_v51 = vpop.f32.mrf.mxu0  ;;  %v3974_v23 = vadd.f32 %v3955_v14, %v3885_v21  ;;  %v7768_v14 = vld [vmem:[#allocation2 + $0x40] sm:$0xff] }
 0x64e   : > { %v3888_v41 = vadd.f32 %v3887_v42, %v9396_v51 }
 0x652   : > { %v4035_v0 = vpop.f32.mrf.mxu3 }
 0x653   : > { %v4054_v30 = vadd.f32 %v4035_v0, %v3974_v23 }
 0x654   : > { %v3958_v48 = vpop.f32.mrf.mxu2 }
 0x655   : > { %v9398_v19 = vpop.f32.mrf.mxu0 }
 0x656   : > { %v3891_v35 = vadd.f32 %v3890_v16, %v9398_v19 }
 0x65a   : > { %v4038_v20 = vpop.f32.mrf.mxu3 }
 0x65d   : > { %v9400_v53 = vpop.f32.mrf.mxu0 }
 0x65e   : > { %v3894_v56 = vadd.f32 %v3893_v27, %v9400_v53 }
 0x665   : > { %v9406_v25 = vpop.f32.mrf.mxu0 }
 0x66d   : > { %v4103_v12 = vpop.f32.mrf.mxu0 }
 0x66e   : > { %v4130_v33 = vadd.f32 %v4103_v12, %v4050_v32  ;;  %v3975_v12 = vadd.f32 %v3958_v48, %v3888_v41 }
 0x670   : > { %v4144_v47 = vadd.f32 %v9413_v50, %v4130_v33  ;;  %v7766_v33 = vld [vmem:[#allocation2 + $0x30] sm:$0xff]  ;;  %v4055_v34 = vadd.f32 %v4038_v20, %v3975_v12  ;;  %v7163_v12 = vld [vmem:[%s8077_s14 + $0x20] sm:$0xff] }
 0x671   : > { %v7770_v20 = vld [vmem:[#allocation2 + $0x50] sm:$0xff] }
 0x672   : > { %v4153_v59 = vadd.f32 %v7762_v38, %v4144_v47  ;;  %v3961_v47 = vpop.f32.mrf.mxu2  ;;  %v4041_v38 = vpop.f32.mrf.mxu3 }
 0x674   : > { %v4167_v2 = vmul.f32 %v9417_v1, %v4153_v59 }
 0x675   : > { %v4106_v46 = vpop.f32.mrf.mxu0 }
 0x676   : > { %v4181_v49 = vadd.f32 %v9420_v63, %v4167_v2  ;;  %v4131_v61 = vadd.f32 %v4106_v46, %v4051_v43 }
 0x678   : > { %4190 = vst.msk [vmem:[#allocation2] sm:$0xff] %vm1397_vm1, %v4181_v49  ;;  %v4145_v52 = vadd.f32 %v9413_v50, %v4131_v61  ;;  %v3976_v49 = vadd.f32 %v3961_v47, %v3891_v35  ;;  %v7767_v61 = vld [vmem:[#allocation2 + $0x38] sm:$0xff] }
 0x67a   : > { %v4154_v39 = vadd.f32 %v7763_v44, %v4145_v52  ;;  %v4056_v52 = vadd.f32 %v4041_v38, %v3976_v49  ;;  %v3964_v19 = vpop.f32.mrf.mxu2 }
 0x67c   : > { %v4168_v54 = vmul.f32 %v9417_v1, %v4154_v39 }
 0x67d   : > { %v4109_v13 = vpop.f32.mrf.mxu0 }
 0x67e   : > { %v4182_v57 = vadd.f32 %v9420_v63, %v4168_v54  ;;  %v4132_v36 = vadd.f32 %v4109_v13, %v4052_v29  ;;  %v4044_v54 = vpop.f32.mrf.mxu3 }
 0x67f   : > { %v4199_v6 = vld [vmem:[#allocation2] sm:$0xff] }
 0x680   : > { %4191 = vst.msk [vmem:[#allocation2 + $0x8] sm:$0xff] %vm1397_vm1, %v4182_v57  ;;  %v4146_v40 = vadd.f32 %v9413_v50, %v4132_v36  ;;  %7125 = vmatmul.msk.f32.vlgmr.msrb.gmra.mxu2 %vm1397_vm1, %v4199_v6  ;;  %7146 = vmatmul.msk.f32.vlgmr.msra.gmra.mxu0 %vm1397_vm1, %v4199_v6  ;;  %v3977_v36 = vadd.f32 %v3964_v19, %v3894_v56 }
 0x682   : > { %v4155_v8 = vadd.f32 %v7764_v37, %v4146_v40  ;;  %v4057_v11 = vadd.f32 %v4044_v54, %v3977_v36  ;;  %v3896_v37 = vpop.f32.mrf.mxu1 }
 0x684   : > { %v4169_v10 = vmul.f32 %v9417_v1, %v4155_v8  ;;  %v3967_v8 = vpop.f32.mrf.mxu2 }
 0x685   : > { %v4112_v15 = vpop.f32.mrf.mxu0 }
 0x686   : > { %v4183_v17 = vadd.f32 %v9420_v63, %v4169_v10  ;;  %v4133_v62 = vadd.f32 %v4112_v15, %v4053_v22  ;;  %v3897_v10 = vadd.f32 %v3896_v37, %v9406_v25 }
 0x687   : > { %v4200_v9 = vld [vmem:[#allocation2 + $0x8] sm:$0xff] }
 0x688   : > { %4192 = vst.msk [vmem:[#allocation2 + $0x10] sm:$0xff] %vm1397_vm1, %v4183_v17  ;;  %v4147_v3 = vadd.f32 %v9413_v50, %v4133_v62  ;;  %7117 = vmatmul.msk.f32.vlgmr.msrb.gmra.mxu1 %vm1397_vm1, %v4200_v9  ;;  %7126 = vmatmul.msk.f32.gmra.mxu2 %vm1397_vm1, %v4200_v9  ;;  %v4047_v17 = vpop.f32.mrf.mxu3  ;;  %v3978_v62 = vadd.f32 %v3967_v8, %v3897_v10 }
 0x689   : > { %7138 = vmatmul.msk.f32.vlgmr.msrb.gmra.mxu3 %vm1397_vm1, %v4200_v9  ;;  %7147 = vmatmul.msk.f32.gmra.mxu0 %vm1397_vm1, %v4200_v9  ;;  %v7769_v9 = vld [vmem:[#allocation2 + $0x48] sm:$0xff] }
 0x68a   : > { %v4156_v60 = vadd.f32 %v7765_v24, %v4147_v3  ;;  %v4058_v21 = vadd.f32 %v4047_v17, %v3978_v62 }
 0x68c   : > { %v4170_v4 = vmul.f32 %v9417_v1, %v4156_v60 }
 0x68d   : > { %v4115_v28 = vpop.f32.mrf.mxu0 }
 0x68e   : > { %v4184_v31 = vadd.f32 %v9420_v63, %v4170_v4  ;;  %v4134_v5 = vadd.f32 %v4115_v28, %v4054_v30 }
 0x68f   : > { %v4201_v26 = vld [vmem:[#allocation2 + $0x10] sm:$0xff] }
 0x690   : > { %4193 = vst.msk [vmem:[#allocation2 + $0x18] sm:$0xff] %vm1397_vm1, %v4184_v31  ;;  %v4148_v32 = vadd.f32 %v9413_v50, %v4134_v5  ;;  %7118 = vmatmul.msk.f32.gmra.mxu1 %vm1397_vm1, %v4201_v26  ;;  %7127 = vmatmul.msk.f32.gmra.mxu2 %vm1397_vm1, %v4201_v26 }
 0x691   : > { %7139 = vmatmul.msk.f32.gmra.mxu3 %vm1397_vm1, %v4201_v26  ;;  %7148 = vmatmul.msk.f32.gmra.mxu0 %vm1397_vm1, %v4201_v26  ;;  %v7164_v26 = vld [vmem:[%s8077_s14 + $0x28] sm:$0xff] }
 0x692   : > { %v4157_v7 = vadd.f32 %v7766_v33, %v4148_v32  ;;  %4651 = vmatpush.msra.mxu1 %v7164_v26 }
 0x694   : > { %v4171_v51 = vmul.f32 %v9417_v1, %v4157_v7  ;;  %4652 = vmatpush.msra.mxu1 %v7163_v12 }
 0x695   : > { %v4118_v59 = vpop.f32.mrf.mxu0 }
 0x696   : > { %v4185_v55 = vadd.f32 %v9420_v63, %v4171_v51  ;;  %v4135_v43 = vadd.f32 %v4118_v59, %v4055_v34 }
 0x697   : > { %v4202_v2 = vld [vmem:[#allocation2 + $0x18] sm:$0xff] }
 0x698   : > { %4194 = vst.msk [vmem:[#allocation2 + $0x20] sm:$0xff] %vm1397_vm1, %v4185_v55  ;;  %v4149_v46 = vadd.f32 %v9413_v50, %v4135_v43  ;;  %7119 = vmatmul.msk.f32.gmra.mxu1 %vm1397_vm1, %v4202_v2  ;;  %7128 = vmatmul.msk.f32.gmra.mxu2 %vm1397_vm1, %v4202_v2 }
 0x699   : > { %7140 = vmatmul.msk.f32.gmra.mxu3 %vm1397_vm1, %v4202_v2  ;;  %7149 = vmatmul.msk.f32.gmra.mxu0 %vm1397_vm1, %v4202_v2 }
 0x69a   : > { %v4158_v58 = vadd.f32 %v7767_v61, %v4149_v46 }
 0x69c   : > { %v4172_v45 = vmul.f32 %v9417_v1, %v4158_v58 }
 0x69d   : > { %v4121_v44 = vpop.f32.mrf.mxu0 }
 0x69e   : > { %v4186_v39 = vadd.f32 %v9420_v63, %v4172_v45  ;;  %v4136_v29 = vadd.f32 %v4121_v44, %v4056_v52  ;;  %v9503_v52 = vld [vmem:[%s8057_s25 + $0x2] ss:$0 sm:$0xff] }
 0x69f   : > { %v4203_v13 = vld [vmem:[#allocation2 + $0x20] sm:$0xff] }
 0x6a0   : > { %4195 = vst.msk [vmem:[#allocation2 + $0x28] sm:$0xff] %vm1397_vm1, %v4186_v39  ;;  %v4150_v57 = vadd.f32 %v9413_v50, %v4136_v29  ;;  %7120 = vmatmul.msk.f32.gmra.mxu1 %vm1397_vm1, %v4203_v13  ;;  %7129 = vmatmul.msk.f32.gmra.mxu2 %vm1397_vm1, %v4203_v13 }
 0x6a1   : > { %7141 = vmatmul.msk.f32.gmra.mxu3 %vm1397_vm1, %v4203_v13  ;;  %7150 = vmatmul.msk.f32.gmra.mxu0 %vm1397_vm1, %v4203_v13 }
 0x6a2   : > { %v4159_v6 = vadd.f32 %v7768_v14, %v4150_v57 }
 0x6a4   : > { %v4173_v40 = vmul.f32 %v9417_v1, %v4159_v6 }
 0x6a5   : > { %v4124_v0 = vpop.f32.mrf.mxu0 }
 0x6a6   : > { %v4187_v53 = vadd.f32 %v9420_v63, %v4173_v40  ;;  %v4137_v18 = vadd.f32 %v4124_v0, %v4057_v11 }
 0x6a7   : > { %v4204_v22 = vld [vmem:[#allocation2 + $0x28] sm:$0xff] }
 0x6a8   : > { %4196 = vst.msk [vmem:[#allocation2 + $0x30] sm:$0xff] %vm1397_vm1, %v4187_v53  ;;  %v4151_v15 = vadd.f32 %v9413_v50, %v4137_v18  ;;  %7121 = vmatmul.msk.f32.gmra.mxu1 %vm1397_vm1, %v4204_v22  ;;  %7130 = vmatmul.msk.f32.gmra.mxu2 %vm1397_vm1, %v4204_v22 }
 0x6a9   : > { %7142 = vmatmul.msk.f32.gmra.mxu3 %vm1397_vm1, %v4204_v22  ;;  %7151 = vmatmul.msk.f32.gmra.mxu0 %vm1397_vm1, %v4204_v22 }
 0x6aa   : > { %v4160_v42 = vadd.f32 %v7769_v9, %v4151_v15 }
 0x6ac   : > { %v4174_v3 = vmul.f32 %v9417_v1, %v4160_v42 }
 0x6ad   : > { %v4127_v25 = vpop.f32.mrf.mxu0 }
 0x6ae   : > { %v4188_v48 = vadd.f32 %v9420_v63, %v4174_v3  ;;  %v4138_v23 = vadd.f32 %v4127_v25, %v4058_v21 }
 0x6af   : > { %v4205_v24 = vld [vmem:[#allocation2 + $0x30] sm:$0xff] }
 0x6b0   : > { %4197 = vst.msk [vmem:[#allocation2 + $0x38] sm:$0xff] %vm1397_vm1, %v4188_v48  ;;  %v4152_v60 = vadd.f32 %v9413_v50, %v4138_v23  ;;  %7122 = vmatmul.msk.f32.gmra.mxu1 %vm1397_vm1, %v4205_v24  ;;  %7131 = vmatmul.msk.f32.gmra.mxu2 %vm1397_vm1, %v4205_v24 }
 0x6b1   : > { %7143 = vmatmul.msk.f32.gmra.mxu3 %vm1397_vm1, %v4205_v24  ;;  %7152 = vmatmul.msk.f32.gmra.mxu0 %vm1397_vm1, %v4205_v24 }
 0x6b2   : > { %v4161_v30 = vadd.f32 %v7770_v20, %v4152_v60 }
 0x6b4   : > { %v4175_v4 = vmul.f32 %v9417_v1, %v4161_v30 }
 0x6b6   : > { %v4189_v28 = vadd.f32 %v9420_v63, %v4175_v4  ;;  %v9496_v63 = vld [vmem:[%s10261_s8 + $0x2] ss:$0 sm:$0xff] }
 0x6b7   : > { %v4206_v31 = vld [vmem:[#allocation2 + $0x38] sm:$0xff] }
 0x6b8   : > { %4198 = vst.msk [vmem:[#allocation2 + $0x40] sm:$0xff] %vm1397_vm1, %v4189_v28  ;;  %7123 = vmatmul.msk.f32.gmra.mxu1 %vm1397_vm1, %v4206_v31  ;;  %7132 = vmatmul.msk.f32.gmra.mxu2 %vm1397_vm1, %v4206_v31 }
 0x6b9   : > { %7144 = vmatmul.msk.f32.gmra.mxu3 %vm1397_vm1, %v4206_v31  ;;  %7153 = vmatmul.msk.f32.gmra.mxu0 %vm1397_vm1, %v4206_v31 }
 0x6bf   : > { %v4207_v50 = vld [vmem:[#allocation2 + $0x40] sm:$0xff] }
 0x6c0   : > { %7124 = vmatmul.msk.f32.gmra.mxu1 %vm1397_vm1, %v4207_v50 }
 0x6c1   : > { %7145 = vmatmul.msk.f32.gmra.mxu3 %vm1397_vm1, %v4207_v50 }
 0x6fd   : > { %v4400_v1 = vpop.f32.mrf.mxu0 }
 0x703   : > { %v4299_v33 = vpop.f32.mrf.mxu2 }
 0x705   : > { %v4255_v32 = vpop.f32.mrf.mxu1 }
 0x706   : > { %v4403_v5 = vpop.f32.mrf.mxu0  ;;  %v4300_v27 = vadd.f32 %v4299_v33, %v4255_v32 }
 0x708   : > { %v4328_v54 = vadd.f32 %v9503_v52, %v4300_v27 }
 0x70b   : > { %v4302_v2 = vpop.f32.mrf.mxu2 }
 0x70c   : > { %v4359_v41 = vpop.f32.mrf.mxu3 }
 0x70d   : > { %v4401_v16 = vadd.f32 %v4400_v1, %v4359_v41  ;;  %v4258_v59 = vpop.f32.mrf.mxu1 }
 0x70e   : > { %v4406_v34 = vpop.f32.mrf.mxu0  ;;  %v4303_v11 = vadd.f32 %v4302_v2, %v4258_v59 }
 0x70f   : > { %v4429_v7 = vadd.f32 %v9496_v63, %v4401_v16 }
 0x710   : > { %v4329_v62 = vadd.f32 %v9503_v52, %v4303_v11 }
 0x711   : > { %v7155_v47 = vmul.f32 -1.442695, %v4429_v7 }
 0x713   : > { %7667 = vpow2.f32 %v7155_v47  ;;  %v4305_v57 = vpop.f32.mrf.mxu2 }
 0x714   : > { %v4362_v51 = vpop.f32.mrf.mxu3 }
 0x715   : > { %v4404_v38 = vadd.f32 %v4403_v5, %v4362_v51  ;;  %v4261_v44 = vpop.f32.mrf.mxu1 }
 0x716   : > { %v4409_v49 = vpop.f32.mrf.mxu0  ;;  %v4306_v4 = vadd.f32 %v4305_v57, %v4261_v44 }
 0x717   : > { %v4430_v55 = vadd.f32 %v9496_v63, %v4404_v38 }
 0x718   : > { %v4330_v33 = vadd.f32 %v9503_v52, %v4306_v4 }
 0x719   : > { %v7668_v43 = vpop.eup %7667  ;;  %v7156_v35 = vmul.f32 -1.442695, %v4430_v55 }
 0x71a   : > { %v4469_v46 = vadd.f32 1.0, %v7668_v43 }
 0x71b   : > { %7669 = vpow2.f32 %v7156_v35  ;;  %v4308_v60 = vpop.f32.mrf.mxu2 }
 0x71c   : > { %7671 = vrcp.f32 %v4469_v46  ;;  %v4365_v61 = vpop.f32.mrf.mxu3  ;;  %v4488_v53 = vand.u32 2147483648, %v4469_v46  ;;  %v4486_v37 = vand.u32 2147483647, %v4469_v46  ;;  %vm4482_vm13 = vweird.f32 %v4469_v46 }
 0x71d   : > { %v4407_v58 = vadd.f32 %v4406_v34, %v4365_v61  ;;  %v4264_v3 = vpop.f32.mrf.mxu1 }
 0x71e   : > { %v4412_v40 = vpop.f32.mrf.mxu0  ;;  %v4489_v42 = vor.u32 1.1754944e-38, %v4488_v53  ;;  %vm4487_vm15 = vcmp.eq.f32.partialorder %v4486_v37, 8.507059e+37 }
 0x71f   : > { %v4431_v45 = vadd.f32 %v9496_v63, %v4407_v58 }
 0x721   : > { %v7670_v19 = vpop.eup %7669  ;;  %v7157_v39 = vmul.f32 -1.442695, %v4431_v45 }
 0x722   : > { %v7672_v29 = vpop.eup %7671  ;;  %v4470_v13 = vadd.f32 1.0, %v7670_v19 }
 0x723   : > { %v4478_v56 = vmul.f32 %v7672_v29, %v4469_v46  ;;  %7673 = vpow2.f32 %v7157_v39  ;;  %vm4483_vm12 = vweird.f32 %v7672_v29  ;;  %v4309_v46 = vadd.f32 %v4308_v60, %v4264_v3  ;;  %v4311_v27 = vpop.f32.mrf.mxu2 }
 0x724   : > { %7675 = vrcp.f32 %v4470_v13  ;;  %v4368_v36 = vpop.f32.mrf.mxu3  ;;  %vm9508_vm14 = vmor %vm4482_vm13, %vm4483_vm12  ;;  %v4503_v50 = vand.u32 2147483648, %v4470_v13  ;;  %v4501_v5 = vand.u32 2147483647, %v4470_v13  ;;  %vm4497_vm3 = vweird.f32 %v4470_v13 }
 0x725   : > { %v4479_v14 = vsub.f32 1.0, %v4478_v56  ;;  %v4410_v6 = vadd.f32 %v4409_v49, %v4368_v36  ;;  %7677 = vtanh.f32 %v4328_v54  ;;  %v4267_v43 = vpop.f32.mrf.mxu1 }
 0x726   : > { %v4415_v26 = vpop.f32.mrf.mxu0  ;;  %v4504_v47 = vor.u32 1.1754944e-38, %v4503_v50  ;;  %vm4502_vm5 = vcmp.eq.f32.partialorder %v4501_v5, 8.507059e+37  ;;  %v4312_v37 = vadd.f32 %v4311_v27, %v4267_v43 }
 0x727   : > { %v4480_v0 = vmul.f32 %v7672_v29, %v4479_v14  ;;  %v4432_v18 = vadd.f32 %v9496_v63, %v4410_v6 }
 0x729   : > { %v7674_v8 = vpop.eup %7673  ;;  %v4481_v22 = vadd.f32 %v7672_v29, %v4480_v0  ;;  %v7158_v10 = vmul.f32 -1.442695, %v4432_v18 }
 0x72a   : > { %v7676_v15 = vpop.eup %7675  ;;  %v9513_v9 = vadd.f32 1.0, %v7674_v8 }
 0x72b   : > { %v4493_v21 = vmul.f32 %v7676_v15, %v4470_v13  ;;  %7679 = vpow2.f32 %v7158_v10  ;;  %v4485_v25 = vsel %vm9508_vm14, %v7672_v29, %v4481_v22  ;;  %v7678_v48 = vpop.eup %7677  ;;  %vm4498_vm0 = vweird.f32 %v7676_v15 }
 0x72c   : > { %7681 = vrcp.f32 %v9513_v9  ;;  %v4371_v23 = vpop.f32.mrf.mxu3  ;;  %v4490_v30 = vsel %vm4487_vm15, %v4489_v42, %v4485_v25  ;;  %vm4499_vm4 = vmor %vm4497_vm3, %vm4498_vm0  ;;  %v4518_v58 = vand.u32 2147483648, %v9513_v9  ;;  %v4516_v19 = vand.u32 2147483647, %v9513_v9 }
 0x72d   : > { %v4494_v24 = vsub.f32 1.0, %v4493_v21  ;;  %v4413_v20 = vadd.f32 %v4412_v40, %v4371_v23  ;;  %7683 = vtanh.f32 %v4329_v62  ;;  %v9518_v28 = vmul.f32 %v7678_v48, %v4490_v30  ;;  %v4314_v21 = vpop.f32.mrf.mxu2 }
 0x72e   : > { %vm4512_vm7 = vweird.f32 %v9513_v9  ;;  %v4331_v13 = vadd.f32 %v9503_v52, %v4309_v46  ;;  %v4418_v57 = vpop.f32.mrf.mxu0  ;;  %v4519_v36 = vor.u32 1.1754944e-38, %v4518_v58  ;;  %vm4517_vm9 = vcmp.eq.f32.partialorder %v4516_v19, 8.507059e+37 }
 0x72f   : > { %v4495_v31 = vmul.f32 %v7676_v15, %v4494_v24  ;;  %v4433_v1 = vadd.f32 %v9496_v63, %v4413_v20  ;;  %7166 = vmatmul.msk.f32.vlgmr.msra.gmra.mxu1 %vm1397_vm1, %v9518_v28  ;;  %v4332_v48 = vadd.f32 %v9503_v52, %v4312_v37 }
 0x731   : > { %v7680_v41 = vpop.eup %7679  ;;  %v4496_v32 = vadd.f32 %v7676_v15, %v4495_v31  ;;  %v7159_v16 = vmul.f32 -1.442695, %v4433_v1 }
 0x732   : > { %v7682_v12 = vpop.eup %7681  ;;  %v9524_v7 = vadd.f32 1.0, %v7680_v41 }
 0x733   : > { %v4508_v34 = vmul.f32 %v7682_v12, %v9513_v9  ;;  %7685 = vpow2.f32 %v7159_v16  ;;  %v4500_v51 = vsel %vm4499_vm4, %v7676_v15, %v4496_v32  ;;  %v7684_v38 = vpop.eup %7683  ;;  %vm4513_vm6 = vweird.f32 %v7682_v12  ;;  %v4270_v15 = vpop.f32.mrf.mxu1 }
 0x734   : > { %7687 = vrcp.f32 %v9524_v7  ;;  %v4374_v59 = vpop.f32.mrf.mxu3  ;;  %v4505_v35 = vsel %vm4502_vm5, %v4504_v47, %v4500_v51  ;;  %vm4514_vm8 = vmor %vm4512_vm7, %vm4513_vm6  ;;  %v4533_v10 = vand.u32 2147483648, %v9524_v7  ;;  %v4531_v62 = vand.u32 2147483647, %v9524_v7 }
 0x735   : > { %v4509_v55 = vsub.f32 1.0, %v4508_v34  ;;  %v4416_v2 = vadd.f32 %v4415_v26, %v4374_v59  ;;  %7689 = vtanh.f32 %v4330_v33  ;;  %v9528_v49 = vmul.f32 %v7684_v38, %v4505_v35 }
 0x736   : > { %vm4527_vm11 = vweird.f32 %v9524_v7  ;;  %v4534_v24 = vor.u32 1.1754944e-38, %v4533_v10  ;;  %vm4532_vm13 = vcmp.eq.f32.partialorder %v4531_v62, 8.507059e+37  ;;  %v4421_v4 = vpop.f32.mrf.mxu0  ;;  %v4315_v26 = vadd.f32 %v4314_v21, %v4270_v15 }
 0x737   : > { %v4510_v61 = vmul.f32 %v7682_v12, %v4509_v55  ;;  %v4434_v45 = vadd.f32 %v9496_v63, %v4416_v2  ;;  %7167 = vmatmul.msk.f32.gmra.mxu1 %vm1397_vm1, %v9528_v49  ;;  %v4317_v2 = vpop.f32.mrf.mxu2 }
 0x738   : > { %v4333_v59 = vadd.f32 %v9503_v52, %v4315_v26 }
 0x739   : > { %v7686_v44 = vpop.eup %7685  ;;  %v4511_v39 = vadd.f32 %v7682_v12, %v4510_v61  ;;  %v7160_v29 = vmul.f32 -1.442695, %v4434_v45 }
 0x73a   : > { %v7688_v54 = vpop.eup %7687  ;;  %v9537_v56 = vadd.f32 1.0, %v7686_v44 }
 0x73b   : > { %v4523_v14 = vmul.f32 %v7688_v54, %v9524_v7  ;;  %7691 = vpow2.f32 %v7160_v29  ;;  %v4515_v6 = vsel %vm4514_vm8, %v7682_v12, %v4511_v39  ;;  %v7690_v11 = vpop.eup %7689  ;;  %vm4528_vm10 = vweird.f32 %v7688_v54  ;;  %v4273_v34 = vpop.f32.mrf.mxu1 }
 0x73c   : > { %7693 = vrcp.f32 %v9537_v56  ;;  %v4377_v40 = vpop.f32.mrf.mxu3  ;;  %v4520_v18 = vsel %vm4517_vm9, %v4519_v36, %v4515_v6  ;;  %vm4529_vm12 = vmor %vm4527_vm11, %vm4528_vm10  ;;  %v4548_v16 = vand.u32 2147483648, %v9537_v56  ;;  %v4546_v33 = vand.u32 2147483647, %v9537_v56 }
 0x73d   : > { %v4524_v0 = vsub.f32 1.0, %v4523_v14  ;;  %v4419_v53 = vadd.f32 %v4418_v57, %v4377_v40  ;;  %7695 = vtanh.f32 %v4331_v13  ;;  %v9541_v8 = vmul.f32 %v7690_v11, %v4520_v18 }
 0x73e   : > { %vm4542_vm15 = vweird.f32 %v9537_v56  ;;  %v4549_v43 = vor.u32 1.1754944e-38, %v4548_v16  ;;  %vm4547_vm3 = vcmp.eq.f32.partialorder %v4546_v33, 8.507059e+37  ;;  %v4318_v27 = vadd.f32 %v4317_v2, %v4273_v34  ;;  %v4776_v16 = vld [vmem:[%s10297_s28] sm:$0xff]  ;;  %v4703_v33 = vld [vmem:[%s10296_s10 + $0x8] sm:$0xff]  ;;  %v4704_v34 = vld [vmem:[%s10296_s10 + $0x10] sm:$0xff]  ;;  %s9651_s28 = scalar_lea.vmem %s10299_s22, %s7390_s26  ;;  %s10301_s26 = sld [smem:[#allocation28_spill]] }
 0x73f   : > { %v4525_v22 = vmul.f32 %v7688_v54, %v4524_v0  ;;  %v4435_v17 = vadd.f32 %v9496_v63, %v4419_v53  ;;  %7168 = vmatmul.msk.f32.gmra.mxu1 %vm1397_vm1, %v9541_v8  ;;  %v4320_v0 = vpop.f32.mrf.mxu2  ;;  %v7207_v2 = vld [vmem:[%s10280_s24 + $0xa8] sm:$0xff]  ;;  %s7399_s22 = smul.u32 48, %s8332_s23 }
 0x741   : > { %v7692_v9 = vpop.eup %7691  ;;  %v4526_v42 = vadd.f32 %v7688_v54, %v4525_v22  ;;  %v7161_v3 = vmul.f32 -1.442695, %v4435_v17 }
 0x742   : > { %v7694_v25 = vpop.eup %7693  ;;  %v4474_v23 = vadd.f32 1.0, %v7692_v9 }
 0x743   : > { %v4538_v60 = vmul.f32 %v7694_v25, %v9537_v56  ;;  %7697 = vpow2.f32 %v7161_v3  ;;  %v4530_v20 = vsel %vm4529_vm12, %v7688_v54, %v4526_v42  ;;  %v7696_v30 = vpop.eup %7695  ;;  %vm4543_vm14 = vweird.f32 %v7694_v25  ;;  %v4276_v6 = vpop.f32.mrf.mxu1 }
 0x744   : > { %7699 = vrcp.f32 %v4474_v23  ;;  %v4380_v31 = vpop.f32.mrf.mxu3  ;;  %v4535_v5 = vsel %vm4532_vm13, %v4534_v24, %v4530_v20  ;;  %vm4544_vm0 = vmor %vm4542_vm15, %vm4543_vm14  ;;  %v4563_v44 = vand.u32 2147483648, %v4474_v23  ;;  %v4561_v39 = vand.u32 2147483647, %v4474_v23 }
 0x745   : > { %v4539_v50 = vsub.f32 1.0, %v4538_v60  ;;  %v4422_v1 = vadd.f32 %v4421_v4, %v4380_v31  ;;  %7701 = vtanh.f32 %v4332_v48  ;;  %v9551_v41 = vmul.f32 %v7696_v30, %v4535_v5 }
 0x746   : > { %vm4557_vm5 = vweird.f32 %v4474_v23  ;;  %v4334_v56 = vadd.f32 %v9503_v52, %v4318_v27  ;;  %v4564_v36 = vor.u32 1.1754944e-38, %v4563_v44  ;;  %vm4562_vm7 = vcmp.eq.f32.partialorder %v4561_v39, 8.507059e+37  ;;  %v4781_v27 = vld [vmem:[%s10298_s18 + $0x28] sm:$0xff]  ;;  %v4922_v44 = vld [vmem:[%s9651_s28] sm:$0xff]  ;;  %v4708_v39 = vld [vmem:[%s10296_s10 + $0x30] sm:$0xff] }
 0x747   : > { %v4540_v32 = vmul.f32 %v7694_v25, %v4539_v50  ;;  %v4436_v12 = vadd.f32 %v9496_v63, %v4422_v1  ;;  %7169 = vmatmul.msk.f32.gmra.mxu1 %vm1397_vm1, %v9551_v41  ;;  %v4321_v22 = vadd.f32 %v4320_v0, %v4276_v6  ;;  %v4856_v6 = vld [vmem:[%s9605_s2 + $0x38] sm:$0xff]  ;;  %v4678_v0 = vld [vmem:[#allocation3 + $0x8] sm:$0xff] }
 0x749   : > { %v7698_v7 = vpop.eup %7697  ;;  %v4541_v47 = vadd.f32 %v7694_v25, %v4540_v32  ;;  %v7162_v51 = vmul.f32 -1.442695, %v4436_v12  ;;  %v4335_v21 = vadd.f32 %v9503_v52, %v4321_v22  ;;  %v4702_v32 = vld [vmem:[%s10296_s10] sm:$0xff] }
 0x74a   : > { %v7700_v38 = vpop.eup %7699  ;;  %v4475_v55 = vadd.f32 1.0, %v7698_v7  ;;  %v4849_v12 = vld [vmem:[%s9605_s2] sm:$0xff]  ;;  %v4777_v7 = vld [vmem:[%s10298_s18 + $0x8] sm:$0xff] }
 0x74b   : > { %v4553_v35 = vmul.f32 %v7700_v38, %v4474_v23  ;;  %7703 = vpow2.f32 %v7162_v51  ;;  %v4545_v63 = vsel %vm4544_vm0, %v7694_v25, %v4541_v47  ;;  %v7702_v46 = vpop.eup %7701  ;;  %vm4558_vm4 = vweird.f32 %v7700_v38  ;;  %v4850_v47 = vld [vmem:[%s9605_s2 + $0x8] sm:$0xff]  ;;  %v4778_v51 = vld [vmem:[%s10298_s18 + $0x10] sm:$0xff] }
 0x74c   : > { %7705 = vrcp.f32 %v4475_v55  ;;  %v4550_v58 = vsel %vm4547_vm3, %v4549_v43, %v4545_v63  ;;  %vm4559_vm6 = vmor %vm4557_vm5, %vm4558_vm4  ;;  %v4578_v37 = vand.u32 2147483648, %v4475_v55  ;;  %v4576_v17 = vand.u32 2147483647, %v4475_v55  ;;  %v4852_v43 = vld [vmem:[%s9605_s2 + $0x18] sm:$0xff]  ;;  %v4780_v63 = vld [vmem:[%s10298_s18 + $0x20] sm:$0xff] }
 0x74d   : > { %v4554_v61 = vsub.f32 1.0, %v4553_v35  ;;  %v9560_v45 = vmul.f32 %v7702_v46, %v4550_v58  ;;  %7707 = vtanh.f32 %v4333_v59  ;;  %vm4572_vm9 = vweird.f32 %v4475_v55  ;;  %v4705_v59 = vld [vmem:[%s10296_s10 + $0x18] sm:$0xff]  ;;  %v4706_v35 = vld [vmem:[%s10296_s10 + $0x20] sm:$0xff]  ;;  %v4707_v58 = vld [vmem:[%s10296_s10 + $0x28] sm:$0xff] }
 0x74e   : > { %v4579_v42 = vor.u32 1.1754944e-38, %v4578_v37  ;;  %vm4577_vm11 = vcmp.eq.f32.partialorder %v4576_v17, 8.507059e+37  ;;  %vm4710_vm0 = vcmask 523264   ;;  %v4853_v46 = vld [vmem:[%s9605_s2 + $0x20] sm:$0xff]  ;;  %v4925_v37 = vld [vmem:[%s9651_s28 + $0x18] sm:$0xff] }
 0x74f   : > { %v4555_v19 = vmul.f32 %v7700_v38, %v4554_v61  ;;  %7170 = vmatmul.msk.f32.gmra.mxu1 %vm1397_vm1, %v9560_v45  ;;  %v7206_v61 = vld [vmem:[%s10280_s24 + $0xa0] sm:$0xff] }
 0x751   : > { %v7704_v29 = vpop.eup %7703  ;;  %v4556_v54 = vadd.f32 %v7700_v38, %v4555_v19  ;;  %v4854_v19 = vld [vmem:[%s9605_s2 + $0x28] sm:$0xff] }
 0x752   : > { %v7706_v13 = vpop.eup %7705  ;;  %v4476_v57 = vadd.f32 1.0, %v7704_v29  ;;  %v4782_v29 = vld [vmem:[%s10298_s18 + $0x30] sm:$0xff] }
 0x753   : > { %v4568_v14 = vmul.f32 %v7706_v13, %v4475_v55  ;;  %v4560_v11 = vsel %vm4559_vm6, %v7700_v38, %v4556_v54  ;;  %v7708_v40 = vpop.eup %7707  ;;  %vm4573_vm8 = vweird.f32 %v7706_v13  ;;  %v4851_v38 = vld [vmem:[%s9605_s2 + $0x10] sm:$0xff]  ;;  %v4779_v55 = vld [vmem:[%s10298_s18 + $0x18] sm:$0xff] }
 0x754   : > { %7709 = vrcp.f32 %v4476_v57  ;;  %v4565_v18 = vsel %vm4562_vm7, %v4564_v36, %v4560_v11  ;;  %vm4574_vm10 = vmor %vm4572_vm9, %vm4573_vm8  ;;  %v4593_v20 = vand.u32 2147483648, %v4476_v57  ;;  %v4591_v4 = vand.u32 2147483647, %v4476_v57  ;;  %v4855_v54 = vld [vmem:[%s9605_s2 + $0x30] sm:$0xff]  ;;  %s10300_s2 = sld [smem:[#allocation35_spill]] }
 0x755   : > { %v4569_v53 = vsub.f32 1.0, %v4568_v14  ;;  %7711 = vtanh.f32 %v4334_v56  ;;  %v9565_v10 = vmul.f32 %v7708_v40, %v4565_v18  ;;  %vm4587_vm13 = vweird.f32 %v4476_v57  ;;  %v9670_v56 = vld [vmem:[%s10279_s7 + $0x2] ss:$0 sm:$0xff]  ;;  %v4783_v14 = vld [vmem:[%s10298_s18 + $0x38] sm:$0xff]  ;;  %v4924_v11 = vld [vmem:[%s9651_s28 + $0x10] sm:$0xff] }
 0x756   : > { %7713 = vtanh.f32 %v4335_v21  ;;  %v4594_v52 = vor.u32 1.1754944e-38, %v4593_v20  ;;  %vm4592_vm15 = vcmp.eq.f32.partialorder %v4591_v4, 8.507059e+37  ;;  %v4680_v21 = vld [vmem:[#allocation3 + $0x18] sm:$0xff]  ;;  %v4928_v20 = vld [vmem:[%s9651_s28 + $0x30] sm:$0xff]  ;;  %v4682_v4 = vld [vmem:[#allocation3 + $0x28] sm:$0xff] }
 0x757   : > { %v4570_v15 = vmul.f32 %v7706_v13, %v4569_v53  ;;  %7171 = vmatmul.msk.f32.gmra.mxu1 %vm1397_vm1, %v9565_v10 }
 0x759   : > { %v4571_v62 = vadd.f32 %v7706_v13, %v4570_v15  ;;  %v4679_v15 = vld [vmem:[#allocation3 + $0x10] sm:$0xff] }
 0x75a   : > { %v7710_v9 = vpop.eup %7709  ;;  %s9987_s6 = scalar_lea.vmem %s10300_s2, %s7399_s22 }
 0x75b   : > { %v4583_v3 = vmul.f32 %v7710_v9, %v4476_v57  ;;  %v4575_v25 = vsel %vm4574_vm10, %v7706_v13, %v4571_v62  ;;  %v7712_v48 = vpop.eup %7711  ;;  %vm4588_vm12 = vweird.f32 %v7710_v9  ;;  %v4923_v13 = vld [vmem:[%s9651_s28 + $0x8] sm:$0xff]  ;;  %v4709_v57 = vld [vmem:[%s10296_s10 + $0x38] sm:$0xff] }
 0x75c   : > { %v4580_v23 = vsel %vm4577_vm11, %v4579_v42, %v4575_v25  ;;  %vm4589_vm14 = vmor %vm4587_vm13, %vm4588_vm12  ;;  %v7714_v1 = vpop.eup %7713 }
 0x75d   : > { %v4584_v24 = vsub.f32 1.0, %v4583_v3  ;;  %v9570_v60 = vmul.f32 %v7712_v48, %v4580_v23  ;;  %v4927_v48 = vld [vmem:[%s9651_s28 + $0x28] sm:$0xff]  ;;  %v4681_v23 = vld [vmem:[#allocation3 + $0x20] sm:$0xff] }
 0x75f   : > { %v4585_v30 = vmul.f32 %v7710_v9, %v4584_v24  ;;  %7172 = vmatmul.msk.f32.gmra.mxu1 %vm1397_vm1, %v9570_v60 }
 0x761   : > { %v4586_v31 = vadd.f32 %v7710_v9, %v4585_v30 }
 0x763   : > { %v4590_v50 = vsel %vm4589_vm14, %v7710_v9, %v4586_v31  ;;  %v4926_v9 = vld [vmem:[%s9651_s28 + $0x20] sm:$0xff] }
 0x764   : > { %v4595_v5 = vsel %vm4592_vm15, %v4594_v52, %v4590_v50  ;;  %v7209_v52 = vld [vmem:[%s10280_s24 + $0xb8] sm:$0xff] }
 0x765   : > { %v9574_v26 = vmul.f32 %v7714_v1, %v4595_v5  ;;  %v4683_v5 = vld [vmem:[#allocation3 + $0x30] sm:$0xff] }
 0x767   : > { %4743 = vmatpush.msra.mxu2 %v9574_v26  ;;  %4816 = vmatpush.msra.mxu3 %v9574_v26 }
 0x768   : > { %7173 = vmatmul.msk.f32.gmra.mxu1 %vm1397_vm1, %v9574_v26  ;;  %4889 = vmatpush.msrb.mxu0 %v9574_v26 }
 0x769   : > { %4962 = vmatpush.msrb.mxu1 %v9574_v26  ;;  %4744 = vmatpush.msra.mxu2 %v9570_v60 }
 0x76a   : > { %4817 = vmatpush.msra.mxu3 %v9570_v60  ;;  %4890 = vmatpush.msrb.mxu0 %v9570_v60 }
 0x76b   : > { %4963 = vmatpush.msrb.mxu1 %v9570_v60  ;;  %4745 = vmatpush.msra.mxu2 %v9565_v10 }
 0x76c   : > { %4818 = vmatpush.msra.mxu3 %v9565_v10  ;;  %4891 = vmatpush.msrb.mxu0 %v9565_v10 }
 0x76d   : > { %4964 = vmatpush.msrb.mxu1 %v9565_v10  ;;  %4746 = vmatpush.msra.mxu2 %v9560_v45 }
 0x76e   : > { %4819 = vmatpush.msra.mxu3 %v9560_v45  ;;  %4892 = vmatpush.msrb.mxu0 %v9560_v45 }
 0x76f   : > { %4965 = vmatpush.msrb.mxu1 %v9560_v45  ;;  %4747 = vmatpush.msra.mxu2 %v9551_v41 }
 0x770   : > { %4820 = vmatpush.msra.mxu3 %v9551_v41  ;;  %4893 = vmatpush.msrb.mxu0 %v9551_v41 }
 0x771   : > { %4966 = vmatpush.msrb.mxu1 %v9551_v41  ;;  %4748 = vmatpush.msra.mxu2 %v9541_v8 }
 0x772   : > { %4821 = vmatpush.msra.mxu3 %v9541_v8  ;;  %4894 = vmatpush.msrb.mxu0 %v9541_v8 }
 0x773   : > { %4967 = vmatpush.msrb.mxu1 %v9541_v8  ;;  %4749 = vmatpush.msra.mxu2 %v9528_v49 }
 0x774   : > { %4822 = vmatpush.msra.mxu3 %v9528_v49  ;;  %4895 = vmatpush.msrb.mxu0 %v9528_v49 }
 0x775   : > { %4968 = vmatpush.msrb.mxu1 %v9528_v49  ;;  %4750 = vmatpush.msra.mxu2 %v9518_v28 }
 0x776   : > { %4823 = vmatpush.msra.mxu3 %v9518_v28  ;;  %4896 = vmatpush.msrb.mxu0 %v9518_v28 }
 0x777   : > { %4969 = vmatpush.msrb.mxu1 %v9518_v28  ;;  %7174 = vmatmul.msk.f32.vlgmr.msra.gmra.mxu2 %vm4710_vm0, %v4702_v32 }
 0x778   : > { %7182 = vmatmul.msk.f32.vlgmr.msra.gmra.mxu3 %vm4710_vm0, %v4776_v16  ;;  %7190 = vmatmul.msk.f32.vlgmr.msrb.gmra.mxu0 %vm4710_vm0, %v4849_v12  ;;  %v7211_v16 = vld [vmem:[%s10280_s24 + $0xc8] sm:$0xff] }
 0x779   : > { %5085 = vmatpush.msrb.mxu3 %v7207_v2  ;;  %7198 = vmatmul.msk.f32.vlgmr.msrb.gmra.mxu1 %vm4710_vm0, %v4922_v44 }
 0x77a   : > { %5044 = vmatpush.msrb.mxu2 %v7209_v52  ;;  %5150 = vmatpush.msra.mxu0 %v7211_v16 }
 0x77b   : > { %5086 = vmatpush.msrb.mxu3 %v7206_v61 }
 0x77f   : > { %7175 = vmatmul.msk.f32.gmra.mxu2 %vm4710_vm0, %v4703_v33 }
 0x780   : > { %7183 = vmatmul.msk.f32.gmra.mxu3 %vm4710_vm0, %v4777_v7  ;;  %7191 = vmatmul.msk.f32.gmra.mxu0 %vm4710_vm0, %v4850_v47  ;;  %v4684_v7 = vld [vmem:[#allocation3 + $0x38] sm:$0xff] }
 0x781   : > { %7199 = vmatmul.msk.f32.gmra.mxu1 %vm4710_vm0, %v4923_v13  ;;  %v7214_v13 = vld [vmem:[%s10280_s24 + $0xe0] sm:$0xff] }
 0x787   : > { %7176 = vmatmul.msk.f32.gmra.mxu2 %vm4710_vm0, %v4704_v34  ;;  %v7210_v34 = vld [vmem:[%s10280_s24 + $0xc0] sm:$0xff] }
 0x788   : > { %7184 = vmatmul.msk.f32.gmra.mxu3 %vm4710_vm0, %v4778_v51  ;;  %7192 = vmatmul.msk.f32.gmra.mxu0 %vm4710_vm0, %v4851_v38  ;;  %v7213_v51 = vld [vmem:[%s10280_s24 + $0xd8] sm:$0xff] }
 0x789   : > { %7200 = vmatmul.msk.f32.gmra.mxu1 %vm4710_vm0, %v4924_v11  ;;  %5151 = vmatpush.msra.mxu0 %v7210_v34 }
 0x78a   : > { %5223 = vmatpush.msra.mxu1 %v7213_v51  ;;  %v7262_v51 = vld [vmem:[%s8052_s21 + $0x38] sm:$0xff] }
 0x78b   : > { %5432 = vmatpush.msra.mxu3 %v7262_v51 }
 0x78f   : > { %7177 = vmatmul.msk.f32.gmra.mxu2 %vm4710_vm0, %v4705_v59 }
 0x790   : > { %7185 = vmatmul.msk.f32.gmra.mxu3 %vm4710_vm0, %v4779_v55  ;;  %7193 = vmatmul.msk.f32.gmra.mxu0 %vm4710_vm0, %v4852_v43  ;;  %v4685_v55 = vld [vmem:[#allocation3 + $0x40] sm:$0xff] }
 0x791   : > { %7201 = vmatmul.msk.f32.gmra.mxu1 %vm4710_vm0, %v4925_v37 }
 0x797   : > { %7178 = vmatmul.msk.f32.gmra.mxu2 %vm4710_vm0, %v4706_v35 }
 0x798   : > { %7186 = vmatmul.msk.f32.gmra.mxu3 %vm4710_vm0, %v4780_v63  ;;  %7194 = vmatmul.msk.f32.gmra.mxu0 %vm4710_vm0, %v4853_v46 }
 0x799   : > { %7202 = vmatmul.msk.f32.gmra.mxu1 %vm4710_vm0, %v4926_v9 }
 0x79f   : > { %7179 = vmatmul.msk.f32.gmra.mxu2 %vm4710_vm0, %v4707_v58 }
 0x7a0   : > { %7187 = vmatmul.msk.f32.gmra.mxu3 %vm4710_vm0, %v4781_v27  ;;  %7195 = vmatmul.msk.f32.gmra.mxu0 %vm4710_vm0, %v4854_v19 }
 0x7a1   : > { %7203 = vmatmul.msk.f32.gmra.mxu1 %vm4710_vm0, %v4927_v48 }
 0x7a7   : > { %7180 = vmatmul.msk.f32.gmra.mxu2 %vm4710_vm0, %v4708_v39  ;;  %v7215_v39 = vld [vmem:[%s10280_s24 + $0xe8] sm:$0xff] }
 0x7a8   : > { %7188 = vmatmul.msk.f32.gmra.mxu3 %vm4710_vm0, %v4782_v29  ;;  %7196 = vmatmul.msk.f32.gmra.mxu0 %vm4710_vm0, %v4855_v54 }
 0x7a9   : > { %7204 = vmatmul.msk.f32.gmra.mxu1 %vm4710_vm0, %v4928_v20 }
 0x7ac   : > { %v4654_v36 = vpop.f32.mrf.mxu1 }
 0x7ad   : > { %v4655_v40 = vadd.f32 %v9670_v56, %v4654_v36 }
 0x7af   : > { %7181 = vmatmul.msk.f32.gmra.mxu2 %vm4710_vm0, %v4709_v57  ;;  %v4686_v53 = vadd.f32 %v4678_v0, %v4655_v40 }
 0x7b0   : > { %7189 = vmatmul.msk.f32.gmra.mxu3 %vm4710_vm0, %v4783_v14  ;;  %7197 = vmatmul.msk.f32.gmra.mxu0 %vm4710_vm0, %v4856_v6 }
 0x7b1   : > { %4694 = vst.msk [vmem:[#allocation3] sm:$0xff] %vm2016_vm2, %v4686_v53 }
 0x7b4   : > { %v4657_v18 = vpop.f32.mrf.mxu1 }
 0x7b5   : > { %v4658_v22 = vadd.f32 %v9670_v56, %v4657_v18 }
 0x7b7   : > { %v4687_v17 = vadd.f32 %v4679_v15, %v4658_v22 }
 0x7b8   : > { %7224 = vmatmul.msk.f32.vlgmr.msrb.gmra.mxu3 %vm1397_vm1, %v9518_v28 }
 0x7b9   : > { %4695 = vst.msk [vmem:[#allocation3 + $0x8] sm:$0xff] %vm2016_vm2, %v4687_v17 }
 0x7bc   : > { %v4660_v62 = vpop.f32.mrf.mxu1 }
 0x7bd   : > { %v4661_v42 = vadd.f32 %v9670_v56, %v4660_v62 }
 0x7bf   : > { %v4688_v3 = vadd.f32 %v4680_v21, %v4661_v42 }
 0x7c0   : > { %7225 = vmatmul.msk.f32.gmra.mxu3 %vm1397_vm1, %v9528_v49 }
 0x7c1   : > { %4696 = vst.msk [vmem:[#allocation3 + $0x10] sm:$0xff] %vm2016_vm2, %v4688_v3 }
 0x7c4   : > { %v4663_v25 = vpop.f32.mrf.mxu1 }
 0x7c5   : > { %v4664_v28 = vadd.f32 %v9670_v56, %v4663_v25 }
 0x7c7   : > { %v4689_v24 = vadd.f32 %v4681_v23, %v4664_v28 }
 0x7c8   : > { %7226 = vmatmul.msk.f32.gmra.mxu3 %vm1397_vm1, %v9541_v8  ;;  %v4929_v8 = vld [vmem:[%s9651_s28 + $0x38] sm:$0xff]  ;;  %s10303_s28 = sld [smem:[#allocation32_spill]] }
 0x7c9   : > { %4697 = vst.msk [vmem:[#allocation3 + $0x18] sm:$0xff] %vm2016_vm2, %v4689_v24  ;;  %7205 = vmatmul.msk.f32.gmra.mxu1 %vm4710_vm0, %v4929_v8  ;;  %v7276_v8 = vld [vmem:[%s8062_s29 + $0x30] sm:$0xff] }
 0x7cc   : > { %v4666_v30 = vpop.f32.mrf.mxu1 }
 0x7cd   : > { %v4667_v49 = vadd.f32 %v9670_v56, %v4666_v30 }
 0x7ce   : > { %s10304_s5 = smov %s10303_s28 }
 0x7cf   : > { %v4690_v31 = vadd.f32 %v4682_v4, %v4667_v49 }
 0x7d0   : > { %7227 = vmatmul.msk.f32.gmra.mxu3 %vm1397_vm1, %v9551_v41  ;;  %v7208_v41 = vld [vmem:[%s10280_s24 + $0xb0] sm:$0xff] }
 0x7d1   : > { %4698 = vst.msk [vmem:[#allocation3 + $0x20] sm:$0xff] %vm2016_vm2, %v4690_v31  ;;  %5045 = vmatpush.msrb.mxu2 %v7208_v41  ;;  %v7277_v31 = vld [vmem:[%s8062_s29 + $0x38] sm:$0xff] }
 0x7d3   : > { %5296 = vmatpush.msra.mxu2 %v7215_v39 }
 0x7d4   : > { %v4669_v50 = vpop.f32.mrf.mxu1 }
 0x7d5   : > { %v4670_v1 = vadd.f32 %v9670_v56, %v4669_v50  ;;  %5297 = vmatpush.msra.mxu2 %v7214_v13 }
 0x7d7   : > { %v4691_v32 = vadd.f32 %v4683_v5, %v4670_v1 }
 0x7d8   : > { %7228 = vmatmul.msk.f32.gmra.mxu3 %vm1397_vm1, %v9560_v45  ;;  %v7212_v45 = vld [vmem:[%s10280_s24 + $0xd0] sm:$0xff] }
 0x7d9   : > { %4699 = vst.msk [vmem:[#allocation3 + $0x28] sm:$0xff] %vm2016_vm2, %v4691_v32  ;;  %5224 = vmatpush.msra.mxu1 %v7212_v45  ;;  %v7279_v45 = vld [vmem:[%s10263_s3 + $0x38] sm:$0xff] }
 0x7da   : > { %5525 = vmatpush.msrb.mxu0 %v7279_v45 }
 0x7db   : > { %5560 = vmatpush.msrb.mxu1 %v7277_v31 }
 0x7dc   : > { %v4672_v12 = vpop.f32.mrf.mxu1 }
 0x7dd   : > { %v4673_v33 = vadd.f32 %v9670_v56, %v4672_v12  ;;  %5561 = vmatpush.msrb.mxu1 %v7276_v8 }
 0x7df   : > { %v4692_v47 = vadd.f32 %v4684_v7, %v4673_v33 }
 0x7e0   : > { %7229 = vmatmul.msk.f32.gmra.mxu3 %vm1397_vm1, %v9565_v10 }
 0x7e1   : > { %4700 = vst.msk [vmem:[#allocation3 + $0x30] sm:$0xff] %vm2016_vm2, %v4692_v47  ;;  %v9773_v47 = vld [vmem:[%s10282_s16 + $0x2] ss:$0 sm:$0xff] }
 0x7e5   : > { %v4675_v38 = vpop.f32.mrf.mxu1 }
 0x7e6   : > { %v4676_v59 = vadd.f32 %v9670_v56, %v4675_v38 }
 0x7e8   : > { %v4693_v43 = vadd.f32 %v4685_v55, %v4676_v59  ;;  %7230 = vmatmul.msk.f32.gmra.mxu3 %vm1397_vm1, %v9570_v60  ;;  %v7261_v55 = vld [vmem:[%s8052_s21 + $0x30] sm:$0xff] }
 0x7e9   : > { %5433 = vmatpush.msra.mxu3 %v7261_v55 }
 0x7ea   : > { %4701 = vst.msk [vmem:[#allocation3 + $0x38] sm:$0xff] %vm2016_vm2, %v4693_v43  ;;  %v7278_v43 = vld [vmem:[%s10263_s3 + $0x30] sm:$0xff]  ;;  %s10302_s3 = smov %s10301_s26 }
 0x7eb   : > { %5526 = vmatpush.msrb.mxu0 %v7278_v43 }
 0x7f0   : > { %7231 = vmatmul.msk.f32.gmra.mxu3 %vm1397_vm1, %v9574_v26 }
 0x7f5   : > { %v4898_v10 = vpop.f32.mrf.mxu0 }
 0x7f6   : > { %7240 = vmatmul.msk.f32.vlgmr.msra.gmra.mxu1 %vm1397_vm1, %v4898_v10  ;;  %v4971_v40 = vpop.f32.mrf.mxu1 }
 0x7fa   : > { %v4752_v2 = vpop.f32.mrf.mxu2 }
 0x7fb   : > { %v4825_v35 = vpop.f32.mrf.mxu3  ;;  %7216 = vmatmul.msk.f32.vlgmr.msrb.gmra.mxu2 %vm1397_vm1, %v4752_v2 }
 0x7fc   : > { %7232 = vmatmul.msk.f32.vlgmr.msra.gmra.mxu0 %vm1397_vm1, %v4825_v35  ;;  %v9781_v35 = vld [vmem:[%s10283_s1 + $0x2] ss:$0 sm:$0xff] }
 0x7fd   : > { %v4901_v63 = vpop.f32.mrf.mxu0 }
 0x7fe   : > { %7241 = vmatmul.msk.f32.gmra.mxu1 %vm1397_vm1, %v4901_v63  ;;  %v4974_v22 = vpop.f32.mrf.mxu1  ;;  %v7771_v63 = vld [vmem:[#allocation2 + $0x8] sm:$0xff] }
 0x802   : > { %v4755_v46 = vpop.f32.mrf.mxu2 }
 0x803   : > { %v4828_v60 = vpop.f32.mrf.mxu3  ;;  %7217 = vmatmul.msk.f32.gmra.mxu2 %vm1397_vm1, %v4755_v46 }
 0x804   : > { %7233 = vmatmul.msk.f32.gmra.mxu0 %vm1397_vm1, %v4828_v60  ;;  %v9784_v60 = vld [vmem:[%s10285_s11 + $0x2] ss:$0 sm:$0xff] }
 0x805   : > { %v4904_v26 = vpop.f32.mrf.mxu0 }
 0x806   : > { %7242 = vmatmul.msk.f32.gmra.mxu1 %vm1397_vm1, %v4904_v26  ;;  %v4977_v15 = vpop.f32.mrf.mxu1 }
 0x80a   : > { %v4758_v61 = vpop.f32.mrf.mxu2 }
 0x80b   : > { %v4831_v58 = vpop.f32.mrf.mxu3  ;;  %7218 = vmatmul.msk.f32.gmra.mxu2 %vm1397_vm1, %v4758_v61 }
 0x80c   : > { %7234 = vmatmul.msk.f32.gmra.mxu0 %vm1397_vm1, %v4831_v58 }
 0x80d   : > { %v4907_v27 = vpop.f32.mrf.mxu0 }
 0x80e   : > { %7243 = vmatmul.msk.f32.gmra.mxu1 %vm1397_vm1, %v4907_v27  ;;  %v4980_v17 = vpop.f32.mrf.mxu1 }
 0x812   : > { %v4761_v19 = vpop.f32.mrf.mxu2 }
 0x813   : > { %v4834_v44 = vpop.f32.mrf.mxu3  ;;  %7219 = vmatmul.msk.f32.gmra.mxu2 %vm1397_vm1, %v4761_v19 }
 0x814   : > { %7235 = vmatmul.msk.f32.gmra.mxu0 %vm1397_vm1, %v4834_v44 }
 0x815   : > { %v4910_v29 = vpop.f32.mrf.mxu0 }
 0x816   : > { %7244 = vmatmul.msk.f32.gmra.mxu1 %vm1397_vm1, %v4910_v29  ;;  %v4983_v62 = vpop.f32.mrf.mxu1 }
 0x81a   : > { %v4764_v54 = vpop.f32.mrf.mxu2 }
 0x81b   : > { %v4837_v56 = vpop.f32.mrf.mxu3  ;;  %7220 = vmatmul.msk.f32.gmra.mxu2 %vm1397_vm1, %v4764_v54 }
 0x81c   : > { %7236 = vmatmul.msk.f32.gmra.mxu0 %vm1397_vm1, %v4837_v56 }
 0x81d   : > { %v4913_v57 = vpop.f32.mrf.mxu0 }
 0x81e   : > { %7245 = vmatmul.msk.f32.gmra.mxu1 %vm1397_vm1, %v4913_v57  ;;  %v4986_v9 = vpop.f32.mrf.mxu1  ;;  %v7772_v57 = vld [vmem:[#allocation2 + $0x10] sm:$0xff] }
 0x822   : > { %v4767_v36 = vpop.f32.mrf.mxu2 }
 0x823   : > { %v4840_v14 = vpop.f32.mrf.mxu3  ;;  %7221 = vmatmul.msk.f32.gmra.mxu2 %vm1397_vm1, %v4767_v36 }
 0x824   : > { %7237 = vmatmul.msk.f32.gmra.mxu0 %vm1397_vm1, %v4840_v14 }
 0x825   : > { %v4916_v6 = vpop.f32.mrf.mxu0 }
 0x826   : > { %7246 = vmatmul.msk.f32.gmra.mxu1 %vm1397_vm1, %v4916_v6  ;;  %v4989_v42 = vpop.f32.mrf.mxu1 }
 0x82a   : > { %v4770_v11 = vpop.f32.mrf.mxu2 }
 0x82b   : > { %v4843_v0 = vpop.f32.mrf.mxu3  ;;  %7222 = vmatmul.msk.f32.gmra.mxu2 %vm1397_vm1, %v4770_v11 }
 0x82c   : > { %7238 = vmatmul.msk.f32.gmra.mxu0 %vm1397_vm1, %v4843_v0 }
 0x82d   : > { %v4919_v53 = vpop.f32.mrf.mxu0 }
 0x82e   : > { %7247 = vmatmul.msk.f32.gmra.mxu1 %vm1397_vm1, %v4919_v53 }
 0x832   : > { %v4773_v18 = vpop.f32.mrf.mxu2 }
 0x833   : > { %v4846_v37 = vpop.f32.mrf.mxu3  ;;  %7223 = vmatmul.msk.f32.gmra.mxu2 %vm1397_vm1, %v4773_v18 }
 0x834   : > { %7239 = vmatmul.msk.f32.gmra.mxu0 %vm1397_vm1, %v4846_v37 }
 0x83b   : > { %7248 = vmatmul.msk.f32.vlgmr.msra.gmra.mxu2 %vm1397_vm1, %v4971_v40  ;;  %v5088_v24 = vpop.f32.mrf.mxu3 }
 0x843   : > { %7249 = vmatmul.msk.f32.gmra.mxu2 %vm1397_vm1, %v4974_v22  ;;  %v5091_v52 = vpop.f32.mrf.mxu3 }
 0x846   : > { %v4992_v21 = vpop.f32.mrf.mxu1 }
 0x84b   : > { %7250 = vmatmul.msk.f32.gmra.mxu2 %vm1397_vm1, %v4977_v15  ;;  %v5094_v16 = vpop.f32.mrf.mxu3 }
 0x853   : > { %7251 = vmatmul.msk.f32.gmra.mxu2 %vm1397_vm1, %v4980_v17  ;;  %v5097_v26 = vpop.f32.mrf.mxu3 }
 0x85b   : > { %7252 = vmatmul.msk.f32.gmra.mxu2 %vm1397_vm1, %v4983_v62  ;;  %v5100_v40 = vpop.f32.mrf.mxu3  ;;  %v7773_v62 = vld [vmem:[#allocation2 + $0x18] sm:$0xff] }
 0x863   : > { %7253 = vmatmul.msk.f32.gmra.mxu2 %vm1397_vm1, %v4986_v9 }
 0x86b   : > { %7254 = vmatmul.msk.f32.gmra.mxu2 %vm1397_vm1, %v4989_v42 }
 0x873   : > { %7255 = vmatmul.msk.f32.gmra.mxu2 %vm1397_vm1, %v4992_v21  ;;  %v5226_v49 = vpop.f32.mrf.mxu1 }
 0x879   : > { %v5153_v30 = vpop.f32.mrf.mxu0 }
 0x87b   : > { %v5229_v5 = vpop.f32.mrf.mxu1 }
 0x87e   : > { %v5047_v3 = vpop.f32.mrf.mxu2 }
 0x87f   : > { %v5089_v1 = vadd.f32 %v5088_v24, %v5047_v3 }
 0x881   : > { %v5156_v50 = vpop.f32.mrf.mxu0  ;;  %v5177_v41 = vadd.f32 %v5153_v30, %v5089_v1  ;;  %v5103_v30 = vpop.f32.mrf.mxu3 }
 0x883   : > { %v5250_v33 = vadd.f32 %v5226_v49, %v5177_v41  ;;  %v5232_v59 = vpop.f32.mrf.mxu1 }
 0x886   : > { %v5050_v25 = vpop.f32.mrf.mxu2 }
 0x887   : > { %v5092_v7 = vadd.f32 %v5091_v52, %v5050_v25 }
 0x889   : > { %v5159_v12 = vpop.f32.mrf.mxu0  ;;  %v5178_v10 = vadd.f32 %v5156_v50, %v5092_v7  ;;  %v7774_v50 = vld [vmem:[#allocation2 + $0x20] sm:$0xff] }
 0x88b   : > { %v5251_v61 = vadd.f32 %v5229_v5, %v5178_v10  ;;  %v5235_v56 = vpop.f32.mrf.mxu1 }
 0x88e   : > { %v5053_v48 = vpop.f32.mrf.mxu2 }
 0x88f   : > { %v5095_v58 = vadd.f32 %v5094_v16, %v5053_v48 }
 0x891   : > { %v5162_v19 = vpop.f32.mrf.mxu0  ;;  %v5179_v54 = vadd.f32 %v5159_v12, %v5095_v58 }
 0x893   : > { %v5252_v14 = vadd.f32 %v5232_v59, %v5179_v54  ;;  %v5238_v42 = vpop.f32.mrf.mxu1 }
 0x896   : > { %v5056_v28 = vpop.f32.mrf.mxu2 }
 0x897   : > { %v5098_v6 = vadd.f32 %v5097_v26, %v5056_v28 }
 0x899   : > { %v5165_v37 = vpop.f32.mrf.mxu0  ;;  %v5180_v15 = vadd.f32 %v5162_v19, %v5098_v6 }
 0x89b   : > { %v5253_v21 = vadd.f32 %v5235_v56, %v5180_v15  ;;  %v5241_v16 = vpop.f32.mrf.mxu1 }
 0x89e   : > { %v9762_v23 = vpop.f32.mrf.mxu2 }
 0x89f   : > { %v5101_v3 = vadd.f32 %v5100_v40, %v9762_v23 }
 0x8a1   : > { %v5181_v31 = vadd.f32 %v5165_v37, %v5101_v3  ;;  %v5168_v8 = vpop.f32.mrf.mxu0 }
 0x8a3   : > { %v5254_v1 = vadd.f32 %v5238_v42, %v5181_v31 }
 0x8a6   : > { %v9764_v20 = vpop.f32.mrf.mxu2 }
 0x8a7   : > { %v5104_v5 = vadd.f32 %v5103_v30, %v9764_v20  ;;  %v5106_v20 = vpop.f32.mrf.mxu3 }
 0x8a9   : > { %v5182_v51 = vadd.f32 %v5168_v8, %v5104_v5  ;;  %v5171_v55 = vpop.f32.mrf.mxu0 }
 0x8ab   : > { %v5255_v43 = vadd.f32 %v5241_v16, %v5182_v51 }
 0x8ae   : > { %v9766_v4 = vpop.f32.mrf.mxu2 }
 0x8af   : > { %v5107_v10 = vadd.f32 %v5106_v20, %v9766_v4  ;;  %v7776_v4 = vld [vmem:[#allocation2 + $0x30] sm:$0xff]  ;;  %v5109_v54 = vpop.f32.mrf.mxu3 }
 0x8b6   : > { %v9770_v32 = vpop.f32.mrf.mxu2 }
 0x8b7   : > { %v5110_v56 = vadd.f32 %v5109_v54, %v9770_v32  ;;  %v7777_v32 = vld [vmem:[#allocation2 + $0x38] sm:$0xff] }
 0x8be   : > { %v5299_v34 = vpop.f32.mrf.mxu2 }
 0x8bf   : > { %v5323_v38 = vadd.f32 %v5299_v34, %v5250_v33 }
 0x8c1   : > { %v5336_v2 = vadd.f32 %v9773_v47, %v5323_v38  ;;  %v7775_v38 = vld [vmem:[#allocation2 + $0x28] sm:$0xff] }
 0x8c3   : > { %v5344_v46 = vadd.f32 %v7771_v63, %v5336_v2 }
 0x8c5   : > { %v5357_v27 = vmul.f32 %v9781_v35, %v5344_v46 }
 0x8c6   : > { %v5302_v44 = vpop.f32.mrf.mxu2 }
 0x8c7   : > { %v5370_v39 = vadd.f32 %v9784_v60, %v5357_v27  ;;  %v5324_v29 = vadd.f32 %v5302_v44, %v5251_v61  ;;  %v5244_v61 = vpop.f32.mrf.mxu1  ;;  %v5183_v27 = vadd.f32 %v5171_v55, %v5107_v10  ;;  %v7260_v44 = vld [vmem:[%s8047_s17 + $0x38] sm:$0xff]  ;;  %v7299_v10 = vld [vmem:[%s8077_s14 + $0x30] sm:$0xff] }
 0x8c8   : > { %5473 = vmatpush.msrb.mxu3 %v7260_v44 }
 0x8c9   : > { %5378 = vst.msk [vmem:[#allocation2] sm:$0xff] %vm1397_vm1, %v5370_v39  ;;  %v5337_v13 = vadd.f32 %v9773_v47, %v5324_v29  ;;  %v7259_v39 = vld [vmem:[%s8047_s17 + $0x30] sm:$0xff] }
 0x8ca   : > { %5474 = vmatpush.msrb.mxu3 %v7259_v39 }
 0x8cb   : > { %v5345_v36 = vadd.f32 %v7772_v57, %v5337_v13  ;;  %v5256_v13 = vadd.f32 %v5244_v61, %v5183_v27 }
 0x8cd   : > { %v5358_v11 = vmul.f32 %v9781_v35, %v5345_v36  ;;  %v5174_v36 = vpop.f32.mrf.mxu0 }
 0x8ce   : > { %v5305_v0 = vpop.f32.mrf.mxu2 }
 0x8cf   : > { %v5371_v53 = vadd.f32 %v9784_v60, %v5358_v11  ;;  %v5325_v18 = vadd.f32 %v5305_v0, %v5252_v14  ;;  %v5184_v0 = vadd.f32 %v5174_v36, %v5110_v56 }
 0x8d0   : > { %v9792_v22 = vld [vmem:[#allocation2] sm:$0xff] }
 0x8d1   : > { %5379 = vst.msk [vmem:[#allocation2 + $0x8] sm:$0xff] %vm1397_vm1, %v5371_v53  ;;  %v5338_v17 = vadd.f32 %v9773_v47, %v5325_v18  ;;  %7286 = vmatmul.msk.f32.vlgmr.msrb.gmra.mxu1 %vm1397_vm1, %v9792_v22  ;;  %v5247_v18 = vpop.f32.mrf.mxu1 }
 0x8d2   : > { %v5257_v15 = vadd.f32 %v5247_v18, %v5184_v0 }
 0x8d3   : > { %v5346_v9 = vadd.f32 %v7773_v62, %v5338_v17 }
 0x8d5   : > { %v5359_v25 = vmul.f32 %v9781_v35, %v5346_v9 }
 0x8d6   : > { %v5308_v48 = vpop.f32.mrf.mxu2 }
 0x8d7   : > { %v5372_v28 = vadd.f32 %v9784_v60, %v5359_v25  ;;  %v5326_v24 = vadd.f32 %v5308_v48, %v5253_v21  ;;  %v7778_v25 = vld [vmem:[#allocation2 + $0x40] sm:$0xff] }
 0x8d8   : > { %v9801_v49 = vld [vmem:[#allocation2 + $0x8] sm:$0xff] }
 0x8d9   : > { %5380 = vst.msk [vmem:[#allocation2 + $0x10] sm:$0xff] %vm1397_vm1, %v5372_v28  ;;  %v5339_v52 = vadd.f32 %v9773_v47, %v5326_v24  ;;  %7287 = vmatmul.msk.f32.gmra.mxu1 %vm1397_vm1, %v9801_v49 }
 0x8db   : > { %v5347_v23 = vadd.f32 %v7774_v50, %v5339_v52 }
 0x8dd   : > { %v5360_v41 = vmul.f32 %v9781_v35, %v5347_v23  ;;  %v7539_v23 = vld [vmem:[%s10261_s8 + $0x3] ss:$0 sm:$0xff]  ;;  %s10305_s8 = sld [smem:[#allocation39_spill]] }
 0x8de   : > { %v5311_v12 = vpop.f32.mrf.mxu2 }
 0x8df   : > { %v5373_v33 = vadd.f32 %v9784_v60, %v5360_v41  ;;  %v5327_v7 = vadd.f32 %v5311_v12, %v5254_v1 }
 0x8e0   : > { %v9810_v34 = vld [vmem:[#allocation2 + $0x10] sm:$0xff] }
 0x8e1   : > { %5381 = vst.msk [vmem:[#allocation2 + $0x18] sm:$0xff] %vm1397_vm1, %v5373_v33  ;;  %v5340_v45 = vadd.f32 %v9773_v47, %v5327_v7  ;;  %7263 = vmatmul.msk.f32.vlgmr.msra.gmra.mxu3 %vm1397_vm1, %v9810_v34  ;;  %7280 = vmatmul.msk.f32.vlgmr.msrb.gmra.mxu0 %vm1397_vm1, %v9810_v34 }
 0x8e2   : > { %7288 = vmatmul.msk.f32.gmra.mxu1 %vm1397_vm1, %v9810_v34 }
 0x8e3   : > { %v5348_v59 = vadd.f32 %v7775_v38, %v5340_v45  ;;  %s10010_s2 = scalar_lea.vmem %s10305_s8, %s7399_s22  ;;  %s10306_s8 = sld [smem:[#allocation43_spill]] }
 0x8e4   : > { %s10307_s22 = sld [smem:[#allocation41_spill]] }
 0x8e5   : > { %v5361_v2 = vmul.f32 %v9781_v35, %v5348_v59 }
 0x8e6   : > { %v5314_v63 = vpop.f32.mrf.mxu2 }
 0x8e7   : > { %v5374_v46 = vadd.f32 %v9784_v60, %v5361_v2  ;;  %v5328_v26 = vadd.f32 %v5314_v63, %v5255_v43  ;;  %v7300_v43 = vld [vmem:[%s8077_s14 + $0x38] sm:$0xff] }
 0x8e8   : > { %v5389_v58 = vld [vmem:[#allocation2 + $0x18] sm:$0xff]  ;;  %5758 = vmatpush.msrb.mxu2 %v7300_v43 }
 0x8e9   : > { %5382 = vst.msk [vmem:[#allocation2 + $0x20] sm:$0xff] %vm1397_vm1, %v5374_v46  ;;  %v5341_v19 = vadd.f32 %v9773_v47, %v5328_v26  ;;  %7264 = vmatmul.msk.f32.gmra.mxu3 %vm1397_vm1, %v5389_v58  ;;  %7281 = vmatmul.msk.f32.gmra.mxu0 %vm1397_vm1, %v5389_v58 }
 0x8ea   : > { %7289 = vmatmul.msk.f32.gmra.mxu1 %vm1397_vm1, %v5389_v58  ;;  %5759 = vmatpush.msrb.mxu2 %v7299_v10 }
 0x8eb   : > { %v5349_v29 = vadd.f32 %v7776_v4, %v5341_v19 }
 0x8ed   : > { %v5362_v57 = vmul.f32 %v9781_v35, %v5349_v29 }
 0x8ee   : > { %v5317_v14 = vpop.f32.mrf.mxu2 }
 0x8ef   : > { %v5375_v6 = vadd.f32 %v9784_v60, %v5362_v57  ;;  %v5329_v11 = vadd.f32 %v5317_v14, %v5256_v13 }
 0x8f0   : > { %v5390_v40 = vld [vmem:[#allocation2 + $0x20] sm:$0xff] }
 0x8f1   : > { %5383 = vst.msk [vmem:[#allocation2 + $0x28] sm:$0xff] %vm1397_vm1, %v5375_v6  ;;  %v5342_v53 = vadd.f32 %v9773_v47, %v5329_v11  ;;  %7265 = vmatmul.msk.f32.gmra.mxu3 %vm1397_vm1, %v5390_v40  ;;  %7282 = vmatmul.msk.f32.gmra.mxu0 %vm1397_vm1, %v5390_v40 }
 0x8f2   : > { %7290 = vmatmul.msk.f32.gmra.mxu1 %vm1397_vm1, %v5390_v40 }
 0x8f3   : > { %v5350_v37 = vadd.f32 %v7777_v32, %v5342_v53  ;;  %v9883_v53 = vld [vmem:[%s8057_s25 + $0x3] ss:$0 sm:$0xff] }
 0x8f5   : > { %v5363_v17 = vmul.f32 %v9781_v35, %v5350_v37 }
 0x8f6   : > { %v5320_v62 = vpop.f32.mrf.mxu2 }
 0x8f7   : > { %v5376_v9 = vadd.f32 %v9784_v60, %v5363_v17  ;;  %v5330_v42 = vadd.f32 %v5320_v62, %v5257_v15 }
 0x8f8   : > { %v5391_v21 = vld [vmem:[#allocation2 + $0x28] sm:$0xff] }
 0x8f9   : > { %5384 = vst.msk [vmem:[#allocation2 + $0x30] sm:$0xff] %vm1397_vm1, %v5376_v9  ;;  %v5343_v3 = vadd.f32 %v9773_v47, %v5330_v42  ;;  %7266 = vmatmul.msk.f32.gmra.mxu3 %vm1397_vm1, %v5391_v21  ;;  %7283 = vmatmul.msk.f32.gmra.mxu0 %vm1397_vm1, %v5391_v21 }
 0x8fa   : > { %7291 = vmatmul.msk.f32.gmra.mxu1 %vm1397_vm1, %v5391_v21 }
 0x8fb   : > { %v5351_v48 = vadd.f32 %v7778_v25, %v5343_v3 }
 0x8fd   : > { %v5364_v28 = vmul.f32 %v9781_v35, %v5351_v48 }
 0x8ff   : > { %v5377_v24 = vadd.f32 %v9784_v60, %v5364_v28 }
 0x900   : > { %v5392_v30 = vld [vmem:[#allocation2 + $0x30] sm:$0xff] }
 0x901   : > { %5385 = vst.msk [vmem:[#allocation2 + $0x38] sm:$0xff] %vm1397_vm1, %v5377_v24  ;;  %7267 = vmatmul.msk.f32.gmra.mxu3 %vm1397_vm1, %v5392_v30  ;;  %7284 = vmatmul.msk.f32.gmra.mxu0 %vm1397_vm1, %v5392_v30 }
 0x908   : > { %v5393_v47 = vld [vmem:[#allocation2 + $0x38] sm:$0xff] }
 0x909   : > { %7268 = vmatmul.msk.f32.gmra.mxu3 %vm1397_vm1, %v5393_v47  ;;  %7285 = vmatmul.msk.f32.gmra.mxu0 %vm1397_vm1, %v5393_v47 }
 0x911   : > { %7269 = vmatmul.msk.f32.vlgmr.msrb.gmra.mxu3 %vm1397_vm1, %v9792_v22 }
 0x919   : > { %7270 = vmatmul.msk.f32.gmra.mxu3 %vm1397_vm1, %v9801_v49 }
 0x921   : > { %7271 = vmatmul.msk.f32.gmra.mxu3 %vm1397_vm1, %v9810_v34 }
 0x929   : > { %7272 = vmatmul.msk.f32.gmra.mxu3 %vm1397_vm1, %v5389_v58 }
 0x931   : > { %7273 = vmatmul.msk.f32.gmra.mxu3 %vm1397_vm1, %v5390_v40 }
 0x939   : > { %7274 = vmatmul.msk.f32.gmra.mxu3 %vm1397_vm1, %v5391_v21 }
 0x94e   : > { %v5563_v60 = vpop.f32.mrf.mxu1 }
 0x956   : > { %v5566_v8 = vpop.f32.mrf.mxu1 }
 0x95e   : > { %v5528_v35 = vpop.f32.mrf.mxu0 }
 0x95f   : > { %v5564_v50 = vadd.f32 %v5563_v60, %v5528_v35  ;;  %v5569_v16 = vpop.f32.mrf.mxu1 }
 0x961   : > { %v5586_v1 = vadd.f32 %v7539_v23, %v5564_v50 }
 0x963   : > { %v7293_v5 = vmul.f32 -1.442695, %v5586_v1 }
 0x964   : > { %v5435_v31 = vpop.f32.mrf.mxu3 }
 0x965   : > { %7715 = vpow2.f32 %v7293_v5 }
 0x966   : > { %v5531_v52 = vpop.f32.mrf.mxu0 }
 0x967   : > { %v5567_v41 = vadd.f32 %v5566_v8, %v5531_v52  ;;  %v5572_v38 = vpop.f32.mrf.mxu1 }
 0x969   : > { %v5587_v33 = vadd.f32 %v7539_v23, %v5567_v41 }
 0x96b   : > { %v7294_v7 = vmul.f32 -1.442695, %v5587_v33  ;;  %v7716_v45 = vpop.eup %7715 }
 0x96c   : > { %v9862_v22 = vpop.f32.mrf.mxu3  ;;  %v5616_v55 = vadd.f32 1.0, %v7716_v45 }
 0x96d   : > { %7717 = vpow2.f32 %v7294_v7 }
 0x96e   : > { %v5534_v49 = vpop.f32.mrf.mxu0  ;;  %7719 = vrcp.f32 %v5616_v55  ;;  %v5633_v48 = vand.u32 2147483648, %v5616_v55  ;;  %vm5627_vm4 = vweird.f32 %v5616_v55  ;;  %v5631_v24 = vand.u32 2147483647, %v5616_v55 }
 0x96f   : > { %v5570_v34 = vadd.f32 %v5569_v16, %v5534_v49  ;;  %v5575_v19 = vpop.f32.mrf.mxu1 }
 0x970   : > { %v5634_v52 = vor.u32 1.1754944e-38, %v5633_v48  ;;  %vm5632_vm6 = vcmp.eq.f32.partialorder %v5631_v24, 8.507059e+37 }
 0x971   : > { %v5588_v59 = vadd.f32 %v7539_v23, %v5570_v34 }
 0x973   : > { %v7295_v2 = vmul.f32 -1.442695, %v5588_v59  ;;  %v7718_v46 = vpop.eup %7717 }
 0x974   : > { %v9864_v12 = vpop.f32.mrf.mxu3  ;;  %v9872_v27 = vadd.f32 1.0, %v7718_v46  ;;  %v7720_v44 = vpop.eup %7719 }
 0x975   : > { %7721 = vpow2.f32 %v7295_v2  ;;  %v5623_v54 = vmul.f32 %v7720_v44, %v5616_v55  ;;  %vm5628_vm3 = vweird.f32 %v7720_v44 }
 0x976   : > { %v5537_v51 = vpop.f32.mrf.mxu0  ;;  %7723 = vrcp.f32 %v9872_v27  ;;  %vm5629_vm5 = vmor %vm5627_vm4, %vm5628_vm3  ;;  %vm5642_vm8 = vweird.f32 %v9872_v27  ;;  %v5646_v7 = vand.u32 2147483647, %v9872_v27 }
 0x977   : > { %v5573_v63 = vadd.f32 %v5572_v38, %v5537_v51  ;;  %v5624_v14 = vsub.f32 1.0, %v5623_v54  ;;  %v5578_v11 = vpop.f32.mrf.mxu1 }
 0x978   : > { %vm5647_vm10 = vcmp.eq.f32.partialorder %v5646_v7, 8.507059e+37 }
 0x979   : > { %v5589_v58 = vadd.f32 %v7539_v23, %v5573_v63  ;;  %v5625_v15 = vmul.f32 %v7720_v44, %v5624_v14 }
 0x97b   : > { %v7296_v39 = vmul.f32 -1.442695, %v5589_v58  ;;  %v7722_v29 = vpop.eup %7721  ;;  %v5626_v3 = vadd.f32 %v7720_v44, %v5625_v15 }
 0x97c   : > { %v9866_v20 = vpop.f32.mrf.mxu3  ;;  %v9877_v57 = vadd.f32 1.0, %v7722_v29  ;;  %v9879_v6 = vpop.eup %7723 }
 0x97d   : > { %7725 = vpow2.f32 %v7296_v39  ;;  %v5638_v32 = vmul.f32 %v9879_v6, %v9872_v27  ;;  %v5630_v35 = vsel %vm5629_vm5, %v7720_v44, %v5626_v3  ;;  %vm5643_vm7 = vweird.f32 %v9879_v6 }
 0x97e   : > { %v5540_v61 = vpop.f32.mrf.mxu0  ;;  %7727 = vrcp.f32 %v9877_v57  ;;  %v5635_v1 = vsel %vm5632_vm6, %v5634_v52, %v5630_v35  ;;  %vm5644_vm9 = vmor %vm5642_vm8, %vm5643_vm7  ;;  %v5663_v44 = vand.u32 2147483648, %v9877_v57  ;;  %vm5657_vm12 = vweird.f32 %v9877_v57 }
 0x97f   : > { %v5576_v4 = vadd.f32 %v5575_v19, %v5540_v61  ;;  %v5639_v21 = vsub.f32 1.0, %v5638_v32 }
 0x981   : > { %v5590_v56 = vadd.f32 %v7539_v23, %v5576_v4 }
 0x983   : > { %v7297_v40 = vmul.f32 -1.442695, %v5590_v56  ;;  %v7726_v18 = vpop.eup %7725  ;;  %v5664_v56 = vor.u32 1.1754944e-38, %v5663_v44  ;;  %v5860_v44 = vld [vmem:[%s10304_s5 + $0x18] sm:$0xff] }
 0x984   : > { %v9870_v26 = vpop.f32.mrf.mxu3  ;;  %v9887_v9 = vadd.f32 1.0, %v7726_v18  ;;  %v9890_v25 = vpop.eup %7727 }
 0x985   : > { %7729 = vpow2.f32 %v7297_v40  ;;  %v5653_v47 = vmul.f32 %v9890_v25, %v9877_v57  ;;  %vm5658_vm11 = vweird.f32 %v9890_v25 }
 0x986   : > { %v5543_v36 = vpop.f32.mrf.mxu0  ;;  %vm5659_vm13 = vmor %vm5657_vm12, %vm5658_vm11  ;;  %v5678_v32 = vand.u32 2147483648, %v9887_v9  ;;  %vm5672_vm0 = vweird.f32 %v9887_v9 }
 0x987   : > { %v5579_v0 = vadd.f32 %v5578_v11, %v5543_v36  ;;  %v5654_v5 = vsub.f32 1.0, %v5653_v47 }
 0x989   : > { %v5591_v62 = vadd.f32 %v7539_v23, %v5579_v0  ;;  %v5655_v59 = vmul.f32 %v9890_v25, %v5654_v5 }
 0x98b   : > { %v7298_v28 = vmul.f32 -1.442695, %v5591_v62  ;;  %v7730_v30 = vpop.eup %7729 }
 0x98c   : > { %v9875_v13 = vpop.f32.mrf.mxu3  ;;  %v9897_v23 = vadd.f32 1.0, %v7730_v30 }
 0x98e   : > { %v5693_v30 = vand.u32 2147483648, %v9897_v23  ;;  %vm5687_vm6 = vweird.f32 %v9897_v23  ;;  %v5691_v47 = vand.u32 2147483647, %v9897_v23 }
 0x990   : > { %vm5692_vm8 = vcmp.eq.f32.partialorder %v5691_v47, 8.507059e+37  ;;  %v7335_v47 = vld [vmem:[%s10280_s24 + $0x108] sm:$0xff] }
 0x994   : > { %v5476_v37 = vpop.f32.mrf.mxu3 }
 0x995   : > { %v5477_v17 = vadd.f32 %v5476_v37, %v5435_v31  ;;  %v5640_v31 = vmul.f32 %v9879_v6, %v5639_v21 }
 0x997   : > { %v5499_v42 = vadd.f32 %v9883_v53, %v5477_v17  ;;  %v5641_v16 = vadd.f32 %v9879_v6, %v5640_v31  ;;  %v5694_v31 = vor.u32 1.1754944e-38, %v5693_v30  ;;  %v5781_v30 = vld [vmem:[#allocation3 + $0x20] sm:$0xff] }
 0x999   : > { %7731 = vtanh.f32 %v5499_v42  ;;  %v5645_v45 = vsel %vm5644_vm9, %v9879_v6, %v5641_v16  ;;  %v5679_v42 = vor.u32 1.1754944e-38, %v5678_v32  ;;  %v6368_v32 = vld [vmem:[#allocation7 + $0x8] sm:$0xff] }
 0x99a   : > { %7733 = vrcp.f32 %v9887_v9 }
 0x99b   : > { %7735 = vpow2.f32 %v7298_v28 }
 0x99c   : > { %v5479_v60 = vpop.f32.mrf.mxu3 }
 0x99d   : > { %v5480_v8 = vadd.f32 %v5479_v60, %v9862_v22  ;;  %v5648_v22 = vand.u32 2147483648, %v9872_v27  ;;  %v5656_v27 = vadd.f32 %v9890_v25, %v5655_v59  ;;  %v5858_v59 = vld [vmem:[%s10304_s5 + $0x8] sm:$0xff] }
 0x99f   : > { %v7732_v50 = vpop.eup %7731  ;;  %v5500_v49 = vadd.f32 %v9883_v53, %v5480_v8  ;;  %v5649_v55 = vor.u32 1.1754944e-38, %v5648_v22  ;;  %v5660_v4 = vsel %vm5659_vm13, %v9890_v25, %v5656_v27  ;;  %vm5803_vm13 = vcmask 392192   ;;  %v5976_v27 = vld [vmem:[%s10010_s2 + $0x8] sm:$0xff] }
 0x9a0   : > { %v9900_v41 = vmul.f32 %v7732_v50, %v5635_v1  ;;  %v9904_v33 = vpop.eup %7733 }
 0x9a1   : > { %7737 = vtanh.f32 %v5500_v49  ;;  %v7736_v34 = vpop.eup %7735  ;;  %v5668_v51 = vmul.f32 %v9904_v33, %v9887_v9  ;;  %v5650_v63 = vsel %vm5647_vm10, %v5649_v55, %v5645_v45  ;;  %vm5673_vm15 = vweird.f32 %v9904_v33  ;;  %v5916_v45 = vld [vmem:[%s9987_s6] sm:$0xff]  ;;  %v5917_v55 = vld [vmem:[%s9987_s6 + $0x8] sm:$0xff] }
 0x9a2   : > { %7302 = vmatmul.msk.f32.vlgmr.msrb.gmra.mxu2 %vm1397_vm1, %v9900_v41  ;;  %7739 = vrcp.f32 %v9897_v23  ;;  %v9917_v2 = vadd.f32 1.0, %v7736_v34  ;;  %vm5674_vm3 = vmor %vm5672_vm0, %vm5673_vm15  ;;  %v5797_v34 = vld [vmem:[%s10301_s26] sm:$0xff] }
 0x9a3   : > { %v5669_v61 = vsub.f32 1.0, %v5668_v51  ;;  %v5857_v51 = vld [vmem:[%s10303_s28] sm:$0xff]  ;;  %s7400_s28 = smul.u32 48, %s8230_s0 }
 0x9a4   : > { %v5482_v38 = vpop.f32.mrf.mxu3  ;;  %vm5702_vm10 = vweird.f32 %v9917_v2  ;;  %v5706_v16 = vand.u32 2147483647, %v9917_v2 }
 0x9a5   : > { %v5483_v43 = vadd.f32 %v5482_v38, %v9864_v12  ;;  %v5661_v12 = vand.u32 2147483647, %v9877_v57  ;;  %v5670_v54 = vmul.f32 %v9904_v33, %v5669_v61  ;;  %v5798_v38 = vld [vmem:[%s10302_s3 + $0x8] sm:$0xff]  ;;  %v5918_v61 = vld [vmem:[%s9987_s6 + $0x10] sm:$0xff] }
 0x9a6   : > { %vm5707_vm12 = vcmp.eq.f32.partialorder %v5706_v16, 8.507059e+37 }
 0x9a7   : > { %v7738_v10 = vpop.eup %7737  ;;  %v5501_v46 = vadd.f32 %v9883_v53, %v5483_v43  ;;  %vm5662_vm14 = vcmp.eq.f32.partialorder %v5661_v12, 8.507059e+37  ;;  %v5671_v0 = vadd.f32 %v9904_v33, %v5670_v54  ;;  %v7333_v43 = vld [vmem:[%s10280_s24 + $0xf8] sm:$0xff]  ;;  %v5920_v54 = vld [vmem:[%s9987_s6 + $0x20] sm:$0xff] }
 0x9a8   : > { %v9920_v58 = vmul.f32 %v7738_v10, %v5650_v63  ;;  %v7740_v19 = vpop.eup %7739  ;;  %v5665_v6 = vsel %vm5662_vm14, %v5664_v56, %v5660_v4  ;;  %v7332_v10 = vld [vmem:[%s10280_s24 + $0xf0] sm:$0xff]  ;;  %v5919_v12 = vld [vmem:[%s9987_s6 + $0x18] sm:$0xff]  ;;  %v5801_v4 = vld [vmem:[%s10302_s3 + $0x20] sm:$0xff] }
 0x9a9   : > { %7741 = vtanh.f32 %v5501_v46  ;;  %v5683_v39 = vmul.f32 %v7740_v19, %v9897_v23  ;;  %v5675_v15 = vsel %vm5674_vm3, %v9904_v33, %v5671_v0  ;;  %vm5688_vm5 = vweird.f32 %v7740_v19  ;;  %v5799_v63 = vld [vmem:[%s10302_s3 + $0x10] sm:$0xff]  ;;  %v5978_v56 = vld [vmem:[%s10010_s2 + $0x18] sm:$0xff] }
 0x9aa   : > { %7303 = vmatmul.msk.f32.gmra.mxu2 %vm1397_vm1, %v9920_v58  ;;  %7743 = vrcp.f32 %v9917_v2  ;;  %vm5689_vm7 = vmor %vm5687_vm6, %vm5688_vm5  ;;  %v5708_v23 = vand.u32 2147483648, %v9917_v2  ;;  %v5859_v46 = vld [vmem:[%s10304_s5 + $0x10] sm:$0xff] }
 0x9ab   : > { %v5684_v11 = vsub.f32 1.0, %v5683_v39  ;;  %v5977_v39 = vld [vmem:[%s10010_s2 + $0x10] sm:$0xff] }
 0x9ac   : > { %v5485_v29 = vpop.f32.mrf.mxu3  ;;  %v5709_v33 = vor.u32 1.1754944e-38, %v5708_v23  ;;  %v6370_v0 = vld [vmem:[#allocation7 + $0x18] sm:$0xff] }
 0x9ad   : > { %v5486_v36 = vadd.f32 %v5485_v29, %v9866_v20  ;;  %v5676_v20 = vand.u32 2147483647, %v9887_v9  ;;  %v5685_v62 = vmul.f32 %v7740_v19, %v5684_v11  ;;  %v5861_v29 = vld [vmem:[%s10304_s5 + $0x20] sm:$0xff]  ;;  %v5980_v11 = vld [vmem:[%s10010_s2 + $0x28] sm:$0xff] }
 0x9af   : > { %v7742_v14 = vpop.eup %7741  ;;  %v5502_v57 = vadd.f32 %v9883_v53, %v5486_v36  ;;  %vm5677_vm4 = vcmp.eq.f32.partialorder %v5676_v20, 8.507059e+37  ;;  %v5686_v24 = vadd.f32 %v7740_v19, %v5685_v62  ;;  %v5802_v36 = vld [vmem:[%s10302_s3 + $0x28] sm:$0xff]  ;;  %v6367_v20 = vld [vmem:[#allocation7] sm:$0xff] }
 0x9b0   : > { %v9935_v40 = vmul.f32 %v7742_v14, %v5665_v6  ;;  %v7744_v18 = vpop.eup %7743  ;;  %v5680_v25 = vsel %vm5677_vm4, %v5679_v42, %v5675_v15  ;;  %v5862_v14 = vld [vmem:[%s10304_s5 + $0x28] sm:$0xff]  ;;  %v5779_v15 = vld [vmem:[#allocation3 + $0x10] sm:$0xff] }
 0x9b1   : > { %7745 = vtanh.f32 %v5502_v57  ;;  %v5698_v37 = vmul.f32 %v7744_v18, %v9917_v2  ;;  %vm5703_vm9 = vweird.f32 %v7744_v18  ;;  %v5975_v2 = vld [vmem:[%s10010_s2] sm:$0xff]  ;;  %v5921_v6 = vld [vmem:[%s9987_s6 + $0x28] sm:$0xff]  ;;  %s10228_s6 = sand.u32 1, %s10306_s8  }
 0x9b2   : > { %7304 = vmatmul.msk.f32.gmra.mxu2 %vm1397_vm1, %v9935_v40  ;;  %vm5704_vm11 = vmor %vm5702_vm10, %vm5703_vm9  ;;  %v5979_v57 = vld [vmem:[%s10010_s2 + $0x20] sm:$0xff]  ;;  %s7395_s23 = smul.u32 48, %s10228_s6  ;;  %s10308_s2 = smov %s10307_s22 }
 0x9b3   : > { %v5699_v28 = vsub.f32 1.0, %v5698_v37  ;;  %s6514_s6 = scalar_lea.hbm %s10307_s22, %s7400_s28  ;;  %s7925_s22 = scalar_lea.hbm %s10308_s2, 96 }
 0x9b4   : > { %v5488_v17 = vpop.f32.mrf.mxu3  ;;  %s1244_s26 = scalar_lea.vmem [#allocation12], %s7395_s23 }
 0x9b5   : > { %v5489_v21 = vadd.f32 %v5488_v17, %v9870_v26  ;;  %v5690_v26 = vsel %vm5689_vm7, %v7740_v19, %v5686_v24  ;;  %v5700_v60 = vmul.f32 %v7744_v18, %v5699_v28  ;;  %v5800_v19 = vld [vmem:[%s10302_s3 + $0x18] sm:$0xff]  ;;  %v7336_v28 = vld [vmem:[%s10280_s24 + $0x110] sm:$0xff]  ;;  %s6517_s3 = sshll.u32 %s6514_s6, 4  ;;  %s6518_s3 = int_to_ptr.hbm [resolvable:$true] %s6517_s3 }
 0x9b6   : > { %v5695_v50 = vsel %vm5692_vm8, %v5694_v31, %v5690_v26 }
 0x9b7   : > { %v7746_v3 = vpop.eup %7745  ;;  %v5503_v48 = vadd.f32 %v9883_v53, %v5489_v21  ;;  %v5701_v5 = vadd.f32 %v7744_v18, %v5700_v60  ;;  %v5780_v21 = vld [vmem:[#allocation3 + $0x18] sm:$0xff]  ;;  %v7334_v60 = vld [vmem:[%s10280_s24 + $0x100] sm:$0xff] }
 0x9b8   : > { %v9948_v9 = vmul.f32 %v7746_v3, %v5680_v25  ;;  %v7337_v25 = vld [vmem:[%s10280_s24 + $0x118] sm:$0xff] }
 0x9b9   : > { %7747 = vtanh.f32 %v5503_v48 }
 0x9ba   : > { %7305 = vmatmul.msk.f32.gmra.mxu2 %vm1397_vm1, %v9948_v9 }
 0x9bc   : > { %v5491_v35 = vpop.f32.mrf.mxu3 }
 0x9bd   : > { %v5492_v52 = vadd.f32 %v5491_v35, %v9875_v13  ;;  %v5705_v13 = vsel %vm5704_vm11, %v7744_v18, %v5701_v5  ;;  %v6369_v18 = vld [vmem:[#allocation7 + $0x10] sm:$0xff] }
 0x9be   : > { %v5710_v22 = vsel %vm5707_vm12, %v5709_v33, %v5705_v13 }
 0x9bf   : > { %v7748_v8 = vpop.eup %7747  ;;  %v5504_v1 = vadd.f32 %v9883_v53, %v5492_v52  ;;  %v7339_v52 = vld [vmem:[%s10280_s24 + $0x128] sm:$0xff] }
 0x9c0   : > { %v9957_v49 = vmul.f32 %v7748_v8, %v5695_v50  ;;  %v7338_v8 = vld [vmem:[%s10280_s24 + $0x120] sm:$0xff] }
 0x9c1   : > { %7749 = vtanh.f32 %v5504_v1 }
 0x9c2   : > { %7306 = vmatmul.msk.f32.gmra.mxu2 %vm1397_vm1, %v9957_v49 }
 0x9c7   : > { %v7750_v53 = vpop.eup %7749 }
 0x9c8   : > { %v9964_v7 = vmul.f32 %v7750_v53, %v5710_v22  ;;  %v5783_v53 = vld [vmem:[#allocation3 + $0x30] sm:$0xff] }
 0x9ca   : > { %7307 = vmatmul.msk.f32.gmra.mxu2 %vm1397_vm1, %v9964_v7  ;;  %5832 = vmatpush.msra.mxu3 %v9964_v7 }
 0x9cb   : > { %5891 = vmatpush.msra.mxu0 %v9964_v7  ;;  %5950 = vmatpush.msra.mxu1 %v9964_v7 }
 0x9cc   : > { %6009 = vmatpush.msra.mxu2 %v9964_v7  ;;  %5833 = vmatpush.msra.mxu3 %v9957_v49 }
 0x9cd   : > { %5892 = vmatpush.msra.mxu0 %v9957_v49  ;;  %5951 = vmatpush.msra.mxu1 %v9957_v49 }
 0x9ce   : > { %6010 = vmatpush.msra.mxu2 %v9957_v49  ;;  %5834 = vmatpush.msra.mxu3 %v9948_v9 }
 0x9cf   : > { %5893 = vmatpush.msra.mxu0 %v9948_v9  ;;  %5952 = vmatpush.msra.mxu1 %v9948_v9 }
 0x9d0   : > { %6011 = vmatpush.msra.mxu2 %v9948_v9  ;;  %5835 = vmatpush.msra.mxu3 %v9935_v40 }
 0x9d1   : > { %5894 = vmatpush.msra.mxu0 %v9935_v40  ;;  %5953 = vmatpush.msra.mxu1 %v9935_v40 }
 0x9d2   : > { %6012 = vmatpush.msra.mxu2 %v9935_v40  ;;  %5836 = vmatpush.msra.mxu3 %v9920_v58 }
 0x9d3   : > { %5895 = vmatpush.msra.mxu0 %v9920_v58  ;;  %5954 = vmatpush.msra.mxu1 %v9920_v58 }
 0x9d4   : > { %6013 = vmatpush.msra.mxu2 %v9920_v58  ;;  %5837 = vmatpush.msra.mxu3 %v9900_v41 }
 0x9d5   : > { %5896 = vmatpush.msra.mxu0 %v9900_v41  ;;  %5955 = vmatpush.msra.mxu1 %v9900_v41 }
 0x9d6   : > { %6014 = vmatpush.msra.mxu2 %v9900_v41  ;;  %7308 = vmatmul.msk.f32.vlgmr.msra.gmra.mxu3 %vm5803_vm13, %v5797_v34 }
 0x9d7   : > { %7314 = vmatmul.msk.f32.vlgmr.msra.gmra.mxu0 %vm5803_vm13, %v5857_v51  ;;  %7320 = vmatmul.msk.f32.vlgmr.msra.gmra.mxu1 %vm5803_vm13, %v5916_v45 }
 0x9d8   : > { %6112 = vmatpush.msrb.mxu0 %v7333_v43  ;;  %7326 = vmatmul.msk.f32.vlgmr.msra.gmra.mxu2 %vm5803_vm13, %v5975_v2 }
 0x9d9   : > { %6165 = vmatpush.msrb.mxu1 %v7337_v25  ;;  %6077 = vmatpush.msrb.mxu3 %v7335_v47 }
 0x9da   : > { %6113 = vmatpush.msrb.mxu0 %v7332_v10  ;;  %6224 = vmatpush.msrb.mxu2 %v7339_v52 }
 0x9db   : > { %6166 = vmatpush.msrb.mxu1 %v7336_v28  ;;  %6078 = vmatpush.msrb.mxu3 %v7334_v60 }
 0x9dc   : > { %6405 = vmatpush.msra.mxu0 %v6370_v0  ;;  %6225 = vmatpush.msrb.mxu2 %v7338_v8 }
 0x9de   : > { %7309 = vmatmul.msk.f32.gmra.mxu3 %vm5803_vm13, %v5798_v38  ;;  %6406 = vmatpush.msra.mxu0 %v6369_v18  ;;  %v5784_v38 = vld [vmem:[#allocation3 + $0x38] sm:$0xff] }
 0x9df   : > { %7315 = vmatmul.msk.f32.gmra.mxu0 %vm5803_vm13, %v5858_v59  ;;  %7321 = vmatmul.msk.f32.gmra.mxu1 %vm5803_vm13, %v5917_v55 }
 0x9e0   : > { %7327 = vmatmul.msk.f32.gmra.mxu2 %vm5803_vm13, %v5976_v27  ;;  %6407 = vmatpush.msra.mxu0 %v6368_v32 }
 0x9e2   : > { %6408 = vmatpush.msra.mxu0 %v6367_v20 }
 0x9e6   : > { %7310 = vmatmul.msk.f32.gmra.mxu3 %vm5803_vm13, %v5799_v63 }
 0x9e7   : > { %7316 = vmatmul.msk.f32.gmra.mxu0 %vm5803_vm13, %v5859_v46  ;;  %7322 = vmatmul.msk.f32.gmra.mxu1 %vm5803_vm13, %v5918_v61 }
 0x9e8   : > { %7328 = vmatmul.msk.f32.gmra.mxu2 %vm5803_vm13, %v5977_v39 }
 0x9ee   : > { %7311 = vmatmul.msk.f32.gmra.mxu3 %vm5803_vm13, %v5800_v19 }
 0x9ef   : > { %7317 = vmatmul.msk.f32.gmra.mxu0 %vm5803_vm13, %v5860_v44  ;;  %7323 = vmatmul.msk.f32.gmra.mxu1 %vm5803_vm13, %v5919_v12 }
 0x9f0   : > { %7329 = vmatmul.msk.f32.gmra.mxu2 %vm5803_vm13, %v5978_v56 }
 0x9f6   : > { %7312 = vmatmul.msk.f32.gmra.mxu3 %vm5803_vm13, %v5801_v4  ;;  %v7341_v4 = vld [vmem:[%s10280_s24 + $0x138] sm:$0xff] }
 0x9f7   : > { %7318 = vmatmul.msk.f32.gmra.mxu0 %vm5803_vm13, %v5861_v29  ;;  %7324 = vmatmul.msk.f32.gmra.mxu1 %vm5803_vm13, %v5920_v54  ;;  %v7340_v29 = vld [vmem:[%s10280_s24 + $0x130] sm:$0xff] }
 0x9f8   : > { %7330 = vmatmul.msk.f32.gmra.mxu2 %vm5803_vm13, %v5979_v57  ;;  %6283 = vmatpush.msra.mxu3 %v7341_v4 }
 0x9fa   : > { %6284 = vmatpush.msra.mxu3 %v7340_v29 }
 0x9fe   : > { %7313 = vmatmul.msk.f32.gmra.mxu3 %vm5803_vm13, %v5802_v36 }
 0x9ff   : > { %7319 = vmatmul.msk.f32.gmra.mxu0 %vm5803_vm13, %v5862_v14  ;;  %7325 = vmatmul.msk.f32.gmra.mxu1 %vm5803_vm13, %v5921_v6 }
 0xa00   : > { %7331 = vmatmul.msk.f32.gmra.mxu2 %vm5803_vm13, %v5980_v11 }
 0xa07   : > { %7348 = vmatmul.msk.f32.vlgmr.msrb.gmra.mxu0 %vm1397_vm1, %v9900_v41  ;;  %v7541_v41 = vld [vmem:[%s10279_s7 + $0x3] ss:$0 sm:$0xff]  ;;  %s7919_s7 = sshra.s32 %s6518_s3, 4  ;;  %s7920_s7 = int_to_ptr.hbm [resolvable:$true] %s7919_s7 }
 0xa08   : > { %s7921_s0 = scalar_lea.hbm %s7920_s7, 48  ;;  %p7926_p4 = scmp.lt.s32.totalorder %s7920_s7, %s10308_s2 }
 0xa09   : > { %p7922_p9 = scmp.ne.s32.totalorder %s7920_s7, %s7921_s0  ;;  %p7927_p7 = scmp.lt.s32.totalorder %s7925_s22, %s7921_s0 }
 0xa0b   : > { %p7923_p12 = pnand %p7922_p9, %p8247_p5  ;;  %p7928_p8 = por %p7927_p7, %p7926_p4 }
 0xa0d   : > { %p7924_p0 = pneg %p7923_p12 }
 0xa0f   : > { %7349 = vmatmul.msk.f32.gmra.mxu0 %vm1397_vm1, %v9920_v58  ;;  %p7929_p11 = pnand %p7928_p8, %p7924_p0 }
 0xa17   : > { %7350 = vmatmul.msk.f32.gmra.mxu0 %vm1397_vm1, %v9935_v40 }
 0xa1f   : > { %7351 = vmatmul.msk.f32.gmra.mxu0 %vm1397_vm1, %v9948_v9 }
 0xa25   : > { %v5761_v37 = vpop.f32.mrf.mxu2 }
 0xa26   : > { %v5762_v58 = vadd.f32 %v7541_v41, %v5761_v37 }
 0xa27   : > { %7352 = vmatmul.msk.f32.gmra.mxu0 %vm1397_vm1, %v9957_v49  ;;  %v5782_v49 = vld [vmem:[#allocation3 + $0x28] sm:$0xff] }
 0xa28   : > { %v5785_v17 = vadd.f32 %v5779_v15, %v5762_v58  ;;  %v6437_v15 = vld [vmem:[%s10260_s4 + $0x18] sm:$0xff] }
 0xa29   : > { %6472 = vmatpush.msra.mxu1 %v6437_v15 }
 0xa2a   : > { %5791 = vst.msk [vmem:[#allocation3] sm:$0xff] %vm2016_vm2, %v5785_v17 }
 0xa2d   : > { %v5764_v62 = vpop.f32.mrf.mxu2 }
 0xa2e   : > { %v5765_v42 = vadd.f32 %v7541_v41, %v5764_v62  ;;  %v6436_v62 = vld [vmem:[%s10260_s4 + $0x10] sm:$0xff] }
 0xa2f   : > { %7353 = vmatmul.msk.f32.gmra.mxu0 %vm1397_vm1, %v9964_v7  ;;  %6473 = vmatpush.msra.mxu1 %v6436_v62 }
 0xa30   : > { %v5786_v40 = vadd.f32 %v5780_v21, %v5765_v42  ;;  %v6435_v21 = vld [vmem:[%s10260_s4 + $0x8] sm:$0xff] }
 0xa31   : > { %v6355_v3 = vld [vmem:[#allocation3] sm:$0xff]  ;;  %6474 = vmatpush.msra.mxu1 %v6435_v21 }
 0xa32   : > { %5792 = vst.msk [vmem:[#allocation3 + $0x8] sm:$0xff] %vm2016_vm2, %v5786_v40  ;;  %v6361_v48 = vmax.f32 %v6355_v3, 0.0  ;;  %v6434_v40 = vld [vmem:[%s10260_s4] sm:$0xff]  ;;  %s10310_s4 = sand.u32 1, %s10306_s8  }
 0xa33   : > { %6475 = vmatpush.msra.mxu1 %v6434_v40  ;;  %s6503_s5 = scalar_lea.sflag [#allocation6], %s10310_s4 }
 0xa35   : > { %v5767_v9 = vpop.f32.mrf.mxu2 }
 0xa36   : > { %v5768_v24 = vadd.f32 %v7541_v41, %v5767_v9 }
 0xa37   : > { %7375 = vmatmul.msk.f32.vlgmr.msra.gmra.mxu0 %vm2016_vm2, %v6361_v48 }
 0xa38   : > { %v5787_v26 = vadd.f32 %v5781_v30, %v5768_v24  ;;  %v7542_v30 = vld [vmem:[#allocation9] ss:$0 sm:$0xff] }
 0xa39   : > { %v6356_v35 = vld [vmem:[#allocation3 + $0x8] sm:$0xff] }
 0xa3a   : > { %5793 = vst.msk [vmem:[#allocation3 + $0x10] sm:$0xff] %vm2016_vm2, %v5787_v26  ;;  %v6362_v31 = vmax.f32 %v6356_v35, 0.0 }
 0xa3d   : > { %v5770_v50 = vpop.f32.mrf.mxu2 }
 0xa3e   : > { %v5771_v1 = vadd.f32 %v7541_v41, %v5770_v50 }
 0xa3f   : > { %7376 = vmatmul.msk.f32.gmra.mxu0 %vm2016_vm2, %v6362_v31 }
 0xa40   : > { %v5788_v5 = vadd.f32 %v5782_v49, %v5771_v1 }
 0xa41   : > { %v6357_v23 = vld [vmem:[#allocation3 + $0x10] sm:$0xff] }
 0xa42   : > { %5794 = vst.msk [vmem:[#allocation3 + $0x18] sm:$0xff] %vm2016_vm2, %v5788_v5  ;;  %v6363_v16 = vmax.f32 %v6357_v23, 0.0 }
 0xa45   : > { %v5773_v13 = vpop.f32.mrf.mxu2 }
 0xa46   : > { %v5774_v33 = vadd.f32 %v7541_v41, %v5773_v13 }
 0xa47   : > { %7377 = vmatmul.msk.f32.gmra.mxu0 %vm2016_vm2, %v6363_v16 }
 0xa48   : > { %v5789_v22 = vadd.f32 %v5783_v53, %v5774_v33 }
 0xa49   : > { %v6358_v7 = vld [vmem:[#allocation3 + $0x18] sm:$0xff] }
 0xa4a   : > { %5795 = vst.msk [vmem:[#allocation3 + $0x20] sm:$0xff] %vm2016_vm2, %v5789_v22  ;;  %v6364_v34 = vmax.f32 %v6358_v7, 0.0 }
 0xa4d   : > { %v5776_v51 = vpop.f32.mrf.mxu2 }
 0xa4e   : > { %v5777_v45 = vadd.f32 %v7541_v41, %v5776_v51 }
 0xa4f   : > { %7378 = vmatmul.msk.f32.gmra.mxu0 %vm2016_vm2, %v6364_v34 }
 0xa50   : > { %v5790_v59 = vadd.f32 %v5784_v38, %v5777_v45 }
 0xa51   : > { %v6359_v55 = vld [vmem:[#allocation3 + $0x20] sm:$0xff] }
 0xa52   : > { %5796 = vst.msk [vmem:[#allocation3 + $0x28] sm:$0xff] %vm2016_vm2, %v5790_v59  ;;  %v6365_v43 = vmax.f32 %v6359_v55, 0.0 }
 0xa54   : > { %v5898_v10 = vpop.f32.mrf.mxu0  ;;  %v5957_v2 = vpop.f32.mrf.mxu1 }
 0xa55   : > { %7360 = vmatmul.msk.f32.vlgmr.msrb.gmra.mxu2 %vm1397_vm1, %v5957_v2  ;;  %7354 = vmatmul.msk.f32.vlgmr.msrb.gmra.mxu1 %vm1397_vm1, %v5898_v10 }
 0xa57   : > { %7379 = vmatmul.msk.f32.gmra.mxu0 %vm2016_vm2, %v6365_v43 }
 0xa59   : > { %v5839_v63 = vpop.f32.mrf.mxu3  ;;  %v6360_v46 = vld [vmem:[#allocation3 + $0x28] sm:$0xff] }
 0xa5a   : > { %7342 = vmatmul.msk.f32.vlgmr.msrb.gmra.mxu3 %vm1397_vm1, %v5839_v63  ;;  %v6366_v61 = vmax.f32 %v6360_v46, 0.0 }
 0xa5b   : > { %v6016_v32 = vpop.f32.mrf.mxu2 }
 0xa5c   : > { %v5901_v27 = vpop.f32.mrf.mxu0  ;;  %v5960_v19 = vpop.f32.mrf.mxu1 }
 0xa5d   : > { %7361 = vmatmul.msk.f32.gmra.mxu2 %vm1397_vm1, %v5960_v19  ;;  %7355 = vmatmul.msk.f32.gmra.mxu1 %vm1397_vm1, %v5901_v27 }
 0xa5f   : > { %7380 = vmatmul.msk.f32.gmra.mxu0 %vm2016_vm2, %v6366_v61 }
 0xa61   : > { %v5842_v44 = vpop.f32.mrf.mxu3 }
 0xa62   : > { %7343 = vmatmul.msk.f32.gmra.mxu3 %vm1397_vm1, %v5842_v44  ;;  %v10129_v44 = vld [vmem:[%s10282_s16 + $0x3] ss:$0 sm:$0xff] }
 0xa63   : > { %v6019_v37 = vpop.f32.mrf.mxu2 }
 0xa64   : > { %v5904_v12 = vpop.f32.mrf.mxu0  ;;  %v5963_v39 = vpop.f32.mrf.mxu1 }
 0xa65   : > { %7362 = vmatmul.msk.f32.gmra.mxu2 %vm1397_vm1, %v5963_v39  ;;  %7356 = vmatmul.msk.f32.gmra.mxu1 %vm1397_vm1, %v5904_v12 }
 0xa69   : > { %v5845_v54 = vpop.f32.mrf.mxu3 }
 0xa6a   : > { %7344 = vmatmul.msk.f32.gmra.mxu3 %vm1397_vm1, %v5845_v54 }
 0xa6b   : > { %v6022_v17 = vpop.f32.mrf.mxu2 }
 0xa6c   : > { %v5907_v56 = vpop.f32.mrf.mxu0  ;;  %v5966_v36 = vpop.f32.mrf.mxu1 }
 0xa6d   : > { %7363 = vmatmul.msk.f32.gmra.mxu2 %vm1397_vm1, %v5966_v36  ;;  %7357 = vmatmul.msk.f32.gmra.mxu1 %vm1397_vm1, %v5907_v56  ;;  %v10133_v56 = vld [vmem:[%s10283_s1 + $0x3] ss:$0 sm:$0xff]  ;;  %v7779_v36 = vld [vmem:[#allocation2 + $0x10] sm:$0xff]  ;;  %s6515_s1 = sshll.u32 %s1244_s26, 4  ;;  %s6516_s1 = int_to_ptr.vmem [resolvable:$true] %s6515_s1 }
 0xa71   : > { %v5848_v14 = vpop.f32.mrf.mxu3 }
 0xa72   : > { %7345 = vmatmul.msk.f32.gmra.mxu3 %vm1397_vm1, %v5848_v14 }
 0xa73   : > { %v6025_v3 = vpop.f32.mrf.mxu2 }
 0xa74   : > { %v5910_v6 = vpop.f32.mrf.mxu0  ;;  %v5969_v57 = vpop.f32.mrf.mxu1 }
 0xa75   : > { %7364 = vmatmul.msk.f32.gmra.mxu2 %vm1397_vm1, %v5969_v57  ;;  %7358 = vmatmul.msk.f32.gmra.mxu1 %vm1397_vm1, %v5910_v6  ;;  %v10136_v6 = vld [vmem:[%s10285_s11 + $0x3] ss:$0 sm:$0xff] }
 0xa79   : > { %v5851_v11 = vpop.f32.mrf.mxu3 }
 0xa7a   : > { %7346 = vmatmul.msk.f32.gmra.mxu3 %vm1397_vm1, %v5851_v11 }
 0xa7b   : > { %v6028_v28 = vpop.f32.mrf.mxu2 }
 0xa7c   : > { %v5913_v0 = vpop.f32.mrf.mxu0  ;;  %v5972_v18 = vpop.f32.mrf.mxu1 }
 0xa7d   : > { %7365 = vmatmul.msk.f32.gmra.mxu2 %vm1397_vm1, %v5972_v18  ;;  %7359 = vmatmul.msk.f32.gmra.mxu1 %vm1397_vm1, %v5913_v0 }
 0xa81   : > { %v5854_v20 = vpop.f32.mrf.mxu3 }
 0xa82   : > { %7347 = vmatmul.msk.f32.gmra.mxu3 %vm1397_vm1, %v5854_v20 }
 0xa83   : > { %v6031_v24 = vpop.f32.mrf.mxu2 }
 0xa84   : > { %v6115_v41 = vpop.f32.mrf.mxu0 }
 0xa8a   : > { %7366 = vmatmul.msk.f32.vlgmr.msra.gmra.mxu3 %vm1397_vm1, %v6016_v32 }
 0xa8c   : > { %v6118_v58 = vpop.f32.mrf.mxu0 }
 0xa92   : > { %7367 = vmatmul.msk.f32.gmra.mxu3 %vm1397_vm1, %v6019_v37 }
 0xa94   : > { %v10108_v42 = vpop.f32.mrf.mxu0 }
 0xa9a   : > { %7368 = vmatmul.msk.f32.gmra.mxu3 %vm1397_vm1, %v6022_v17  ;;  %v7780_v17 = vld [vmem:[#allocation2 + $0x18] sm:$0xff] }
 0xa9c   : > { %v10113_v25 = vpop.f32.mrf.mxu0 }
 0xaa2   : > { %7369 = vmatmul.msk.f32.gmra.mxu3 %vm1397_vm1, %v6025_v3 }
 0xaa4   : > { %v10116_v48 = vpop.f32.mrf.mxu0 }
 0xaaa   : > { %7370 = vmatmul.msk.f32.gmra.mxu3 %vm1397_vm1, %v6028_v28 }
 0xaac   : > { %v10119_v9 = vpop.f32.mrf.mxu0 }
 0xab2   : > { %7371 = vmatmul.msk.f32.gmra.mxu3 %vm1397_vm1, %v6031_v24 }
 0xab4   : > { %v6410_v47 = vpop.f32.mrf.mxu0 }
 0xab5   : > { %v6411_v26 = vadd.f32 %v7542_v30, %v6410_v47 }
 0xab7   : > { %v6428_v35 = vmax.f32 %v6411_v26, 0.0 }
 0xab9   : > { %7381 = vmatmul.msk.f32.vlgmr.msra.gmra.mxu1 %vm2016_vm2, %v6428_v35  ;;  %v7781_v35 = vld [vmem:[#allocation2 + $0x20] sm:$0xff] }
 0xabc   : > { %v6413_v60 = vpop.f32.mrf.mxu0 }
 0xabd   : > { %v6414_v31 = vadd.f32 %v7542_v30, %v6413_v60 }
 0xabf   : > { %v6429_v52 = vmax.f32 %v6414_v31, 0.0 }
 0xac1   : > { %7382 = vmatmul.msk.f32.gmra.mxu1 %vm2016_vm2, %v6429_v52 }
 0xac4   : > { %v6416_v8 = vpop.f32.mrf.mxu0 }
 0xac5   : > { %v6417_v50 = vadd.f32 %v7542_v30, %v6416_v8 }
 0xac7   : > { %v6430_v1 = vmax.f32 %v6417_v50, 0.0 }
 0xac9   : > { %7383 = vmatmul.msk.f32.gmra.mxu1 %vm2016_vm2, %v6430_v1 }
 0xacc   : > { %v6419_v49 = vpop.f32.mrf.mxu0 }
 0xacd   : > { %v6420_v5 = vadd.f32 %v7542_v30, %v6419_v49 }
 0xacf   : > { %v6431_v23 = vmax.f32 %v6420_v5, 0.0 }
 0xad1   : > { %7384 = vmatmul.msk.f32.gmra.mxu1 %vm2016_vm2, %v6431_v23 }
 0xad2   : > { %v6168_v59 = vpop.f32.mrf.mxu1 }
 0xad4   : > { %v6422_v16 = vpop.f32.mrf.mxu0 }
 0xad5   : > { %v6423_v13 = vadd.f32 %v7542_v30, %v6422_v16 }
 0xad7   : > { %v6432_v33 = vmax.f32 %v6423_v13, 0.0  ;;  %v7782_v13 = vld [vmem:[#allocation2 + $0x28] sm:$0xff] }
 0xad8   : > { %v6227_v43 = vpop.f32.mrf.mxu2 }
 0xad9   : > { %7385 = vmatmul.msk.f32.gmra.mxu1 %vm2016_vm2, %v6432_v33 }
 0xada   : > { %v6171_v63 = vpop.f32.mrf.mxu1 }
 0xadc   : > { %v6425_v53 = vpop.f32.mrf.mxu0 }
 0xadd   : > { %v6426_v22 = vadd.f32 %v7542_v30, %v6425_v53  ;;  %v6080_v7 = vpop.f32.mrf.mxu3 }
 0xade   : > { %v6116_v10 = vadd.f32 %v6115_v41, %v6080_v7 }
 0xadf   : > { %v6433_v34 = vmax.f32 %v6426_v22, 0.0 }
 0xae0   : > { %v6186_v46 = vadd.f32 %v6168_v59, %v6116_v10  ;;  %v6230_v61 = vpop.f32.mrf.mxu2 }
 0xae1   : > { %7386 = vmatmul.msk.f32.gmra.mxu1 %vm2016_vm2, %v6433_v34  ;;  %vm6495_vm2 = vcmask 97280  }
 0xae2   : > { %v6245_v27 = vadd.f32 %v6227_v43, %v6186_v46  ;;  %v6174_v29 = vpop.f32.mrf.mxu1  ;;  %v7783_v43 = vld [vmem:[#allocation2 + $0x30] sm:$0xff] }
 0xae5   : > { %v6083_v51 = vpop.f32.mrf.mxu3 }
 0xae6   : > { %v6119_v19 = vadd.f32 %v6118_v58, %v6083_v51 }
 0xae8   : > { %v6187_v4 = vadd.f32 %v6171_v63, %v6119_v19  ;;  %v6233_v57 = vpop.f32.mrf.mxu2  ;;  %v7546_v63 = vld [vmem:[#allocation10] ss:$0 sm:$0xff] }
 0xaea   : > { %v6246_v11 = vadd.f32 %v6230_v61, %v6187_v4  ;;  %v6177_v15 = vpop.f32.mrf.mxu1  ;;  %v7784_v4 = vld [vmem:[#allocation2 + $0x38] sm:$0xff] }
 0xaed   : > { %v6086_v45 = vpop.f32.mrf.mxu3 }
 0xaee   : > { %v6122_v0 = vadd.f32 %v10108_v42, %v6086_v45 }
 0xaf0   : > { %v6188_v37 = vadd.f32 %v6174_v29, %v6122_v0  ;;  %v6236_v42 = vpop.f32.mrf.mxu2 }
 0xaf2   : > { %v6247_v21 = vadd.f32 %v6233_v57, %v6188_v37  ;;  %v6180_v8 = vpop.f32.mrf.mxu1 }
 0xaf5   : > { %v6089_v38 = vpop.f32.mrf.mxu3 }
 0xaf6   : > { %v6125_v40 = vadd.f32 %v10113_v25, %v6089_v38 }
 0xaf8   : > { %v6189_v47 = vadd.f32 %v6177_v15, %v6125_v40  ;;  %v6239_v5 = vpop.f32.mrf.mxu2 }
 0xafa   : > { %v6248_v31 = vadd.f32 %v6236_v42, %v6189_v47  ;;  %v6183_v34 = vpop.f32.mrf.mxu1 }
 0xafd   : > { %v6092_v55 = vpop.f32.mrf.mxu3 }
 0xafe   : > { %v6128_v52 = vadd.f32 %v10116_v48, %v6092_v55 }
 0xb00   : > { %v6190_v23 = vadd.f32 %v6180_v8, %v6128_v52  ;;  %v6242_v55 = vpop.f32.mrf.mxu2 }
 0xb02   : > { %v6249_v53 = vadd.f32 %v6239_v5, %v6190_v23 }
 0xb05   : > { %v6095_v2 = vpop.f32.mrf.mxu3 }
 0xb06   : > { %v6131_v48 = vadd.f32 %v10119_v9, %v6095_v2 }
 0xb08   : > { %v6191_v38 = vadd.f32 %v6183_v34, %v6131_v48 }
 0xb0a   : > { %v6250_v9 = vadd.f32 %v6242_v55, %v6191_v38 }
 0xb0d   : > { %v6286_v12 = vpop.f32.mrf.mxu3 }
 0xb0e   : > { %v6304_v39 = vadd.f32 %v6286_v12, %v6245_v27 }
 0xb10   : > { %v6315_v54 = vadd.f32 %v10129_v44, %v6304_v39 }
 0xb12   : > { %v6321_v14 = vadd.f32 %v7779_v36, %v6315_v54 }
 0xb14   : > { %v6332_v18 = vmul.f32 %v10133_v56, %v6321_v14 }
 0xb15   : > { %v6289_v32 = vpop.f32.mrf.mxu3 }
 0xb16   : > { %v6343_v20 = vadd.f32 %v10136_v6, %v6332_v18  ;;  %v6305_v41 = vadd.f32 %v6289_v32, %v6246_v11 }
 0xb18   : > { %6349 = vst.msk [vmem:[#allocation2] sm:$0xff] %vm1397_vm1, %v6343_v20  ;;  %v6316_v58 = vadd.f32 %v10129_v44, %v6305_v41 }
 0xb1a   : > { %v6322_v62 = vadd.f32 %v7780_v17, %v6316_v58 }
 0xb1c   : > { %v6333_v3 = vmul.f32 %v10133_v56, %v6322_v62 }
 0xb1d   : > { %v6292_v28 = vpop.f32.mrf.mxu3 }
 0xb1e   : > { %v6344_v24 = vadd.f32 %v10136_v6, %v6333_v3  ;;  %v6306_v30 = vadd.f32 %v6292_v28, %v6247_v21 }
 0xb20   : > { %6350 = vst.msk [vmem:[#allocation2 + $0x8] sm:$0xff] %vm1397_vm1, %v6344_v24  ;;  %v6317_v26 = vadd.f32 %v10129_v44, %v6306_v30 }
 0xb22   : > { %v6323_v60 = vadd.f32 %v7781_v35, %v6317_v26 }
 0xb24   : > { %v6334_v25 = vmul.f32 %v10133_v56, %v6323_v60 }
 0xb25   : > { %v6295_v50 = vpop.f32.mrf.mxu3 }
 0xb26   : > { %v6345_v1 = vadd.f32 %v10136_v6, %v6334_v25  ;;  %v6307_v49 = vadd.f32 %v6295_v50, %v6248_v31 }
 0xb28   : > { %6351 = vst.msk [vmem:[#allocation2 + $0x10] sm:$0xff] %vm1397_vm1, %v6345_v1  ;;  %v6318_v16 = vadd.f32 %v10129_v44, %v6307_v49 }
 0xb2a   : > { %v6324_v33 = vadd.f32 %v7782_v13, %v6318_v16 }
 0xb2c   : > { %v6335_v22 = vmul.f32 %v10133_v56, %v6324_v33 }
 0xb2d   : > { %v6298_v7 = vpop.f32.mrf.mxu3 }
 0xb2e   : > { %v6346_v51 = vadd.f32 %v10136_v6, %v6335_v22  ;;  %v6308_v45 = vadd.f32 %v6298_v7, %v6249_v53 }
 0xb30   : > { %6352 = vst.msk [vmem:[#allocation2 + $0x18] sm:$0xff] %vm1397_vm1, %v6346_v51  ;;  %v6319_v59 = vadd.f32 %v10129_v44, %v6308_v45 }
 0xb32   : > { %v6325_v10 = vadd.f32 %v7783_v43, %v6319_v59 }
 0xb34   : > { %v6336_v2 = vmul.f32 %v10133_v56, %v6325_v10 }
 0xb35   : > { %v6301_v46 = vpop.f32.mrf.mxu3 }
 0xb36   : > { %v6347_v61 = vadd.f32 %v10136_v6, %v6336_v2  ;;  %v6309_v27 = vadd.f32 %v6301_v46, %v6250_v9  ;;  %v6477_v19 = vpop.f32.mrf.mxu1 }
 0xb37   : > { %v6478_v12 = vadd.f32 %v7546_v63, %v6477_v19 }
 0xb38   : > { %6353 = vst.msk [vmem:[#allocation2 + $0x20] sm:$0xff] %vm1397_vm1, %v6347_v61  ;;  %v6320_v39 = vadd.f32 %v10129_v44, %v6309_v27 }
 0xb39   : > { %6496 = vst.msk [vmem:[%s1244_s26] sm:$0xff] %vm6495_vm2, %v6478_v12 }
 0xb3a   : > { %v6326_v29 = vadd.f32 %v7784_v4, %v6320_v39 }
 0xb3c   : > { %v6337_v54 = vmul.f32 %v10133_v56, %v6326_v29 }
 0xb3e   : > { %v6348_v36 = vadd.f32 %v10136_v6, %v6337_v54  ;;  %v6480_v14 = vpop.f32.mrf.mxu1 }
 0xb3f   : > { %v6481_v57 = vadd.f32 %v7546_v63, %v6480_v14 }
 0xb40   : > { %6354 = vst.msk [vmem:[#allocation2 + $0x28] sm:$0xff] %vm1397_vm1, %v6348_v36 }
 0xb41   : > { %6497 = vst.msk [vmem:[%s1244_s26 + $0x8] sm:$0xff] %vm6495_vm2, %v6481_v57 }
 0xb46   : > { %v6483_v11 = vpop.f32.mrf.mxu1 }
 0xb47   : > { %v6484_v0 = vadd.f32 %v7546_v63, %v6483_v11 }
 0xb49   : > { %6498 = vst.msk [vmem:[%s1244_s26 + $0x10] sm:$0xff] %vm6495_vm2, %v6484_v0 }
 0xb4e   : > { %v6486_v44 = vpop.f32.mrf.mxu1 }
 0xb4f   : > { %v6487_v18 = vadd.f32 %v7546_v63, %v6486_v44 }
 0xb51   : > { %6499 = vst.msk [vmem:[%s1244_s26 + $0x18] sm:$0xff] %vm6495_vm2, %v6487_v18 }
 0xb56   : > { %v6489_v32 = vpop.f32.mrf.mxu1 }
 0xb57   : > { %v6490_v56 = vadd.f32 %v7546_v63, %v6489_v32 }
 0xb59   : > { %6500 = vst.msk [vmem:[%s1244_s26 + $0x20] sm:$0xff] %vm6495_vm2, %v6490_v56 }
 0xb5e   : > { %v6492_v6 = vpop.f32.mrf.mxu1 }
 0xb5f   : > { %v6493_v20 = vadd.f32 %v7546_v63, %v6492_v6 }
 0xb61   : > { %6501 = vst.msk [vmem:[%s1244_s26 + $0x28] sm:$0xff] %vm6495_vm2, %v6493_v20 }
 0xb62   : > { %7932 = shalt.err (!%p7929_p11)
}
 0xb63   : > { %s8022_s6 = smov 128   ;;  %s8023_s28 = smov 8  }
 0xb64   : > { %7417 = dma.vmem_to_hbm [thread:$0]  (%p8247_p5), %s6516_s1, 768, %s6518_s3, %s6503_s5, %s8022_s6, %s8022_s6, %s8023_s28  }
 0xb65 PF: > { %s10311_s4 = sld [smem:[#allocation45_spill]] }
 0xb66   : > { %s10312_s8 = sld [smem:[#allocation42_spill]] }
 0xb6b   : > { %p7444_p13 = scmp.ge.s32.totalorder %s10311_s4, 2 }
 0xb6c   : > { %s6532_s9 = sand.u32 1, %s10312_s8  }
 0xb6d   : > { %p7433_p1 = pnand %p7444_p13, %p8251_p6  ;;  %s6533_s10 = scalar_lea.sflag [#allocation6], %s6532_s9 }
 0xb6f   : > { %p7434_p2 = pneg %p7433_p1 }
 0xb71   : > { %7962 = dma.done.wait (%p7434_p2), %s6533_s10, 768  }
 0xb72   : > { %7964 = vsyncadd (%p7434_p2), %s6533_s10, 4294966528  ;;  %s10314_s28 = sld [smem:[#allocation46_spill]] }
 0xb73   : > { %s10315_s22 = sld [smem:[#allocation43_spill]] }
 0xb74   : > { %s10316_s23 = sld [smem:[#allocation44_spill]] }
 0xb75   : > { %s10317_s26 = sld [smem:[#allocation47_spill]] }
 0xb78   : > { %p84_p3 = scmp.ge.s32.totalorder %s10314_s28, 4  }
 0xb7a   :  { %86 = sbr.rel (!%p84_p3) target bundleno = 73 (0x49), region = 307 }
 0xb7f   :  { %6539 = vsyncpa [#allocation5], 1 }
 0xb80   :  { %6541 = vsyncpa [#allocation5 + $0x1], 1 }
 0xb81   :  { %6542 = vsyncpa [#allocation8], 1 }
 0xb82   :  { %6543 = vsyncpa [#allocation11], 1 }
 0xb83   :  { %6544 = vsyncpa [#allocation6], 1 }
 0xb84   :  { %6546 = vsyncpa [#allocation6 + $0x1], 1 }

</bundles_post_ra>
